<compile_context>
chip_gen: v6e
topology: v6e:2x2x1
jax: 0.10.0
libtpu: 0.0.40
codegen_flags: <defaults>
</compile_context>

<pallas_src>
import jax
import jax.numpy as jnp
from jax.experimental import pallas as pl
from jax.experimental.pallas import tpu as pltpu


_LANE = 128


# ----------------------------- Pallas kernels -----------------------------

def _conv_relu_pool_kernel(p00_ref, p01_ref, p10_ref, p11_ref, w_ref, b_ref,
                           o_ref):
    """Fused conv-as-matmul + bias + ReLU + 2x2 max-pool for one M-tile.

    Each p*_ref holds the im2col patch rows for one element of the 2x2
    pooling window (same (n, hp, wp) row ordering), so pooling is a 4-way
    elementwise max of the four matmul results."""
    w = w_ref[...]
    b = b_ref[...]

    def branch(p_ref):
        y = jnp.dot(p_ref[...], w, preferred_element_type=jnp.float32) + b
        return jnp.maximum(y, 0.0)

    o_ref[...] = jnp.maximum(
        jnp.maximum(branch(p00_ref), branch(p01_ref)),
        jnp.maximum(branch(p10_ref), branch(p11_ref)),
    ).astype(o_ref.dtype)


def _fc_fused_kernel(x_ref, w1_ref, b1_ref, w2_ref, b2_ref, w3_ref, b3_ref,
                     o_ref):
    """fc1+relu -> fc2+relu -> fc3 in a single kernel; the (M,120)/(M,128)
    intermediates never leave VMEM/vregs.  fc2/fc3 are zero-padded to 128
    output lanes so the final store is lane-dense."""
    h = jnp.dot(x_ref[...], w1_ref[...],
                preferred_element_type=jnp.float32) + b1_ref[...]
    h = jnp.maximum(h, 0.0)
    h = jnp.dot(h, w2_ref[...],
                preferred_element_type=jnp.float32) + b2_ref[...]
    h = jnp.maximum(h, 0.0)
    o_ref[...] = (jnp.dot(h, w3_ref[...], preferred_element_type=jnp.float32)
                  + b3_ref[...]).astype(o_ref.dtype)


# ------------------------------- wrappers ----------------------------------

def _pooled_im2col(x, kh, kw, k_pad):
    """Build, for each of the 4 elements of a 2x2 pooling window, the im2col
    patch matrix of the conv-output pixels that land in that window slot.
    Rows are ordered (n, hp, wp); columns are (kh, kw, cin), zero-padded to
    k_pad.  Slicing/concat is plain-JAX glue (XLA)."""
    N, H, W, C = x.shape
    Ho, Wo = H - kh + 1, W - kw + 1
    Hp, Wp = Ho // 2, Wo // 2          # 2x2/2 max-pool (assumes even Ho, Wo)
    K = kh * kw * C
    shards = []
    for dh in range(2):
        for dw in range(2):
            cols = [x[:, dh + i: dh + i + 2 * Hp - 1: 2,
                        dw + j: dw + j + 2 * Wp - 1: 2, :]
                    for i in range(kh) for j in range(kw)]
            if k_pad > K:
                cols.append(jnp.zeros((N, Hp, Wp, k_pad - K), x.dtype))
            shards.append(
                jnp.concatenate(cols, axis=-1).reshape(N * Hp * Wp, k_pad))
    return shards, (N, Hp, Wp)


def conv_relu_pool(x, w, b):
    """VALID conv (stride 1) + bias + ReLU + 2x2 stride-2 max-pool, fused in
    one Pallas kernel.  x is NHWC; w is (kh, kw, cin, cout)."""
    kh, kw, cin, cout = w.shape
    K = kh * kw * cin
    Kp = (K + 7) // 8 * 8                       # sublane-align contraction dim
    shards, (N, Hp, Wp) = _pooled_im2col(x, kh, kw, Kp)
    M = N * Hp * Wp

    wmat = w.reshape(K, cout)
    if Kp > K:
        wmat = jnp.concatenate(
            [wmat, jnp.zeros((Kp - K, cout), wmat.dtype)], axis=0)
    b2 = b.reshape(1, cout)

    # M-tiling: single block for small M, otherwise moderate tiles sized for
    # v7x's 64 MiB VMEM and marked "parallel" so both TensorCores get work.
    tile_m = 256 if Kp <= 512 else 128
    if M <= tile_m:
        tm, grid_m = M, 1
    else:
        tm, grid_m = tile_m, pl.cdiv(M, tile_m)

    out = pl.pallas_call(
        _conv_relu_pool_kernel,
        out_shape=jax.ShapeDtypeStruct((M, cout), jnp.float32),
        grid=(grid_m,),
        in_specs=[pl.BlockSpec((tm, Kp), lambda i: (i, 0)) for _ in range(4)]
        + [pl.BlockSpec((Kp, cout), lambda i: (0, 0)),
           pl.BlockSpec((1, cout), lambda i: (0, 0))],
        out_specs=pl.BlockSpec((tm, cout), lambda i: (i, 0)),
        compiler_params=pltpu.CompilerParams(
            dimension_semantics=("parallel",)),
    )(*shards, wmat, b2)
    return out.reshape(N, Hp, Wp, cout)


def _pad2d(a, rows, cols):
    r, c = a.shape
    return jnp.pad(a, ((0, rows - r), (0, cols - c)))


def fc_fused(x, w1, b1, w2, b2, w3, b3):
    """The three Linear layers (with the two interior ReLUs) as a single
    Pallas kernel.  fc2/fc3 weights and biases are zero-padded to 128 columns
    (exact math); the padded output columns are sliced off afterwards."""
    M, K1 = x.shape
    n1 = w1.shape[1]                    # 120
    n3 = w3.shape[1]                    # 10
    w2p = _pad2d(w2, n1, _LANE)         # (120, 128)
    w3p = _pad2d(w3, _LANE, _LANE)      # (128, 128)
    b1r = b1.reshape(1, n1)
    b2p = _pad2d(b2.reshape(1, -1), 1, _LANE)
    b3p = _pad2d(b3.reshape(1, -1), 1, _LANE)

    out = pl.pallas_call(
        _fc_fused_kernel,
        out_shape=jax.ShapeDtypeStruct((M, _LANE), jnp.float32),
        grid=(1,),
        in_specs=[
            pl.BlockSpec((M, K1), lambda i: (0, 0)),
            pl.BlockSpec((K1, n1), lambda i: (0, 0)),
            pl.BlockSpec((1, n1), lambda i: (0, 0)),
            pl.BlockSpec((n1, _LANE), lambda i: (0, 0)),
            pl.BlockSpec((1, _LANE), lambda i: (0, 0)),
            pl.BlockSpec((_LANE, _LANE), lambda i: (0, 0)),
            pl.BlockSpec((1, _LANE), lambda i: (0, 0)),
        ],
        out_specs=pl.BlockSpec((M, _LANE), lambda i: (0, 0)),
    )(x, w1, b1r, w2p, b2p, w3p, b3p)
    return out[:, :n3]


# ------------------------------ model glue ---------------------------------

def init_params(key):
    """Deterministic synthetic parameters (PyTorch-default-style uniform)."""
    ks = jax.random.split(key, 10)

    def u(k, shape, fan_in):
        bound = 1.0 / jnp.sqrt(float(fan_in))
        return jax.random.uniform(k, shape, jnp.float32, -bound, bound)

    return {
        "conv1_w": u(ks[0], (5, 5, 3, 64), 3 * 25),
        "conv1_b": u(ks[1], (64,), 3 * 25),
        "conv2_w": u(ks[2], (5, 5, 64, 128), 64 * 25),
        "conv2_b": u(ks[3], (128,), 64 * 25),
        "fc1_w": u(ks[4], (128 * 5 * 5, 120), 128 * 5 * 5),
        "fc1_b": u(ks[5], (120,), 128 * 5 * 5),
        "fc2_w": u(ks[6], (120, 84), 120),
        "fc2_b": u(ks[7], (84,), 120),
        "fc3_w": u(ks[8], (84, 10), 84),
        "fc3_b": u(ks[9], (10,), 84),
    }


def net_forward(params, x_nchw):
    # NCHW (PyTorch) -> NHWC (kernel layout)
    x = jnp.transpose(x_nchw, (0, 2, 3, 1))
    x = conv_relu_pool(x, params["conv1_w"], params["conv1_b"])   # (N,14,14,64)
    x = conv_relu_pool(x, params["conv2_w"], params["conv2_b"])   # (N, 5, 5,128)
    # torch.flatten(x, 1) flattens NCHW in (C, H, W) order -> match it.
    x = jnp.transpose(x, (0, 3, 1, 2)).reshape(x.shape[0], -1)     # (N, 3200)
    x = fc_fused(x, params["fc1_w"], params["fc1_b"],
                 params["fc2_w"], params["fc2_b"],
                 params["fc3_w"], params["fc3_b"])                 # (N, 10)
    return x


if __name__ == "__main__":
    key = jax.random.PRNGKey(0)
    kp, kx = jax.random.split(key)
    params = init_params(kp)
    # Input spatial size must be 32x32 so that fc1 sees 128*5*5 features.
    x = jax.random.normal(kx, (2, 3, 32, 32), jnp.float32)
    out = jax.jit(net_forward)(params, x)
    out = jax.block_until_ready(out)
    assert out.shape == (2, 10), out.shape
    assert bool(jnp.all(jnp.isfinite(out)))
    print("KERNEL_OK")
</pallas_src>

<mosaic_0001>
module attributes {stable_mosaic.version = 11 : i64} {
  func.func @_conv_relu_pool_kernel(%arg0: i32, %arg1: memref<256x80xf32, #tpu.memory_space<vmem>>, %arg2: memref<256x80xf32, #tpu.memory_space<vmem>>, %arg3: memref<256x80xf32, #tpu.memory_space<vmem>>, %arg4: memref<256x80xf32, #tpu.memory_space<vmem>>, %arg5: memref<80x64xf32, #tpu.memory_space<vmem>>, %arg6: memref<1x64xf32, #tpu.memory_space<vmem>>, %arg7: memref<256x64xf32, #tpu.memory_space<vmem>>) attributes {dimension_semantics = [#tpu.dimension_semantics<parallel>], iteration_bounds = array<i64: 2>, scalar_prefetch = 0 : i64, scratch_operands = 0 : i64, tpu.core_type = #tpu.core_type<tc>, window_params = [{transform_indices = @transform_0, window_bounds = array<i64: 256, 80>}, {transform_indices = @transform_1, window_bounds = array<i64: 256, 80>}, {transform_indices = @transform_2, window_bounds = array<i64: 256, 80>}, {transform_indices = @transform_3, window_bounds = array<i64: 256, 80>}, {pipeline_mode = #tpu.pipeline_mode<synchronous>, transform_indices = @transform_4, window_bounds = array<i64: 80, 64>}, {pipeline_mode = #tpu.pipeline_mode<synchronous>, transform_indices = @transform_5, window_bounds = array<i64: 1, 64>}, {transform_indices = @transform_6, window_bounds = array<i64: 256, 64>}]} {
    %c0 = arith.constant 0 : index
    %c0_0 = arith.constant 0 : index
    %0 = vector.load %arg5[%c0, %c0_0] : memref<80x64xf32, #tpu.memory_space<vmem>>, vector<80x64xf32>
    %c0_1 = arith.constant 0 : index
    %c0_2 = arith.constant 0 : index
    %1 = vector.load %arg6[%c0_1, %c0_2] : memref<1x64xf32, #tpu.memory_space<vmem>>, vector<1x64xf32>
    %c0_3 = arith.constant 0 : index
    %c0_4 = arith.constant 0 : index
    %2 = vector.load %arg1[%c0_3, %c0_4] : memref<256x80xf32, #tpu.memory_space<vmem>>, vector<256x80xf32>
    %cst = arith.constant dense<0.000000e+00> : vector<256x64xf32>
    %3 = tpu.matmul %2, %0, %cst {dimension_numbers = #tpu.dot_dimension_numbers<[1], [0], [0], [1], [0, 0, 1, 1], [], []>} : vector<256x80xf32>, vector<80x64xf32>, vector<256x64xf32> -> vector<256x64xf32>
    %4 = vector.broadcast %1 : vector<1x64xf32> to vector<256x64xf32>
    %5 = arith.addf %3, %4 : vector<256x64xf32>
    %cst_5 = arith.constant 0.000000e+00 : f32
    %6 = vector.broadcast %cst_5 : f32 to vector<256x64xf32>
    %7 = arith.maximumf %5, %6 : vector<256x64xf32>
    %c0_6 = arith.constant 0 : index
    %c0_7 = arith.constant 0 : index
    %8 = vector.load %arg2[%c0_6, %c0_7] : memref<256x80xf32, #tpu.memory_space<vmem>>, vector<256x80xf32>
    %cst_8 = arith.constant dense<0.000000e+00> : vector<256x64xf32>
    %9 = tpu.matmul %8, %0, %cst_8 {dimension_numbers = #tpu.dot_dimension_numbers<[1], [0], [0], [1], [0, 0, 1, 1], [], []>} : vector<256x80xf32>, vector<80x64xf32>, vector<256x64xf32> -> vector<256x64xf32>
    %10 = vector.broadcast %1 : vector<1x64xf32> to vector<256x64xf32>
    %11 = arith.addf %9, %10 : vector<256x64xf32>
    %cst_9 = arith.constant 0.000000e+00 : f32
    %12 = vector.broadcast %cst_9 : f32 to vector<256x64xf32>
    %13 = arith.maximumf %11, %12 : vector<256x64xf32>
    %14 = arith.maximumf %7, %13 : vector<256x64xf32>
    %c0_10 = arith.constant 0 : index
    %c0_11 = arith.constant 0 : index
    %15 = vector.load %arg3[%c0_10, %c0_11] : memref<256x80xf32, #tpu.memory_space<vmem>>, vector<256x80xf32>
    %cst_12 = arith.constant dense<0.000000e+00> : vector<256x64xf32>
    %16 = tpu.matmul %15, %0, %cst_12 {dimension_numbers = #tpu.dot_dimension_numbers<[1], [0], [0], [1], [0, 0, 1, 1], [], []>} : vector<256x80xf32>, vector<80x64xf32>, vector<256x64xf32> -> vector<256x64xf32>
    %17 = vector.broadcast %1 : vector<1x64xf32> to vector<256x64xf32>
    %18 = arith.addf %16, %17 : vector<256x64xf32>
    %cst_13 = arith.constant 0.000000e+00 : f32
    %19 = vector.broadcast %cst_13 : f32 to vector<256x64xf32>
    %20 = arith.maximumf %18, %19 : vector<256x64xf32>
    %c0_14 = arith.constant 0 : index
    %c0_15 = arith.constant 0 : index
    %21 = vector.load %arg4[%c0_14, %c0_15] : memref<256x80xf32, #tpu.memory_space<vmem>>, vector<256x80xf32>
    %cst_16 = arith.constant dense<0.000000e+00> : vector<256x64xf32>
    %22 = tpu.matmul %21, %0, %cst_16 {dimension_numbers = #tpu.dot_dimension_numbers<[1], [0], [0], [1], [0, 0, 1, 1], [], []>} : vector<256x80xf32>, vector<80x64xf32>, vector<256x64xf32> -> vector<256x64xf32>
    %23 = vector.broadcast %1 : vector<1x64xf32> to vector<256x64xf32>
    %24 = arith.addf %22, %23 : vector<256x64xf32>
    %cst_17 = arith.constant 0.000000e+00 : f32
    %25 = vector.broadcast %cst_17 : f32 to vector<256x64xf32>
    %26 = arith.maximumf %24, %25 : vector<256x64xf32>
    %27 = arith.maximumf %20, %26 : vector<256x64xf32>
    %28 = arith.maximumf %14, %27 : vector<256x64xf32>
    %c0_18 = arith.constant 0 : index
    %c0_19 = arith.constant 0 : index
    %29 = vector.load %arg7[%c0_18, %c0_19] : memref<256x64xf32, #tpu.memory_space<vmem>>, vector<256x64xf32>
    tpu.vector_store %arg7[%c0_18, %c0_19], %28 {strides = array<i32>} : memref<256x64xf32, #tpu.memory_space<vmem>>, vector<256x64xf32>,
    return
  }
  func.func @transform_0(%arg0: i32) -> (i32, i32) {
    %c0_i32 = arith.constant 0 : i32
    %c0_i32_0 = arith.constant 0 : i32
    return %arg0, %c0_i32 : i32, i32
  }
  func.func @transform_1(%arg0: i32) -> (i32, i32) {
    %c0_i32 = arith.constant 0 : i32
    %c0_i32_0 = arith.constant 0 : i32
    return %arg0, %c0_i32 : i32, i32
  }
  func.func @transform_2(%arg0: i32) -> (i32, i32) {
    %c0_i32 = arith.constant 0 : i32
    %c0_i32_0 = arith.constant 0 : i32
    return %arg0, %c0_i32 : i32, i32
  }
  func.func @transform_3(%arg0: i32) -> (i32, i32) {
    %c0_i32 = arith.constant 0 : i32
    %c0_i32_0 = arith.constant 0 : i32
    return %arg0, %c0_i32 : i32, i32
  }
  func.func @transform_4(%arg0: i32) -> (i32, i32) {
    %c0_i32 = arith.constant 0 : i32
    %c0_i32_0 = arith.constant 0 : i32
    %c0_i32_1 = arith.constant 0 : i32
    return %c0_i32, %c0_i32_0 : i32, i32
  }
  func.func @transform_5(%arg0: i32) -> (i32, i32) {
    %c0_i32 = arith.constant 0 : i32
    %c0_i32_0 = arith.constant 0 : i32
    %c0_i32_1 = arith.constant 0 : i32
    return %c0_i32, %c0_i32_0 : i32, i32
  }
  func.func @transform_6(%arg0: i32) -> (i32, i32) {
    %c0_i32 = arith.constant 0 : i32
    %c0_i32_0 = arith.constant 0 : i32
    return %arg0, %c0_i32 : i32, i32
  }
}

module attributes {stable_mosaic.version = 11 : i64} {
  func.func @_conv_relu_pool_kernel(%arg0: i32, %arg1: memref<50x1600xf32, #tpu.memory_space<vmem>>, %arg2: memref<50x1600xf32, #tpu.memory_space<vmem>>, %arg3: memref<50x1600xf32, #tpu.memory_space<vmem>>, %arg4: memref<50x1600xf32, #tpu.memory_space<vmem>>, %arg5: memref<1600x128xf32, #tpu.memory_space<vmem>>, %arg6: memref<1x128xf32, #tpu.memory_space<vmem>>, %arg7: memref<50x128xf32, #tpu.memory_space<vmem>>) attributes {dimension_semantics = [#tpu.dimension_semantics<parallel>], iteration_bounds = array<i64: 1>, scalar_prefetch = 0 : i64, scratch_operands = 0 : i64, tpu.core_type = #tpu.core_type<tc>, window_params = [{transform_indices = @transform_0, window_bounds = array<i64: 50, 1600>}, {transform_indices = @transform_1, window_bounds = array<i64: 50, 1600>}, {transform_indices = @transform_2, window_bounds = array<i64: 50, 1600>}, {transform_indices = @transform_3, window_bounds = array<i64: 50, 1600>}, {pipeline_mode = #tpu.pipeline_mode<synchronous>, transform_indices = @transform_4, window_bounds = array<i64: 1600, 128>}, {pipeline_mode = #tpu.pipeline_mode<synchronous>, transform_indices = @transform_5, window_bounds = array<i64: 1, 128>}, {transform_indices = @transform_6, window_bounds = array<i64: 50, 128>}]} {
    %c0 = arith.constant 0 : index
    %c0_0 = arith.constant 0 : index
    %0 = vector.load %arg5[%c0, %c0_0] : memref<1600x128xf32, #tpu.memory_space<vmem>>, vector<1600x128xf32>
    %c0_1 = arith.constant 0 : index
    %c0_2 = arith.constant 0 : index
    %1 = vector.load %arg6[%c0_1, %c0_2] : memref<1x128xf32, #tpu.memory_space<vmem>>, vector<1x128xf32>
    %c0_3 = arith.constant 0 : index
    %c0_4 = arith.constant 0 : index
    %2 = vector.load %arg1[%c0_3, %c0_4] : memref<50x1600xf32, #tpu.memory_space<vmem>>, vector<50x1600xf32>
    %cst = arith.constant dense<0.000000e+00> : vector<50x128xf32>
    %3 = tpu.matmul %2, %0, %cst {dimension_numbers = #tpu.dot_dimension_numbers<[1], [0], [0], [1], [0, 0, 1, 1], [], []>} : vector<50x1600xf32>, vector<1600x128xf32>, vector<50x128xf32> -> vector<50x128xf32>
    %4 = vector.broadcast %1 : vector<1x128xf32> to vector<50x128xf32>
    %5 = arith.addf %3, %4 : vector<50x128xf32>
    %cst_5 = arith.constant 0.000000e+00 : f32
    %6 = vector.broadcast %cst_5 : f32 to vector<50x128xf32>
    %7 = arith.maximumf %5, %6 : vector<50x128xf32>
    %c0_6 = arith.constant 0 : index
    %c0_7 = arith.constant 0 : index
    %8 = vector.load %arg2[%c0_6, %c0_7] : memref<50x1600xf32, #tpu.memory_space<vmem>>, vector<50x1600xf32>
    %cst_8 = arith.constant dense<0.000000e+00> : vector<50x128xf32>
    %9 = tpu.matmul %8, %0, %cst_8 {dimension_numbers = #tpu.dot_dimension_numbers<[1], [0], [0], [1], [0, 0, 1, 1], [], []>} : vector<50x1600xf32>, vector<1600x128xf32>, vector<50x128xf32> -> vector<50x128xf32>
    %10 = vector.broadcast %1 : vector<1x128xf32> to vector<50x128xf32>
    %11 = arith.addf %9, %10 : vector<50x128xf32>
    %cst_9 = arith.constant 0.000000e+00 : f32
    %12 = vector.broadcast %cst_9 : f32 to vector<50x128xf32>
    %13 = arith.maximumf %11, %12 : vector<50x128xf32>
    %14 = arith.maximumf %7, %13 : vector<50x128xf32>
    %c0_10 = arith.constant 0 : index
    %c0_11 = arith.constant 0 : index
    %15 = vector.load %arg3[%c0_10, %c0_11] : memref<50x1600xf32, #tpu.memory_space<vmem>>, vector<50x1600xf32>
    %cst_12 = arith.constant dense<0.000000e+00> : vector<50x128xf32>
    %16 = tpu.matmul %15, %0, %cst_12 {dimension_numbers = #tpu.dot_dimension_numbers<[1], [0], [0], [1], [0, 0, 1, 1], [], []>} : vector<50x1600xf32>, vector<1600x128xf32>, vector<50x128xf32> -> vector<50x128xf32>
    %17 = vector.broadcast %1 : vector<1x128xf32> to vector<50x128xf32>
    %18 = arith.addf %16, %17 : vector<50x128xf32>
    %cst_13 = arith.constant 0.000000e+00 : f32
    %19 = vector.broadcast %cst_13 : f32 to vector<50x128xf32>
    %20 = arith.maximumf %18, %19 : vector<50x128xf32>
    %c0_14 = arith.constant 0 : index
    %c0_15 = arith.constant 0 : index
    %21 = vector.load %arg4[%c0_14, %c0_15] : memref<50x1600xf32, #tpu.memory_space<vmem>>, vector<50x1600xf32>
    %cst_16 = arith.constant dense<0.000000e+00> : vector<50x128xf32>
    %22 = tpu.matmul %21, %0, %cst_16 {dimension_numbers = #tpu.dot_dimension_numbers<[1], [0], [0], [1], [0, 0, 1, 1], [], []>} : vector<50x1600xf32>, vector<1600x128xf32>, vector<50x128xf32> -> vector<50x128xf32>
    %23 = vector.broadcast %1 : vector<1x128xf32> to vector<50x128xf32>
    %24 = arith.addf %22, %23 : vector<50x128xf32>
    %cst_17 = arith.constant 0.000000e+00 : f32
    %25 = vector.broadcast %cst_17 : f32 to vector<50x128xf32>
    %26 = arith.maximumf %24, %25 : vector<50x128xf32>
    %27 = arith.maximumf %20, %26 : vector<50x128xf32>
    %28 = arith.maximumf %14, %27 : vector<50x128xf32>
    %c0_18 = arith.constant 0 : index
    %c0_19 = arith.constant 0 : index
    %29 = vector.load %arg7[%c0_18, %c0_19] : memref<50x128xf32, #tpu.memory_space<vmem>>, vector<50x128xf32>
    tpu.vector_store %arg7[%c0_18, %c0_19], %28 {strides = array<i32>} : memref<50x128xf32, #tpu.memory_space<vmem>>, vector<50x128xf32>,
    return
  }
  func.func @transform_0(%arg0: i32) -> (i32, i32) {
    %c0_i32 = arith.constant 0 : i32
    %c0_i32_0 = arith.constant 0 : i32
    return %arg0, %c0_i32 : i32, i32
  }
  func.func @transform_1(%arg0: i32) -> (i32, i32) {
    %c0_i32 = arith.constant 0 : i32
    %c0_i32_0 = arith.constant 0 : i32
    return %arg0, %c0_i32 : i32, i32
  }
  func.func @transform_2(%arg0: i32) -> (i32, i32) {
    %c0_i32 = arith.constant 0 : i32
    %c0_i32_0 = arith.constant 0 : i32
    return %arg0, %c0_i32 : i32, i32
  }
  func.func @transform_3(%arg0: i32) -> (i32, i32) {
    %c0_i32 = arith.constant 0 : i32
    %c0_i32_0 = arith.constant 0 : i32
    return %arg0, %c0_i32 : i32, i32
  }
  func.func @transform_4(%arg0: i32) -> (i32, i32) {
    %c0_i32 = arith.constant 0 : i32
    %c0_i32_0 = arith.constant 0 : i32
    %c0_i32_1 = arith.constant 0 : i32
    return %c0_i32, %c0_i32_0 : i32, i32
  }
  func.func @transform_5(%arg0: i32) -> (i32, i32) {
    %c0_i32 = arith.constant 0 : i32
    %c0_i32_0 = arith.constant 0 : i32
    %c0_i32_1 = arith.constant 0 : i32
    return %c0_i32, %c0_i32_0 : i32, i32
  }
  func.func @transform_6(%arg0: i32) -> (i32, i32) {
    %c0_i32 = arith.constant 0 : i32
    %c0_i32_0 = arith.constant 0 : i32
    return %arg0, %c0_i32 : i32, i32
  }
}

module attributes {stable_mosaic.version = 11 : i64} {
  func.func @_fc_fused_kernel(%arg0: i32, %arg1: memref<2x3200xf32, #tpu.memory_space<vmem>>, %arg2: memref<3200x120xf32, #tpu.memory_space<vmem>>, %arg3: memref<1x120xf32, #tpu.memory_space<vmem>>, %arg4: memref<120x128xf32, #tpu.memory_space<vmem>>, %arg5: memref<1x128xf32, #tpu.memory_space<vmem>>, %arg6: memref<128x128xf32, #tpu.memory_space<vmem>>, %arg7: memref<1x128xf32, #tpu.memory_space<vmem>>, %arg8: memref<2x128xf32, #tpu.memory_space<vmem>>) attributes {dimension_semantics = [#tpu.dimension_semantics<arbitrary>], iteration_bounds = array<i64: 1>, scalar_prefetch = 0 : i64, scratch_operands = 0 : i64, tpu.core_type = #tpu.core_type<tc>, window_params = [{pipeline_mode = #tpu.pipeline_mode<synchronous>, transform_indices = @transform_0, window_bounds = array<i64: 2, 3200>}, {pipeline_mode = #tpu.pipeline_mode<synchronous>, transform_indices = @transform_1, window_bounds = array<i64: 3200, 120>}, {pipeline_mode = #tpu.pipeline_mode<synchronous>, transform_indices = @transform_2, window_bounds = array<i64: 1, 120>}, {pipeline_mode = #tpu.pipeline_mode<synchronous>, transform_indices = @transform_3, window_bounds = array<i64: 120, 128>}, {pipeline_mode = #tpu.pipeline_mode<synchronous>, transform_indices = @transform_4, window_bounds = array<i64: 1, 128>}, {pipeline_mode = #tpu.pipeline_mode<synchronous>, transform_indices = @transform_5, window_bounds = array<i64: 128, 128>}, {pipeline_mode = #tpu.pipeline_mode<synchronous>, transform_indices = @transform_6, window_bounds = array<i64: 1, 128>}, {pipeline_mode = #tpu.pipeline_mode<synchronous>, transform_indices = @transform_7, window_bounds = array<i64: 2, 128>}]} {
    %c0 = arith.constant 0 : index
    %c0_0 = arith.constant 0 : index
    %0 = vector.load %arg1[%c0, %c0_0] : memref<2x3200xf32, #tpu.memory_space<vmem>>, vector<2x3200xf32>
    %c0_1 = arith.constant 0 : index
    %c0_2 = arith.constant 0 : index
    %1 = vector.load %arg2[%c0_1, %c0_2] : memref<3200x120xf32, #tpu.memory_space<vmem>>, vector<3200x120xf32>
    %cst = arith.constant dense<0.000000e+00> : vector<2x120xf32>
    %2 = tpu.matmul %0, %1, %cst {dimension_numbers = #tpu.dot_dimension_numbers<[1], [0], [0], [1], [0, 0, 1, 1], [], []>} : vector<2x3200xf32>, vector<3200x120xf32>, vector<2x120xf32> -> vector<2x120xf32>
    %c0_3 = arith.constant 0 : index
    %c0_4 = arith.constant 0 : index
    %3 = vector.load %arg3[%c0_3, %c0_4] : memref<1x120xf32, #tpu.memory_space<vmem>>, vector<1x120xf32>
    %4 = vector.broadcast %3 : vector<1x120xf32> to vector<2x120xf32>
    %5 = arith.addf %2, %4 : vector<2x120xf32>
    %cst_5 = arith.constant 0.000000e+00 : f32
    %6 = vector.broadcast %cst_5 : f32 to vector<2x120xf32>
    %7 = arith.maximumf %5, %6 : vector<2x120xf32>
    %c0_6 = arith.constant 0 : index
    %c0_7 = arith.constant 0 : index
    %8 = vector.load %arg4[%c0_6, %c0_7] : memref<120x128xf32, #tpu.memory_space<vmem>>, vector<120x128xf32>
    %cst_8 = arith.constant dense<0.000000e+00> : vector<2x128xf32>
    %9 = tpu.matmul %7, %8, %cst_8 {dimension_numbers = #tpu.dot_dimension_numbers<[1], [0], [0], [1], [0, 0, 1, 1], [], []>} : vector<2x120xf32>, vector<120x128xf32>, vector<2x128xf32> -> vector<2x128xf32>
    %c0_9 = arith.constant 0 : index
    %c0_10 = arith.constant 0 : index
    %10 = vector.load %arg5[%c0_9, %c0_10] : memref<1x128xf32, #tpu.memory_space<vmem>>, vector<1x128xf32>
    %11 = vector.broadcast %10 : vector<1x128xf32> to vector<2x128xf32>
    %12 = arith.addf %9, %11 : vector<2x128xf32>
    %cst_11 = arith.constant 0.000000e+00 : f32
    %13 = vector.broadcast %cst_11 : f32 to vector<2x128xf32>
    %14 = arith.maximumf %12, %13 : vector<2x128xf32>
    %c0_12 = arith.constant 0 : index
    %c0_13 = arith.constant 0 : index
    %15 = vector.load %arg6[%c0_12, %c0_13] : memref<128x128xf32, #tpu.memory_space<vmem>>, vector<128x128xf32>
    %cst_14 = arith.constant dense<0.000000e+00> : vector<2x128xf32>
    %16 = tpu.matmul %14, %15, %cst_14 {dimension_numbers = #tpu.dot_dimension_numbers<[1], [0], [0], [1], [0, 0, 1, 1], [], []>} : vector<2x128xf32>, vector<128x128xf32>, vector<2x128xf32> -> vector<2x128xf32>
    %c0_15 = arith.constant 0 : index
    %c0_16 = arith.constant 0 : index
    %17 = vector.load %arg7[%c0_15, %c0_16] : memref<1x128xf32, #tpu.memory_space<vmem>>, vector<1x128xf32>
    %18 = vector.broadcast %17 : vector<1x128xf32> to vector<2x128xf32>
    %19 = arith.addf %16, %18 : vector<2x128xf32>
    %c0_17 = arith.constant 0 : index
    %c0_18 = arith.constant 0 : index
    %20 = vector.load %arg8[%c0_17, %c0_18] : memref<2x128xf32, #tpu.memory_space<vmem>>, vector<2x128xf32>
    tpu.vector_store %arg8[%c0_17, %c0_18], %19 {strides = array<i32>} : memref<2x128xf32, #tpu.memory_space<vmem>>, vector<2x128xf32>,
    return
  }
  func.func @transform_0(%arg0: i32) -> (i32, i32) {
    %c0_i32 = arith.constant 0 : i32
    %c0_i32_0 = arith.constant 0 : i32
    %c0_i32_1 = arith.constant 0 : i32
    return %c0_i32, %c0_i32_0 : i32, i32
  }
  func.func @transform_1(%arg0: i32) -> (i32, i32) {
    %c0_i32 = arith.constant 0 : i32
    %c0_i32_0 = arith.constant 0 : i32
    %c0_i32_1 = arith.constant 0 : i32
    return %c0_i32, %c0_i32_0 : i32, i32
  }
  func.func @transform_2(%arg0: i32) -> (i32, i32) {
    %c0_i32 = arith.constant 0 : i32
    %c0_i32_0 = arith.constant 0 : i32
    %c0_i32_1 = arith.constant 0 : i32
    return %c0_i32, %c0_i32_0 : i32, i32
  }
  func.func @transform_3(%arg0: i32) -> (i32, i32) {
    %c0_i32 = arith.constant 0 : i32
    %c0_i32_0 = arith.constant 0 : i32
    %c0_i32_1 = arith.constant 0 : i32
    return %c0_i32, %c0_i32_0 : i32, i32
  }
  func.func @transform_4(%arg0: i32) -> (i32, i32) {
    %c0_i32 = arith.constant 0 : i32
    %c0_i32_0 = arith.constant 0 : i32
    %c0_i32_1 = arith.constant 0 : i32
    return %c0_i32, %c0_i32_0 : i32, i32
  }
  func.func @transform_5(%arg0: i32) -> (i32, i32) {
    %c0_i32 = arith.constant 0 : i32
    %c0_i32_0 = arith.constant 0 : i32
    %c0_i32_1 = arith.constant 0 : i32
    return %c0_i32, %c0_i32_0 : i32, i32
  }
  func.func @transform_6(%arg0: i32) -> (i32, i32) {
    %c0_i32 = arith.constant 0 : i32
    %c0_i32_0 = arith.constant 0 : i32
    %c0_i32_1 = arith.constant 0 : i32
    return %c0_i32, %c0_i32_0 : i32, i32
  }
  func.func @transform_7(%arg0: i32) -> (i32, i32) {
    %c0_i32 = arith.constant 0 : i32
    %c0_i32_0 = arith.constant 0 : i32
    %c0_i32_1 = arith.constant 0 : i32
    return %c0_i32, %c0_i32_0 : i32, i32
  }
}

</mosaic_0001>

<bundles_post_ra>
// kernel: net_forward.3
= control target key start
LH: loop header
LB: loop body
LE: loop exit
PB: predicated region body
PF: predicated region fallthrough
CT: control target
= control target key end

     0   :  { %s3275_s21 = smov 0   ;;  %s3277_s22 = smov 0   ;;  %s4156_s0 = inlined_call_operand.vmem [shape: f32[392,80], index: 0, kind: input, shape index: {}]   ;;  %s4157_s1 = inlined_call_operand.vmem [shape: f32[392,80], index: 1, kind: input, shape index: {}]   ;;  %s4158_s2 = inlined_call_operand.vmem [shape: f32[392,80], index: 2, kind: input, shape index: {}]   ;;  %s4159_s3 = inlined_call_operand.vmem [shape: f32[392,80], index: 3, kind: input, shape index: {}]   ;;  %s4160_s4 = inlined_call_operand.vmem [shape: f32[80,64], index: 4, kind: input, shape index: {}]   ;;  %s4161_s5 = inlined_call_operand.vmem [shape: f32[1,64], index: 5, kind: input, shape index: {}]   ;;  %s4162_s6 = inlined_call_operand.vmem [shape: f32[392,64], index: 6, kind: output, shape index: {}]  }
   0x1   :  { %s3279_s23 = smov 0  }
   0x2 LB: > { %s3288_s24 = sadd.s32 4294967295, %s3206_s23   ;;  %s3290_s25 = sadd.s32 1, %s3206_s23   ;;  %s3206_s23 = sphi %s3279_s23, %s4171_s23   ;;  %s3202_s22 = sphi %s3277_s22, %s4170_s22   ;;  %s3198_s21 = sphi %s3275_s21, %s4169_s21  }
   0x3   : > { %s166_s26 = ssub.s32 %s3206_s23, %s3290_s25  ;;  %s169_s27 = sadd.s32 1, %s3202_s22 }
   0x4   : > { %p167_p0 = scmp.eq.s32.totalorder %s166_s26, 0  ;;  %p179_p1 = scmp.ne.s32.totalorder %s3202_s22, %s3198_s21 }
   0x5   : > { %p180_p2 = scmp.eq.s32.totalorder %s3288_s24, 1  ;;  %p2465_p3 = scmp.ge.s32.totalorder %s3206_s23, 1 }
   0x6   : > { %s3298_s28 = scalar_select %p167_p0, %s3202_s22, %s169_s27  }
   0x7   : > { %p3300_p4 = por %p180_p2, %p179_p1  ;;  %p278_p5 = scmp.lt.s32.totalorder %s3206_s23, 3 }
   0x9   : > { %p279_p6 = pnand %p2465_p3, %p278_p5 }
   0xa   : > { %s3315_s10 = sshll.u32 (!%p279_p6), %s3288_s24, 5  ;;  %s335_s8 = sand.u32 (!%p279_p6), 1, %s3198_s21  }
   0xb   : > { %282 = sbr.rel (%p279_p6) target bundleno = 415 (0x19f), region = 44  ;;  %p343_p7 = scmp.lt.s32.totalorder (!%p279_p6), %s3315_s10, 48 }
   0xc   : > { %s2466_s9 = sshll.u32 (!%p279_p6), %s335_s8, 8 }
   0xd   : > { %s3866_s21 = scalar_lea.vmem (!%p279_p6), [#allocation2], %s2466_s9  }
  0x10   : > { %v3307_v0 = vld [vmem:[%s4160_s4 + $0x48] sm:$0xff]  ;;  %v3312_v1 = vld [vmem:[%s4160_s4 + $0x40] sm:$0xff]  ;;  %v3324_v2 = vld [vmem:[%s4160_s4 + $0x38] sm:$0xff]  ;;  %s344_s17 = scalar_select %p343_p7, %s3315_s10, 48  ;;  %vm448_vm0 = vcmask 654336   ;;  %vm2053_vm1 = vcmask 523264  }
  0x11   : > { %2792 = vmatprep.subr.mxu0 %v3307_v0  ;;  %2860 = vmatprep.subr.mxu1 %v3307_v0  ;;  %v3334_v3 = vld [vmem:[%s4160_s4 + $0x30] sm:$0xff]  ;;  %v3343_v4 = vld [vmem:[%s4160_s4 + $0x28] sm:$0xff]  ;;  %v3353_v5 = vld [vmem:[%s4160_s4 + $0x20] sm:$0xff]  ;;  %s2094_s11 = ssub.s32 (%p3300_p4), 49, %s3315_s10 }
  0x12   : > { %2793 = vmatpush3.msra.mxu0 %v3307_v0  ;;  %2861 = vmatpush3.msra.mxu1 %v3307_v0  ;;  %v3362_v6 = vld [vmem:[%s4160_s4 + $0x18] sm:$0xff]  ;;  %s3366_s26 = sshll.u32 %s344_s17, 3  ;;  %v3373_v7 = vld [vmem:[%s4160_s4 + $0x10] sm:$0xff]  ;;  %v3382_v8 = vld [vmem:[%s4160_s4 + $0x8] sm:$0xff]  ;;  %p2095_p8 = scmp.lt.s32.totalorder (%p3300_p4), %s2094_s11, 32 }
  0x13   : > { %2794 = vmatprep.subr.mxu0 %v3312_v1  ;;  %2862 = vmatprep.subr.mxu1 %v3312_v1  ;;  %s3388_s12 = scalar_lea.vmem %s4156_s0, %s3366_s26  ;;  %s3396_s15 = scalar_lea.vmem %s4157_s1, %s3366_s26  ;;  %v3403_v9 = vld [vmem:[%s4160_s4] sm:$0xff] }
  0x14   : > { %2795 = vmatpush3.msra.mxu0 %v3312_v1  ;;  %2863 = vmatpush3.msra.mxu1 %v3312_v1  ;;  %v410_v10 = vld [vmem:[%s3388_s12] sm:$0xff]  ;;  %v411_v12 = vld [vmem:[%s3388_s12 + $0x8] sm:$0xff]  ;;  %v412_v14 = vld [vmem:[%s3388_s12 + $0x10] sm:$0xff]  ;;  %s3577_s20 = scalar_lea.vmem %s4158_s2, %s3366_s26  ;;  %s3583_s30 = scalar_lea.vmem %s4159_s3, %s3366_s26 }
  0x15   : > { %2796 = vmatprep.subr.mxu0 %v3324_v2  ;;  %2864 = vmatprep.subr.mxu1 %v3324_v2  ;;  %v802_v11 = vld [vmem:[%s3396_s15] sm:$0xff]  ;;  %v803_v13 = vld [vmem:[%s3396_s15 + $0x8] sm:$0xff]  ;;  %v804_v15 = vld [vmem:[%s3396_s15 + $0x10] sm:$0xff] }
  0x16   : > { %2797 = vmatpush3.msra.mxu0 %v3324_v2  ;;  %2865 = vmatpush3.msra.mxu1 %v3324_v2  ;;  %v413_v16 = vld [vmem:[%s3388_s12 + $0x18] sm:$0xff]  ;;  %v414_v18 = vld [vmem:[%s3388_s12 + $0x20] sm:$0xff]  ;;  %v415_v20 = vld [vmem:[%s3388_s12 + $0x28] sm:$0xff] }
  0x17   : > { %2798 = vmatprep.subr.mxu0 %v3334_v3  ;;  %2866 = vmatprep.subr.mxu1 %v3334_v3  ;;  %v805_v17 = vld [vmem:[%s3396_s15 + $0x18] sm:$0xff]  ;;  %v806_v19 = vld [vmem:[%s3396_s15 + $0x20] sm:$0xff]  ;;  %v807_v21 = vld [vmem:[%s3396_s15 + $0x28] sm:$0xff] }
  0x18   : > { %2799 = vmatpush3.msra.mxu0 %v3334_v3  ;;  %2867 = vmatpush3.msra.mxu1 %v3334_v3  ;;  %v416_v22 = vld [vmem:[%s3388_s12 + $0x30] sm:$0xff]  ;;  %v417_v24 = vld [vmem:[%s3388_s12 + $0x38] sm:$0xff]  ;;  %v418_v26 = vld [vmem:[%s3388_s12 + $0x40] sm:$0xff] }
  0x19   : > { %2800 = vmatprep.subr.mxu0 %v3343_v4  ;;  %2868 = vmatprep.subr.mxu1 %v3343_v4  ;;  %v808_v23 = vld [vmem:[%s3396_s15 + $0x30] sm:$0xff]  ;;  %v809_v25 = vld [vmem:[%s3396_s15 + $0x38] sm:$0xff]  ;;  %v810_v27 = vld [vmem:[%s3396_s15 + $0x40] sm:$0xff] }
  0x1a   : > { %2801 = vmatpush3.msra.mxu0 %v3343_v4  ;;  %2869 = vmatpush3.msra.mxu1 %v3343_v4  ;;  %v419_v28 = vld [vmem:[%s3388_s12 + $0x48] sm:$0xff]  ;;  %v420_v30 = vld [vmem:[%s3388_s12 + $0x50] sm:$0xff]  ;;  %v421_v32 = vld [vmem:[%s3388_s12 + $0x58] sm:$0xff] }
  0x1b   : > { %2802 = vmatprep.subr.mxu0 %v3353_v5  ;;  %2870 = vmatprep.subr.mxu1 %v3353_v5  ;;  %v811_v29 = vld [vmem:[%s3396_s15 + $0x48] sm:$0xff]  ;;  %v812_v31 = vld [vmem:[%s3396_s15 + $0x50] sm:$0xff]  ;;  %v813_v33 = vld [vmem:[%s3396_s15 + $0x58] sm:$0xff] }
  0x1c   : > { %2803 = vmatpush3.msra.mxu0 %v3353_v5  ;;  %2871 = vmatpush3.msra.mxu1 %v3353_v5  ;;  %v422_v34 = vld [vmem:[%s3388_s12 + $0x60] sm:$0xff]  ;;  %v423_v36 = vld [vmem:[%s3388_s12 + $0x68] sm:$0xff]  ;;  %v424_v38 = vld [vmem:[%s3388_s12 + $0x70] sm:$0xff] }
  0x1d   : > { %2804 = vmatprep.subr.mxu0 %v3362_v6  ;;  %2872 = vmatprep.subr.mxu1 %v3362_v6  ;;  %v814_v35 = vld [vmem:[%s3396_s15 + $0x60] sm:$0xff]  ;;  %v815_v37 = vld [vmem:[%s3396_s15 + $0x68] sm:$0xff]  ;;  %v816_v39 = vld [vmem:[%s3396_s15 + $0x70] sm:$0xff] }
  0x1e   : > { %2805 = vmatpush3.msra.mxu0 %v3362_v6  ;;  %2873 = vmatpush3.msra.mxu1 %v3362_v6  ;;  %v425_v40 = vld [vmem:[%s3388_s12 + $0x78] sm:$0xff]  ;;  %v426_v42 = vld [vmem:[%s3388_s12 + $0x80] sm:$0xff]  ;;  %v427_v44 = vld [vmem:[%s3388_s12 + $0x88] sm:$0xff] }
  0x1f   : > { %2806 = vmatprep.subr.mxu0 %v3373_v7  ;;  %2874 = vmatprep.subr.mxu1 %v3373_v7  ;;  %v817_v41 = vld [vmem:[%s3396_s15 + $0x78] sm:$0xff]  ;;  %v818_v43 = vld [vmem:[%s3396_s15 + $0x80] sm:$0xff]  ;;  %v819_v45 = vld [vmem:[%s3396_s15 + $0x88] sm:$0xff] }
  0x20   : > { %2807 = vmatpush3.msra.mxu0 %v3373_v7  ;;  %2875 = vmatpush3.msra.mxu1 %v3373_v7  ;;  %v428_v46 = vld [vmem:[%s3388_s12 + $0x90] sm:$0xff]  ;;  %v429_v48 = vld [vmem:[%s3388_s12 + $0x98] sm:$0xff]  ;;  %v430_v50 = vld [vmem:[%s3388_s12 + $0xa0] sm:$0xff] }
  0x21   : > { %2808 = vmatprep.subr.mxu0 %v3382_v8  ;;  %2876 = vmatprep.subr.mxu1 %v3382_v8  ;;  %v820_v47 = vld [vmem:[%s3396_s15 + $0x90] sm:$0xff]  ;;  %v821_v49 = vld [vmem:[%s3396_s15 + $0x98] sm:$0xff]  ;;  %v822_v51 = vld [vmem:[%s3396_s15 + $0xa0] sm:$0xff] }
  0x22   : > { %2809 = vmatpush3.msra.mxu0 %v3382_v8  ;;  %2877 = vmatpush3.msra.mxu1 %v3382_v8  ;;  %v431_v52 = vld [vmem:[%s3388_s12 + $0xa8] sm:$0xff]  ;;  %v432_v54 = vld [vmem:[%s3388_s12 + $0xb0] sm:$0xff]  ;;  %v433_v56 = vld [vmem:[%s3388_s12 + $0xb8] sm:$0xff] }
  0x23   : > { %2810 = vmatprep.subr.mxu0 %v3403_v9  ;;  %2878 = vmatprep.subr.mxu1 %v3403_v9  ;;  %v823_v53 = vld [vmem:[%s3396_s15 + $0xa8] sm:$0xff]  ;;  %v824_v55 = vld [vmem:[%s3396_s15 + $0xb0] sm:$0xff]  ;;  %v825_v57 = vld [vmem:[%s3396_s15 + $0xb8] sm:$0xff] }
  0x24   : > { %2811 = vmatpush3.msra.mxu0 %v3403_v9  ;;  %2812 = vmatprep.mubr.msk.f32.mxu0 %vm448_vm0, %v410_v10  ;;  %v434_v58 = vld [vmem:[%s3388_s12 + $0xc0] sm:$0xff]  ;;  %v435_v60 = vld [vmem:[%s3388_s12 + $0xc8] sm:$0xff]  ;;  %v436_v62 = vld [vmem:[%s3388_s12 + $0xd0] sm:$0xff] }
  0x25   : > { %2879 = vmatpush3.msra.mxu1 %v3403_v9  ;;  %2880 = vmatprep.mubr.msk.f32.mxu1 %vm448_vm0, %v802_v11  ;;  %v826_v59 = vld [vmem:[%s3396_s15 + $0xc0] sm:$0xff]  ;;  %v827_v61 = vld [vmem:[%s3396_s15 + $0xc8] sm:$0xff]  ;;  %v828_v63 = vld [vmem:[%s3396_s15 + $0xd0] sm:$0xff] }
  0x26   : > { %2813 = vmatmul.mubr.msk.f32.vlgmr.msra.gmra.mxu0 %vm448_vm0, %v411_v12  ;;  %2881 = vmatmul.mubr.msk.f32.vlgmr.msra.gmra.mxu1 %vm448_vm0, %v803_v13  ;;  %v1219_v10 = vld [vmem:[%s3577_s20] sm:$0xff]  ;;  %v1220_v12 = vld [vmem:[%s3577_s20 + $0x8] sm:$0xff] }
  0x27   : > { %2928 = vmatprep.subr.mxu0 %v3307_v0  ;;  %2996 = vmatprep.subr.mxu1 %v3307_v0  ;;  %v1604_v11 = vld [vmem:[%s3583_s30] sm:$0xff]  ;;  %v1605_v13 = vld [vmem:[%s3583_s30 + $0x8] sm:$0xff] }
  0x28   : > { %2929 = vmatpush3.msra.mxu0 %v3307_v0  ;;  %2997 = vmatpush3.msra.mxu1 %v3307_v0  ;;  %v437_v0 = vld [vmem:[%s3388_s12 + $0xd8] sm:$0xff] }
  0x29   : > { %2815 = vmatprep.mubr.msk.f32.mxu0 %vm448_vm0, %v412_v14  ;;  %2883 = vmatprep.mubr.msk.f32.mxu1 %vm448_vm0, %v804_v15  ;;  %v1221_v14 = vld [vmem:[%s3577_s20 + $0x10] sm:$0xff] }
  0x2a   : > { %2816 = vmatmul.mubr.msk.f32.gmra.mxu0 %vm448_vm0, %v413_v16  ;;  %2884 = vmatmul.mubr.msk.f32.gmra.mxu1 %vm448_vm0, %v805_v17  ;;  %v1606_v15 = vld [vmem:[%s3583_s30 + $0x10] sm:$0xff]  ;;  %v1222_v16 = vld [vmem:[%s3577_s20 + $0x18] sm:$0xff] }
  0x2b   : > { %2818 = vmatprep.mubr.msk.f32.mxu0 %vm448_vm0, %v414_v18  ;;  %2886 = vmatprep.mubr.msk.f32.mxu1 %vm448_vm0, %v806_v19  ;;  %v1607_v17 = vld [vmem:[%s3583_s30 + $0x18] sm:$0xff]  ;;  %v1223_v18 = vld [vmem:[%s3577_s20 + $0x20] sm:$0xff] }
  0x2c   : > { %2930 = vmatprep.subr.mxu0 %v3312_v1  ;;  %2998 = vmatprep.subr.mxu1 %v3312_v1  ;;  %v1608_v19 = vld [vmem:[%s3583_s30 + $0x20] sm:$0xff] }
  0x2d   : > { %2931 = vmatpush3.msra.mxu0 %v3312_v1  ;;  %2999 = vmatpush3.msra.mxu1 %v3312_v1  ;;  %v829_v1 = vld [vmem:[%s3396_s15 + $0xd8] sm:$0xff] }
  0x2e   : > { %2819 = vmatmul.mubr.msk.f32.gmra.mxu0 %vm448_vm0, %v415_v20  ;;  %2887 = vmatmul.mubr.msk.f32.gmra.mxu1 %vm448_vm0, %v807_v21  ;;  %v1224_v20 = vld [vmem:[%s3577_s20 + $0x28] sm:$0xff] }
  0x2f   : > { %2821 = vmatprep.mubr.msk.f32.mxu0 %vm448_vm0, %v416_v22  ;;  %2889 = vmatprep.mubr.msk.f32.mxu1 %vm448_vm0, %v808_v23  ;;  %v1609_v21 = vld [vmem:[%s3583_s30 + $0x28] sm:$0xff]  ;;  %v1225_v22 = vld [vmem:[%s3577_s20 + $0x30] sm:$0xff] }
  0x30   : > { %2932 = vmatprep.subr.mxu0 %v3324_v2  ;;  %3000 = vmatprep.subr.mxu1 %v3324_v2  ;;  %v1610_v23 = vld [vmem:[%s3583_s30 + $0x30] sm:$0xff] }
  0x31   : > { %2933 = vmatpush3.msra.mxu0 %v3324_v2  ;;  %3001 = vmatpush3.msra.mxu1 %v3324_v2  ;;  %v438_v2 = vld [vmem:[%s3388_s12 + $0xe0] sm:$0xff] }
  0x32   : > { %2822 = vmatmul.mubr.msk.f32.gmra.mxu0 %vm448_vm0, %v417_v24  ;;  %2890 = vmatmul.mubr.msk.f32.gmra.mxu1 %vm448_vm0, %v809_v25  ;;  %v1226_v24 = vld [vmem:[%s3577_s20 + $0x38] sm:$0xff] }
  0x33   : > { %2824 = vmatprep.mubr.msk.f32.mxu0 %vm448_vm0, %v418_v26  ;;  %2892 = vmatprep.mubr.msk.f32.mxu1 %vm448_vm0, %v810_v27  ;;  %v1611_v25 = vld [vmem:[%s3583_s30 + $0x38] sm:$0xff]  ;;  %v1227_v26 = vld [vmem:[%s3577_s20 + $0x40] sm:$0xff] }
  0x34   : > { %2934 = vmatprep.subr.mxu0 %v3334_v3  ;;  %3002 = vmatprep.subr.mxu1 %v3334_v3  ;;  %v1612_v27 = vld [vmem:[%s3583_s30 + $0x40] sm:$0xff] }
  0x35   : > { %2935 = vmatpush3.msra.mxu0 %v3334_v3  ;;  %3003 = vmatpush3.msra.mxu1 %v3334_v3  ;;  %v830_v3 = vld [vmem:[%s3396_s15 + $0xe0] sm:$0xff] }
  0x36   : > { %2825 = vmatmul.mubr.msk.f32.gmra.mxu0 %vm448_vm0, %v419_v28  ;;  %2893 = vmatmul.mubr.msk.f32.gmra.mxu1 %vm448_vm0, %v811_v29  ;;  %v1228_v28 = vld [vmem:[%s3577_s20 + $0x48] sm:$0xff] }
  0x37   : > { %2827 = vmatprep.mubr.msk.f32.mxu0 %vm448_vm0, %v420_v30  ;;  %2895 = vmatprep.mubr.msk.f32.mxu1 %vm448_vm0, %v812_v31  ;;  %v1613_v29 = vld [vmem:[%s3583_s30 + $0x48] sm:$0xff]  ;;  %v1229_v30 = vld [vmem:[%s3577_s20 + $0x50] sm:$0xff] }
  0x38   : > { %2936 = vmatprep.subr.mxu0 %v3343_v4  ;;  %3004 = vmatprep.subr.mxu1 %v3343_v4  ;;  %v1614_v31 = vld [vmem:[%s3583_s30 + $0x50] sm:$0xff] }
  0x39   : > { %2937 = vmatpush3.msra.mxu0 %v3343_v4  ;;  %3005 = vmatpush3.msra.mxu1 %v3343_v4  ;;  %v439_v4 = vld [vmem:[%s3388_s12 + $0xe8] sm:$0xff] }
  0x3a   : > { %2828 = vmatmul.mubr.msk.f32.gmra.mxu0 %vm448_vm0, %v421_v32  ;;  %2896 = vmatmul.mubr.msk.f32.gmra.mxu1 %vm448_vm0, %v813_v33  ;;  %v1230_v32 = vld [vmem:[%s3577_s20 + $0x58] sm:$0xff] }
  0x3b   : > { %2830 = vmatprep.mubr.msk.f32.mxu0 %vm448_vm0, %v422_v34  ;;  %2898 = vmatprep.mubr.msk.f32.mxu1 %vm448_vm0, %v814_v35  ;;  %v1615_v33 = vld [vmem:[%s3583_s30 + $0x58] sm:$0xff]  ;;  %v1231_v34 = vld [vmem:[%s3577_s20 + $0x60] sm:$0xff] }
  0x3c   : > { %2938 = vmatprep.subr.mxu0 %v3353_v5  ;;  %3006 = vmatprep.subr.mxu1 %v3353_v5  ;;  %v1616_v35 = vld [vmem:[%s3583_s30 + $0x60] sm:$0xff] }
  0x3d   : > { %2939 = vmatpush3.msra.mxu0 %v3353_v5  ;;  %3007 = vmatpush3.msra.mxu1 %v3353_v5  ;;  %v831_v5 = vld [vmem:[%s3396_s15 + $0xe8] sm:$0xff] }
  0x3e   : > { %2831 = vmatmul.mubr.msk.f32.gmra.mxu0 %vm448_vm0, %v423_v36  ;;  %2899 = vmatmul.mubr.msk.f32.gmra.mxu1 %vm448_vm0, %v815_v37  ;;  %v1232_v36 = vld [vmem:[%s3577_s20 + $0x68] sm:$0xff] }
  0x3f   : > { %2833 = vmatprep.mubr.msk.f32.mxu0 %vm448_vm0, %v424_v38  ;;  %2901 = vmatprep.mubr.msk.f32.mxu1 %vm448_vm0, %v816_v39  ;;  %v1617_v37 = vld [vmem:[%s3583_s30 + $0x68] sm:$0xff]  ;;  %v1233_v38 = vld [vmem:[%s3577_s20 + $0x70] sm:$0xff] }
  0x40   : > { %2940 = vmatprep.subr.mxu0 %v3362_v6  ;;  %3008 = vmatprep.subr.mxu1 %v3362_v6  ;;  %v1618_v39 = vld [vmem:[%s3583_s30 + $0x70] sm:$0xff] }
  0x41   : > { %2941 = vmatpush3.msra.mxu0 %v3362_v6  ;;  %3009 = vmatpush3.msra.mxu1 %v3362_v6  ;;  %v440_v6 = vld [vmem:[%s3388_s12 + $0xf0] sm:$0xff] }
  0x42   : > { %2834 = vmatmul.mubr.msk.f32.gmra.mxu0 %vm448_vm0, %v425_v40  ;;  %2902 = vmatmul.mubr.msk.f32.gmra.mxu1 %vm448_vm0, %v817_v41  ;;  %v1234_v40 = vld [vmem:[%s3577_s20 + $0x78] sm:$0xff] }
  0x43   : > { %2836 = vmatprep.mubr.msk.f32.mxu0 %vm448_vm0, %v426_v42  ;;  %2904 = vmatprep.mubr.msk.f32.mxu1 %vm448_vm0, %v818_v43  ;;  %v1619_v41 = vld [vmem:[%s3583_s30 + $0x78] sm:$0xff]  ;;  %v1235_v42 = vld [vmem:[%s3577_s20 + $0x80] sm:$0xff] }
  0x44   : > { %2942 = vmatprep.subr.mxu0 %v3373_v7  ;;  %3010 = vmatprep.subr.mxu1 %v3373_v7  ;;  %v1620_v43 = vld [vmem:[%s3583_s30 + $0x80] sm:$0xff] }
  0x45   : > { %2943 = vmatpush3.msra.mxu0 %v3373_v7  ;;  %3011 = vmatpush3.msra.mxu1 %v3373_v7  ;;  %v832_v7 = vld [vmem:[%s3396_s15 + $0xf0] sm:$0xff] }
  0x46   : > { %2837 = vmatmul.mubr.msk.f32.gmra.mxu0 %vm448_vm0, %v427_v44  ;;  %2905 = vmatmul.mubr.msk.f32.gmra.mxu1 %vm448_vm0, %v819_v45  ;;  %v1236_v44 = vld [vmem:[%s3577_s20 + $0x88] sm:$0xff] }
  0x47   : > { %2839 = vmatprep.mubr.msk.f32.mxu0 %vm448_vm0, %v428_v46  ;;  %2907 = vmatprep.mubr.msk.f32.mxu1 %vm448_vm0, %v820_v47  ;;  %v1621_v45 = vld [vmem:[%s3583_s30 + $0x88] sm:$0xff]  ;;  %v1237_v46 = vld [vmem:[%s3577_s20 + $0x90] sm:$0xff] }
  0x48   : > { %2944 = vmatprep.subr.mxu0 %v3382_v8  ;;  %3012 = vmatprep.subr.mxu1 %v3382_v8  ;;  %v1622_v47 = vld [vmem:[%s3583_s30 + $0x90] sm:$0xff] }
  0x49   : > { %2945 = vmatpush3.msra.mxu0 %v3382_v8  ;;  %3013 = vmatpush3.msra.mxu1 %v3382_v8  ;;  %v441_v8 = vld [vmem:[%s3388_s12 + $0xf8] sm:$0xff]  ;;  %s2621_s12 = sshll.u32 (%p3300_p4), %s3288_s24, 8 }
  0x4a   : > { %2840 = vmatmul.mubr.msk.f32.gmra.mxu0 %vm448_vm0, %v429_v48  ;;  %2908 = vmatmul.mubr.msk.f32.gmra.mxu1 %vm448_vm0, %v821_v49  ;;  %v1238_v48 = vld [vmem:[%s3577_s20 + $0x98] sm:$0xff] }
  0x4b   : > { %2842 = vmatprep.mubr.msk.f32.mxu0 %vm448_vm0, %v430_v50  ;;  %2910 = vmatprep.mubr.msk.f32.mxu1 %vm448_vm0, %v822_v51  ;;  %v1623_v49 = vld [vmem:[%s3583_s30 + $0x98] sm:$0xff]  ;;  %v1239_v50 = vld [vmem:[%s3577_s20 + $0xa0] sm:$0xff] }
  0x4c   : > { %2946 = vmatprep.subr.mxu0 %v3403_v9  ;;  %3014 = vmatprep.subr.mxu1 %v3403_v9  ;;  %v1624_v51 = vld [vmem:[%s3583_s30 + $0xa0] sm:$0xff] }
  0x4d   : > { %2947 = vmatpush3.msra.mxu0 %v3403_v9  ;;  %3015 = vmatpush3.msra.mxu1 %v3403_v9  ;;  %v833_v9 = vld [vmem:[%s3396_s15 + $0xf8] sm:$0xff]  ;;  %s4024_s15 = scalar_lea.vmem (%p3300_p4), %s4162_s6, %s2621_s12  }
  0x4e   : > { %2843 = vmatmul.mubr.msk.f32.gmra.mxu0 %vm448_vm0, %v431_v52  ;;  %2911 = vmatmul.mubr.msk.f32.gmra.mxu1 %vm448_vm0, %v823_v53  ;;  %v1240_v52 = vld [vmem:[%s3577_s20 + $0xa8] sm:$0xff] }
  0x4f   : > { %2845 = vmatprep.mubr.msk.f32.mxu0 %vm448_vm0, %v432_v54  ;;  %2913 = vmatprep.mubr.msk.f32.mxu1 %vm448_vm0, %v824_v55  ;;  %v1625_v53 = vld [vmem:[%s3583_s30 + $0xa8] sm:$0xff]  ;;  %v1241_v54 = vld [vmem:[%s3577_s20 + $0xb0] sm:$0xff] }
  0x50   : > { %v1626_v55 = vld [vmem:[%s3583_s30 + $0xb0] sm:$0xff] }
  0x52   : > { %2846 = vmatmul.mubr.msk.f32.gmra.mxu0 %vm448_vm0, %v433_v56  ;;  %2914 = vmatmul.mubr.msk.f32.gmra.mxu1 %vm448_vm0, %v825_v57  ;;  %v1242_v56 = vld [vmem:[%s3577_s20 + $0xb8] sm:$0xff] }
  0x53   : > { %2848 = vmatprep.mubr.msk.f32.mxu0 %vm448_vm0, %v434_v58  ;;  %2916 = vmatprep.mubr.msk.f32.mxu1 %vm448_vm0, %v826_v59  ;;  %v1627_v57 = vld [vmem:[%s3583_s30 + $0xb8] sm:$0xff]  ;;  %v1243_v58 = vld [vmem:[%s3577_s20 + $0xc0] sm:$0xff] }
  0x54   : > { %v1628_v59 = vld [vmem:[%s3583_s30 + $0xc0] sm:$0xff] }
  0x56   : > { %2849 = vmatmul.mubr.msk.f32.gmra.mxu0 %vm448_vm0, %v435_v60  ;;  %2917 = vmatmul.mubr.msk.f32.gmra.mxu1 %vm448_vm0, %v827_v61  ;;  %v1244_v60 = vld [vmem:[%s3577_s20 + $0xc8] sm:$0xff] }
  0x57   : > { %2851 = vmatprep.mubr.msk.f32.mxu0 %vm448_vm0, %v436_v62  ;;  %2919 = vmatprep.mubr.msk.f32.mxu1 %vm448_vm0, %v828_v63  ;;  %v1629_v61 = vld [vmem:[%s3583_s30 + $0xc8] sm:$0xff]  ;;  %v1245_v62 = vld [vmem:[%s3577_s20 + $0xd0] sm:$0xff] }
  0x58   : > { %v1630_v63 = vld [vmem:[%s3583_s30 + $0xd0] sm:$0xff] }
  0x5a   : > { %2852 = vmatmul.mubr.msk.f32.gmra.mxu0 %vm448_vm0, %v437_v0  ;;  %2920 = vmatmul.mubr.msk.f32.gmra.mxu1 %vm448_vm0, %v829_v1  ;;  %v1246_v0 = vld [vmem:[%s3577_s20 + $0xd8] sm:$0xff] }
  0x5b   : > { %2854 = vmatprep.mubr.msk.f32.mxu0 %vm448_vm0, %v438_v2  ;;  %2922 = vmatprep.mubr.msk.f32.mxu1 %vm448_vm0, %v830_v3  ;;  %v1631_v1 = vld [vmem:[%s3583_s30 + $0xd8] sm:$0xff]  ;;  %v1247_v2 = vld [vmem:[%s3577_s20 + $0xe0] sm:$0xff] }
  0x5c   : > { %v1632_v3 = vld [vmem:[%s3583_s30 + $0xe0] sm:$0xff] }
  0x5e   : > { %2855 = vmatmul.mubr.msk.f32.gmra.mxu0 %vm448_vm0, %v439_v4  ;;  %2923 = vmatmul.mubr.msk.f32.gmra.mxu1 %vm448_vm0, %v831_v5  ;;  %v1248_v4 = vld [vmem:[%s3577_s20 + $0xe8] sm:$0xff] }
  0x5f   : > { %2857 = vmatprep.mubr.msk.f32.mxu0 %vm448_vm0, %v440_v6  ;;  %2925 = vmatprep.mubr.msk.f32.mxu1 %vm448_vm0, %v832_v7  ;;  %v1633_v5 = vld [vmem:[%s3583_s30 + $0xe8] sm:$0xff]  ;;  %v1249_v6 = vld [vmem:[%s3577_s20 + $0xf0] sm:$0xff] }
  0x60   : > { %v1634_v7 = vld [vmem:[%s3583_s30 + $0xf0] sm:$0xff] }
  0x62   : > { %2858 = vmatmul.mubr.msk.f32.gmra.mxu0 %vm448_vm0, %v441_v8  ;;  %2926 = vmatmul.mubr.msk.f32.gmra.mxu1 %vm448_vm0, %v833_v9  ;;  %v1250_v8 = vld [vmem:[%s3577_s20 + $0xf8] sm:$0xff] }
  0x63   : > { %2948 = vmatprep.mubr.msk.f32.mxu0 %vm448_vm0, %v1219_v10  ;;  %3016 = vmatprep.mubr.msk.f32.mxu1 %vm448_vm0, %v1604_v11  ;;  %v1635_v9 = vld [vmem:[%s3583_s30 + $0xf8] sm:$0xff]  ;;  %v3724_v10 = vld [vmem:[%s4161_s5] ss:$0 sm:$0xff] }
  0x66   : > { %2949 = vmatmul.mubr.msk.f32.vlgmr.msra.gmra.mxu0 %vm448_vm0, %v1220_v12  ;;  %3017 = vmatmul.mubr.msk.f32.vlgmr.msra.gmra.mxu1 %vm448_vm0, %v1605_v13 }
  0x67   : > { %2951 = vmatprep.mubr.msk.f32.mxu0 %vm448_vm0, %v1221_v14  ;;  %3019 = vmatprep.mubr.msk.f32.mxu1 %vm448_vm0, %v1606_v15 }
  0x6a   : > { %2952 = vmatmul.mubr.msk.f32.gmra.mxu0 %vm448_vm0, %v1222_v16  ;;  %3020 = vmatmul.mubr.msk.f32.gmra.mxu1 %vm448_vm0, %v1607_v17 }
  0x6b   : > { %2954 = vmatprep.mubr.msk.f32.mxu0 %vm448_vm0, %v1223_v18  ;;  %3022 = vmatprep.mubr.msk.f32.mxu1 %vm448_vm0, %v1608_v19 }
  0x6e   : > { %2955 = vmatmul.mubr.msk.f32.gmra.mxu0 %vm448_vm0, %v1224_v20  ;;  %3023 = vmatmul.mubr.msk.f32.gmra.mxu1 %vm448_vm0, %v1609_v21 }
  0x6f   : > { %2957 = vmatprep.mubr.msk.f32.mxu0 %vm448_vm0, %v1225_v22  ;;  %3025 = vmatprep.mubr.msk.f32.mxu1 %vm448_vm0, %v1610_v23 }
  0x72   : > { %2958 = vmatmul.mubr.msk.f32.gmra.mxu0 %vm448_vm0, %v1226_v24  ;;  %3026 = vmatmul.mubr.msk.f32.gmra.mxu1 %vm448_vm0, %v1611_v25 }
  0x73   : > { %2960 = vmatprep.mubr.msk.f32.mxu0 %vm448_vm0, %v1227_v26  ;;  %3028 = vmatprep.mubr.msk.f32.mxu1 %vm448_vm0, %v1612_v27 }
  0x76   : > { %2961 = vmatmul.mubr.msk.f32.gmra.mxu0 %vm448_vm0, %v1228_v28  ;;  %3029 = vmatmul.mubr.msk.f32.gmra.mxu1 %vm448_vm0, %v1613_v29 }
  0x77   : > { %2963 = vmatprep.mubr.msk.f32.mxu0 %vm448_vm0, %v1229_v30  ;;  %3031 = vmatprep.mubr.msk.f32.mxu1 %vm448_vm0, %v1614_v31 }
  0x7a   : > { %2964 = vmatmul.mubr.msk.f32.gmra.mxu0 %vm448_vm0, %v1230_v32  ;;  %3032 = vmatmul.mubr.msk.f32.gmra.mxu1 %vm448_vm0, %v1615_v33 }
  0x7b   : > { %2966 = vmatprep.mubr.msk.f32.mxu0 %vm448_vm0, %v1231_v34  ;;  %3034 = vmatprep.mubr.msk.f32.mxu1 %vm448_vm0, %v1616_v35 }
  0x7e   : > { %2967 = vmatmul.mubr.msk.f32.gmra.mxu0 %vm448_vm0, %v1232_v36  ;;  %3035 = vmatmul.mubr.msk.f32.gmra.mxu1 %vm448_vm0, %v1617_v37 }
  0x7f   : > { %2969 = vmatprep.mubr.msk.f32.mxu0 %vm448_vm0, %v1233_v38  ;;  %3037 = vmatprep.mubr.msk.f32.mxu1 %vm448_vm0, %v1618_v39 }
  0x82   : > { %2970 = vmatmul.mubr.msk.f32.gmra.mxu0 %vm448_vm0, %v1234_v40  ;;  %3038 = vmatmul.mubr.msk.f32.gmra.mxu1 %vm448_vm0, %v1619_v41 }
  0x83   : > { %2972 = vmatprep.mubr.msk.f32.mxu0 %vm448_vm0, %v1235_v42  ;;  %3040 = vmatprep.mubr.msk.f32.mxu1 %vm448_vm0, %v1620_v43 }
  0x86   : > { %2973 = vmatmul.mubr.msk.f32.gmra.mxu0 %vm448_vm0, %v1236_v44  ;;  %3041 = vmatmul.mubr.msk.f32.gmra.mxu1 %vm448_vm0, %v1621_v45 }
  0x87   : > { %2975 = vmatprep.mubr.msk.f32.mxu0 %vm448_vm0, %v1237_v46  ;;  %3043 = vmatprep.mubr.msk.f32.mxu1 %vm448_vm0, %v1622_v47 }
  0x8a   : > { %2976 = vmatmul.mubr.msk.f32.gmra.mxu0 %vm448_vm0, %v1238_v48  ;;  %3044 = vmatmul.mubr.msk.f32.gmra.mxu1 %vm448_vm0, %v1623_v49 }
  0x8b   : > { %2978 = vmatprep.mubr.msk.f32.mxu0 %vm448_vm0, %v1239_v50  ;;  %3046 = vmatprep.mubr.msk.f32.mxu1 %vm448_vm0, %v1624_v51 }
  0x8e   : > { %2979 = vmatmul.mubr.msk.f32.gmra.mxu0 %vm448_vm0, %v1240_v52  ;;  %3047 = vmatmul.mubr.msk.f32.gmra.mxu1 %vm448_vm0, %v1625_v53 }
  0x8f   : > { %2981 = vmatprep.mubr.msk.f32.mxu0 %vm448_vm0, %v1241_v54  ;;  %3049 = vmatprep.mubr.msk.f32.mxu1 %vm448_vm0, %v1626_v55 }
  0x92   : > { %2982 = vmatmul.mubr.msk.f32.gmra.mxu0 %vm448_vm0, %v1242_v56  ;;  %3050 = vmatmul.mubr.msk.f32.gmra.mxu1 %vm448_vm0, %v1627_v57 }
  0x93   : > { %2984 = vmatprep.mubr.msk.f32.mxu0 %vm448_vm0, %v1243_v58  ;;  %3052 = vmatprep.mubr.msk.f32.mxu1 %vm448_vm0, %v1628_v59 }
  0x96   : > { %2985 = vmatmul.mubr.msk.f32.gmra.mxu0 %vm448_vm0, %v1244_v60  ;;  %3053 = vmatmul.mubr.msk.f32.gmra.mxu1 %vm448_vm0, %v1629_v61 }
  0x97   : > { %2987 = vmatprep.mubr.msk.f32.mxu0 %vm448_vm0, %v1245_v62  ;;  %3055 = vmatprep.mubr.msk.f32.mxu1 %vm448_vm0, %v1630_v63 }
  0x9a   : > { %2988 = vmatmul.mubr.msk.f32.gmra.mxu0 %vm448_vm0, %v1246_v0  ;;  %3056 = vmatmul.mubr.msk.f32.gmra.mxu1 %vm448_vm0, %v1631_v1 }
  0x9b   : > { %2990 = vmatprep.mubr.msk.f32.mxu0 %vm448_vm0, %v1247_v2  ;;  %3058 = vmatprep.mubr.msk.f32.mxu1 %vm448_vm0, %v1632_v3 }
  0x9e   : > { %2991 = vmatmul.mubr.msk.f32.gmra.mxu0 %vm448_vm0, %v1248_v4  ;;  %3059 = vmatmul.mubr.msk.f32.gmra.mxu1 %vm448_vm0, %v1633_v5 }
  0x9f   : > { %2993 = vmatprep.mubr.msk.f32.mxu0 %vm448_vm0, %v1249_v6  ;;  %3061 = vmatprep.mubr.msk.f32.mxu1 %vm448_vm0, %v1634_v7 }
  0xa2   : > { %2994 = vmatmul.mubr.msk.f32.gmra.mxu0 %vm448_vm0, %v1250_v8  ;;  %3062 = vmatmul.mubr.msk.f32.gmra.mxu1 %vm448_vm0, %v1635_v9 }
  0xe6   : > { %v2814_v11 = vpop.f32.mrf.mxu0  ;;  %v2882_v12 = vpop.f32.mrf.mxu1 }
  0xe7   : > { %v617_v13 = vadd.f32 %v2814_v11, %v3724_v10  ;;  %v1002_v14 = vadd.f32 %v2882_v12, %v3724_v10 }
  0xe8   : > { %v611_v15 = vpop.f32.mrf.mxu0  ;;  %v996_v16 = vpop.f32.mrf.mxu1 }
  0xe9   : > { %v771_v17 = vmax.f32 %v617_v13, 0.0  ;;  %v1156_v18 = vmax.f32 %v1002_v14, 0.0  ;;  %v612_v19 = vadd.f32 %v3724_v10, %v611_v15  ;;  %v997_v20 = vadd.f32 %v3724_v10, %v996_v16 }
  0xea   : > { %v2817_v21 = vpop.f32.mrf.mxu0  ;;  %v2885_v22 = vpop.f32.mrf.mxu1 }
  0xeb   : > { %v3730_v23 = vmax.f32 %v771_v17, %v1156_v18  ;;  %v770_v24 = vmax.f32 %v612_v19, 0.0  ;;  %v1155_v25 = vmax.f32 %v997_v20, 0.0  ;;  %v627_v26 = vadd.f32 %v2817_v21, %v3724_v10 }
  0xec   : > { %v1012_v27 = vadd.f32 %v2885_v22, %v3724_v10  ;;  %v621_v28 = vpop.f32.mrf.mxu0  ;;  %v1006_v29 = vpop.f32.mrf.mxu1 }
  0xed   : > { %v3734_v30 = vmax.f32 %v770_v24, %v1155_v25  ;;  %v773_v31 = vmax.f32 %v627_v26, 0.0  ;;  %v622_v32 = vadd.f32 %v3724_v10, %v621_v28  ;;  %v1007_v33 = vadd.f32 %v3724_v10, %v1006_v29 }
  0xee   : > { %v1158_v34 = vmax.f32 %v1012_v27, 0.0  ;;  %v2820_v35 = vpop.f32.mrf.mxu0  ;;  %v2888_v36 = vpop.f32.mrf.mxu1 }
  0xef   : > { %v772_v37 = vmax.f32 %v622_v32, 0.0  ;;  %v1157_v38 = vmax.f32 %v1007_v33, 0.0  ;;  %v637_v39 = vadd.f32 %v2820_v35, %v3724_v10  ;;  %v1022_v40 = vadd.f32 %v2888_v36, %v3724_v10 }
  0xf0   : > { %v3740_v41 = vmax.f32 %v773_v31, %v1158_v34  ;;  %v631_v42 = vpop.f32.mrf.mxu0  ;;  %v1016_v43 = vpop.f32.mrf.mxu1 }
  0xf1   : > { %v3742_v44 = vmax.f32 %v772_v37, %v1157_v38  ;;  %v775_v45 = vmax.f32 %v637_v39, 0.0  ;;  %v1160_v46 = vmax.f32 %v1022_v40, 0.0  ;;  %v632_v47 = vadd.f32 %v3724_v10, %v631_v42 }
  0xf2   : > { %v1017_v48 = vadd.f32 %v3724_v10, %v1016_v43  ;;  %v2823_v49 = vpop.f32.mrf.mxu0  ;;  %v2891_v50 = vpop.f32.mrf.mxu1 }
  0xf3   : > { %v3746_v51 = vmax.f32 %v775_v45, %v1160_v46  ;;  %v774_v52 = vmax.f32 %v632_v47, 0.0  ;;  %v647_v53 = vadd.f32 %v2823_v49, %v3724_v10  ;;  %v1032_v54 = vadd.f32 %v2891_v50, %v3724_v10 }
  0xf4   : > { %v1159_v55 = vmax.f32 %v1017_v48, 0.0  ;;  %v641_v56 = vpop.f32.mrf.mxu0  ;;  %v1026_v57 = vpop.f32.mrf.mxu1 }
  0xf5   : > { %v777_v58 = vmax.f32 %v647_v53, 0.0  ;;  %v1162_v59 = vmax.f32 %v1032_v54, 0.0  ;;  %v642_v60 = vadd.f32 %v3724_v10, %v641_v56  ;;  %v1027_v61 = vadd.f32 %v3724_v10, %v1026_v57 }
  0xf6   : > { %v3752_v62 = vmax.f32 %v774_v52, %v1159_v55  ;;  %v2826_v63 = vpop.f32.mrf.mxu0  ;;  %v2894_v0 = vpop.f32.mrf.mxu1 }
  0xf7   : > { %v3754_v1 = vmax.f32 %v777_v58, %v1162_v59  ;;  %v776_v2 = vmax.f32 %v642_v60, 0.0  ;;  %v1161_v3 = vmax.f32 %v1027_v61, 0.0  ;;  %v657_v4 = vadd.f32 %v2826_v63, %v3724_v10 }
  0xf8   : > { %v1042_v5 = vadd.f32 %v2894_v0, %v3724_v10  ;;  %v651_v6 = vpop.f32.mrf.mxu0  ;;  %v1036_v7 = vpop.f32.mrf.mxu1 }
  0xf9   : > { %v3758_v8 = vmax.f32 %v776_v2, %v1161_v3  ;;  %v779_v9 = vmax.f32 %v657_v4, 0.0  ;;  %v652_v11 = vadd.f32 %v3724_v10, %v651_v6  ;;  %v1037_v12 = vadd.f32 %v3724_v10, %v1036_v7 }
  0xfa   : > { %v1164_v13 = vmax.f32 %v1042_v5, 0.0  ;;  %v2829_v14 = vpop.f32.mrf.mxu0  ;;  %v2897_v15 = vpop.f32.mrf.mxu1 }
  0xfb   : > { %v778_v16 = vmax.f32 %v652_v11, 0.0  ;;  %v1163_v17 = vmax.f32 %v1037_v12, 0.0  ;;  %v667_v18 = vadd.f32 %v2829_v14, %v3724_v10  ;;  %v1052_v19 = vadd.f32 %v2897_v15, %v3724_v10 }
  0xfc   : > { %v3764_v20 = vmax.f32 %v779_v9, %v1164_v13  ;;  %v661_v21 = vpop.f32.mrf.mxu0  ;;  %v1046_v22 = vpop.f32.mrf.mxu1 }
  0xfd   : > { %v3766_v24 = vmax.f32 %v778_v16, %v1163_v17  ;;  %v781_v25 = vmax.f32 %v667_v18, 0.0  ;;  %v1166_v26 = vmax.f32 %v1052_v19, 0.0  ;;  %v662_v27 = vadd.f32 %v3724_v10, %v661_v21 }
  0xfe   : > { %v1047_v28 = vadd.f32 %v3724_v10, %v1046_v22  ;;  %v2832_v29 = vpop.f32.mrf.mxu0  ;;  %v2900_v31 = vpop.f32.mrf.mxu1 }
  0xff   : > { %v3770_v32 = vmax.f32 %v781_v25, %v1166_v26  ;;  %v780_v33 = vmax.f32 %v662_v27, 0.0  ;;  %v677_v34 = vadd.f32 %v2832_v29, %v3724_v10  ;;  %v1062_v35 = vadd.f32 %v2900_v31, %v3724_v10 }
 0x100   : > { %v1165_v36 = vmax.f32 %v1047_v28, 0.0  ;;  %v671_v37 = vpop.f32.mrf.mxu0  ;;  %v1056_v38 = vpop.f32.mrf.mxu1 }
 0x101   : > { %v783_v39 = vmax.f32 %v677_v34, 0.0  ;;  %v1168_v40 = vmax.f32 %v1062_v35, 0.0  ;;  %v672_v42 = vadd.f32 %v3724_v10, %v671_v37  ;;  %v1057_v43 = vadd.f32 %v3724_v10, %v1056_v38 }
 0x102   : > { %v3776_v45 = vmax.f32 %v780_v33, %v1165_v36  ;;  %v2835_v46 = vpop.f32.mrf.mxu0  ;;  %v2903_v47 = vpop.f32.mrf.mxu1 }
 0x103   : > { %v3778_v48 = vmax.f32 %v783_v39, %v1168_v40  ;;  %v782_v49 = vmax.f32 %v672_v42, 0.0  ;;  %v1167_v50 = vmax.f32 %v1057_v43, 0.0  ;;  %v687_v52 = vadd.f32 %v2835_v46, %v3724_v10 }
 0x104   : > { %v1072_v53 = vadd.f32 %v2903_v47, %v3724_v10  ;;  %v681_v54 = vpop.f32.mrf.mxu0  ;;  %v1066_v55 = vpop.f32.mrf.mxu1 }
 0x105   : > { %v3782_v56 = vmax.f32 %v782_v49, %v1167_v50  ;;  %v785_v57 = vmax.f32 %v687_v52, 0.0  ;;  %v682_v58 = vadd.f32 %v3724_v10, %v681_v54  ;;  %v1067_v59 = vadd.f32 %v3724_v10, %v1066_v55 }
 0x106   : > { %v1170_v60 = vmax.f32 %v1072_v53, 0.0  ;;  %v2838_v61 = vpop.f32.mrf.mxu0  ;;  %v2906_v63 = vpop.f32.mrf.mxu1 }
 0x107   : > { %v784_v0 = vmax.f32 %v682_v58, 0.0  ;;  %v1169_v2 = vmax.f32 %v1067_v59, 0.0  ;;  %v697_v3 = vadd.f32 %v2838_v61, %v3724_v10  ;;  %v1082_v4 = vadd.f32 %v2906_v63, %v3724_v10 }
 0x108   : > { %v3788_v5 = vmax.f32 %v785_v57, %v1170_v60  ;;  %v691_v6 = vpop.f32.mrf.mxu0  ;;  %v1076_v7 = vpop.f32.mrf.mxu1 }
 0x109   : > { %v3790_v9 = vmax.f32 %v784_v0, %v1169_v2  ;;  %v787_v11 = vmax.f32 %v697_v3, 0.0  ;;  %v1172_v12 = vmax.f32 %v1082_v4, 0.0  ;;  %v692_v13 = vadd.f32 %v3724_v10, %v691_v6 }
 0x10a   : > { %v1077_v14 = vadd.f32 %v3724_v10, %v1076_v7  ;;  %v2841_v15 = vpop.f32.mrf.mxu0  ;;  %v2909_v16 = vpop.f32.mrf.mxu1 }
 0x10b   : > { %v3794_v17 = vmax.f32 %v787_v11, %v1172_v12  ;;  %v786_v18 = vmax.f32 %v692_v13, 0.0  ;;  %v707_v19 = vadd.f32 %v2841_v15, %v3724_v10  ;;  %v1092_v21 = vadd.f32 %v2909_v16, %v3724_v10 }
 0x10c   : > { %v1171_v22 = vmax.f32 %v1077_v14, 0.0  ;;  %v701_v25 = vpop.f32.mrf.mxu0  ;;  %v1086_v26 = vpop.f32.mrf.mxu1 }
 0x10d   : > { %v789_v27 = vmax.f32 %v707_v19, 0.0  ;;  %v1174_v28 = vmax.f32 %v1092_v21, 0.0  ;;  %v702_v29 = vadd.f32 %v3724_v10, %v701_v25  ;;  %v1087_v31 = vadd.f32 %v3724_v10, %v1086_v26 }
 0x10e   : > { %v3800_v33 = vmax.f32 %v786_v18, %v1171_v22  ;;  %v2844_v34 = vpop.f32.mrf.mxu0  ;;  %v2912_v35 = vpop.f32.mrf.mxu1 }
 0x10f   : > { %v3802_v36 = vmax.f32 %v789_v27, %v1174_v28  ;;  %v788_v37 = vmax.f32 %v702_v29, 0.0  ;;  %v1173_v38 = vmax.f32 %v1087_v31, 0.0  ;;  %v717_v39 = vadd.f32 %v2844_v34, %v3724_v10 }
 0x110   : > { %v1102_v40 = vadd.f32 %v2912_v35, %v3724_v10  ;;  %v711_v42 = vpop.f32.mrf.mxu0  ;;  %v1096_v43 = vpop.f32.mrf.mxu1 }
 0x111   : > { %v3806_v46 = vmax.f32 %v788_v37, %v1173_v38  ;;  %v791_v47 = vmax.f32 %v717_v39, 0.0  ;;  %v712_v49 = vadd.f32 %v3724_v10, %v711_v42  ;;  %v1097_v50 = vadd.f32 %v3724_v10, %v1096_v43 }
 0x112   : > { %v1176_v52 = vmax.f32 %v1102_v40, 0.0  ;;  %v2847_v53 = vpop.f32.mrf.mxu0  ;;  %v2915_v54 = vpop.f32.mrf.mxu1 }
 0x113   : > { %v790_v55 = vmax.f32 %v712_v49, 0.0  ;;  %v1175_v57 = vmax.f32 %v1097_v50, 0.0  ;;  %v727_v58 = vadd.f32 %v2847_v53, %v3724_v10  ;;  %v1112_v59 = vadd.f32 %v2915_v54, %v3724_v10 }
 0x114   : > { %v3812_v60 = vmax.f32 %v791_v47, %v1176_v52  ;;  %v721_v61 = vpop.f32.mrf.mxu0  ;;  %v1106_v63 = vpop.f32.mrf.mxu1 }
 0x115   : > { %v3814_v0 = vmax.f32 %v790_v55, %v1175_v57  ;;  %v793_v2 = vmax.f32 %v727_v58, 0.0  ;;  %v1178_v3 = vmax.f32 %v1112_v59, 0.0  ;;  %v722_v4 = vadd.f32 %v3724_v10, %v721_v61 }
 0x116   : > { %v1107_v6 = vadd.f32 %v3724_v10, %v1106_v63  ;;  %v2850_v7 = vpop.f32.mrf.mxu0  ;;  %v2918_v11 = vpop.f32.mrf.mxu1 }
 0x117   : > { %v3818_v12 = vmax.f32 %v793_v2, %v1178_v3  ;;  %v792_v13 = vmax.f32 %v722_v4, 0.0  ;;  %v737_v14 = vadd.f32 %v2850_v7, %v3724_v10  ;;  %v1122_v15 = vadd.f32 %v2918_v11, %v3724_v10 }
 0x118   : > { %v1177_v16 = vmax.f32 %v1107_v6, 0.0  ;;  %v731_v18 = vpop.f32.mrf.mxu0  ;;  %v1116_v19 = vpop.f32.mrf.mxu1 }
 0x119   : > { %v795_v21 = vmax.f32 %v737_v14, 0.0  ;;  %v1180_v22 = vmax.f32 %v1122_v15, 0.0  ;;  %v732_v25 = vadd.f32 %v3724_v10, %v731_v18  ;;  %v1117_v26 = vadd.f32 %v3724_v10, %v1116_v19 }
 0x11a   : > { %v3824_v27 = vmax.f32 %v792_v13, %v1177_v16  ;;  %v2853_v28 = vpop.f32.mrf.mxu0  ;;  %v2921_v29 = vpop.f32.mrf.mxu1 }
 0x11b   : > { %v3826_v31 = vmax.f32 %v795_v21, %v1180_v22  ;;  %v794_v34 = vmax.f32 %v732_v25, 0.0  ;;  %v1179_v35 = vmax.f32 %v1117_v26, 0.0  ;;  %v747_v37 = vadd.f32 %v2853_v28, %v3724_v10 }
 0x11c   : > { %v1132_v38 = vadd.f32 %v2921_v29, %v3724_v10  ;;  %v741_v39 = vpop.f32.mrf.mxu0  ;;  %v1126_v40 = vpop.f32.mrf.mxu1 }
 0x11d   : > { %v3830_v42 = vmax.f32 %v794_v34, %v1179_v35  ;;  %v797_v43 = vmax.f32 %v747_v37, 0.0  ;;  %v742_v47 = vadd.f32 %v3724_v10, %v741_v39  ;;  %v1127_v49 = vadd.f32 %v3724_v10, %v1126_v40 }
 0x11e   : > { %v1182_v50 = vmax.f32 %v1132_v38, 0.0  ;;  %v2856_v52 = vpop.f32.mrf.mxu0  ;;  %v2924_v53 = vpop.f32.mrf.mxu1 }
 0x11f   : > { %v796_v54 = vmax.f32 %v742_v47, 0.0  ;;  %v1181_v55 = vmax.f32 %v1127_v49, 0.0  ;;  %v757_v57 = vadd.f32 %v2856_v52, %v3724_v10  ;;  %v1142_v58 = vadd.f32 %v2924_v53, %v3724_v10 }
 0x120   : > { %v3836_v59 = vmax.f32 %v797_v43, %v1182_v50  ;;  %v751_v61 = vpop.f32.mrf.mxu0  ;;  %v1136_v63 = vpop.f32.mrf.mxu1 }
 0x121   : > { %v3838_v2 = vmax.f32 %v796_v54, %v1181_v55  ;;  %v799_v3 = vmax.f32 %v757_v57, 0.0  ;;  %v1184_v4 = vmax.f32 %v1142_v58, 0.0  ;;  %v752_v6 = vadd.f32 %v3724_v10, %v751_v61 }
 0x122   : > { %v1137_v7 = vadd.f32 %v3724_v10, %v1136_v63  ;;  %v2859_v11 = vpop.f32.mrf.mxu0  ;;  %v2927_v13 = vpop.f32.mrf.mxu1 }
 0x123   : > { %v3842_v14 = vmax.f32 %v799_v3, %v1184_v4  ;;  %v798_v15 = vmax.f32 %v752_v6, 0.0  ;;  %v767_v16 = vadd.f32 %v2859_v11, %v3724_v10  ;;  %v1152_v18 = vadd.f32 %v2927_v13, %v3724_v10 }
 0x124   : > { %v1183_v19 = vmax.f32 %v1137_v7, 0.0  ;;  %v761_v21 = vpop.f32.mrf.mxu0  ;;  %v1146_v22 = vpop.f32.mrf.mxu1 }
 0x125   : > { %v801_v25 = vmax.f32 %v767_v16, 0.0  ;;  %v1186_v26 = vmax.f32 %v1152_v18, 0.0  ;;  %v762_v28 = vadd.f32 %v3724_v10, %v761_v21  ;;  %v1147_v29 = vadd.f32 %v3724_v10, %v1146_v22 }
 0x126   : > { %v3848_v34 = vmax.f32 %v798_v15, %v1183_v19  ;;  %v2950_v35 = vpop.f32.mrf.mxu0  ;;  %v3018_v37 = vpop.f32.mrf.mxu1 }
 0x127   : > { %v3850_v38 = vmax.f32 %v801_v25, %v1186_v26  ;;  %v800_v39 = vmax.f32 %v762_v28, 0.0  ;;  %v1185_v40 = vmax.f32 %v1147_v29, 0.0  ;;  %v1419_v43 = vadd.f32 %v2950_v35, %v3724_v10 }
 0x128   : > { %v1804_v47 = vadd.f32 %v3018_v37, %v3724_v10  ;;  %v1413_v49 = vpop.f32.mrf.mxu0  ;;  %v1798_v50 = vpop.f32.mrf.mxu1 }
 0x129   : > { %v3855_v52 = vmax.f32 %v800_v39, %v1185_v40  ;;  %v1573_v53 = vmax.f32 %v1419_v43, 0.0  ;;  %v1414_v54 = vadd.f32 %v3724_v10, %v1413_v49  ;;  %v1799_v55 = vadd.f32 %v3724_v10, %v1798_v50 }
 0x12a   : > { %v1958_v57 = vmax.f32 %v1804_v47, 0.0  ;;  %v2953_v58 = vpop.f32.mrf.mxu0  ;;  %v3021_v61 = vpop.f32.mrf.mxu1 }
 0x12b   : > { %v1572_v63 = vmax.f32 %v1414_v54, 0.0  ;;  %v1957_v3 = vmax.f32 %v1799_v55, 0.0  ;;  %v1429_v4 = vadd.f32 %v2953_v58, %v3724_v10  ;;  %v1814_v6 = vadd.f32 %v3021_v61, %v3724_v10 }
 0x12c   : > { %v1990_v7 = vmax.f32 %v1573_v53, %v1958_v57  ;;  %v1423_v11 = vpop.f32.mrf.mxu0  ;;  %v1808_v13 = vpop.f32.mrf.mxu1 }
 0x12d   : > { %v1989_v15 = vmax.f32 %v1572_v63, %v1957_v3  ;;  %v1575_v16 = vmax.f32 %v1429_v4, 0.0  ;;  %v1960_v18 = vmax.f32 %v1814_v6, 0.0  ;;  %v1424_v19 = vadd.f32 %v3724_v10, %v1423_v11 }
 0x12e   : > { %v2022_v21 = vmax.f32 %v3730_v23, %v1990_v7  ;;  %v1809_v22 = vadd.f32 %v3724_v10, %v1808_v13  ;;  %v2956_v25 = vpop.f32.mrf.mxu0  ;;  %v3024_v26 = vpop.f32.mrf.mxu1 }
 0x12f   : > { %v2021_v28 = vmax.f32 %v3734_v30, %v1989_v15  ;;  %v1992_v29 = vmax.f32 %v1575_v16, %v1960_v18  ;;  %v1574_v35 = vmax.f32 %v1424_v19, 0.0  ;;  %v1439_v37 = vadd.f32 %v2956_v25, %v3724_v10 }
 0x130   : > { %2055 = vst.msk [vmem:[%s3866_s21 + $0x8] sm:$0xff] %vm2053_vm1, %v2022_v21  ;;  %v1959_v39 = vmax.f32 %v1809_v22, 0.0  ;;  %v1824_v23 = vadd.f32 %v3024_v26, %v3724_v10  ;;  %v1433_v40 = vpop.f32.mrf.mxu0  ;;  %v1818_v43 = vpop.f32.mrf.mxu1 }
 0x131   : > { %2054 = vst.msk [vmem:[%s3866_s21] sm:$0xff] %vm2053_vm1, %v2021_v28  ;;  %v2024_v30 = vmax.f32 %v3740_v41, %v1992_v29  ;;  %v1577_v47 = vmax.f32 %v1439_v37, 0.0  ;;  %v1434_v49 = vadd.f32 %v3724_v10, %v1433_v40  ;;  %v1819_v50 = vadd.f32 %v3724_v10, %v1818_v43 }
 0x132   : > { %v1991_v53 = vmax.f32 %v1574_v35, %v1959_v39  ;;  %v1962_v54 = vmax.f32 %v1824_v23, 0.0  ;;  %v2959_v55 = vpop.f32.mrf.mxu0  ;;  %v3027_v57 = vpop.f32.mrf.mxu1 }
 0x133   : > { %2057 = vst.msk [vmem:[%s3866_s21 + $0x18] sm:$0xff] %vm2053_vm1, %v2024_v30  ;;  %v1576_v58 = vmax.f32 %v1434_v49, 0.0  ;;  %v1961_v61 = vmax.f32 %v1819_v50, 0.0  ;;  %v1449_v63 = vadd.f32 %v2959_v55, %v3724_v10  ;;  %v1834_v3 = vadd.f32 %v3027_v57, %v3724_v10 }
 0x134   : > { %v2023_v41 = vmax.f32 %v3742_v44, %v1991_v53  ;;  %v1994_v4 = vmax.f32 %v1577_v47, %v1962_v54  ;;  %v1443_v6 = vpop.f32.mrf.mxu0  ;;  %v1828_v7 = vpop.f32.mrf.mxu1 }
 0x135   : > { %v1993_v11 = vmax.f32 %v1576_v58, %v1961_v61  ;;  %v1579_v13 = vmax.f32 %v1449_v63, 0.0  ;;  %v1964_v15 = vmax.f32 %v1834_v3, 0.0  ;;  %v1444_v16 = vadd.f32 %v3724_v10, %v1443_v6 }
 0x136   : > { %2056 = vst.msk [vmem:[%s3866_s21 + $0x10] sm:$0xff] %vm2053_vm1, %v2023_v41  ;;  %v2026_v18 = vmax.f32 %v3746_v51, %v1994_v4  ;;  %v1829_v19 = vadd.f32 %v3724_v10, %v1828_v7  ;;  %v2962_v21 = vpop.f32.mrf.mxu0  ;;  %v3030_v22 = vpop.f32.mrf.mxu1 }
 0x137   : > { %v2025_v44 = vmax.f32 %v3752_v62, %v1993_v11  ;;  %v1996_v25 = vmax.f32 %v1579_v13, %v1964_v15  ;;  %v1578_v26 = vmax.f32 %v1444_v16, 0.0  ;;  %v1459_v28 = vadd.f32 %v2962_v21, %v3724_v10 }
 0x138   : > { %2059 = vst.msk [vmem:[%s3866_s21 + $0x28] sm:$0xff] %vm2053_vm1, %v2026_v18  ;;  %v1963_v29 = vmax.f32 %v1829_v19, 0.0  ;;  %v1844_v35 = vadd.f32 %v3030_v22, %v3724_v10  ;;  %v1453_v37 = vpop.f32.mrf.mxu0  ;;  %v1838_v39 = vpop.f32.mrf.mxu1 }
 0x139   : > { %2058 = vst.msk [vmem:[%s3866_s21 + $0x20] sm:$0xff] %vm2053_vm1, %v2025_v44  ;;  %v2028_v51 = vmax.f32 %v3754_v1, %v1996_v25  ;;  %v1581_v23 = vmax.f32 %v1459_v28, 0.0  ;;  %v1454_v40 = vadd.f32 %v3724_v10, %v1453_v37  ;;  %v1839_v62 = vadd.f32 %v3724_v10, %v1838_v39 }
 0x13a   : > { %v1995_v43 = vmax.f32 %v1578_v26, %v1963_v29  ;;  %v1966_v30 = vmax.f32 %v1844_v35, 0.0  ;;  %v2965_v47 = vpop.f32.mrf.mxu0  ;;  %v3033_v49 = vpop.f32.mrf.mxu1 }
 0x13b   : > { %2061 = vst.msk [vmem:[%s3866_s21 + $0x38] sm:$0xff] %vm2053_vm1, %v2028_v51  ;;  %v1580_v50 = vmax.f32 %v1454_v40, 0.0  ;;  %v1965_v53 = vmax.f32 %v1839_v62, 0.0  ;;  %v1469_v54 = vadd.f32 %v2965_v47, %v3724_v10  ;;  %v1854_v55 = vadd.f32 %v3033_v49, %v3724_v10 }
 0x13c   : > { %v2027_v1 = vmax.f32 %v3758_v8, %v1995_v43  ;;  %v1998_v57 = vmax.f32 %v1581_v23, %v1966_v30  ;;  %v1463_v58 = vpop.f32.mrf.mxu0  ;;  %v1848_v61 = vpop.f32.mrf.mxu1 }
 0x13d   : > { %v1997_v63 = vmax.f32 %v1580_v50, %v1965_v53  ;;  %v1583_v3 = vmax.f32 %v1469_v54, 0.0  ;;  %v1968_v41 = vmax.f32 %v1854_v55, 0.0  ;;  %v1464_v4 = vadd.f32 %v3724_v10, %v1463_v58 }
 0x13e   : > { %2060 = vst.msk [vmem:[%s3866_s21 + $0x30] sm:$0xff] %vm2053_vm1, %v2027_v1  ;;  %v2030_v6 = vmax.f32 %v3764_v20, %v1998_v57  ;;  %v1849_v7 = vadd.f32 %v3724_v10, %v1848_v61  ;;  %v2968_v11 = vpop.f32.mrf.mxu0  ;;  %v3036_v13 = vpop.f32.mrf.mxu1 }
 0x13f   : > { %v2029_v8 = vmax.f32 %v3766_v24, %v1997_v63  ;;  %v2000_v15 = vmax.f32 %v1583_v3, %v1968_v41  ;;  %v1582_v16 = vmax.f32 %v1464_v4, 0.0  ;;  %v1479_v18 = vadd.f32 %v2968_v11, %v3724_v10 }
 0x140   : > { %2063 = vst.msk [vmem:[%s3866_s21 + $0x48] sm:$0xff] %vm2053_vm1, %v2030_v6  ;;  %v1967_v19 = vmax.f32 %v1849_v7, 0.0  ;;  %v1864_v21 = vadd.f32 %v3036_v13, %v3724_v10  ;;  %v1473_v22 = vpop.f32.mrf.mxu0  ;;  %v1858_v44 = vpop.f32.mrf.mxu1 }
 0x141   : > { %2062 = vst.msk [vmem:[%s3866_s21 + $0x40] sm:$0xff] %vm2053_vm1, %v2029_v8  ;;  %v2032_v20 = vmax.f32 %v3770_v32, %v2000_v15  ;;  %v1585_v25 = vmax.f32 %v1479_v18, 0.0  ;;  %v1474_v26 = vadd.f32 %v3724_v10, %v1473_v22  ;;  %v1859_v24 = vadd.f32 %v3724_v10, %v1858_v44 }
 0x142   : > { %v1999_v28 = vmax.f32 %v1582_v16, %v1967_v19  ;;  %v1970_v29 = vmax.f32 %v1864_v21, 0.0  ;;  %v2971_v35 = vpop.f32.mrf.mxu0  ;;  %v3039_v37 = vpop.f32.mrf.mxu1 }
 0x143   : > { %2065 = vst.msk [vmem:[%s3866_s21 + $0x58] sm:$0xff] %vm2053_vm1, %v2032_v20  ;;  %v1584_v39 = vmax.f32 %v1474_v26, 0.0  ;;  %v1969_v51 = vmax.f32 %v1859_v24, 0.0  ;;  %v1489_v23 = vadd.f32 %v2971_v35, %v3724_v10  ;;  %v1874_v40 = vadd.f32 %v3039_v37, %v3724_v10 }
 0x144   : > { %v2031_v32 = vmax.f32 %v3776_v45, %v1999_v28  ;;  %v2002_v62 = vmax.f32 %v1585_v25, %v1970_v29  ;;  %v1483_v43 = vpop.f32.mrf.mxu0  ;;  %v1868_v30 = vpop.f32.mrf.mxu1 }
 0x145   : > { %v2001_v47 = vmax.f32 %v1584_v39, %v1969_v51  ;;  %v1587_v49 = vmax.f32 %v1489_v23, 0.0  ;;  %v1972_v50 = vmax.f32 %v1874_v40, 0.0  ;;  %v1484_v53 = vadd.f32 %v3724_v10, %v1483_v43 }
 0x146   : > { %2064 = vst.msk [vmem:[%s3866_s21 + $0x50] sm:$0xff] %vm2053_vm1, %v2031_v32  ;;  %v2034_v54 = vmax.f32 %v3778_v48, %v2002_v62  ;;  %v1869_v55 = vadd.f32 %v3724_v10, %v1868_v30  ;;  %v2974_v1 = vpop.f32.mrf.mxu0  ;;  %v3042_v57 = vpop.f32.mrf.mxu1 }
 0x147   : > { %v2033_v45 = vmax.f32 %v3782_v56, %v2001_v47  ;;  %v2004_v58 = vmax.f32 %v1587_v49, %v1972_v50  ;;  %v1586_v61 = vmax.f32 %v1484_v53, 0.0  ;;  %v1499_v63 = vadd.f32 %v2974_v1, %v3724_v10 }
 0x148   : > { %2067 = vst.msk [vmem:[%s3866_s21 + $0x68] sm:$0xff] %vm2053_vm1, %v2034_v54  ;;  %v1971_v3 = vmax.f32 %v1869_v55, 0.0  ;;  %v1884_v41 = vadd.f32 %v3042_v57, %v3724_v10  ;;  %v1493_v4 = vpop.f32.mrf.mxu0  ;;  %v1878_v6 = vpop.f32.mrf.mxu1 }
 0x149   : > { %2066 = vst.msk [vmem:[%s3866_s21 + $0x60] sm:$0xff] %vm2053_vm1, %v2033_v45  ;;  %v2036_v48 = vmax.f32 %v3788_v5, %v2004_v58  ;;  %v1589_v7 = vmax.f32 %v1499_v63, 0.0  ;;  %v1494_v11 = vadd.f32 %v3724_v10, %v1493_v4  ;;  %v1879_v56 = vadd.f32 %v3724_v10, %v1878_v6 }
 0x14a   : > { %v2003_v13 = vmax.f32 %v1586_v61, %v1971_v3  ;;  %v1974_v8 = vmax.f32 %v1884_v41, 0.0  ;;  %v2977_v15 = vpop.f32.mrf.mxu0  ;;  %v3045_v16 = vpop.f32.mrf.mxu1 }
 0x14b   : > { %2069 = vst.msk [vmem:[%s3866_s21 + $0x78] sm:$0xff] %vm2053_vm1, %v2036_v48  ;;  %v1588_v18 = vmax.f32 %v1494_v11, 0.0  ;;  %v1973_v19 = vmax.f32 %v1879_v56, 0.0  ;;  %v1509_v21 = vadd.f32 %v2977_v15, %v3724_v10  ;;  %v1894_v22 = vadd.f32 %v3045_v16, %v3724_v10 }
 0x14c   : > { %v2035_v5 = vmax.f32 %v3790_v9, %v2003_v13  ;;  %v2006_v44 = vmax.f32 %v1589_v7, %v1974_v8  ;;  %v1503_v20 = vpop.f32.mrf.mxu0  ;;  %v1888_v25 = vpop.f32.mrf.mxu1 }
 0x14d   : > { %v2005_v26 = vmax.f32 %v1588_v18, %v1973_v19  ;;  %v1591_v24 = vmax.f32 %v1509_v21, 0.0  ;;  %v1976_v28 = vmax.f32 %v1894_v22, 0.0  ;;  %v1504_v29 = vadd.f32 %v3724_v10, %v1503_v20 }
 0x14e   : > { %2068 = vst.msk [vmem:[%s3866_s21 + $0x70] sm:$0xff] %vm2053_vm1, %v2035_v5  ;;  %v2038_v35 = vmax.f32 %v3794_v17, %v2006_v44  ;;  %v1889_v37 = vadd.f32 %v3724_v10, %v1888_v25  ;;  %v2980_v39 = vpop.f32.mrf.mxu0  ;;  %v3048_v51 = vpop.f32.mrf.mxu1 }
 0x14f   : > { %v2037_v9 = vmax.f32 %v3800_v33, %v2005_v26  ;;  %v2008_v23 = vmax.f32 %v1591_v24, %v1976_v28  ;;  %v1590_v40 = vmax.f32 %v1504_v29, 0.0  ;;  %v1519_v32 = vadd.f32 %v2980_v39, %v3724_v10 }
 0x150   : > { %2071 = vst.msk [vmem:[%s3866_s21 + $0x88] sm:$0xff] %vm2053_vm1, %v2038_v35  ;;  %v1975_v62 = vmax.f32 %v1889_v37, 0.0  ;;  %v1904_v43 = vadd.f32 %v3048_v51, %v3724_v10  ;;  %v1513_v30 = vpop.f32.mrf.mxu0  ;;  %v1898_v47 = vpop.f32.mrf.mxu1 }
 0x151   : > { %2070 = vst.msk [vmem:[%s3866_s21 + $0x80] sm:$0xff] %vm2053_vm1, %v2037_v9  ;;  %v2040_v17 = vmax.f32 %v3802_v36, %v2008_v23  ;;  %v1593_v49 = vmax.f32 %v1519_v32, 0.0  ;;  %v1514_v50 = vadd.f32 %v3724_v10, %v1513_v30  ;;  %v1899_v33 = vadd.f32 %v3724_v10, %v1898_v47 }
 0x152   : > { %v2007_v53 = vmax.f32 %v1590_v40, %v1975_v62  ;;  %v1978_v54 = vmax.f32 %v1904_v43, 0.0  ;;  %v2983_v55 = vpop.f32.mrf.mxu0  ;;  %v3051_v1 = vpop.f32.mrf.mxu1 }
 0x153   : > { %2073 = vst.msk [vmem:[%s3866_s21 + $0x98] sm:$0xff] %vm2053_vm1, %v2040_v17  ;;  %v1592_v57 = vmax.f32 %v1514_v50, 0.0  ;;  %v1977_v45 = vmax.f32 %v1899_v33, 0.0  ;;  %v1529_v58 = vadd.f32 %v2983_v55, %v3724_v10  ;;  %v1914_v61 = vadd.f32 %v3051_v1, %v3724_v10 }
 0x154   : > { %v2039_v36 = vmax.f32 %v3806_v46, %v2007_v53  ;;  %v2010_v63 = vmax.f32 %v1593_v49, %v1978_v54  ;;  %v1523_v3 = vpop.f32.mrf.mxu0  ;;  %v1908_v41 = vpop.f32.mrf.mxu1 }
 0x155   : > { %v2009_v4 = vmax.f32 %v1592_v57, %v1977_v45  ;;  %v1595_v6 = vmax.f32 %v1529_v58, 0.0  ;;  %v1980_v48 = vmax.f32 %v1914_v61, 0.0  ;;  %v1524_v7 = vadd.f32 %v3724_v10, %v1523_v3 }
 0x156   : > { %2072 = vst.msk [vmem:[%s3866_s21 + $0x90] sm:$0xff] %vm2053_vm1, %v2039_v36  ;;  %v2042_v11 = vmax.f32 %v3812_v60, %v2010_v63  ;;  %v1909_v56 = vadd.f32 %v3724_v10, %v1908_v41  ;;  %v2986_v13 = vpop.f32.mrf.mxu0  ;;  %v3054_v8 = vpop.f32.mrf.mxu1 }
 0x157   : > { %v2041_v46 = vmax.f32 %v3814_v0, %v2009_v4  ;;  %v2012_v15 = vmax.f32 %v1595_v6, %v1980_v48  ;;  %v1594_v16 = vmax.f32 %v1524_v7, 0.0  ;;  %v1539_v18 = vadd.f32 %v2986_v13, %v3724_v10 }
 0x158   : > { %2075 = vst.msk [vmem:[%s3866_s21 + $0xa8] sm:$0xff] %vm2053_vm1, %v2042_v11  ;;  %v1979_v19 = vmax.f32 %v1909_v56, 0.0  ;;  %v1924_v21 = vadd.f32 %v3054_v8, %v3724_v10  ;;  %v1533_v22 = vpop.f32.mrf.mxu0  ;;  %v1918_v5 = vpop.f32.mrf.mxu1 }
 0x159   : > { %2074 = vst.msk [vmem:[%s3866_s21 + $0xa0] sm:$0xff] %vm2053_vm1, %v2041_v46  ;;  %v2044_v60 = vmax.f32 %v3818_v12, %v2012_v15  ;;  %v1597_v44 = vmax.f32 %v1539_v18, 0.0  ;;  %v1534_v20 = vadd.f32 %v3724_v10, %v1533_v22  ;;  %v1919_v0 = vadd.f32 %v3724_v10, %v1918_v5 }
 0x15a   : > { %v2011_v25 = vmax.f32 %v1594_v16, %v1979_v19  ;;  %v1982_v26 = vmax.f32 %v1924_v21, 0.0  ;;  %v2989_v24 = vpop.f32.mrf.mxu0  ;;  %v3057_v28 = vpop.f32.mrf.mxu1 }
 0x15b   : > { %2077 = vst.msk [vmem:[%s3866_s21 + $0xb8] sm:$0xff] %vm2053_vm1, %v2044_v60  ;;  %v1596_v29 = vmax.f32 %v1534_v20, 0.0  ;;  %v1981_v35 = vmax.f32 %v1919_v0, 0.0  ;;  %v1549_v37 = vadd.f32 %v2989_v24, %v3724_v10  ;;  %v1934_v39 = vadd.f32 %v3057_v28, %v3724_v10 }
 0x15c   : > { %v2043_v12 = vmax.f32 %v3824_v27, %v2011_v25  ;;  %v2014_v51 = vmax.f32 %v1597_v44, %v1982_v26  ;;  %v1543_v9 = vpop.f32.mrf.mxu0  ;;  %v1928_v23 = vpop.f32.mrf.mxu1 }
 0x15d   : > { %v2013_v40 = vmax.f32 %v1596_v29, %v1981_v35  ;;  %v1599_v32 = vmax.f32 %v1549_v37, 0.0  ;;  %v1984_v62 = vmax.f32 %v1934_v39, 0.0  ;;  %v1544_v43 = vadd.f32 %v3724_v10, %v1543_v9 }
 0x15e   : > { %2076 = vst.msk [vmem:[%s3866_s21 + $0xb0] sm:$0xff] %vm2053_vm1, %v2043_v12  ;;  %v2046_v30 = vmax.f32 %v3826_v31, %v2014_v51  ;;  %v1929_v47 = vadd.f32 %v3724_v10, %v1928_v23  ;;  %v2992_v17 = vpop.f32.mrf.mxu0  ;;  %v3060_v49 = vpop.f32.mrf.mxu1 }
 0x15f   : > { %v2045_v27 = vmax.f32 %v3830_v42, %v2013_v40  ;;  %v2016_v50 = vmax.f32 %v1599_v32, %v1984_v62  ;;  %v1598_v33 = vmax.f32 %v1544_v43, 0.0  ;;  %v1559_v53 = vadd.f32 %v2992_v17, %v3724_v10 }
 0x160   : > { %2079 = vst.msk [vmem:[%s3866_s21 + $0xc8] sm:$0xff] %vm2053_vm1, %v2046_v30  ;;  %v1983_v54 = vmax.f32 %v1929_v47, 0.0  ;;  %v1944_v55 = vadd.f32 %v3060_v49, %v3724_v10  ;;  %v1553_v1 = vpop.f32.mrf.mxu0  ;;  %v1938_v57 = vpop.f32.mrf.mxu1 }
 0x161   : > { %2078 = vst.msk [vmem:[%s3866_s21 + $0xc0] sm:$0xff] %vm2053_vm1, %v2045_v27  ;;  %v2048_v31 = vmax.f32 %v3836_v59, %v2016_v50  ;;  %v1601_v45 = vmax.f32 %v1559_v53, 0.0  ;;  %v1554_v58 = vadd.f32 %v3724_v10, %v1553_v1  ;;  %v1939_v42 = vadd.f32 %v3724_v10, %v1938_v57 }
 0x162   : > { %v2015_v61 = vmax.f32 %v1598_v33, %v1983_v54  ;;  %v1986_v36 = vmax.f32 %v1944_v55, 0.0  ;;  %v2995_v63 = vpop.f32.mrf.mxu0  ;;  %v3063_v3 = vpop.f32.mrf.mxu1 }
 0x163   : > { %2081 = vst.msk [vmem:[%s3866_s21 + $0xd8] sm:$0xff] %vm2053_vm1, %v2048_v31  ;;  %v1600_v41 = vmax.f32 %v1554_v58, 0.0  ;;  %v1985_v4 = vmax.f32 %v1939_v42, 0.0  ;;  %v1569_v6 = vadd.f32 %v2995_v63, %v3724_v10  ;;  %v1954_v48 = vadd.f32 %v3063_v3, %v3724_v10 }
 0x164   : > { %v2047_v59 = vmax.f32 %v3838_v2, %v2015_v61  ;;  %v2018_v7 = vmax.f32 %v1601_v45, %v1986_v36  ;;  %v1563_v11 = vpop.f32.mrf.mxu0  ;;  %v1948_v56 = vpop.f32.mrf.mxu1 }
 0x165   : > { %v2017_v13 = vmax.f32 %v1600_v41, %v1985_v4  ;;  %v1603_v8 = vmax.f32 %v1569_v6, 0.0  ;;  %v1988_v46 = vmax.f32 %v1954_v48, 0.0  ;;  %v1564_v15 = vadd.f32 %v3724_v10, %v1563_v11 }
 0x166   : > { %2080 = vst.msk [vmem:[%s3866_s21 + $0xd0] sm:$0xff] %vm2053_vm1, %v2047_v59  ;;  %v2050_v16 = vmax.f32 %v3842_v14, %v2018_v7  ;;  %v1949_v18 = vadd.f32 %v3724_v10, %v1948_v56 }
 0x167   : > { %v2049_v19 = vmax.f32 %v3848_v34, %v2017_v13  ;;  %v2020_v2 = vmax.f32 %v1603_v8, %v1988_v46  ;;  %v1602_v21 = vmax.f32 %v1564_v15, 0.0 }
 0x168   : > { %2083 = vst.msk [vmem:[%s3866_s21 + $0xe8] sm:$0xff] %vm2053_vm1, %v2050_v16  ;;  %v1987_v22 = vmax.f32 %v1949_v18, 0.0 }
 0x169   : > { %2082 = vst.msk [vmem:[%s3866_s21 + $0xe0] sm:$0xff] %vm2053_vm1, %v2049_v19  ;;  %v2052_v5 = vmax.f32 %v3850_v38, %v2020_v2 }
 0x16a   : > { %v2019_v60 = vmax.f32 %v1602_v21, %v1987_v22  ;;  %2092 = sbr.rel (!%p3300_p4) target bundleno = 415 (0x19f), region = 48 }
 0x16b   : > { %2085 = vst.msk [vmem:[%s3866_s21 + $0xf8] sm:$0xff] %vm2053_vm1, %v2052_v5 }
 0x16c   : > { %v2051_v44 = vmax.f32 %v3855_v52, %v2019_v60 }
 0x16e   : > { %2084 = vst.msk [vmem:[%s3866_s21 + $0xf0] sm:$0xff] %vm2053_vm1, %v2051_v44 }
 0x16f   : > { %s4173_s11 = smov (!%p2095_p8, %s2094_s11), 32 }
 0x170   : > { %s2606_s16 = sshll.u32 %s4173_s11, 7 }
 0x171   : > { %p2609_p9 = scmp.eq.s32.totalorder %s2606_s16, 0 }
 0x172   : > { %s4030_s17 = sshrl.u32 (!%p2609_p9), %s4173_s11, 5 }
 0x173   : > { %2103 = sbr.rel (%p2609_p9) target bundleno = 415 (0x19f), region = 52  ;;  %p2610_p10 = scmp.le.s32.totalorder (!%p2609_p9), %s4030_s17, 0 }
 0x178   : > { %2400 = sbr.rel (%p2610_p10) target bundleno = 398 (0x18e), region = 137  ;;  %s4164_s24 = smov (!%p2610_p10), %s4024_s15 }
 0x179   : > { %s4165_s29 = smov (!%p2610_p10), %s3866_s21  ;;  %s4039_s10 = smov (!%p2610_p10), 0  }
 0x17a   : > { %s4041_s18 = smov (!%p2610_p10), 0  }
 0x17d LB: >> { %v2228_v10 = vld [vmem:[%s3214_s29] sm:$0xff]  ;;  %v2230_v14 = vld [vmem:[%s3214_s29 + $0x8] sm:$0xff]  ;;  %v2232_v34 = vld [vmem:[%s3214_s29 + $0x10] sm:$0xff]  ;;  %s2292_s19 = sadd.s32 1, %s3218_s10  ;;  %s2222_s18 = sadd.s32 1, %s3222_s18   ;;  %s3222_s18 = sphi %s4041_s18, %s2222_s18   ;;  %s3218_s10 = sphi %s4039_s10, %s4168_s10   ;;  %s3214_s29 = sphi %s4165_s29, %s4167_s29   ;;  %s3210_s24 = sphi %s4164_s24, %s4166_s24  }
 0x17e   : >> { %2229 = vst [vmem:[%s3210_s24] sm:$0xff] %v2228_v10  ;;  %2231 = vst [vmem:[%s3210_s24 + $0x8] sm:$0xff] %v2230_v14  ;;  %v2234_v38 = vld [vmem:[%s3214_s29 + $0x18] sm:$0xff]  ;;  %v2236_v52 = vld [vmem:[%s3214_s29 + $0x20] sm:$0xff]  ;;  %p2293_p11 = scmp.ge.s32.totalorder %s2292_s19, %s4030_s17  ;;  %p2221_p12 = scmp.ge.s32.totalorder %s2222_s18, %s4030_s17 }
 0x17f   : >> { %2233 = vst [vmem:[%s3210_s24 + $0x10] sm:$0xff] %v2232_v34  ;;  %v2238_v20 = vld [vmem:[%s3214_s29 + $0x28] sm:$0xff]  ;;  %2235 = vst [vmem:[%s3210_s24 + $0x18] sm:$0xff] %v2234_v38  ;;  %v2240_v0 = vld [vmem:[%s3214_s29 + $0x30] sm:$0xff] }
 0x180   : >> { %2237 = vst [vmem:[%s3210_s24 + $0x20] sm:$0xff] %v2236_v52  ;;  %2239 = vst [vmem:[%s3210_s24 + $0x28] sm:$0xff] %v2238_v20  ;;  %v2242_v25 = vld [vmem:[%s3214_s29 + $0x38] sm:$0xff]  ;;  %v2244_v26 = vld [vmem:[%s3214_s29 + $0x40] sm:$0xff]  ;;  %s4175_s19 = smov (%p2293_p11, %s2292_s19), 0 }
 0x181   : >> { %2241 = vst [vmem:[%s3210_s24 + $0x30] sm:$0xff] %v2240_v0  ;;  %2243 = vst [vmem:[%s3210_s24 + $0x38] sm:$0xff] %v2242_v25  ;;  %v2246_v24 = vld [vmem:[%s3214_s29 + $0x48] sm:$0xff]  ;;  %v2248_v28 = vld [vmem:[%s3214_s29 + $0x50] sm:$0xff]  ;;  %s2611_s20 = sshll.u32 %s4175_s19, 8  ;;  %s4168_s10 = smov %s4175_s19 }
 0x182   : >> { %2245 = vst [vmem:[%s3210_s24 + $0x40] sm:$0xff] %v2244_v26  ;;  %v2250_v29 = vld [vmem:[%s3214_s29 + $0x58] sm:$0xff]  ;;  %2247 = vst [vmem:[%s3210_s24 + $0x48] sm:$0xff] %v2246_v24  ;;  %v2252_v35 = vld [vmem:[%s3214_s29 + $0x60] sm:$0xff]  ;;  %s4097_s23 = scalar_lea.vmem %s3866_s21, %s2611_s20 [#allocation2]   ;;  %s2298_s27 = scalar_lea.vmem %s4024_s15, %s2611_s20  }
 0x183   : >> { %2249 = vst [vmem:[%s3210_s24 + $0x50] sm:$0xff] %v2248_v28  ;;  %2251 = vst [vmem:[%s3210_s24 + $0x58] sm:$0xff] %v2250_v29  ;;  %v2254_v37 = vld [vmem:[%s3214_s29 + $0x68] sm:$0xff]  ;;  %v2256_v39 = vld [vmem:[%s3214_s29 + $0x70] sm:$0xff] }
 0x184   : >> { %2253 = vst [vmem:[%s3210_s24 + $0x60] sm:$0xff] %v2252_v35  ;;  %2255 = vst [vmem:[%s3210_s24 + $0x68] sm:$0xff] %v2254_v37  ;;  %v2258_v12 = vld [vmem:[%s3214_s29 + $0x78] sm:$0xff]  ;;  %v2260_v51 = vld [vmem:[%s3214_s29 + $0x80] sm:$0xff] }
 0x185   : >> { %2257 = vst [vmem:[%s3210_s24 + $0x70] sm:$0xff] %v2256_v39  ;;  %v2262_v9 = vld [vmem:[%s3214_s29 + $0x88] sm:$0xff]  ;;  %2259 = vst [vmem:[%s3210_s24 + $0x78] sm:$0xff] %v2258_v12  ;;  %v2264_v23 = vld [vmem:[%s3214_s29 + $0x90] sm:$0xff] }
 0x186   : >> { %2261 = vst [vmem:[%s3210_s24 + $0x80] sm:$0xff] %v2260_v51  ;;  %2263 = vst [vmem:[%s3210_s24 + $0x88] sm:$0xff] %v2262_v9  ;;  %v2266_v40 = vld [vmem:[%s3214_s29 + $0x98] sm:$0xff]  ;;  %v2268_v32 = vld [vmem:[%s3214_s29 + $0xa0] sm:$0xff] }
 0x187   : >> { %2265 = vst [vmem:[%s3210_s24 + $0x90] sm:$0xff] %v2264_v23  ;;  %2267 = vst [vmem:[%s3210_s24 + $0x98] sm:$0xff] %v2266_v40  ;;  %v2270_v62 = vld [vmem:[%s3214_s29 + $0xa8] sm:$0xff]  ;;  %v2272_v43 = vld [vmem:[%s3214_s29 + $0xb0] sm:$0xff] }
 0x188   : >> { %2269 = vst [vmem:[%s3210_s24 + $0xa0] sm:$0xff] %v2268_v32  ;;  %v2274_v30 = vld [vmem:[%s3214_s29 + $0xb8] sm:$0xff]  ;;  %2271 = vst [vmem:[%s3210_s24 + $0xa8] sm:$0xff] %v2270_v62  ;;  %v2276_v47 = vld [vmem:[%s3214_s29 + $0xc0] sm:$0xff] }
 0x189   : >> { %2273 = vst [vmem:[%s3210_s24 + $0xb0] sm:$0xff] %v2272_v43  ;;  %2275 = vst [vmem:[%s3210_s24 + $0xb8] sm:$0xff] %v2274_v30  ;;  %v2278_v17 = vld [vmem:[%s3214_s29 + $0xc8] sm:$0xff]  ;;  %v2280_v49 = vld [vmem:[%s3214_s29 + $0xd0] sm:$0xff]  ;;  %2224 = sbr.rel (!%p2221_p12) target bundleno = 381 (0x17d), region = 143 }
 0x18a   : >> { %2277 = vst [vmem:[%s3210_s24 + $0xc0] sm:$0xff] %v2276_v47  ;;  %2279 = vst [vmem:[%s3210_s24 + $0xc8] sm:$0xff] %v2278_v17  ;;  %v2282_v27 = vld [vmem:[%s3214_s29 + $0xd8] sm:$0xff]  ;;  %v2284_v50 = vld [vmem:[%s3214_s29 + $0xe0] sm:$0xff] }
 0x18b   : >> { %2281 = vst [vmem:[%s3210_s24 + $0xd0] sm:$0xff] %v2280_v49  ;;  %v2286_v33 = vld [vmem:[%s3214_s29 + $0xe8] sm:$0xff]  ;;  %2283 = vst [vmem:[%s3210_s24 + $0xd8] sm:$0xff] %v2282_v27  ;;  %v2288_v53 = vld [vmem:[%s3214_s29 + $0xf0] sm:$0xff] }
 0x18c   : >> { %2285 = vst [vmem:[%s3210_s24 + $0xe0] sm:$0xff] %v2284_v50  ;;  %2287 = vst [vmem:[%s3210_s24 + $0xe8] sm:$0xff] %v2286_v33  ;;  %v2290_v54 = vld [vmem:[%s3214_s29 + $0xf8] sm:$0xff]  ;;  %s4167_s29 = smov %s4097_s23 }
 0x18d   : >> { %2289 = vst [vmem:[%s3210_s24 + $0xf0] sm:$0xff] %v2288_v53  ;;  %2291 = vst [vmem:[%s3210_s24 + $0xf8] sm:$0xff] %v2290_v54  ;;  %s4166_s24 = smov %s2298_s27 }
 0x18e PF: > { %s4138_s30 = sand.u32 31, %s4173_s11   ;;  %s2622_s26 = sshll.u32 %s4030_s17, 8 }
 0x18f   : > { %s2303_s7 = scalar_lea.vmem %s3866_s21, %s2622_s26 [#allocation2]   ;;  %s2305_s8 = scalar_lea.vmem %s4024_s15, %s2622_s26  }
 0x190   : > { %p2616_p13 = scmp.le.s32.totalorder %s4138_s30, 0 }
 0x191   : > { %s3224_s9 = smov (!%p2616_p13), %s2305_s8   ;;  %s3228_s12 = smov (!%p2616_p13), %s2303_s7  }
 0x192   : > { %2414 = sbr.rel (%p2616_p13) target bundleno = 415 (0x19f), region = 148  ;;  %s3232_s13 = smov (!%p2616_p13), 0  }
 0x193   : > { %s3236_s14 = smov (!%p2616_p13), 0  }
 0x197 LB: >> { %v2315_v55 = vld [vmem:[%s3230_s12] sm:$0xff]  ;;  %s2317_s11 = sadd.s32 1, %s3234_s13  ;;  %s2309_s14 = sadd.s32 1, %s3238_s14   ;;  %s3238_s14 = sphi %s3236_s14, %s2309_s14   ;;  %s3234_s13 = sphi %s3232_s13, %s3233_s13   ;;  %s3230_s12 = sphi %s3228_s12, %s2322_s12   ;;  %s3226_s9 = sphi %s3224_s9, %s2323_s9  }
 0x198   : >> { %2316 = vst [vmem:[%s3226_s9] sm:$0xff] %v2315_v55  ;;  %p2318_p0 = scmp.ge.s32.totalorder %s2317_s11, %s4138_s30  ;;  %p2308_p1 = scmp.ge.s32.totalorder %s2309_s14, %s4138_s30 }
 0x19a   : >> { %s4177_s11 = smov (%p2318_p0, %s2317_s11), 0  ;;  %2311 = sbr.rel (!%p2308_p1) target bundleno = 407 (0x197), region = 154 }
 0x19b   : >> { %s2617_s21 = sshll.u32 %s4177_s11, 3  ;;  %s3233_s13 = smov %s4177_s11  }
 0x19c   : >> { %s2322_s12 = scalar_lea.vmem %s2303_s7, %s2617_s21 [#allocation2]   ;;  %s2323_s9 = scalar_lea.vmem %s2305_s8, %s2617_s21  }
 0x19f PF: > { %p13_p2 = scmp.ge.s32.totalorder %s3290_s25, 4   ;;  %s4169_s21 = smov %s3202_s22 }
 0x1a0   : > { %s4170_s22 = smov %s3298_s28  ;;  %s4171_s23 = smov %s3290_s25 }
 0x1a1   :  { %15 = sbr.rel (!%p13_p2) target bundleno = 2 (0x2), region = 165 }

// kernel: net_forward.4
= control target key start
LH: loop header
LB: loop body
LE: loop exit
PB: predicated region body
PF: predicated region fallthrough
CT: control target
= control target key end

     0   :  { %vm321_vm0 = vcmask 523264   ;;  %vm5480_vm1 = vmmov 0   ;;  %s9719_s4 = inlined_call_operand.vmem [shape: f32[1600,128], index: 4, kind: input, shape index: {}]   ;;  %s9720_s0 = inlined_call_operand.vmem [shape: f32[50,1600], index: 0, kind: input, shape index: {}]   ;;  %s9721_s1 = inlined_call_operand.vmem [shape: f32[50,1600], index: 1, kind: input, shape index: {}]   ;;  %s9722_s5 = inlined_call_operand.vmem [shape: f32[1,128], index: 5, kind: input, shape index: {}]   ;;  %s9723_s2 = inlined_call_operand.vmem [shape: f32[50,1600], index: 2, kind: input, shape index: {}]   ;;  %s9724_s3 = inlined_call_operand.vmem [shape: f32[50,1600], index: 3, kind: input, shape index: {}]   ;;  %s9725_s6 = inlined_call_operand.vmem [shape: f32[50,128], index: 6, kind: output, shape index: {}]  }
   0x1   :  { %v5519_v0 = vld [vmem:[%s9719_s4 + $0xf8] sm:$0xff]  ;;  %v5536_v4 = vld [vmem:[%s9719_s4 + $0xf0] sm:$0xff]  ;;  %v5553_v8 = vld [vmem:[%s9719_s4 + $0xe8] sm:$0xff] }
   0x2   :  { %v86_v1 = vld [vmem:[%s9719_s4 + $0x1f8] sm:$0xff]  ;;  %3568 = vmatprep.subr.mxu0 %v5519_v0  ;;  %v85_v5 = vld [vmem:[%s9719_s4 + $0x1f0] sm:$0xff]  ;;  %v84_v9 = vld [vmem:[%s9719_s4 + $0x1e8] sm:$0xff] }
   0x3   :  { %v5527_v2 = vld [vmem:[%s9719_s4 + $0x78] sm:$0xff]  ;;  %3621 = vmatprep.subr.mxu1 %v86_v1  ;;  %v5545_v6 = vld [vmem:[%s9719_s4 + $0x70] sm:$0xff]  ;;  %v5562_v10 = vld [vmem:[%s9719_s4 + $0x68] sm:$0xff] }
   0x4   :  { %v70_v3 = vld [vmem:[%s9719_s4 + $0x178] sm:$0xff]  ;;  %3569 = vmatpush3.msra.mxu0 %v5527_v2  ;;  %v69_v7 = vld [vmem:[%s9719_s4 + $0x170] sm:$0xff]  ;;  %v68_v11 = vld [vmem:[%s9719_s4 + $0x168] sm:$0xff] }
   0x5   :  { %3622 = vmatpush3.msra.mxu1 %v70_v3  ;;  %3570 = vmatprep.subr.mxu0 %v5536_v4  ;;  %v5571_v12 = vld [vmem:[%s9719_s4 + $0xe0] sm:$0xff]  ;;  %v5589_v16 = vld [vmem:[%s9719_s4 + $0xd8] sm:$0xff]  ;;  %v5607_v20 = vld [vmem:[%s9719_s4 + $0xd0] sm:$0xff] }
   0x6   :  { %3623 = vmatprep.subr.mxu1 %v85_v5  ;;  %3571 = vmatpush3.msra.mxu0 %v5545_v6  ;;  %v83_v13 = vld [vmem:[%s9719_s4 + $0x1e0] sm:$0xff]  ;;  %v82_v17 = vld [vmem:[%s9719_s4 + $0x1d8] sm:$0xff]  ;;  %v81_v21 = vld [vmem:[%s9719_s4 + $0x1d0] sm:$0xff] }
   0x7   :  { %3624 = vmatpush3.msra.mxu1 %v69_v7  ;;  %3572 = vmatprep.subr.mxu0 %v5553_v8  ;;  %v5580_v14 = vld [vmem:[%s9719_s4 + $0x60] sm:$0xff]  ;;  %v5598_v18 = vld [vmem:[%s9719_s4 + $0x58] sm:$0xff]  ;;  %v5616_v22 = vld [vmem:[%s9719_s4 + $0x50] sm:$0xff] }
   0x8   :  { %3625 = vmatprep.subr.mxu1 %v84_v9  ;;  %v67_v15 = vld [vmem:[%s9719_s4 + $0x160] sm:$0xff]  ;;  %3573 = vmatpush3.msra.mxu0 %v5562_v10  ;;  %v66_v19 = vld [vmem:[%s9719_s4 + $0x158] sm:$0xff]  ;;  %v65_v23 = vld [vmem:[%s9719_s4 + $0x150] sm:$0xff] }
   0x9   :  { %3626 = vmatpush3.msra.mxu1 %v68_v11  ;;  %3574 = vmatprep.subr.mxu0 %v5571_v12  ;;  %v5625_v24 = vld [vmem:[%s9719_s4 + $0xc8] sm:$0xff]  ;;  %v5643_v28 = vld [vmem:[%s9719_s4 + $0xc0] sm:$0xff]  ;;  %v5661_v32 = vld [vmem:[%s9719_s4 + $0xb8] sm:$0xff] }
   0xa   :  { %3627 = vmatprep.subr.mxu1 %v83_v13  ;;  %3575 = vmatpush3.msra.mxu0 %v5580_v14  ;;  %v80_v25 = vld [vmem:[%s9719_s4 + $0x1c8] sm:$0xff]  ;;  %v79_v29 = vld [vmem:[%s9719_s4 + $0x1c0] sm:$0xff]  ;;  %v78_v33 = vld [vmem:[%s9719_s4 + $0x1b8] sm:$0xff] }
   0xb   :  { %3628 = vmatpush3.msra.mxu1 %v67_v15  ;;  %3576 = vmatprep.subr.mxu0 %v5589_v16  ;;  %v5634_v26 = vld [vmem:[%s9719_s4 + $0x48] sm:$0xff]  ;;  %v5652_v30 = vld [vmem:[%s9719_s4 + $0x40] sm:$0xff]  ;;  %v5670_v34 = vld [vmem:[%s9719_s4 + $0x38] sm:$0xff] }
   0xc   :  { %3629 = vmatprep.subr.mxu1 %v82_v17  ;;  %3577 = vmatpush3.msra.mxu0 %v5598_v18  ;;  %v64_v27 = vld [vmem:[%s9719_s4 + $0x148] sm:$0xff]  ;;  %v63_v31 = vld [vmem:[%s9719_s4 + $0x140] sm:$0xff]  ;;  %v62_v35 = vld [vmem:[%s9719_s4 + $0x138] sm:$0xff] }
   0xd   :  { %3630 = vmatpush3.msra.mxu1 %v66_v19  ;;  %3578 = vmatprep.subr.mxu0 %v5607_v20  ;;  %v5679_v36 = vld [vmem:[%s9719_s4 + $0xb0] sm:$0xff]  ;;  %v5697_v40 = vld [vmem:[%s9719_s4 + $0xa8] sm:$0xff]  ;;  %v5715_v44 = vld [vmem:[%s9719_s4 + $0xa0] sm:$0xff] }
   0xe   :  { %3631 = vmatprep.subr.mxu1 %v81_v21  ;;  %3579 = vmatpush3.msra.mxu0 %v5616_v22  ;;  %v77_v37 = vld [vmem:[%s9719_s4 + $0x1b0] sm:$0xff]  ;;  %v76_v41 = vld [vmem:[%s9719_s4 + $0x1a8] sm:$0xff]  ;;  %v75_v45 = vld [vmem:[%s9719_s4 + $0x1a0] sm:$0xff] }
   0xf   :  { %3632 = vmatpush3.msra.mxu1 %v65_v23  ;;  %3580 = vmatprep.subr.mxu0 %v5625_v24  ;;  %v5688_v38 = vld [vmem:[%s9719_s4 + $0x30] sm:$0xff]  ;;  %v5706_v42 = vld [vmem:[%s9719_s4 + $0x28] sm:$0xff]  ;;  %v5724_v46 = vld [vmem:[%s9719_s4 + $0x20] sm:$0xff] }
  0x10   :  { %3633 = vmatprep.subr.mxu1 %v80_v25  ;;  %3581 = vmatpush3.msra.mxu0 %v5634_v26  ;;  %v61_v39 = vld [vmem:[%s9719_s4 + $0x130] sm:$0xff]  ;;  %v60_v43 = vld [vmem:[%s9719_s4 + $0x128] sm:$0xff]  ;;  %v59_v47 = vld [vmem:[%s9719_s4 + $0x120] sm:$0xff] }
  0x11   :  { %3634 = vmatpush3.msra.mxu1 %v64_v27  ;;  %3582 = vmatprep.subr.mxu0 %v5643_v28  ;;  %v5733_v48 = vld [vmem:[%s9719_s4 + $0x98] sm:$0xff]  ;;  %v5751_v52 = vld [vmem:[%s9719_s4 + $0x90] sm:$0xff]  ;;  %v5769_v56 = vld [vmem:[%s9719_s4 + $0x88] sm:$0xff] }
  0x12   :  { %3635 = vmatprep.subr.mxu1 %v79_v29  ;;  %3583 = vmatpush3.msra.mxu0 %v5652_v30  ;;  %v74_v49 = vld [vmem:[%s9719_s4 + $0x198] sm:$0xff]  ;;  %v73_v53 = vld [vmem:[%s9719_s4 + $0x190] sm:$0xff]  ;;  %v72_v57 = vld [vmem:[%s9719_s4 + $0x188] sm:$0xff] }
  0x13   :  { %3636 = vmatpush3.msra.mxu1 %v63_v31  ;;  %3584 = vmatprep.subr.mxu0 %v5661_v32  ;;  %v5742_v50 = vld [vmem:[%s9719_s4 + $0x18] sm:$0xff]  ;;  %v5760_v54 = vld [vmem:[%s9719_s4 + $0x10] sm:$0xff]  ;;  %v5778_v58 = vld [vmem:[%s9719_s4 + $0x8] sm:$0xff] }
  0x14   :  { %3637 = vmatprep.subr.mxu1 %v78_v33  ;;  %3585 = vmatpush3.msra.mxu0 %v5670_v34  ;;  %v58_v51 = vld [vmem:[%s9719_s4 + $0x118] sm:$0xff]  ;;  %v57_v55 = vld [vmem:[%s9719_s4 + $0x110] sm:$0xff]  ;;  %v56_v59 = vld [vmem:[%s9719_s4 + $0x108] sm:$0xff] }
  0x15   :  { %3638 = vmatpush3.msra.mxu1 %v62_v35  ;;  %3586 = vmatprep.subr.mxu0 %v5679_v36  ;;  %v5787_v60 = vld [vmem:[%s9719_s4 + $0x80] sm:$0xff]  ;;  %v225_v63 = vld [vmem:[%s9720_s0 + $0x8] sm:$0xff]  ;;  %v227_v5 = vld [vmem:[%s9720_s0 + $0x18] sm:$0xff] }
  0x16   :  { %3639 = vmatprep.subr.mxu1 %v77_v37  ;;  %3587 = vmatpush3.msra.mxu0 %v5688_v38  ;;  %v71_v61 = vld [vmem:[%s9719_s4 + $0x180] sm:$0xff]  ;;  %v5815_v7 = vld [vmem:[%s9719_s4 + $0x2f8] sm:$0xff]  ;;  %v226_v11 = vld [vmem:[%s9720_s0 + $0x10] sm:$0xff] }
  0x17   :  { %3640 = vmatpush3.msra.mxu1 %v61_v39  ;;  %3588 = vmatprep.subr.mxu0 %v5697_v40  ;;  %v5796_v62 = vld [vmem:[%s9719_s4] sm:$0xff]  ;;  %v150_v9 = vld [vmem:[%s9719_s4 + $0x3f8] sm:$0xff]  ;;  %v5836_v17 = vld [vmem:[%s9719_s4 + $0x2f0] sm:$0xff] }
  0x18   :  { %3641 = vmatprep.subr.mxu1 %v76_v41  ;;  %3589 = vmatpush3.msra.mxu0 %v5706_v42  ;;  %v55_v1 = vld [vmem:[%s9719_s4 + $0x100] sm:$0xff]  ;;  %v5827_v13 = vld [vmem:[%s9719_s4 + $0x278] sm:$0xff]  ;;  %v149_v19 = vld [vmem:[%s9719_s4 + $0x3f0] sm:$0xff] }
  0x19   :  { %3642 = vmatpush3.msra.mxu1 %v60_v43  ;;  %3590 = vmatprep.subr.mxu0 %v5715_v44  ;;  %v224_v3 = vld [vmem:[%s9720_s0] sm:$0xff]  ;;  %v134_v15 = vld [vmem:[%s9719_s4 + $0x378] sm:$0xff]  ;;  %v5844_v21 = vld [vmem:[%s9719_s4 + $0x270] sm:$0xff] }
  0x1a   :  { %3643 = vmatprep.subr.mxu1 %v75_v45  ;;  %3591 = vmatpush3.msra.mxu0 %v5724_v46  ;;  %v133_v23 = vld [vmem:[%s9719_s4 + $0x370] sm:$0xff]  ;;  %v5853_v25 = vld [vmem:[%s9719_s4 + $0x2e8] sm:$0xff]  ;;  %v5874_v35 = vld [vmem:[%s9719_s4 + $0x2e0] sm:$0xff] }
  0x1b   :  { %3644 = vmatpush3.msra.mxu1 %v59_v47  ;;  %3592 = vmatprep.subr.mxu0 %v5733_v48  ;;  %v148_v27 = vld [vmem:[%s9719_s4 + $0x3e8] sm:$0xff]  ;;  %v238_v33 = vld [vmem:[%s9720_s0 + $0x70] sm:$0xff]  ;;  %v147_v37 = vld [vmem:[%s9719_s4 + $0x3e0] sm:$0xff] }
  0x1c   :  { %3645 = vmatprep.subr.mxu1 %v74_v49  ;;  %3593 = vmatpush3.msra.mxu0 %v5742_v50  ;;  %v5862_v29 = vld [vmem:[%s9719_s4 + $0x268] sm:$0xff]  ;;  %v5887_v41 = vld [vmem:[%s9719_s4 + $0x260] sm:$0xff]  ;;  %v5899_v47 = vld [vmem:[%s9719_s4 + $0x2d8] sm:$0xff] }
  0x1d   :  { %3646 = vmatpush3.msra.mxu1 %v58_v51  ;;  %3594 = vmatprep.subr.mxu0 %v5751_v52  ;;  %v132_v31 = vld [vmem:[%s9719_s4 + $0x368] sm:$0xff]  ;;  %v131_v43 = vld [vmem:[%s9719_s4 + $0x360] sm:$0xff]  ;;  %v146_v49 = vld [vmem:[%s9719_s4 + $0x3d8] sm:$0xff] }
  0x1e   :  { %3647 = vmatprep.subr.mxu1 %v73_v53  ;;  %3595 = vmatpush3.msra.mxu0 %v5760_v54  ;;  %v237_v39 = vld [vmem:[%s9720_s0 + $0x68] sm:$0xff]  ;;  %v240_v45 = vld [vmem:[%s9720_s0 + $0x80] sm:$0xff]  ;;  %v239_v51 = vld [vmem:[%s9720_s0 + $0x78] sm:$0xff] }
  0x1f   :  { %3648 = vmatpush3.msra.mxu1 %v57_v55  ;;  %3596 = vmatprep.subr.mxu0 %v5769_v56  ;;  %v5911_v53 = vld [vmem:[%s9719_s4 + $0x258] sm:$0xff] }
  0x20   :  { %3649 = vmatprep.subr.mxu1 %v72_v57  ;;  %3597 = vmatpush3.msra.mxu0 %v5778_v58  ;;  %v130_v55 = vld [vmem:[%s9719_s4 + $0x358] sm:$0xff] }
  0x21   :  { %3650 = vmatpush3.msra.mxu1 %v56_v59  ;;  %3598 = vmatprep.subr.mxu0 %v5787_v60  ;;  %v251_v57 = vld [vmem:[%s9720_s0 + $0xd8] sm:$0xff]  ;;  %v5923_v59 = vld [vmem:[%s9719_s4 + $0x2d0] sm:$0xff] }
  0x22   :  { %3651 = vmatprep.subr.mxu1 %v71_v61  ;;  %3599 = vmatpush3.msra.mxu0 %v5796_v62  ;;  %v145_v61 = vld [vmem:[%s9719_s4 + $0x3d0] sm:$0xff] }
  0x23   :  { %407 = vmatprep.mubr.f32.mxu0 %v225_v63  ;;  %3652 = vmatpush3.msra.mxu1 %v55_v1  ;;  %v250_v63 = vld [vmem:[%s9720_s0 + $0xd0] sm:$0xff] }
  0x24   :  { %408 = vmatmul.mubr.f32.vlgmr.msra.gmra.mxu0 %v224_v3  ;;  %507 = vmatprep.mubr.f32.mxu1 %v227_v5  ;;  %v5935_v1 = vld [vmem:[%s9719_s4 + $0x250] sm:$0xff]  ;;  %v253_v5 = vld [vmem:[%s9720_s0 + $0xe8] sm:$0xff] }
  0x25   :  { %3674 = vmatprep.subr.mxu0 %v5815_v7  ;;  %3727 = vmatprep.subr.mxu1 %v150_v9  ;;  %v129_v3 = vld [vmem:[%s9719_s4 + $0x350] sm:$0xff]  ;;  %v5947_v9 = vld [vmem:[%s9719_s4 + $0x2c8] sm:$0xff] }
  0x26   :  { %508 = vmatmul.mubr.f32.vlgmr.msra.gmra.mxu1 %v226_v11  ;;  %3675 = vmatpush3.msra.mxu0 %v5827_v13  ;;  %v144_v11 = vld [vmem:[%s9719_s4 + $0x3c8] sm:$0xff] }
  0x27   :  { %3728 = vmatpush3.msra.mxu1 %v134_v15  ;;  %3676 = vmatprep.subr.mxu0 %v5836_v17  ;;  %v252_v15 = vld [vmem:[%s9720_s0 + $0xe0] sm:$0xff] }
  0x28   :  { %3729 = vmatprep.subr.mxu1 %v149_v19  ;;  %3677 = vmatpush3.msra.mxu0 %v5844_v21  ;;  %v5959_v19 = vld [vmem:[%s9719_s4 + $0x248] sm:$0xff] }
  0x29   :  { %3730 = vmatpush3.msra.mxu1 %v133_v23  ;;  %3678 = vmatprep.subr.mxu0 %v5853_v25  ;;  %v128_v23 = vld [vmem:[%s9719_s4 + $0x348] sm:$0xff] }
  0x2a   :  { %3731 = vmatprep.subr.mxu1 %v148_v27  ;;  %3679 = vmatpush3.msra.mxu0 %v5862_v29  ;;  %v264_v27 = vld [vmem:[%s9720_s0 + $0x140] sm:$0xff] }
  0x2b   :  { %3732 = vmatpush3.msra.mxu1 %v132_v31  ;;  %412 = vmatprep.mubr.f32.mxu0 %v238_v33  ;;  %v5971_v31 = vld [vmem:[%s9719_s4 + $0x2c0] sm:$0xff] }
  0x2c   :  { %3680 = vmatprep.subr.mxu0 %v5874_v35  ;;  %3733 = vmatprep.subr.mxu1 %v147_v37  ;;  %v143_v33 = vld [vmem:[%s9719_s4 + $0x3c0] sm:$0xff]  ;;  %v263_v37 = vld [vmem:[%s9720_s0 + $0x138] sm:$0xff] }
  0x2d   :  { %413 = vmatmul.mubr.f32.gmra.mxu0 %v237_v39  ;;  %3734 = vmatpush3.msra.mxu1 %v131_v43  ;;  %v5983_v39 = vld [vmem:[%s9719_s4 + $0x240] sm:$0xff] }
  0x2e   :  { %3681 = vmatpush3.msra.mxu0 %v5887_v41  ;;  %512 = vmatprep.mubr.f32.mxu1 %v240_v45  ;;  %v127_v43 = vld [vmem:[%s9719_s4 + $0x340] sm:$0xff]  ;;  %v266_v45 = vld [vmem:[%s9720_s0 + $0x150] sm:$0xff] }
  0x2f   :  { %3682 = vmatprep.subr.mxu0 %v5899_v47  ;;  %3735 = vmatprep.subr.mxu1 %v146_v49  ;;  %v5995_v49 = vld [vmem:[%s9719_s4 + $0x2b8] sm:$0xff] }
  0x30   :  { %513 = vmatmul.mubr.f32.gmra.mxu1 %v239_v51  ;;  %3683 = vmatpush3.msra.mxu0 %v5911_v53  ;;  %v142_v51 = vld [vmem:[%s9719_s4 + $0x3b8] sm:$0xff] }
  0x31   :  { %3736 = vmatpush3.msra.mxu1 %v130_v55  ;;  %417 = vmatprep.mubr.f32.mxu0 %v251_v57  ;;  %v265_v55 = vld [vmem:[%s9720_s0 + $0x148] sm:$0xff]  ;;  %v6007_v57 = vld [vmem:[%s9719_s4 + $0x238] sm:$0xff] }
  0x32   :  { %3684 = vmatprep.subr.mxu0 %v5923_v59  ;;  %3737 = vmatprep.subr.mxu1 %v145_v61  ;;  %v126_v61 = vld [vmem:[%s9719_s4 + $0x338] sm:$0xff] }
  0x33   :  { %418 = vmatmul.mubr.f32.gmra.mxu0 %v250_v63  ;;  %3738 = vmatpush3.msra.mxu1 %v129_v3  ;;  %v277_v63 = vld [vmem:[%s9720_s0 + $0x1a8] sm:$0xff]  ;;  %v6019_v3 = vld [vmem:[%s9719_s4 + $0x2b0] sm:$0xff] }
  0x34   :  { %3685 = vmatpush3.msra.mxu0 %v5935_v1  ;;  %517 = vmatprep.mubr.f32.mxu1 %v253_v5  ;;  %v141_v5 = vld [vmem:[%s9719_s4 + $0x3b0] sm:$0xff] }
  0x35   :  { %3686 = vmatprep.subr.mxu0 %v5947_v9  ;;  %3739 = vmatprep.subr.mxu1 %v144_v11  ;;  %v276_v11 = vld [vmem:[%s9720_s0 + $0x1a0] sm:$0xff] }
  0x36   :  { %518 = vmatmul.mubr.f32.gmra.mxu1 %v252_v15  ;;  %3687 = vmatpush3.msra.mxu0 %v5959_v19  ;;  %v6031_v15 = vld [vmem:[%s9719_s4 + $0x230] sm:$0xff] }
  0x37   :  { %3740 = vmatpush3.msra.mxu1 %v128_v23  ;;  %422 = vmatprep.mubr.f32.mxu0 %v264_v27  ;;  %v125_v23 = vld [vmem:[%s9719_s4 + $0x330] sm:$0xff]  ;;  %v279_v27 = vld [vmem:[%s9720_s0 + $0x1b8] sm:$0xff] }
  0x38   :  { %3688 = vmatprep.subr.mxu0 %v5971_v31  ;;  %3741 = vmatprep.subr.mxu1 %v143_v33  ;;  %v6043_v33 = vld [vmem:[%s9719_s4 + $0x2a8] sm:$0xff] }
  0x39   :  { %423 = vmatmul.mubr.f32.gmra.mxu0 %v263_v37  ;;  %3742 = vmatpush3.msra.mxu1 %v127_v43  ;;  %v140_v37 = vld [vmem:[%s9719_s4 + $0x3a8] sm:$0xff]  ;;  %v278_v43 = vld [vmem:[%s9720_s0 + $0x1b0] sm:$0xff] }
  0x3a   :  { %3689 = vmatpush3.msra.mxu0 %v5983_v39  ;;  %522 = vmatprep.mubr.f32.mxu1 %v266_v45  ;;  %v6055_v45 = vld [vmem:[%s9719_s4 + $0x228] sm:$0xff] }
  0x3b   :  { %3690 = vmatprep.subr.mxu0 %v5995_v49  ;;  %3743 = vmatprep.subr.mxu1 %v142_v51  ;;  %v124_v51 = vld [vmem:[%s9719_s4 + $0x328] sm:$0xff] }
  0x3c   :  { %523 = vmatmul.mubr.f32.gmra.mxu1 %v265_v55  ;;  %3691 = vmatpush3.msra.mxu0 %v6007_v57  ;;  %v290_v55 = vld [vmem:[%s9720_s0 + $0x210] sm:$0xff] }
  0x3d   :  { %3744 = vmatpush3.msra.mxu1 %v126_v61  ;;  %427 = vmatprep.mubr.f32.mxu0 %v277_v63  ;;  %v6067_v61 = vld [vmem:[%s9719_s4 + $0x2a0] sm:$0xff] }
  0x3e   :  { %3692 = vmatprep.subr.mxu0 %v6019_v3  ;;  %3745 = vmatprep.subr.mxu1 %v141_v5  ;;  %v139_v63 = vld [vmem:[%s9719_s4 + $0x3a0] sm:$0xff]  ;;  %v289_v5 = vld [vmem:[%s9720_s0 + $0x208] sm:$0xff] }
  0x3f   :  { %428 = vmatmul.mubr.f32.gmra.mxu0 %v276_v11  ;;  %3746 = vmatpush3.msra.mxu1 %v125_v23  ;;  %v6079_v11 = vld [vmem:[%s9719_s4 + $0x220] sm:$0xff] }
  0x40   :  { %3693 = vmatpush3.msra.mxu0 %v6031_v15  ;;  %527 = vmatprep.mubr.f32.mxu1 %v279_v27  ;;  %9800 = vst [vmem:[#allocation2_spill] sm:$0xff] %v6079_v11  ;;  %v123_v23 = vld [vmem:[%s9719_s4 + $0x320] sm:$0xff] }
  0x41   :  { %3694 = vmatprep.subr.mxu0 %v6043_v33  ;;  %3747 = vmatprep.subr.mxu1 %v140_v37  ;;  %v292_v27 = vld [vmem:[%s9720_s0 + $0x220] sm:$0xff]  ;;  %v6091_v37 = vld [vmem:[%s9719_s4 + $0x298] sm:$0xff] }
  0x42   :  { %528 = vmatmul.mubr.f32.gmra.mxu1 %v278_v43  ;;  %3695 = vmatpush3.msra.mxu0 %v6055_v45  ;;  %9801 = vst [vmem:[#allocation3_spill] sm:$0xff] %v6091_v37  ;;  %v138_v43 = vld [vmem:[%s9719_s4 + $0x398] sm:$0xff] }
  0x43   :  { %3748 = vmatpush3.msra.mxu1 %v124_v51  ;;  %432 = vmatprep.mubr.f32.mxu0 %v290_v55  ;;  %v291_v51 = vld [vmem:[%s9720_s0 + $0x218] sm:$0xff] }
  0x44   :  { %3696 = vmatprep.subr.mxu0 %v6067_v61  ;;  %3749 = vmatprep.subr.mxu1 %v139_v63  ;;  %v6103_v55 = vld [vmem:[%s9719_s4 + $0x218] sm:$0xff] }
  0x45   :  { %433 = vmatmul.mubr.f32.gmra.mxu0 %v289_v5  ;;  %3750 = vmatpush3.msra.mxu1 %v123_v23  ;;  %9802 = vst [vmem:[#allocation4_spill] sm:$0xff] %v6103_v55  ;;  %v122_v63 = vld [vmem:[%s9719_s4 + $0x318] sm:$0xff]  ;;  %v6115_v23 = vld [vmem:[%s9719_s4 + $0x290] sm:$0xff] }
  0x46   :  { %3697 = vmatpush3.msra.mxu0 %v6079_v11  ;;  %532 = vmatprep.mubr.f32.mxu1 %v292_v27  ;;  %v303_v5 = vld [vmem:[%s9720_s0 + $0x278] sm:$0x3]  ;;  %9803 = vst [vmem:[#allocation5_spill] sm:$0xff] %v6115_v23  ;;  %v137_v11 = vld [vmem:[%s9719_s4 + $0x390] sm:$0xff] }
  0x47   :  { %3698 = vmatprep.subr.mxu0 %v6091_v37  ;;  %3751 = vmatprep.subr.mxu1 %v138_v43  ;;  %v302_v27 = vld [vmem:[%s9720_s0 + $0x270] sm:$0x3] }
  0x48   :  { %533 = vmatmul.mubr.f32.gmra.mxu1 %v291_v51  ;;  %3699 = vmatpush3.msra.mxu0 %v6103_v55  ;;  %v6127_v37 = vld [vmem:[%s9719_s4 + $0x210] sm:$0xff]  ;;  %v305_v51 = vld [vmem:[%s9720_s0 + $0x288] sm:$0x3] }
  0x49   :  { %3752 = vmatpush3.msra.mxu1 %v122_v63  ;;  %9804 = vst [vmem:[#allocation6_spill] sm:$0xff] %v6127_v37  ;;  %v121_v43 = vld [vmem:[%s9719_s4 + $0x310] sm:$0xff]  ;;  %437 = vmatprep.mubr.f32.mxu0 %v303_v5  ;;  %v6139_v63 = vld [vmem:[%s9719_s4 + $0x288] sm:$0xff]  ;;  %v304_v5 = vld [vmem:[%s9720_s0 + $0x280] sm:$0x3] }
  0x4a   :  { %3700 = vmatprep.subr.mxu0 %v6115_v23  ;;  %9805 = vst [vmem:[#allocation7_spill] sm:$0xff] %v6139_v63  ;;  %3753 = vmatprep.subr.mxu1 %v137_v11  ;;  %v136_v55 = vld [vmem:[%s9719_s4 + $0x388] sm:$0xff] }
  0x4b   :  { %438 = vmatmul.mubr.f32.gmra.mxu0 %v302_v27  ;;  %3754 = vmatpush3.msra.mxu1 %v121_v43  ;;  %v6151_v23 = vld [vmem:[%s9719_s4 + $0x208] sm:$0xff]  ;;  %v6160_v27 = vld [vmem:[%s9719_s4 + $0x280] sm:$0xff] }
  0x4c   :  { %3701 = vmatpush3.msra.mxu0 %v6127_v37  ;;  %9806 = vst [vmem:[#allocation8_spill] sm:$0xff] %v6151_v23  ;;  %v120_v11 = vld [vmem:[%s9719_s4 + $0x308] sm:$0xff]  ;;  %537 = vmatprep.mubr.f32.mxu1 %v305_v51  ;;  %9807 = vst [vmem:[#allocation9_spill] sm:$0xff] %v6160_v27  ;;  %v135_v43 = vld [vmem:[%s9719_s4 + $0x380] sm:$0xff] }
  0x4d   :  { %3702 = vmatprep.subr.mxu0 %v6139_v63  ;;  %3755 = vmatprep.subr.mxu1 %v136_v55  ;;  %v6168_v37 = vld [vmem:[%s9719_s4 + $0x200] sm:$0xff]  ;;  %v229_v51 = vld [vmem:[%s9720_s0 + $0x28] sm:$0xff] }
  0x4e   :  { %538 = vmatmul.mubr.f32.gmra.mxu1 %v304_v5  ;;  %9808 = vst [vmem:[#allocation10_spill] sm:$0xff] %v6168_v37  ;;  %3703 = vmatpush3.msra.mxu0 %v6151_v23  ;;  %v119_v63 = vld [vmem:[%s9719_s4 + $0x300] sm:$0xff]  ;;  %v231_v5 = vld [vmem:[%s9720_s0 + $0x38] sm:$0xff] }
  0x4f   :  { %3756 = vmatpush3.msra.mxu1 %v120_v11  ;;  %v228_v55 = vld [vmem:[%s9720_s0 + $0x20] sm:$0xff]  ;;  %3704 = vmatprep.subr.mxu0 %v6160_v27  ;;  %v6187_v23 = vld [vmem:[%s9719_s4 + $0x4f8] sm:$0xff] }
  0x50   :  { %3757 = vmatprep.subr.mxu1 %v135_v43  ;;  %9809 = vst [vmem:[#allocation11_spill] sm:$0xff] %v6187_v23  ;;  %3705 = vmatpush3.msra.mxu0 %v6168_v37  ;;  %v214_v11 = vld [vmem:[%s9719_s4 + $0x5f8] sm:$0xff]  ;;  %v230_v43 = vld [vmem:[%s9720_s0 + $0x30] sm:$0xff] }
  0x51   :  { %607 = vmatprep.mubr.f32.mxu0 %v229_v51  ;;  %3758 = vmatpush3.msra.mxu1 %v119_v63  ;;  %v6199_v27 = vld [vmem:[%s9719_s4 + $0x478] sm:$0xff]  ;;  %v6208_v51 = vld [vmem:[%s9719_s4 + $0x4f0] sm:$0xff] }
  0x52   :  { %608 = vmatmul.mubr.f32.vlgmr.msra.gmra.mxu0 %v228_v55  ;;  %9810 = vst [vmem:[#allocation12_spill] sm:$0xff] %v6199_v27  ;;  %v198_v37 = vld [vmem:[%s9719_s4 + $0x578] sm:$0xff]  ;;  %707 = vmatprep.mubr.f32.mxu1 %v231_v5  ;;  %9811 = vst [vmem:[#allocation13_spill] sm:$0xff] %v6208_v51  ;;  %v213_v63 = vld [vmem:[%s9719_s4 + $0x5f0] sm:$0xff] }
  0x53   :  { %3780 = vmatprep.subr.mxu0 %v6187_v23  ;;  %3833 = vmatprep.subr.mxu1 %v214_v11  ;;  %v242_v55 = vld [vmem:[%s9720_s0 + $0x90] sm:$0xff]  ;;  %v241_v11 = vld [vmem:[%s9720_s0 + $0x88] sm:$0xff] }
  0x54   :  { %708 = vmatmul.mubr.f32.vlgmr.msra.gmra.mxu1 %v230_v43  ;;  %v6219_v5 = vld [vmem:[%s9719_s4 + $0x470] sm:$0xff]  ;;  %3781 = vmatpush3.msra.mxu0 %v6199_v27  ;;  %v6232_v43 = vld [vmem:[%s9719_s4 + $0x4e8] sm:$0xff]  ;;  %v244_v27 = vld [vmem:[%s9720_s0 + $0xa0] sm:$0xff] }
  0x55   :  { %9812 = vst [vmem:[#allocation14_spill] sm:$0xff] %v6219_v5  ;;  %3834 = vmatpush3.msra.mxu1 %v198_v37  ;;  %v197_v23 = vld [vmem:[%s9719_s4 + $0x570] sm:$0xff]  ;;  %3782 = vmatprep.subr.mxu0 %v6208_v51  ;;  %9813 = vst [vmem:[#allocation15_spill] sm:$0xff] %v6232_v43  ;;  %v212_v37 = vld [vmem:[%s9719_s4 + $0x5e8] sm:$0xff] }
  0x56   :  { %3835 = vmatprep.subr.mxu1 %v213_v63  ;;  %612 = vmatprep.mubr.f32.mxu0 %v242_v55  ;;  %v6244_v63 = vld [vmem:[%s9719_s4 + $0x468] sm:$0xff]  ;;  %v6252_v55 = vld [vmem:[%s9719_s4 + $0x4e0] sm:$0xff] }
  0x57   :  { %3783 = vmatpush3.msra.mxu0 %v6219_v5  ;;  %9814 = vst [vmem:[#allocation16_spill] sm:$0xff] %v6244_v63  ;;  %3836 = vmatpush3.msra.mxu1 %v197_v23  ;;  %v196_v51 = vld [vmem:[%s9719_s4 + $0x568] sm:$0xff]  ;;  %9815 = vst [vmem:[#allocation17_spill] sm:$0xff] %v6252_v55  ;;  %v243_v5 = vld [vmem:[%s9720_s0 + $0x98] sm:$0xff] }
  0x58   :  { %613 = vmatmul.mubr.f32.gmra.mxu0 %v241_v11  ;;  %3784 = vmatprep.subr.mxu0 %v6232_v43  ;;  %v211_v23 = vld [vmem:[%s9719_s4 + $0x5e0] sm:$0xff]  ;;  %v255_v11 = vld [vmem:[%s9720_s0 + $0xf8] sm:$0xff] }
  0x59   :  { %3837 = vmatprep.subr.mxu1 %v212_v37  ;;  %712 = vmatprep.mubr.f32.mxu1 %v244_v27  ;;  %v6268_v43 = vld [vmem:[%s9719_s4 + $0x460] sm:$0xff]  ;;  %v254_v27 = vld [vmem:[%s9720_s0 + $0xf0] sm:$0xff] }
  0x5a   :  { %3785 = vmatpush3.msra.mxu0 %v6244_v63  ;;  %9816 = vst [vmem:[#allocation18_spill] sm:$0xff] %v6268_v43  ;;  %3838 = vmatpush3.msra.mxu1 %v196_v51  ;;  %v195_v37 = vld [vmem:[%s9719_s4 + $0x560] sm:$0xff]  ;;  %v6280_v63 = vld [vmem:[%s9719_s4 + $0x4d8] sm:$0xff] }
  0x5b   :  { %3786 = vmatprep.subr.mxu0 %v6252_v55  ;;  %713 = vmatmul.mubr.f32.gmra.mxu1 %v243_v5  ;;  %9817 = vst [vmem:[#allocation19_spill] sm:$0xff] %v6280_v63  ;;  %v210_v51 = vld [vmem:[%s9719_s4 + $0x5d8] sm:$0xff]  ;;  %v257_v55 = vld [vmem:[%s9720_s0 + $0x108] sm:$0xff] }
  0x5c   :  { %3839 = vmatprep.subr.mxu1 %v211_v23  ;;  %617 = vmatprep.mubr.f32.mxu0 %v255_v11  ;;  %v6292_v5 = vld [vmem:[%s9719_s4 + $0x458] sm:$0xff]  ;;  %v6300_v11 = vld [vmem:[%s9719_s4 + $0x4d0] sm:$0xff] }
  0x5d   :  { %3787 = vmatpush3.msra.mxu0 %v6268_v43  ;;  %9818 = vst [vmem:[#allocation20_spill] sm:$0xff] %v6292_v5  ;;  %3840 = vmatpush3.msra.mxu1 %v195_v37  ;;  %v194_v23 = vld [vmem:[%s9719_s4 + $0x558] sm:$0xff]  ;;  %9819 = vst [vmem:[#allocation21_spill] sm:$0xff] %v6300_v11  ;;  %v256_v43 = vld [vmem:[%s9720_s0 + $0x100] sm:$0xff] }
  0x5e   :  { %618 = vmatmul.mubr.f32.gmra.mxu0 %v254_v27  ;;  %3788 = vmatprep.subr.mxu0 %v6280_v63  ;;  %v209_v37 = vld [vmem:[%s9719_s4 + $0x5d0] sm:$0xff]  ;;  %v268_v27 = vld [vmem:[%s9720_s0 + $0x160] sm:$0xff] }
  0x5f   :  { %3841 = vmatprep.subr.mxu1 %v210_v51  ;;  %717 = vmatprep.mubr.f32.mxu1 %v257_v55  ;;  %v6316_v63 = vld [vmem:[%s9719_s4 + $0x450] sm:$0xff]  ;;  %v267_v55 = vld [vmem:[%s9720_s0 + $0x158] sm:$0xff] }
  0x60   :  { %3789 = vmatpush3.msra.mxu0 %v6292_v5  ;;  %9820 = vst [vmem:[#allocation22_spill] sm:$0xff] %v6316_v63  ;;  %3842 = vmatpush3.msra.mxu1 %v194_v23  ;;  %v193_v51 = vld [vmem:[%s9719_s4 + $0x550] sm:$0xff]  ;;  %v6328_v5 = vld [vmem:[%s9719_s4 + $0x4c8] sm:$0xff] }
  0x61   :  { %3790 = vmatprep.subr.mxu0 %v6300_v11  ;;  %718 = vmatmul.mubr.f32.gmra.mxu1 %v256_v43  ;;  %9821 = vst [vmem:[#allocation23_spill] sm:$0xff] %v6328_v5  ;;  %v208_v23 = vld [vmem:[%s9719_s4 + $0x5c8] sm:$0xff]  ;;  %v270_v11 = vld [vmem:[%s9720_s0 + $0x170] sm:$0xff] }
  0x62   :  { %3843 = vmatprep.subr.mxu1 %v209_v37  ;;  %622 = vmatprep.mubr.f32.mxu0 %v268_v27  ;;  %v6340_v43 = vld [vmem:[%s9719_s4 + $0x448] sm:$0xff]  ;;  %v6348_v27 = vld [vmem:[%s9719_s4 + $0x4c0] sm:$0xff] }
  0x63   :  { %3791 = vmatpush3.msra.mxu0 %v6316_v63  ;;  %9822 = vst [vmem:[#allocation24_spill] sm:$0xff] %v6340_v43  ;;  %3844 = vmatpush3.msra.mxu1 %v193_v51  ;;  %v192_v37 = vld [vmem:[%s9719_s4 + $0x548] sm:$0xff]  ;;  %9823 = vst [vmem:[#allocation25_spill] sm:$0xff] %v6348_v27  ;;  %v207_v51 = vld [vmem:[%s9719_s4 + $0x5c0] sm:$0xff] }
  0x64   :  { %623 = vmatmul.mubr.f32.gmra.mxu0 %v267_v55  ;;  %3792 = vmatprep.subr.mxu0 %v6328_v5  ;;  %v269_v63 = vld [vmem:[%s9720_s0 + $0x168] sm:$0xff]  ;;  %v6364_v5 = vld [vmem:[%s9719_s4 + $0x440] sm:$0xff] }
  0x65   :  { %3845 = vmatprep.subr.mxu1 %v208_v23  ;;  %722 = vmatprep.mubr.f32.mxu1 %v270_v11  ;;  %v281_v55 = vld [vmem:[%s9720_s0 + $0x1c8] sm:$0xff]  ;;  %9824 = vst [vmem:[#allocation26_spill] sm:$0xff] %v6364_v5  ;;  %v191_v23 = vld [vmem:[%s9719_s4 + $0x540] sm:$0xff] }
  0x66   :  { %3793 = vmatpush3.msra.mxu0 %v6340_v43  ;;  %3846 = vmatpush3.msra.mxu1 %v192_v37  ;;  %v280_v11 = vld [vmem:[%s9720_s0 + $0x1c0] sm:$0xff]  ;;  %v6376_v43 = vld [vmem:[%s9719_s4 + $0x4b8] sm:$0xff] }
  0x67   :  { %3794 = vmatprep.subr.mxu0 %v6348_v27  ;;  %723 = vmatmul.mubr.f32.gmra.mxu1 %v269_v63  ;;  %9825 = vst [vmem:[#allocation27_spill] sm:$0xff] %v6376_v43  ;;  %v206_v37 = vld [vmem:[%s9719_s4 + $0x5b8] sm:$0xff] }
  0x68   :  { %3847 = vmatprep.subr.mxu1 %v207_v51  ;;  %627 = vmatprep.mubr.f32.mxu0 %v281_v55  ;;  %v283_v27 = vld [vmem:[%s9720_s0 + $0x1d8] sm:$0xff]  ;;  %v6396_v55 = vld [vmem:[%s9719_s4 + $0x4b0] sm:$0xff] }
  0x69   :  { %3795 = vmatpush3.msra.mxu0 %v6364_v5  ;;  %v6388_v63 = vld [vmem:[%s9719_s4 + $0x438] sm:$0xff]  ;;  %3848 = vmatpush3.msra.mxu1 %v191_v23  ;;  %9827 = vst [vmem:[#allocation29_spill] sm:$0xff] %v6396_v55  ;;  %v282_v5 = vld [vmem:[%s9720_s0 + $0x1d0] sm:$0xff] }
  0x6a   :  { %9826 = vst [vmem:[#allocation28_spill] sm:$0xff] %v6388_v63  ;;  %628 = vmatmul.mubr.f32.gmra.mxu0 %v280_v11  ;;  %v190_v51 = vld [vmem:[%s9719_s4 + $0x538] sm:$0xff]  ;;  %3796 = vmatprep.subr.mxu0 %v6376_v43  ;;  %v205_v23 = vld [vmem:[%s9719_s4 + $0x5b0] sm:$0xff] }
  0x6b   :  { %3849 = vmatprep.subr.mxu1 %v206_v37  ;;  %727 = vmatprep.mubr.f32.mxu1 %v283_v27  ;;  %v294_v11 = vld [vmem:[%s9720_s0 + $0x230] sm:$0xff]  ;;  %v293_v27 = vld [vmem:[%s9720_s0 + $0x228] sm:$0xff] }
  0x6c   :  { %3797 = vmatpush3.msra.mxu0 %v6388_v63  ;;  %v6412_v43 = vld [vmem:[%s9719_s4 + $0x430] sm:$0xff]  ;;  %3850 = vmatpush3.msra.mxu1 %v190_v51  ;;  %v6424_v63 = vld [vmem:[%s9719_s4 + $0x4a8] sm:$0xff] }
  0x6d   :  { %9828 = vst [vmem:[#allocation30_spill] sm:$0xff] %v6412_v43  ;;  %3798 = vmatprep.subr.mxu0 %v6396_v55  ;;  %v189_v37 = vld [vmem:[%s9719_s4 + $0x530] sm:$0xff]  ;;  %728 = vmatmul.mubr.f32.gmra.mxu1 %v282_v5  ;;  %9829 = vst [vmem:[#allocation31_spill] sm:$0xff] %v6424_v63  ;;  %v204_v51 = vld [vmem:[%s9719_s4 + $0x5a8] sm:$0xff] }
  0x6e   :  { %3851 = vmatprep.subr.mxu1 %v205_v23  ;;  %632 = vmatprep.mubr.f32.mxu0 %v294_v11  ;;  %v296_v55 = vld [vmem:[%s9720_s0 + $0x240] sm:$0xff]  ;;  %v6436_v5 = vld [vmem:[%s9719_s4 + $0x428] sm:$0xff] }
  0x6f   :  { %3799 = vmatpush3.msra.mxu0 %v6412_v43  ;;  %9830 = vst [vmem:[#allocation32_spill] sm:$0xff] %v6436_v5  ;;  %3852 = vmatpush3.msra.mxu1 %v189_v37  ;;  %v188_v23 = vld [vmem:[%s9719_s4 + $0x528] sm:$0xff]  ;;  %v6444_v11 = vld [vmem:[%s9719_s4 + $0x4a0] sm:$0xff]  ;;  %v295_v43 = vld [vmem:[%s9720_s0 + $0x238] sm:$0xff] }
  0x70   :  { %633 = vmatmul.mubr.f32.gmra.mxu0 %v293_v27  ;;  %9831 = vst [vmem:[#allocation33_spill] sm:$0xff] %v6444_v11  ;;  %3800 = vmatprep.subr.mxu0 %v6424_v63  ;;  %v203_v37 = vld [vmem:[%s9719_s4 + $0x5a0] sm:$0xff]  ;;  %v307_v27 = vld [vmem:[%s9720_s0 + $0x298] sm:$0x3] }
  0x71   :  { %3853 = vmatprep.subr.mxu1 %v204_v51  ;;  %732 = vmatprep.mubr.f32.mxu1 %v296_v55  ;;  %v6460_v63 = vld [vmem:[%s9719_s4 + $0x420] sm:$0xff]  ;;  %v306_v55 = vld [vmem:[%s9720_s0 + $0x290] sm:$0x3] }
  0x72   :  { %3801 = vmatpush3.msra.mxu0 %v6436_v5  ;;  %9832 = vst [vmem:[#allocation34_spill] sm:$0xff] %v6460_v63  ;;  %3854 = vmatpush3.msra.mxu1 %v188_v23  ;;  %v187_v51 = vld [vmem:[%s9719_s4 + $0x520] sm:$0xff]  ;;  %v6472_v5 = vld [vmem:[%s9719_s4 + $0x498] sm:$0xff] }
  0x73   :  { %3802 = vmatprep.subr.mxu0 %v6444_v11  ;;  %733 = vmatmul.mubr.f32.gmra.mxu1 %v295_v43  ;;  %9833 = vst [vmem:[#allocation35_spill] sm:$0xff] %v6472_v5  ;;  %v202_v23 = vld [vmem:[%s9719_s4 + $0x598] sm:$0xff]  ;;  %v309_v11 = vld [vmem:[%s9720_s0 + $0x2a8] sm:$0x3] }
  0x74   :  { %3855 = vmatprep.subr.mxu1 %v203_v37  ;;  %637 = vmatprep.mubr.f32.mxu0 %v307_v27  ;;  %v6484_v43 = vld [vmem:[%s9719_s4 + $0x418] sm:$0xff]  ;;  %v6492_v27 = vld [vmem:[%s9719_s4 + $0x490] sm:$0xff] }
  0x75   :  { %3803 = vmatpush3.msra.mxu0 %v6460_v63  ;;  %9834 = vst [vmem:[#allocation36_spill] sm:$0xff] %v6484_v43  ;;  %3856 = vmatpush3.msra.mxu1 %v187_v51  ;;  %v186_v37 = vld [vmem:[%s9719_s4 + $0x518] sm:$0xff]  ;;  %9835 = vst [vmem:[#allocation37_spill] sm:$0xff] %v6492_v27  ;;  %v308_v63 = vld [vmem:[%s9720_s0 + $0x2a0] sm:$0x3] }
  0x76   :  { %638 = vmatmul.mubr.f32.gmra.mxu0 %v306_v55  ;;  %3804 = vmatprep.subr.mxu0 %v6472_v5  ;;  %v201_v51 = vld [vmem:[%s9719_s4 + $0x590] sm:$0xff]  ;;  %v6514_v5 = vld [vmem:[%s9719_s4 + $0x488] sm:$0xff] }
  0x77   :  { %3857 = vmatprep.subr.mxu1 %v202_v23  ;;  %737 = vmatprep.mubr.f32.mxu1 %v309_v11  ;;  %v6505_v55 = vld [vmem:[%s9719_s4 + $0x410] sm:$0xff]  ;;  %9837 = vst [vmem:[#allocation39_spill] sm:$0xff] %v6514_v5  ;;  %v200_v11 = vld [vmem:[%s9719_s4 + $0x588] sm:$0xff] }
  0x78   :  { %3805 = vmatpush3.msra.mxu0 %v6484_v43  ;;  %9836 = vst [vmem:[#allocation38_spill] sm:$0xff] %v6505_v55  ;;  %v185_v23 = vld [vmem:[%s9719_s4 + $0x510] sm:$0xff]  ;;  %3858 = vmatpush3.msra.mxu1 %v186_v37  ;;  %v6522_v43 = vld [vmem:[%s9719_s4 + $0x408] sm:$0xff] }
  0x79   :  { %3806 = vmatprep.subr.mxu0 %v6492_v27  ;;  %738 = vmatmul.mubr.f32.gmra.mxu1 %v308_v63  ;;  %9838 = vst [vmem:[#allocation40_spill] sm:$0xff] %v6522_v43  ;;  %v184_v37 = vld [vmem:[%s9719_s4 + $0x508] sm:$0xff]  ;;  %v6531_v27 = vld [vmem:[%s9719_s4 + $0x480] sm:$0xff] }
  0x7a   :  { %3859 = vmatprep.subr.mxu1 %v201_v51  ;;  %3807 = vmatpush3.msra.mxu0 %v6505_v55  ;;  %v199_v63 = vld [vmem:[%s9719_s4 + $0x580] sm:$0xff] }
  0x7b   :  { %3860 = vmatpush3.msra.mxu1 %v185_v23  ;;  %3808 = vmatprep.subr.mxu0 %v6514_v5  ;;  %v6540_v51 = vld [vmem:[%s9719_s4 + $0x400] sm:$0xff]  ;;  %v233_v23 = vld [vmem:[%s9720_s0 + $0x48] sm:$0xff]  ;;  %v235_v5 = vld [vmem:[%s9720_s0 + $0x58] sm:$0xff] }
  0x7c   :  { %3861 = vmatprep.subr.mxu1 %v200_v11  ;;  %9839 = vst [vmem:[#allocation41_spill] sm:$0xff] %v6540_v51  ;;  %3809 = vmatpush3.msra.mxu0 %v6522_v43  ;;  %v183_v55 = vld [vmem:[%s9719_s4 + $0x500] sm:$0xff]  ;;  %v6563_v43 = vld [vmem:[%s9719_s4 + $0x638] sm:$0xff] }
  0x7d   :  { %3862 = vmatpush3.msra.mxu1 %v184_v37  ;;  %v232_v11 = vld [vmem:[%s9720_s0 + $0x40] sm:$0xff]  ;;  %3810 = vmatprep.subr.mxu0 %v6531_v27  ;;  %v234_v37 = vld [vmem:[%s9720_s0 + $0x50] sm:$0xff] }
  0x7e   :  { %3863 = vmatprep.subr.mxu1 %v199_v63  ;;  %3811 = vmatpush3.msra.mxu0 %v6540_v51  ;;  %v9766_v63 = vmov 0.0   ;;  %v246_v51 = vld [vmem:[%s9720_s0 + $0xb0] sm:$0xff] }
  0x7f   :  { %807 = vmatprep.mubr.f32.mxu0 %v233_v23  ;;  %3864 = vmatpush3.msra.mxu1 %v183_v55  ;;  %v245_v55 = vld [vmem:[%s9720_s0 + $0xa8] sm:$0xff]  ;;  %v259_v23 = vld [vmem:[%s9720_s0 + $0x118] sm:$0xff] }
  0x80   :  { %808 = vmatmul.mubr.f32.vlgmr.msra.gmra.mxu0 %v232_v11  ;;  %907 = vmatprep.mubr.f32.mxu1 %v235_v5  ;;  %v248_v5 = vld [vmem:[%s9720_s0 + $0xc0] sm:$0xff]  ;;  %v6643_v11 = vld [vmem:[%s9719_s4 + $0x618] sm:$0xff] }
  0x81   :  { %4900 = vmatprep.subr.mxu0 %v9766_v63  ;;  %3901 = vmatprep.subr.mxu1 %v5519_v0  ;;  %v6582_v0 = vld [vmem:[%s9719_s4 + $0x630] sm:$0xff] }
  0x82   :  { %908 = vmatmul.mubr.f32.vlgmr.msra.gmra.mxu1 %v234_v37  ;;  %4901 = vmatpush3.msra.mxu0 %v6563_v43  ;;  %v6666_v37 = vld [vmem:[%s9719_s4 + $0x610] sm:$0xff] }
  0x83   :  { %3902 = vmatpush3.msra.mxu1 %v5527_v2  ;;  %812 = vmatprep.mubr.f32.mxu0 %v246_v51  ;;  %v247_v2 = vld [vmem:[%s9720_s0 + $0xb8] sm:$0xff]  ;;  %v274_v51 = vld [vmem:[%s9720_s0 + $0x190] sm:$0xff] }
  0x84   :  { %3903 = vmatprep.subr.mxu1 %v5536_v4  ;;  %813 = vmatmul.mubr.f32.gmra.mxu0 %v245_v55  ;;  %v258_v4 = vld [vmem:[%s9720_s0 + $0x110] sm:$0xff]  ;;  %v6685_v55 = vld [vmem:[%s9719_s4 + $0x608] sm:$0xff] }
  0x85   :  { %3904 = vmatpush3.msra.mxu1 %v5545_v6  ;;  %4902 = vmatprep.subr.mxu0 %v9766_v63  ;;  %v6602_v6 = vld [vmem:[%s9719_s4 + $0x628] sm:$0xff] }
  0x86   :  { %3905 = vmatprep.subr.mxu1 %v5553_v8  ;;  %912 = vmatprep.mubr.f32.mxu1 %v248_v5  ;;  %v261_v8 = vld [vmem:[%s9720_s0 + $0x128] sm:$0xff]  ;;  %v6708_v5 = vld [vmem:[%s9719_s4 + $0x600] sm:$0xff] }
  0x87   :  { %4903 = vmatpush3.msra.mxu0 %v6582_v0  ;;  %3906 = vmatpush3.msra.mxu1 %v5562_v10  ;;  %v272_v10 = vld [vmem:[%s9720_s0 + $0x180] sm:$0xff] }
  0x88   :  { %817 = vmatprep.mubr.f32.mxu0 %v259_v23  ;;  %913 = vmatmul.mubr.f32.gmra.mxu1 %v247_v2  ;;  %v6771_v23 = vld [vmem:[%s9719_s4 + $0x168] sm:$0xff]  ;;  %v6785_v2 = vld [vmem:[%s9719_s4 + $0x160] sm:$0xff] }
  0x89   :  { %3907 = vmatprep.subr.mxu1 %v5571_v12  ;;  %4904 = vmatprep.subr.mxu0 %v9766_v63  ;;  %v260_v12 = vld [vmem:[%s9720_s0 + $0x120] sm:$0xff] }
  0x8a   :  { %3908 = vmatpush3.msra.mxu1 %v5580_v14  ;;  %818 = vmatmul.mubr.f32.gmra.mxu0 %v258_v4  ;;  %v271_v14 = vld [vmem:[%s9720_s0 + $0x178] sm:$0xff]  ;;  %v1064_v4 = vld [vmem:[%s9721_s1 + $0x70] sm:$0xff] }
  0x8b   :  { %3909 = vmatprep.subr.mxu1 %v5589_v16  ;;  %4905 = vmatpush3.msra.mxu0 %v6602_v6  ;;  %v6625_v16 = vld [vmem:[%s9719_s4 + $0x620] sm:$0xff] }
  0x8c   :  { %917 = vmatprep.mubr.f32.mxu1 %v261_v8  ;;  %3910 = vmatpush3.msra.mxu1 %v5598_v18  ;;  %v273_v18 = vld [vmem:[%s9720_s0 + $0x188] sm:$0xff] }
  0x8d   :  { %822 = vmatprep.mubr.f32.mxu0 %v272_v10  ;;  %918 = vmatmul.mubr.f32.gmra.mxu1 %v260_v12  ;;  %v1063_v8 = vld [vmem:[%s9721_s1 + $0x68] sm:$0xff]  ;;  %v6852_v12 = vld [vmem:[%s9719_s4 + $0x1c0] sm:$0xff] }
  0x8e   :  { %3911 = vmatprep.subr.mxu1 %v5607_v20  ;;  %4906 = vmatprep.subr.mxu0 %v9766_v63  ;;  %v285_v20 = vld [vmem:[%s9720_s0 + $0x1e8] sm:$0xff] }
  0x8f   :  { %3912 = vmatpush3.msra.mxu1 %v5616_v22  ;;  %823 = vmatmul.mubr.f32.gmra.mxu0 %v271_v14  ;;  %v284_v22 = vld [vmem:[%s9720_s0 + $0x1e0] sm:$0xff]  ;;  %v6845_v10 = vld [vmem:[%s9719_s4 + $0x148] sm:$0xff] }
  0x90   :  { %3913 = vmatprep.subr.mxu1 %v5625_v24  ;;  %4907 = vmatpush3.msra.mxu0 %v6625_v16  ;;  %v287_v24 = vld [vmem:[%s9720_s0 + $0x1f8] sm:$0xff]  ;;  %v6862_v14 = vld [vmem:[%s9719_s4 + $0x140] sm:$0xff] }
  0x91   :  { %922 = vmatprep.mubr.f32.mxu1 %v274_v51  ;;  %3914 = vmatpush3.msra.mxu1 %v5634_v26  ;;  %v286_v26 = vld [vmem:[%s9720_s0 + $0x1f0] sm:$0xff]  ;;  %v6877_v51 = vld [vmem:[%s9719_s4 + $0x1b8] sm:$0xff] }
  0x92   :  { %4908 = vmatprep.subr.mxu0 %v9766_v63  ;;  %923 = vmatmul.mubr.f32.gmra.mxu1 %v273_v18  ;;  %v6892_v18 = vld [vmem:[%s9719_s4 + $0x1b0] sm:$0xff] }
  0x93   :  { %3915 = vmatprep.subr.mxu1 %v5643_v28  ;;  %827 = vmatprep.mubr.f32.mxu0 %v285_v20  ;;  %v298_v28 = vld [vmem:[%s9720_s0 + $0x250] sm:$0xff] }
  0x94   :  { %4909 = vmatpush3.msra.mxu0 %v6643_v11  ;;  %3916 = vmatpush3.msra.mxu1 %v5652_v30  ;;  %v297_v30 = vld [vmem:[%s9720_s0 + $0x248] sm:$0xff]  ;;  %v6902_v20 = vld [vmem:[%s9719_s4 + $0x130] sm:$0xff] }
  0x95   :  { %828 = vmatmul.mubr.f32.gmra.mxu0 %v284_v22  ;;  %3917 = vmatprep.subr.mxu1 %v5661_v32  ;;  %v300_v32 = vld [vmem:[%s9720_s0 + $0x260] sm:$0xff]  ;;  %v6917_v22 = vld [vmem:[%s9719_s4 + $0x1a8] sm:$0xff] }
  0x96   :  { %927 = vmatprep.mubr.f32.mxu1 %v287_v24  ;;  %3918 = vmatpush3.msra.mxu1 %v5670_v34  ;;  %v299_v34 = vld [vmem:[%s9720_s0 + $0x258] sm:$0xff]  ;;  %v6932_v24 = vld [vmem:[%s9719_s4 + $0x1a0] sm:$0xff] }
  0x97   :  { %4910 = vmatprep.subr.mxu0 %v9766_v63  ;;  %928 = vmatmul.mubr.f32.gmra.mxu1 %v286_v26  ;;  %v6942_v26 = vld [vmem:[%s9719_s4 + $0x120] sm:$0xff] }
  0x98   :  { %3919 = vmatprep.subr.mxu1 %v5679_v36  ;;  %832 = vmatprep.mubr.f32.mxu0 %v298_v28  ;;  %v311_v36 = vld [vmem:[%s9720_s0 + $0x2b8] sm:$0x3] }
  0x99   :  { %4911 = vmatpush3.msra.mxu0 %v6666_v37  ;;  %3920 = vmatpush3.msra.mxu1 %v5688_v38  ;;  %v310_v38 = vld [vmem:[%s9720_s0 + $0x2b0] sm:$0x3]  ;;  %v6957_v28 = vld [vmem:[%s9719_s4 + $0x198] sm:$0xff] }
  0x9a   :  { %833 = vmatmul.mubr.f32.gmra.mxu0 %v297_v30  ;;  %3921 = vmatprep.subr.mxu1 %v5697_v40  ;;  %v313_v40 = vld [vmem:[%s9720_s0 + $0x2c8] sm:$0x3]  ;;  %v1116_v30 = vld [vmem:[%s9721_s1 + $0x210] sm:$0xff] }
  0x9b   :  { %932 = vmatprep.mubr.f32.mxu1 %v300_v32  ;;  %4912 = vmatprep.subr.mxu0 %v9766_v63  ;;  %v6982_v32 = vld [vmem:[%s9719_s4 + $0x110] sm:$0xff] }
  0x9c   :  { %3922 = vmatpush3.msra.mxu1 %v5706_v42  ;;  %4913 = vmatpush3.msra.mxu0 %v6685_v55  ;;  %v312_v42 = vld [vmem:[%s9720_s0 + $0x2c0] sm:$0x3] }
  0x9d   :  { %933 = vmatmul.mubr.f32.gmra.mxu1 %v299_v34  ;;  %3923 = vmatprep.subr.mxu1 %v5715_v44  ;;  %v236_v44 = vld [vmem:[%s9720_s0 + $0x60] sm:$0xff]  ;;  %v6992_v34 = vld [vmem:[%s9719_s4 + $0x188] sm:$0xff] }
  0x9e   :  { %837 = vmatprep.mubr.f32.mxu0 %v311_v36  ;;  %3924 = vmatpush3.msra.mxu1 %v5724_v46  ;;  %v6724_v46 = vld [vmem:[%s9719_s4 + $0x1f8] sm:$0xff]  ;;  %v6999_v36 = vld [vmem:[%s9719_s4 + $0x108] sm:$0xff] }
  0x9f   :  { %838 = vmatmul.mubr.f32.gmra.mxu0 %v310_v38  ;;  %3925 = vmatprep.subr.mxu1 %v5733_v48  ;;  %v6732_v48 = vld [vmem:[%s9719_s4 + $0x178] sm:$0xff]  ;;  %v9841_v38 = vld [vmem:[#allocation3_spill] sm:$0xff] }
  0xa0   :  { %937 = vmatprep.mubr.f32.mxu1 %v313_v40  ;;  %4914 = vmatprep.subr.mxu0 %v9766_v63  ;;  %v7009_v40 = vld [vmem:[%s9719_s4 + $0x180] sm:$0xff] }
  0xa1   :  { %3926 = vmatpush3.msra.mxu1 %v5742_v50  ;;  %4915 = vmatpush3.msra.mxu0 %v6708_v5  ;;  %v6739_v50 = vld [vmem:[%s9719_s4 + $0x1f0] sm:$0xff] }
  0xa2   :  { %938 = vmatmul.mubr.f32.gmra.mxu1 %v312_v42  ;;  %3927 = vmatprep.subr.mxu1 %v5751_v52  ;;  %v249_v52 = vld [vmem:[%s9720_s0 + $0xc8] sm:$0xff]  ;;  %v1129_v42 = vld [vmem:[%s9721_s1 + $0x278] sm:$0x3] }
  0xa3   :  { %4916 = vmatprep.mubr.msk.f32.mxu0 %vm5480_vm1, %v9766_v63  ;;  %3928 = vmatpush3.msra.mxu1 %v5760_v54  ;;  %v1051_v54 = vld [vmem:[%s9721_s1 + $0x8] sm:$0xff] }
  0xa4   :  { %3954 = vmatprep.subr.mxu0 %v6724_v46  ;;  %4917 = vmatmul.mubr.msk.f32.vlgmr.msra.gmra.mxu0 %vm321_vm0, %v236_v44  ;;  %v1052_v44 = vld [vmem:[%s9721_s1 + $0x10] sm:$0xff] }
  0xa5   :  { %3929 = vmatprep.subr.mxu1 %v5769_v56  ;;  %3955 = vmatpush3.msra.mxu0 %v6732_v48  ;;  %v6752_v56 = vld [vmem:[%s9719_s4 + $0x170] sm:$0xff] }
  0xa6   :  { %3930 = vmatpush3.msra.mxu1 %v5778_v58  ;;  %3956 = vmatprep.subr.mxu0 %v6739_v50  ;;  %v6761_v58 = vld [vmem:[%s9719_s4 + $0x1e8] sm:$0xff] }
  0xa7   :  { %3931 = vmatprep.subr.mxu1 %v5787_v60  ;;  %3957 = vmatpush3.msra.mxu0 %v6752_v56  ;;  %v1050_v60 = vld [vmem:[%s9721_s1] sm:$0xff] }
  0xa8   :  { %4919 = vmatprep.mubr.msk.f32.mxu0 %vm5480_vm1, %v9766_v63  ;;  %3932 = vmatpush3.msra.mxu1 %v5796_v62  ;;  %v6778_v62 = vld [vmem:[%s9719_s4 + $0x1e0] sm:$0xff] }
  0xa9   :  { %3958 = vmatprep.subr.mxu0 %v6761_v58  ;;  %4920 = vmatmul.mubr.msk.f32.gmra.mxu0 %vm321_vm0, %v249_v52  ;;  %v9842_v52 = vld [vmem:[#allocation4_spill] sm:$0xff] }
  0xaa   :  { %1226 = vmatprep.mubr.f32.mxu1 %v1051_v54  ;;  %3959 = vmatpush3.msra.mxu0 %v6771_v23  ;;  %v7022_v54 = vld [vmem:[%s9719_s4 + $0x100] sm:$0xff] }
  0xab   :  { %4007 = vmatprep.subr.mxu1 %v5815_v7  ;;  %1227 = vmatmul.mubr.f32.vlgmr.msra.gmra.mxu1 %v1050_v60  ;;  %v262_v7 = vld [vmem:[%s9720_s0 + $0x130] sm:$0xff]  ;;  %v9843_v60 = vld [vmem:[#allocation5_spill] sm:$0xff] }
  0xac   :  { %3960 = vmatprep.subr.mxu0 %v6778_v62  ;;  %4008 = vmatpush3.msra.mxu1 %v5827_v13  ;;  %v6797_v13 = vld [vmem:[%s9719_s4 + $0x1d8] sm:$0xff] }
  0xad   :  { %3961 = vmatpush3.msra.mxu0 %v6785_v2  ;;  %4009 = vmatprep.subr.mxu1 %v5836_v17  ;;  %v6806_v17 = vld [vmem:[%s9719_s4 + $0x158] sm:$0xff] }
  0xae   :  { %4922 = vmatprep.mubr.msk.f32.mxu0 %vm5480_vm1, %v9766_v63  ;;  %3962 = vmatprep.subr.mxu0 %v6797_v13 }
  0xaf   :  { %4010 = vmatpush3.msra.mxu1 %v5844_v21  ;;  %4923 = vmatmul.mubr.msk.f32.gmra.mxu0 %vm321_vm0, %v262_v7  ;;  %v6816_v21 = vld [vmem:[%s9719_s4 + $0x1d0] sm:$0xff] }
  0xb0   :  { %4011 = vmatprep.subr.mxu1 %v5853_v25  ;;  %3963 = vmatpush3.msra.mxu0 %v6806_v17  ;;  %v275_v25 = vld [vmem:[%s9720_s0 + $0x198] sm:$0xff]  ;;  %v1128_v7 = vld [vmem:[%s9721_s1 + $0x270] sm:$0x3] }
  0xb1   :  { %4012 = vmatpush3.msra.mxu1 %v5862_v29  ;;  %3964 = vmatprep.subr.mxu0 %v6816_v21  ;;  %v6826_v29 = vld [vmem:[%s9719_s4 + $0x150] sm:$0xff] }
  0xb2   :  { %4013 = vmatprep.subr.mxu1 %v5874_v35  ;;  %3965 = vmatpush3.msra.mxu0 %v6826_v29  ;;  %v6837_v35 = vld [vmem:[%s9719_s4 + $0x1c8] sm:$0xff] }
  0xb3   :  { %4925 = vmatprep.mubr.msk.f32.mxu0 %vm5480_vm1, %v9766_v63  ;;  %1231 = vmatprep.mubr.f32.mxu1 %v1064_v4  ;;  %v9844_v4 = vld [vmem:[#allocation6_spill] sm:$0xff] }
  0xb4   :  { %3966 = vmatprep.subr.mxu0 %v6837_v35  ;;  %4014 = vmatpush3.msra.mxu1 %v5887_v41  ;;  %v1077_v41 = vld [vmem:[%s9721_s1 + $0xd8] sm:$0xff] }
  0xb5   :  { %4926 = vmatmul.mubr.msk.f32.gmra.mxu0 %vm321_vm0, %v275_v25  ;;  %1232 = vmatmul.mubr.f32.gmra.mxu1 %v1063_v8  ;;  %v7033_v25 = vld [vmem:[%s9719_s4 + $0x3f8] sm:$0xff]  ;;  %v1066_v8 = vld [vmem:[%s9721_s1 + $0x80] sm:$0xff] }
  0xb6   :  { %3967 = vmatpush3.msra.mxu0 %v6845_v10  ;;  %4015 = vmatprep.subr.mxu1 %v5899_v47  ;;  %v288_v47 = vld [vmem:[%s9720_s0 + $0x200] sm:$0xff] }
  0xb7   :  { %3968 = vmatprep.subr.mxu0 %v6852_v12  ;;  %4016 = vmatpush3.msra.mxu1 %v5911_v53  ;;  %v1076_v53 = vld [vmem:[%s9721_s1 + $0xd0] sm:$0xff] }
  0xb8   :  { %3969 = vmatpush3.msra.mxu0 %v6862_v14  ;;  %4017 = vmatprep.subr.mxu1 %v5923_v59  ;;  %v6885_v59 = vld [vmem:[%s9719_s4 + $0x138] sm:$0xff] }
  0xb9   :  { %4928 = vmatprep.mubr.msk.f32.mxu0 %vm5480_vm1, %v9766_v63  ;;  %1236 = vmatprep.mubr.f32.mxu1 %v1077_v41  ;;  %v9845_v41 = vld [vmem:[#allocation7_spill] sm:$0xff] }
  0xba   :  { %3970 = vmatprep.subr.mxu0 %v6877_v51  ;;  %4018 = vmatpush3.msra.mxu1 %v5935_v1  ;;  %v1090_v1 = vld [vmem:[%s9721_s1 + $0x140] sm:$0xff] }
  0xbb   :  { %4929 = vmatmul.mubr.msk.f32.gmra.mxu0 %vm321_vm0, %v288_v47  ;;  %1237 = vmatmul.mubr.f32.gmra.mxu1 %v1076_v53  ;;  %v7043_v47 = vld [vmem:[%s9719_s4 + $0x378] sm:$0xff]  ;;  %v9846_v53 = vld [vmem:[#allocation8_spill] sm:$0xff] }
  0xbc   :  { %3971 = vmatpush3.msra.mxu0 %v6885_v59  ;;  %4019 = vmatprep.subr.mxu1 %v5947_v9  ;;  %v301_v9 = vld [vmem:[%s9720_s0 + $0x268] sm:$0xff] }
  0xbd   :  { %3972 = vmatprep.subr.mxu0 %v6892_v18  ;;  %4020 = vmatpush3.msra.mxu1 %v5959_v19  ;;  %v1089_v19 = vld [vmem:[%s9721_s1 + $0x138] sm:$0xff] }
  0xbe   :  { %3973 = vmatpush3.msra.mxu0 %v6902_v20  ;;  %4021 = vmatprep.subr.mxu1 %v5971_v31  ;;  %v6925_v31 = vld [vmem:[%s9719_s4 + $0x128] sm:$0xff] }
  0xbf   :  { %4931 = vmatprep.mubr.msk.f32.mxu0 %vm5480_vm1, %v9766_v63  ;;  %1241 = vmatprep.mubr.f32.mxu1 %v1090_v1  ;;  %v1065_v1 = vld [vmem:[%s9721_s1 + $0x78] sm:$0xff] }
  0xc0   :  { %3974 = vmatprep.subr.mxu0 %v6917_v22  ;;  %4022 = vmatpush3.msra.mxu1 %v5983_v39  ;;  %v1103_v39 = vld [vmem:[%s9721_s1 + $0x1a8] sm:$0xff] }
  0xc1   :  { %4932 = vmatmul.mubr.msk.f32.gmra.mxu0 %vm321_vm0, %v301_v9  ;;  %1242 = vmatmul.mubr.f32.gmra.mxu1 %v1089_v19  ;;  %v7053_v9 = vld [vmem:[%s9719_s4 + $0x3f0] sm:$0xff]  ;;  %v1055_v19 = vld [vmem:[%s9721_s1 + $0x28] sm:$0xff] }
  0xc2   :  { %3975 = vmatpush3.msra.mxu0 %v6925_v31  ;;  %4023 = vmatprep.subr.mxu1 %v5995_v49  ;;  %v314_v49 = vld [vmem:[%s9720_s0 + $0x2d0] sm:$0x3] }
  0xc3   :  { %3976 = vmatprep.subr.mxu0 %v6932_v24  ;;  %4024 = vmatpush3.msra.mxu1 %v6007_v57  ;;  %v1102_v57 = vld [vmem:[%s9721_s1 + $0x1a0] sm:$0xff] }
  0xc4   :  { %3977 = vmatpush3.msra.mxu0 %v6942_v26  ;;  %4025 = vmatprep.subr.mxu1 %v6019_v3  ;;  %v6965_v3 = vld [vmem:[%s9719_s4 + $0x118] sm:$0xff] }
  0xc5   :  { %4934 = vmatprep.mubr.msk.f32.mxu0 %vm5480_vm1, %v9766_v63  ;;  %1246 = vmatprep.mubr.f32.mxu1 %v1103_v39  ;;  %v9847_v39 = vld [vmem:[#allocation9_spill] sm:$0xff] }
  0xc6   :  { %3978 = vmatprep.subr.mxu0 %v6957_v28  ;;  %4026 = vmatpush3.msra.mxu1 %v6031_v15  ;;  %v6975_v15 = vld [vmem:[%s9719_s4 + $0x190] sm:$0xff]  ;;  %v1093_v63 = vld [vmem:[%s9721_s1 + $0x158] sm:$0xff] }
  0xc7   :  { %4935 = vmatmul.mubr.msk.f32.gmra.mxu0 %vm321_vm0, %v314_v49  ;;  %1247 = vmatmul.mubr.f32.gmra.mxu1 %v1102_v57  ;;  %v7063_v49 = vld [vmem:[%s9719_s4 + $0x370] sm:$0xff]  ;;  %v1054_v57 = vld [vmem:[%s9721_s1 + $0x20] sm:$0xff] }
  0xc8   :  { %3979 = vmatpush3.msra.mxu0 %v6965_v3  ;;  %4027 = vmatprep.subr.mxu1 %v6043_v33  ;;  %v1115_v33 = vld [vmem:[%s9721_s1 + $0x208] sm:$0xff] }
  0xc9   :  { %3980 = vmatprep.subr.mxu0 %v6975_v15  ;;  %4028 = vmatpush3.msra.mxu1 %v6055_v45  ;;  %v9840_v45 = vld [vmem:[#allocation2_spill] sm:$0xff] }
  0xca   :  { %3981 = vmatpush3.msra.mxu0 %v6982_v32  ;;  %4029 = vmatprep.subr.mxu1 %v6067_v61  ;;  %v1053_v61 = vld [vmem:[%s9721_s1 + $0x18] sm:$0xff] }
  0xcb   :  { %1251 = vmatprep.mubr.f32.mxu1 %v1116_v30  ;;  %3982 = vmatprep.subr.mxu0 %v6992_v34  ;;  %v9848_v30 = vld [vmem:[#allocation10_spill] sm:$0xff] }
  0xcc   :  { %4030 = vmatpush3.msra.mxu1 %v9840_v45  ;;  %3983 = vmatpush3.msra.mxu0 %v6999_v36  ;;  %v1079_v45 = vld [vmem:[%s9721_s1 + $0xe8] sm:$0xff] }
  0xcd   :  { %1252 = vmatmul.mubr.f32.gmra.mxu1 %v1115_v33  ;;  %4031 = vmatprep.subr.mxu1 %v9841_v38  ;;  %v7073_v33 = vld [vmem:[%s9719_s4 + $0x3e8] sm:$0xff] }
  0xce   :  { %3984 = vmatprep.subr.mxu0 %v7009_v40  ;;  %4032 = vmatpush3.msra.mxu1 %v9842_v52  ;;  %v9850_v38 = vld [vmem:[#allocation11_spill] sm:$0xff]  ;;  %v1068_v52 = vld [vmem:[%s9721_s1 + $0x90] sm:$0xff] }
  0xcf   :  { %3985 = vmatpush3.msra.mxu0 %v7022_v54  ;;  %1326 = vmatprep.mubr.f32.mxu0 %v1053_v61  ;;  %v7082_v61 = vld [vmem:[%s9719_s4 + $0x368] sm:$0xff] }
  0xd0   :  { %4033 = vmatprep.subr.mxu1 %v9843_v60  ;;  %1256 = vmatprep.mubr.f32.mxu1 %v1129_v42  ;;  %9849 = vst [vmem:[#allocation2_spill] sm:$0xff] %v7082_v61  ;;  %v7089_v42 = vld [vmem:[%s9719_s4 + $0x3e0] sm:$0xff]  ;;  %v9852_v60 = vld [vmem:[#allocation12_spill] sm:$0xff] }
  0xd1   :  { %1327 = vmatmul.mubr.f32.vlgmr.msra.gmra.mxu0 %v1052_v44  ;;  %4034 = vmatpush3.msra.mxu1 %v9844_v4  ;;  %9851 = vst [vmem:[#allocation3_spill] sm:$0xff] %v7089_v42  ;;  %v1078_v44 = vld [vmem:[%s9721_s1 + $0xe0] sm:$0xff]  ;;  %v9854_v4 = vld [vmem:[#allocation13_spill] sm:$0xff] }
  0xd2   :  { %4060 = vmatprep.subr.mxu0 %v7033_v25  ;;  %1257 = vmatmul.mubr.f32.gmra.mxu1 %v1128_v7  ;;  %v7102_v7 = vld [vmem:[%s9719_s4 + $0x360] sm:$0xff] }
  0xd3   :  { %4035 = vmatprep.subr.mxu1 %v9845_v41  ;;  %4061 = vmatpush3.msra.mxu0 %v7043_v47  ;;  %9853 = vst [vmem:[#allocation4_spill] sm:$0xff] %v7102_v7  ;;  %v7112_v41 = vld [vmem:[%s9719_s4 + $0x3d8] sm:$0xff] }
  0xd4   :  { %4036 = vmatpush3.msra.mxu1 %v9846_v53  ;;  %4062 = vmatprep.subr.mxu0 %v7053_v9  ;;  %9855 = vst [vmem:[#allocation5_spill] sm:$0xff] %v7112_v41  ;;  %v9856_v53 = vld [vmem:[#allocation14_spill] sm:$0xff] }
  0xd5   :  { %1331 = vmatprep.mubr.f32.mxu0 %v1066_v8  ;;  %4037 = vmatprep.subr.mxu1 %v9847_v39  ;;  %v1067_v8 = vld [vmem:[%s9721_s1 + $0x88] sm:$0xff] }
  0xd6   :  { %4063 = vmatpush3.msra.mxu0 %v7063_v49  ;;  %4038 = vmatpush3.msra.mxu1 %v9848_v30  ;;  %v9858_v39 = vld [vmem:[#allocation15_spill] sm:$0xff] }
  0xd7   :  { %1332 = vmatmul.mubr.f32.gmra.mxu0 %v1065_v1  ;;  %1426 = vmatprep.mubr.f32.mxu1 %v1055_v19  ;;  %v1092_v1 = vld [vmem:[%s9721_s1 + $0x150] sm:$0xff]  ;;  %v7122_v19 = vld [vmem:[%s9719_s4 + $0x358] sm:$0xff]  ;;  %v1091_v30 = vld [vmem:[%s9721_s1 + $0x148] sm:$0xff] }
  0xd8   :  { %4064 = vmatprep.subr.mxu0 %v7073_v33  ;;  %1427 = vmatmul.mubr.f32.vlgmr.msra.gmra.mxu1 %v1054_v57  ;;  %9857 = vst [vmem:[#allocation6_spill] sm:$0xff] %v7122_v19  ;;  %v7129_v57 = vld [vmem:[%s9719_s4 + $0x3d0] sm:$0xff] }
  0xd9   :  { %4065 = vmatpush3.msra.mxu0 %v7082_v61  ;;  %4113 = vmatprep.subr.mxu1 %v9850_v38  ;;  %9859 = vst [vmem:[#allocation7_spill] sm:$0xff] %v7129_v57  ;;  %v9860_v38 = vld [vmem:[#allocation16_spill] sm:$0xff] }
  0xda   :  { %4066 = vmatprep.subr.mxu0 %v7089_v42  ;;  %4114 = vmatpush3.msra.mxu1 %v9852_v60  ;;  %v1080_v60 = vld [vmem:[%s9721_s1 + $0xf0] sm:$0xff]  ;;  %v7341_v42 = vld [vmem:[%s9719_s4 + $0x5f8] sm:$0xff] }
  0xdb   :  { %1336 = vmatprep.mubr.f32.mxu0 %v1079_v45  ;;  %4067 = vmatpush3.msra.mxu0 %v7102_v7  ;;  %v1081_v45 = vld [vmem:[%s9721_s1 + $0xf8] sm:$0xff] }
  0xdc   :  { %4115 = vmatprep.subr.mxu1 %v9854_v4  ;;  %1337 = vmatmul.mubr.f32.gmra.mxu0 %v1078_v44  ;;  %v5093_v44 = vld [vmem:[%s9719_s4 + $0x350] sm:$0xff]  ;;  %v5094_v4 = vld [vmem:[%s9719_s4 + $0x3c8] sm:$0xff] }
  0xdd   :  { %1431 = vmatprep.mubr.f32.mxu1 %v1068_v52  ;;  %4068 = vmatprep.subr.mxu0 %v7112_v41  ;;  %v9861_v52 = vld [vmem:[#allocation17_spill] sm:$0xff]  ;;  %v1119_v41 = vld [vmem:[%s9721_s1 + $0x228] sm:$0xff] }
  0xde   :  { %4116 = vmatpush3.msra.mxu1 %v9856_v53  ;;  %4069 = vmatpush3.msra.mxu0 %v7122_v19  ;;  %v1105_v53 = vld [vmem:[%s9721_s1 + $0x1b8] sm:$0xff] }
  0xdf   :  { %1432 = vmatmul.mubr.f32.gmra.mxu1 %v1067_v8  ;;  %4117 = vmatprep.subr.mxu1 %v9858_v39  ;;  %v9862_v8 = vld [vmem:[#allocation18_spill] sm:$0xff]  ;;  %v5095_v39 = vld [vmem:[%s9719_s4 + $0x348] sm:$0xff]  ;;  %v9881_v19 = vld [vmem:[#allocation29_spill] sm:$0xff] }
  0xe0   :  { %4070 = vmatprep.subr.mxu0 %v7129_v57  ;;  %4118 = vmatpush3.msra.mxu1 %v9860_v38  ;;  %v1104_v38 = vld [vmem:[%s9721_s1 + $0x1b0] sm:$0xff] }
  0xe1   :  { %1341 = vmatprep.mubr.f32.mxu0 %v1092_v1  ;;  %4071 = vmatpush3.msra.mxu0 %v5093_v44  ;;  %v1094_v44 = vld [vmem:[%s9721_s1 + $0x160] sm:$0xff] }
  0xe2   :  { %4119 = vmatprep.subr.mxu1 %v9861_v52  ;;  %1342 = vmatmul.mubr.f32.gmra.mxu0 %v1091_v30  ;;  %v9863_v30 = vld [vmem:[#allocation19_spill] sm:$0xff]  ;;  %v7169_v52 = vld [vmem:[%s9722_s5] ss:$0 sm:$0xff] }
  0xe3   :  { %1436 = vmatprep.mubr.f32.mxu1 %v1081_v45  ;;  %4072 = vmatprep.subr.mxu0 %v5094_v4  ;;  %v5096_v45 = vld [vmem:[%s9719_s4 + $0x3c0] sm:$0xff] }
  0xe4   :  { %4120 = vmatpush3.msra.mxu1 %v9862_v8  ;;  %v3600_v1 = vpop.f32.mrf.mxu0  ;;  %4073 = vmatpush3.msra.mxu0 %v5095_v39  ;;  %v9864_v8 = vld [vmem:[#allocation20_spill] sm:$0xff] }
  0xe5   :  { %1437 = vmatmul.mubr.f32.gmra.mxu1 %v1080_v60  ;;  %4121 = vmatprep.subr.mxu1 %v9863_v30  ;;  %v7175_v30 = vld [vmem:[%s9719_s4 + $0x340] sm:$0xff] }
  0xe6   :  { %4074 = vmatprep.subr.mxu0 %v5096_v45  ;;  %v3601_v60 = vpop.f32.mrf.mxu0  ;;  %v3653_v4 = vpop.f32.mrf.mxu1  ;;  %4122 = vmatpush3.msra.mxu1 %v9864_v8  ;;  %9865 = vst [vmem:[#allocation8_spill] sm:$0xff] %v7175_v30  ;;  %v9866_v45 = vld [vmem:[#allocation21_spill] sm:$0xff] }
  0xe7   :  { %1346 = vmatprep.mubr.f32.mxu0 %v1105_v53  ;;  %v3602_v39 = vadd.f32 %v3601_v60, %v3600_v1  ;;  %4075 = vmatpush3.msra.mxu0 %v7175_v30  ;;  %v7186_v1 = vld [vmem:[%s9719_s4 + $0x3b8] sm:$0xff]  ;;  %v9868_v60 = vld [vmem:[#allocation22_spill] sm:$0xff]  ;;  %v9879_v30 = vld [vmem:[#allocation28_spill] sm:$0xff] }
  0xe8   :  { %4123 = vmatprep.subr.mxu1 %v9866_v45  ;;  %v3654_v57 = vpop.f32.mrf.mxu1  ;;  %1347 = vmatmul.mubr.f32.gmra.mxu0 %v1104_v38  ;;  %9867 = vst [vmem:[#allocation9_spill] sm:$0xff] %v7186_v1  ;;  %v1118_v45 = vld [vmem:[%s9721_s1 + $0x220] sm:$0xff]  ;;  %v7196_v38 = vld [vmem:[%s9719_s4 + $0x338] sm:$0xff] }
  0xe9   :  { %1441 = vmatprep.mubr.f32.mxu1 %v1094_v44  ;;  %v410_v8 = vadd.f32 %v3602_v39, %v7169_v52  ;;  %v3655_v53 = vadd.f32 %v3654_v57, %v3653_v4  ;;  %4076 = vmatprep.subr.mxu0 %v7186_v1  ;;  %9869 = vst [vmem:[#allocation10_spill] sm:$0xff] %v7196_v38  ;;  %v9870_v44 = vld [vmem:[#allocation23_spill] sm:$0xff]  ;;  %v7205_v4 = vld [vmem:[%s9719_s4 + $0x3b0] sm:$0xff] }
  0xea   :  { %4124 = vmatpush3.msra.mxu1 %v9868_v60  ;;  %4077 = vmatpush3.msra.mxu0 %v7196_v38  ;;  %9871 = vst [vmem:[#allocation11_spill] sm:$0xff] %v7205_v4  ;;  %v1107_v39 = vld [vmem:[%s9721_s1 + $0x1c8] sm:$0xff]  ;;  %v9872_v60 = vld [vmem:[#allocation24_spill] sm:$0xff]  ;;  %9898 = vst [vmem:[#allocation23_spill] sm:$0xff] %v7341_v42 }
  0xeb   :  { %1442 = vmatmul.mubr.f32.gmra.mxu1 %v1093_v63  ;;  %v7199_v57 = vadd.f32 %v3655_v53, %v410_v8  ;;  %4125 = vmatprep.subr.mxu1 %v9870_v44  ;;  %v1117_v63 = vld [vmem:[%s9721_s1 + $0x218] sm:$0xff]  ;;  %v7218_v53 = vld [vmem:[%s9719_s4 + $0x330] sm:$0xff] }
  0xec   :  { %4078 = vmatprep.subr.mxu0 %v7205_v4  ;;  %4126 = vmatpush3.msra.mxu1 %v9872_v60  ;;  %9873 = vst [vmem:[#allocation12_spill] sm:$0xff] %v7218_v53  ;;  %v9874_v44 = vld [vmem:[#allocation25_spill] sm:$0xff]  ;;  %v1106_v4 = vld [vmem:[%s9721_s1 + $0x1c0] sm:$0xff] }
  0xed   :  { %1351 = vmatprep.mubr.f32.mxu0 %v1118_v45  ;;  %v3603_v8 = vpop.f32.mrf.mxu0  ;;  %4079 = vmatpush3.msra.mxu0 %v7218_v53  ;;  %v7228_v45 = vld [vmem:[%s9719_s4 + $0x3a8] sm:$0xff]  ;;  %v9876_v60 = vld [vmem:[#allocation26_spill] sm:$0xff] }
  0xee   :  { %4127 = vmatprep.subr.mxu1 %v9874_v44  ;;  %1352 = vmatmul.mubr.f32.gmra.mxu0 %v1117_v63  ;;  %9875 = vst [vmem:[#allocation13_spill] sm:$0xff] %v7228_v45  ;;  %v1131_v44 = vld [vmem:[%s9721_s1 + $0x288] sm:$0x3] }
  0xef   :  { %1446 = vmatprep.mubr.f32.mxu1 %v1107_v39  ;;  %v3604_v38 = vpop.f32.mrf.mxu0  ;;  %4080 = vmatprep.subr.mxu0 %v7228_v45  ;;  %v7238_v63 = vld [vmem:[%s9719_s4 + $0x328] sm:$0xff] }
  0xf0   :  { %4128 = vmatpush3.msra.mxu1 %v9876_v60  ;;  %v3605_v53 = vadd.f32 %v3604_v38, %v3603_v8  ;;  %v3656_v1 = vpop.f32.mrf.mxu1  ;;  %9877 = vst [vmem:[#allocation14_spill] sm:$0xff] %v7238_v63  ;;  %4081 = vmatpush3.msra.mxu0 %v7238_v63  ;;  %v9878_v39 = vld [vmem:[#allocation27_spill] sm:$0xff]  ;;  %v5104_v60 = vld [vmem:[%s9719_s4 + $0x3a0] sm:$0xff] }
  0xf1   :  { %1447 = vmatmul.mubr.f32.gmra.mxu1 %v1106_v4  ;;  %4129 = vmatprep.subr.mxu1 %v9878_v39  ;;  %v1130_v38 = vld [vmem:[%s9721_s1 + $0x280] sm:$0x3]  ;;  %v1120_v4 = vld [vmem:[%s9721_s1 + $0x230] sm:$0xff] }
  0xf2   :  { %4082 = vmatprep.subr.mxu0 %v5104_v60  ;;  %v415_v8 = vadd.f32 %v3605_v53, %v7169_v52  ;;  %v3657_v45 = vpop.f32.mrf.mxu1  ;;  %4130 = vmatpush3.msra.mxu1 %v9879_v30  ;;  %v7256_v60 = vld [vmem:[%s9719_s4 + $0x320] sm:$0xff] }
  0xf3   :  { %1356 = vmatprep.mubr.f32.mxu0 %v1131_v44  ;;  %v3606_v39 = vpop.f32.mrf.mxu0  ;;  %v3658_v63 = vadd.f32 %v3657_v45, %v3656_v1  ;;  %9880 = vst [vmem:[#allocation15_spill] sm:$0xff] %v7256_v60  ;;  %4083 = vmatpush3.msra.mxu0 %v7256_v60  ;;  %v7268_v1 = vld [vmem:[%s9719_s4 + $0x398] sm:$0xff]  ;;  %v9883_v45 = vld [vmem:[#allocation30_spill] sm:$0xff] }
  0xf4   :  { %4131 = vmatprep.subr.mxu1 %v9881_v19  ;;  %1357 = vmatmul.mubr.f32.gmra.mxu0 %v1130_v38  ;;  %9882 = vst [vmem:[#allocation16_spill] sm:$0xff] %v7268_v1  ;;  %v7275_v38 = vld [vmem:[%s9719_s4 + $0x318] sm:$0xff] }
  0xf5   :  { %1451 = vmatprep.mubr.f32.mxu1 %v1120_v4  ;;  %v7263_v53 = vadd.f32 %v3658_v63, %v415_v8  ;;  %v3607_v30 = vpop.f32.mrf.mxu0  ;;  %4084 = vmatprep.subr.mxu0 %v7268_v1  ;;  %9884 = vst [vmem:[#allocation17_spill] sm:$0xff] %v7275_v38  ;;  %v1133_v63 = vld [vmem:[%s9721_s1 + $0x298] sm:$0x3]  ;;  %v9885_v4 = vld [vmem:[#allocation31_spill] sm:$0xff]  ;;  %v7285_v8 = vld [vmem:[%s9719_s4 + $0x390] sm:$0xff] }
  0xf6   :  { %4132 = vmatpush3.msra.mxu1 %v9883_v45  ;;  %v3608_v44 = vadd.f32 %v3607_v30, %v3606_v39  ;;  %v3659_v19 = vpop.f32.mrf.mxu1  ;;  %4085 = vmatpush3.msra.mxu0 %v7275_v38  ;;  %9886 = vst [vmem:[#allocation18_spill] sm:$0xff] %v7285_v8  ;;  %v9887_v30 = vld [vmem:[#allocation32_spill] sm:$0xff]  ;;  %v9889_v60 = vld [vmem:[#allocation33_spill] sm:$0xff] }
  0xf7   :  { %1452 = vmatmul.mubr.f32.gmra.mxu1 %v1119_v41  ;;  %4133 = vmatprep.subr.mxu1 %v9885_v4  ;;  %v7293_v45 = vld [vmem:[%s9719_s4 + $0x310] sm:$0xff] }
  0xf8   :  { %4086 = vmatprep.subr.mxu0 %v7285_v8  ;;  %v420_v41 = vadd.f32 %v3608_v44, %v7169_v52  ;;  %v3660_v39 = vpop.f32.mrf.mxu1  ;;  %4134 = vmatpush3.msra.mxu1 %v9887_v30  ;;  %9888 = vst [vmem:[#allocation19_spill] sm:$0xff] %v7293_v45  ;;  %v1132_v4 = vld [vmem:[%s9721_s1 + $0x290] sm:$0x3]  ;;  %v7303_v44 = vld [vmem:[%s9719_s4 + $0x388] sm:$0xff]  ;;  %v9891_v30 = vld [vmem:[#allocation34_spill] sm:$0xff] }
  0xf9   :  { %4087 = vmatpush3.msra.mxu0 %v7293_v45  ;;  %v3609_v38 = vpop.f32.mrf.mxu0  ;;  %v3661_v1 = vadd.f32 %v3660_v39, %v3659_v19  ;;  %4135 = vmatprep.subr.mxu1 %v9889_v60  ;;  %9890 = vst [vmem:[#allocation20_spill] sm:$0xff] %v7303_v44  ;;  %v7312_v19 = vld [vmem:[%s9719_s4 + $0x308] sm:$0xff]  ;;  %v1057_v60 = vld [vmem:[%s9721_s1 + $0x38] sm:$0xff] }
  0xfa   :  { %1456 = vmatprep.mubr.f32.mxu1 %v1133_v63  ;;  %4088 = vmatprep.subr.mxu0 %v7303_v44  ;;  %9892 = vst [vmem:[#allocation21_spill] sm:$0xff] %v7312_v19  ;;  %v9893_v44 = vld [vmem:[#allocation35_spill] sm:$0xff] }
  0xfb   :  { %4136 = vmatpush3.msra.mxu1 %v9891_v30  ;;  %v7307_v8 = vadd.f32 %v3661_v1, %v420_v41  ;;  %v3610_v45 = vpop.f32.mrf.mxu0  ;;  %4089 = vmatpush3.msra.mxu0 %v7312_v19  ;;  %v7322_v1 = vld [vmem:[%s9719_s4 + $0x380] sm:$0xff]  ;;  %v1056_v41 = vld [vmem:[%s9721_s1 + $0x30] sm:$0xff]  ;;  %v9896_v30 = vld [vmem:[#allocation37_spill] sm:$0xff] }
  0xfc   :  { %1457 = vmatmul.mubr.f32.gmra.mxu1 %v1132_v4  ;;  %v3611_v63 = vadd.f32 %v3610_v45, %v3609_v38  ;;  %v3662_v39 = vpop.f32.mrf.mxu1  ;;  %4137 = vmatprep.subr.mxu1 %v9893_v44  ;;  %9894 = vst [vmem:[#allocation22_spill] sm:$0xff] %v7322_v1  ;;  %v9895_v4 = vld [vmem:[#allocation36_spill] sm:$0xff]  ;;  %v5113_v38 = vld [vmem:[%s9719_s4 + $0x300] sm:$0xff] }
  0xfd   :  { %4090 = vmatprep.subr.mxu0 %v7322_v1  ;;  %4138 = vmatpush3.msra.mxu1 %v9895_v4  ;;  %v9897_v1 = vld [vmem:[#allocation38_spill] sm:$0xff] }
  0xfe   :  { %4091 = vmatpush3.msra.mxu0 %v5113_v38  ;;  %v425_v45 = vadd.f32 %v3611_v63, %v7169_v52  ;;  %v3663_v44 = vpop.f32.mrf.mxu1  ;;  %1526 = vmatprep.mubr.f32.mxu0 %v1057_v60  ;;  %v1070_v4 = vld [vmem:[%s9721_s1 + $0xa0] sm:$0xff]  ;;  %v9899_v63 = vld [vmem:[#allocation39_spill] sm:$0xff] }
  0xff   :  { %4139 = vmatprep.subr.mxu1 %v9896_v30  ;;  %v3612_v19 = vpop.f32.mrf.mxu0  ;;  %v3664_v7 = vadd.f32 %v3663_v44, %v3662_v39  ;;  %1527 = vmatmul.mubr.f32.vlgmr.msra.gmra.mxu0 %v1056_v41  ;;  %v7350_v39 = vld [vmem:[%s9719_s4 + $0x578] sm:$0xff] }
 0x100   :  { %4140 = vmatpush3.msra.mxu1 %v9897_v1  ;;  %4166 = vmatprep.subr.mxu0 %v7341_v42  ;;  %9900 = vst [vmem:[#allocation24_spill] sm:$0xff] %v7350_v39  ;;  %v9901_v1 = vld [vmem:[#allocation40_spill] sm:$0xff]  ;;  %v1069_v41 = vld [vmem:[%s9721_s1 + $0x98] sm:$0xff] }
 0x101   :  { %4141 = vmatprep.subr.mxu1 %v9899_v63  ;;  %v7345_v60 = vadd.f32 %v3664_v7, %v425_v45  ;;  %v3613_v38 = vpop.f32.mrf.mxu0  ;;  %4167 = vmatpush3.msra.mxu0 %v7350_v39  ;;  %v7360_v7 = vld [vmem:[%s9719_s4 + $0x5f0] sm:$0xff]  ;;  %v1059_v45 = vld [vmem:[%s9721_s1 + $0x48] sm:$0xff] }
 0x102   :  { %4142 = vmatpush3.msra.mxu1 %v9901_v1  ;;  %v3614_v44 = vadd.f32 %v3613_v38, %v3612_v19  ;;  %v3665_v30 = vpop.f32.mrf.mxu1  ;;  %9902 = vst [vmem:[#allocation25_spill] sm:$0xff] %v7360_v7  ;;  %4168 = vmatprep.subr.mxu0 %v7360_v7  ;;  %v7370_v63 = vld [vmem:[%s9719_s4 + $0x570] sm:$0xff]  ;;  %v1058_v19 = vld [vmem:[%s9721_s1 + $0x40] sm:$0xff]  ;;  %v9904_v1 = vld [vmem:[#allocation41_spill] sm:$0xff] }
 0x103   :  { %1531 = vmatprep.mubr.f32.mxu0 %v1070_v4  ;;  %4143 = vmatprep.subr.mxu1 %v6531_v27  ;;  %9903 = vst [vmem:[#allocation26_spill] sm:$0xff] %v7370_v63  ;;  %v1083_v27 = vld [vmem:[%s9721_s1 + $0x108] sm:$0xff] }
 0x104   :  { %4169 = vmatpush3.msra.mxu0 %v7370_v63  ;;  %v430_v38 = vadd.f32 %v3614_v44, %v7169_v52  ;;  %v3666_v4 = vpop.f32.mrf.mxu1  ;;  %4144 = vmatpush3.msra.mxu1 %v9904_v1  ;;  %v7384_v63 = vld [vmem:[%s9719_s4 + $0x5e8] sm:$0xff]  ;;  %v7404_v1 = vld [vmem:[%s9719_s4 + $0x5e0] sm:$0xff] }
 0x105   :  { %1532 = vmatmul.mubr.f32.gmra.mxu0 %v1069_v41  ;;  %v3615_v7 = vpop.f32.mrf.mxu0  ;;  %v3667_v39 = vadd.f32 %v3666_v4, %v3665_v30  ;;  %1626 = vmatprep.mubr.f32.mxu1 %v1059_v45  ;;  %9905 = vst [vmem:[#allocation27_spill] sm:$0xff] %v7384_v63  ;;  %v1072_v41 = vld [vmem:[%s9721_s1 + $0xb0] sm:$0xff]  ;;  %v7393_v44 = vld [vmem:[%s9719_s4 + $0x568] sm:$0xff]  ;;  %v1082_v30 = vld [vmem:[%s9721_s1 + $0x100] sm:$0xff] }
 0x106   :  { %4170 = vmatprep.subr.mxu0 %v7384_v63  ;;  %1627 = vmatmul.mubr.f32.vlgmr.msra.gmra.mxu1 %v1058_v19  ;;  %9906 = vst [vmem:[#allocation28_spill] sm:$0xff] %v7393_v44  ;;  %9907 = vst [vmem:[#allocation29_spill] sm:$0xff] %v7404_v1  ;;  %v1071_v19 = vld [vmem:[%s9721_s1 + $0xa8] sm:$0xff] }
 0x107   :  { %4171 = vmatpush3.msra.mxu0 %v7393_v44  ;;  %v7399_v45 = vadd.f32 %v3667_v39, %v430_v38  ;;  %v3616_v4 = vpop.f32.mrf.mxu0  ;;  %1536 = vmatprep.mubr.f32.mxu0 %v1083_v27  ;;  %v7413_v39 = vld [vmem:[%s9719_s4 + $0x560] sm:$0xff]  ;;  %v7419_v38 = vld [vmem:[%s9719_s4 + $0x5d8] sm:$0xff] }
 0x108   :  { %4172 = vmatprep.subr.mxu0 %v7404_v1  ;;  %v3617_v44 = vadd.f32 %v3616_v4, %v3615_v7  ;;  %v3668_v63 = vpop.f32.mrf.mxu1  ;;  %9908 = vst [vmem:[#allocation30_spill] sm:$0xff] %v7413_v39  ;;  %1631 = vmatprep.mubr.f32.mxu1 %v1072_v41  ;;  %9909 = vst [vmem:[#allocation31_spill] sm:$0xff] %v7419_v38  ;;  %v1096_v7 = vld [vmem:[%s9721_s1 + $0x170] sm:$0xff]  ;;  %v7429_v41 = vld [vmem:[%s9719_s4 + $0x558] sm:$0xff] }
 0x109   :  { %4173 = vmatpush3.msra.mxu0 %v7413_v39  ;;  %9910 = vst [vmem:[#allocation32_spill] sm:$0xff] %v7429_v41  ;;  %v7438_v1 = vld [vmem:[%s9719_s4 + $0x5d0] sm:$0xff] }
 0x10a   :  { %1537 = vmatmul.mubr.f32.gmra.mxu0 %v1082_v30  ;;  %4174 = vmatprep.subr.mxu0 %v7419_v38  ;;  %v435_v27 = vadd.f32 %v3617_v44, %v7169_v52  ;;  %v3669_v4 = vpop.f32.mrf.mxu1  ;;  %v1095_v30 = vld [vmem:[%s9721_s1 + $0x168] sm:$0xff]  ;;  %9911 = vst [vmem:[#allocation33_spill] sm:$0xff] %v7438_v1  ;;  %v9912_v44 = vmov 0.0  }
 0x10b   :  { %1632 = vmatmul.mubr.f32.gmra.mxu1 %v1071_v19  ;;  %4175 = vmatpush3.msra.mxu0 %v7429_v41  ;;  %v3618_v38 = vpop.f32.mrf.mxu0  ;;  %v3670_v39 = vadd.f32 %v3669_v4, %v3668_v63  ;;  %v1085_v19 = vld [vmem:[%s9721_s1 + $0x118] sm:$0xff]  ;;  %v5125_v41 = vld [vmem:[%s9719_s4 + $0x550] sm:$0xff] }
 0x10c   :  { %4176 = vmatprep.subr.mxu0 %v7438_v1  ;;  %4937 = vmatprep.subr.mxu1 %v9912_v44  ;;  %v1084_v63 = vld [vmem:[%s9721_s1 + $0x110] sm:$0xff] }
 0x10d   :  { %1541 = vmatprep.mubr.f32.mxu0 %v1096_v7  ;;  %4177 = vmatpush3.msra.mxu0 %v5125_v41  ;;  %v7451_v4 = vadd.f32 %v3670_v39, %v435_v27  ;;  %v3619_v42 = vpop.f32.mrf.mxu0  ;;  %v7457_v7 = vld [vmem:[%s9719_s4 + $0x5c8] sm:$0xff]  ;;  %v1109_v41 = vld [vmem:[%s9721_s1 + $0x1d8] sm:$0xff]  ;;  %v5128_v27 = vld [vmem:[%s9719_s4 + $0x5c0] sm:$0xff] }
 0x10e   :  { %4938 = vmatpush3.msra.mxu1 %v6563_v43  ;;  %1542 = vmatmul.mubr.f32.gmra.mxu0 %v1095_v30  ;;  %v3620_v1 = vadd.f32 %v3619_v42, %v3618_v38  ;;  %v3671_v61 = vpop.f32.mrf.mxu1  ;;  %v5127_v43 = vld [vmem:[%s9719_s4 + $0x548] sm:$0xff]  ;;  %v1108_v42 = vld [vmem:[%s9721_s1 + $0x1d0] sm:$0xff]  ;;  %v1098_v30 = vld [vmem:[%s9721_s1 + $0x180] sm:$0xff] }
 0x10f   :  { %1636 = vmatprep.mubr.f32.mxu1 %v1085_v19  ;;  %4178 = vmatprep.subr.mxu0 %v7457_v7 }
 0x110   :  { %1637 = vmatmul.mubr.f32.gmra.mxu1 %v1084_v63  ;;  %4179 = vmatpush3.msra.mxu0 %v5127_v43  ;;  %v440_v39 = vadd.f32 %v3620_v1, %v7169_v52  ;;  %v3672_v38 = vpop.f32.mrf.mxu1  ;;  %v5129_v63 = vld [vmem:[%s9719_s4 + $0x540] sm:$0xff]  ;;  %v1097_v52 = vld [vmem:[%s9721_s1 + $0x178] sm:$0xff] }
 0x111   :  { %4180 = vmatprep.subr.mxu0 %v5128_v27  ;;  %4939 = vmatprep.subr.mxu1 %v9912_v44  ;;  %v3673_v19 = vadd.f32 %v3672_v38, %v3671_v61  ;;  %v5130_v61 = vld [vmem:[%s9719_s4 + $0x5b8] sm:$0xff] }
 0x112   :  { %1546 = vmatprep.mubr.f32.mxu0 %v1109_v41  ;;  %4181 = vmatpush3.msra.mxu0 %v5129_v63  ;;  %v3706_v1 = vpop.f32.mrf.mxu0  ;;  %v1122_v41 = vld [vmem:[%s9721_s1 + $0x240] sm:$0xff] }
 0x113   :  { %4940 = vmatpush3.msra.mxu1 %v6582_v0  ;;  %1547 = vmatmul.mubr.f32.gmra.mxu0 %v1108_v42  ;;  %v7484_v43 = vadd.f32 %v3673_v19, %v440_v39  ;;  %v5131_v0 = vld [vmem:[%s9719_s4 + $0x538] sm:$0xff]  ;;  %v1111_v42 = vld [vmem:[%s9721_s1 + $0x1e8] sm:$0xff] }
 0x114   :  { %1641 = vmatprep.mubr.f32.mxu1 %v1098_v30  ;;  %4182 = vmatprep.subr.mxu0 %v5130_v61  ;;  %v3707_v38 = vpop.f32.mrf.mxu0  ;;  %v3759_v27 = vpop.f32.mrf.mxu1  ;;  %v5132_v30 = vld [vmem:[%s9719_s4 + $0x5b0] sm:$0xff]  ;;  %v1121_v19 = vld [vmem:[%s9721_s1 + $0x238] sm:$0xff] }
 0x115   :  { %1642 = vmatmul.mubr.f32.gmra.mxu1 %v1097_v52  ;;  %4183 = vmatpush3.msra.mxu0 %v5131_v0  ;;  %v3708_v39 = vadd.f32 %v3707_v38, %v3706_v1  ;;  %v1110_v52 = vld [vmem:[%s9721_s1 + $0x1e0] sm:$0xff]  ;;  %v5133_v38 = vld [vmem:[%s9719_s4 + $0x530] sm:$0xff] }
 0x116   :  { %4941 = vmatprep.subr.mxu1 %v9912_v44  ;;  %4184 = vmatprep.subr.mxu0 %v5132_v30  ;;  %v3760_v63 = vpop.f32.mrf.mxu1 }
 0x117   :  { %4942 = vmatpush3.msra.mxu1 %v6602_v6  ;;  %1551 = vmatprep.mubr.f32.mxu0 %v1122_v41  ;;  %v610_v1 = vadd.f32 %v3708_v39, %v7199_v57  ;;  %v3761_v61 = vadd.f32 %v3760_v63, %v3759_v27  ;;  %v5134_v6 = vld [vmem:[%s9719_s4 + $0x5a8] sm:$0xff]  ;;  %v1124_v27 = vld [vmem:[%s9721_s1 + $0x250] sm:$0xff]  ;;  %v5136_v39 = vld [vmem:[%s9719_s4 + $0x5a0] sm:$0xff] }
 0x118   :  { %4185 = vmatpush3.msra.mxu0 %v5133_v38  ;;  %1646 = vmatprep.mubr.f32.mxu1 %v1111_v42  ;;  %v3709_v0 = vpop.f32.mrf.mxu0  ;;  %v1135_v41 = vld [vmem:[%s9721_s1 + $0x2a8] sm:$0x3] }
 0x119   :  { %1552 = vmatmul.mubr.f32.gmra.mxu0 %v1121_v19  ;;  %4186 = vmatprep.subr.mxu0 %v5134_v6  ;;  %v7519_v30 = vadd.f32 %v3761_v61, %v610_v1  ;;  %v5135_v57 = vld [vmem:[%s9719_s4 + $0x528] sm:$0xff]  ;;  %v1134_v19 = vld [vmem:[%s9721_s1 + $0x2a0] sm:$0x3] }
 0x11a   :  { %1647 = vmatmul.mubr.f32.gmra.mxu1 %v1110_v52  ;;  %4187 = vmatpush3.msra.mxu0 %v5135_v57  ;;  %v3710_v42 = vpop.f32.mrf.mxu0  ;;  %v1123_v52 = vld [vmem:[%s9721_s1 + $0x248] sm:$0xff]  ;;  %v5137_v61 = vld [vmem:[%s9719_s4 + $0x520] sm:$0xff]  ;;  %v5139_v57 = vld [vmem:[%s9719_s4 + $0x518] sm:$0xff] }
 0x11b   :  { %4943 = vmatprep.subr.mxu1 %v9912_v44  ;;  %4188 = vmatprep.subr.mxu0 %v5136_v39  ;;  %v3711_v63 = vadd.f32 %v3710_v42, %v3709_v0  ;;  %v3762_v1 = vpop.f32.mrf.mxu1  ;;  %v5138_v0 = vld [vmem:[%s9719_s4 + $0x598] sm:$0xff]  ;;  %v5140_v42 = vld [vmem:[%s9719_s4 + $0x590] sm:$0xff] }
 0x11c   :  { %4944 = vmatpush3.msra.mxu1 %v6625_v16  ;;  %1556 = vmatprep.mubr.f32.mxu0 %v1135_v41  ;;  %v1136_v39 = vld [vmem:[%s9721_s1 + $0x2b0] sm:$0x3] }
 0x11d   :  { %4189 = vmatpush3.msra.mxu0 %v5137_v61  ;;  %1651 = vmatprep.mubr.f32.mxu1 %v1124_v27  ;;  %v615_v38 = vadd.f32 %v3711_v63, %v7263_v53  ;;  %v3763_v6 = vpop.f32.mrf.mxu1  ;;  %v1137_v53 = vld [vmem:[%s9721_s1 + $0x2b8] sm:$0x3] }
 0x11e   :  { %1557 = vmatmul.mubr.f32.gmra.mxu0 %v1134_v19  ;;  %4190 = vmatprep.subr.mxu0 %v5138_v0  ;;  %v3712_v16 = vpop.f32.mrf.mxu0  ;;  %v3764_v41 = vadd.f32 %v3763_v6, %v3762_v1  ;;  %v5142_v1 = vld [vmem:[%s9719_s4 + $0x588] sm:$0xff] }
 0x11f   :  { %4945 = vmatprep.subr.mxu1 %v9912_v44  ;;  %1652 = vmatmul.mubr.f32.gmra.mxu1 %v1123_v52 }
 0x120   :  { %4191 = vmatpush3.msra.mxu0 %v5139_v57  ;;  %4946 = vmatpush3.msra.mxu1 %v6643_v11  ;;  %v3713_v27 = vpop.f32.mrf.mxu0  ;;  %v7560_v19 = vadd.f32 %v3764_v41, %v615_v38  ;;  %v5141_v11 = vld [vmem:[%s9719_s4 + $0x510] sm:$0xff]  ;;  %v1061_v38 = vld [vmem:[%s9721_s1 + $0x58] sm:$0xff]  ;;  %v5144_v41 = vld [vmem:[%s9719_s4 + $0x580] sm:$0xff] }
 0x121   :  { %4192 = vmatprep.subr.mxu0 %v5140_v42  ;;  %4947 = vmatprep.subr.mxu1 %v9912_v44  ;;  %v3714_v63 = vadd.f32 %v3713_v27, %v3712_v16  ;;  %v3765_v52 = vpop.f32.mrf.mxu1 }
 0x122   :  { %4193 = vmatpush3.msra.mxu0 %v5141_v11  ;;  %4948 = vmatpush3.msra.mxu1 %v6666_v37  ;;  %v5143_v37 = vld [vmem:[%s9719_s4 + $0x508] sm:$0xff] }
 0x123   :  { %1656 = vmatprep.mubr.f32.mxu1 %v1137_v53  ;;  %4194 = vmatprep.subr.mxu0 %v5142_v1  ;;  %v620_v61 = vadd.f32 %v3714_v63, %v7307_v8  ;;  %v3766_v16 = vpop.f32.mrf.mxu1  ;;  %v1060_v8 = vld [vmem:[%s9721_s1 + $0x50] sm:$0xff]  ;;  %v5145_v53 = vld [vmem:[%s9719_s4 + $0x500] sm:$0xff]  ;;  %v5146_v63 = vld [vmem:[%s9719_s4 + $0xf8] sm:$0xff] }
 0x124   :  { %4949 = vmatprep.subr.mxu1 %v9912_v44  ;;  %1657 = vmatmul.mubr.f32.gmra.mxu1 %v1136_v39  ;;  %v3715_v0 = vpop.f32.mrf.mxu0  ;;  %v3767_v6 = vadd.f32 %v3766_v16, %v3765_v52  ;;  %v5149_v16 = vld [vmem:[%s9719_s4 + $0x70] sm:$0xff] }
 0x125   :  { %4195 = vmatpush3.msra.mxu0 %v5143_v37  ;;  %4950 = vmatpush3.msra.mxu1 %v6685_v55  ;;  %v1062_v55 = vld [vmem:[%s9721_s1 + $0x60] sm:$0xff] }
 0x126   :  { %4196 = vmatprep.subr.mxu0 %v5144_v41  ;;  %4951 = vmatprep.subr.mxu1 %v9912_v44  ;;  %v3716_v57 = vpop.f32.mrf.mxu0  ;;  %v7591_v27 = vadd.f32 %v3767_v6, %v620_v61  ;;  %v5147_v61 = vld [vmem:[%s9719_s4 + $0x78] sm:$0xff]  ;;  %v5150_v6 = vld [vmem:[%s9719_s4 + $0xe8] sm:$0xff] }
 0x127   :  { %4197 = vmatpush3.msra.mxu0 %v5145_v53  ;;  %1726 = vmatprep.mubr.f32.mxu0 %v1061_v38  ;;  %v3717_v42 = vadd.f32 %v3716_v57, %v3715_v0  ;;  %v3768_v39 = vpop.f32.mrf.mxu1  ;;  %v5148_v38 = vld [vmem:[%s9719_s4 + $0xf0] sm:$0xff]  ;;  %v5151_v57 = vld [vmem:[%s9719_s4 + $0x68] sm:$0xff] }
 0x128   :  { %4952 = vmatpush3.msra.mxu1 %v6708_v5  ;;  %1727 = vmatmul.mubr.f32.vlgmr.msra.gmra.mxu0 %v1060_v8  ;;  %v1074_v5 = vld [vmem:[%s9721_s1 + $0xc0] sm:$0xff] }
 0x129   :  { %4953 = vmatprep.mubr.msk.f32.mxu1 %vm5480_vm1, %v9912_v44  ;;  %4234 = vmatprep.subr.mxu0 %v5146_v63  ;;  %v625_v11 = vadd.f32 %v3717_v42, %v7345_v60  ;;  %v3769_v1 = vpop.f32.mrf.mxu1  ;;  %v1073_v60 = vld [vmem:[%s9721_s1 + $0xb8] sm:$0xff]  ;;  %v5153_v42 = vld [vmem:[%s9719_s4 + $0x60] sm:$0xff] }
 0x12a   :  { %4287 = vmatprep.subr.mxu1 %v6724_v46  ;;  %4954 = vmatmul.mubr.msk.f32.vlgmr.msra.gmra.mxu1 %vm321_vm0, %v1062_v55  ;;  %v3718_v52 = vpop.f32.mrf.mxu0  ;;  %v3770_v46 = vadd.f32 %v3769_v1, %v3768_v39  ;;  %v5155_v1 = vld [vmem:[%s9719_s4 + $0x58] sm:$0xff] }
 0x12b   :  { %4235 = vmatpush3.msra.mxu0 %v5147_v61  ;;  %4288 = vmatpush3.msra.mxu1 %v6732_v48  ;;  %v1099_v61 = vld [vmem:[%s9721_s1 + $0x188] sm:$0xff] }
 0x12c   :  { %4236 = vmatprep.subr.mxu0 %v5148_v38  ;;  %4289 = vmatprep.subr.mxu1 %v6739_v50  ;;  %v3719_v0 = vpop.f32.mrf.mxu0  ;;  %v7619_v48 = vadd.f32 %v3770_v46, %v625_v11  ;;  %v1087_v50 = vld [vmem:[%s9721_s1 + $0x128] sm:$0xff]  ;;  %v5156_v46 = vld [vmem:[%s9719_s4 + $0xd0] sm:$0xff] }
 0x12d   :  { %1731 = vmatprep.mubr.f32.mxu0 %v1074_v5  ;;  %4237 = vmatpush3.msra.mxu0 %v5149_v16  ;;  %v3720_v37 = vadd.f32 %v3719_v0, %v3718_v52  ;;  %v3771_v8 = vpop.f32.mrf.mxu1  ;;  %v5157_v38 = vld [vmem:[%s9719_s4 + $0x50] sm:$0xff] }
 0x12e   :  { %4290 = vmatpush3.msra.mxu1 %v6752_v56  ;;  %1732 = vmatmul.mubr.f32.gmra.mxu0 %v1073_v60  ;;  %v1086_v56 = vld [vmem:[%s9721_s1 + $0x120] sm:$0xff] }
 0x12f   :  { %4238 = vmatprep.subr.mxu0 %v5150_v6  ;;  %4291 = vmatprep.subr.mxu1 %v6761_v58  ;;  %v630_v41 = vadd.f32 %v3720_v37, %v7399_v45  ;;  %v3772_v55 = vpop.f32.mrf.mxu1  ;;  %v5152_v58 = vld [vmem:[%s9719_s4 + $0xe0] sm:$0xff] }
 0x130   :  { %4239 = vmatpush3.msra.mxu0 %v5151_v57  ;;  %4292 = vmatpush3.msra.mxu1 %v6771_v23  ;;  %v3721_v53 = vpop.f32.mrf.mxu0  ;;  %v3773_v45 = vadd.f32 %v3772_v55, %v3771_v8  ;;  %v1075_v23 = vld [vmem:[%s9721_s1 + $0xc8] sm:$0xff]  ;;  %v5160_v57 = vld [vmem:[%s9719_s4 + $0xc0] sm:$0xff] }
 0x131   :  { %4240 = vmatprep.subr.mxu0 %v5152_v58  ;;  %4293 = vmatprep.subr.mxu1 %v6778_v62  ;;  %v5154_v62 = vld [vmem:[%s9719_s4 + $0xd8] sm:$0xff] }
 0x132   :  { %1736 = vmatprep.mubr.f32.mxu0 %v1087_v50  ;;  %4241 = vmatpush3.msra.mxu0 %v5153_v42  ;;  %v3722_v39 = vpop.f32.mrf.mxu0  ;;  %v7648_v63 = vadd.f32 %v3773_v45, %v630_v41  ;;  %v5159_v50 = vld [vmem:[%s9719_s4 + $0x48] sm:$0xff]  ;;  %v1112_v41 = vld [vmem:[%s9721_s1 + $0x1f0] sm:$0xff]  ;;  %v5163_v58 = vld [vmem:[%s9719_s4 + $0x38] sm:$0xff] }
 0x133   :  { %4294 = vmatpush3.msra.mxu1 %v6785_v2  ;;  %1737 = vmatmul.mubr.f32.gmra.mxu0 %v1086_v56  ;;  %v3723_v11 = vadd.f32 %v3722_v39, %v3721_v53  ;;  %v3774_v5 = vpop.f32.mrf.mxu1  ;;  %v1100_v2 = vld [vmem:[%s9721_s1 + $0x190] sm:$0xff]  ;;  %v5161_v56 = vld [vmem:[%s9719_s4 + $0x40] sm:$0xff]  ;;  %v1125_v45 = vld [vmem:[%s9721_s1 + $0x258] sm:$0xff] }
 0x134   :  { %4956 = vmatprep.mubr.msk.f32.mxu1 %vm5480_vm1, %v9912_v44  ;;  %4242 = vmatprep.subr.mxu0 %v5154_v62 }
 0x135   :  { %4295 = vmatprep.subr.mxu1 %v6797_v13  ;;  %4957 = vmatmul.mubr.msk.f32.gmra.mxu1 %vm321_vm0, %v1075_v23  ;;  %v635_v52 = vadd.f32 %v3723_v11, %v7451_v4  ;;  %v3775_v60 = vpop.f32.mrf.mxu1  ;;  %v5165_v11 = vld [vmem:[%s9719_s4 + $0x30] sm:$0xff] }
 0x136   :  { %4243 = vmatpush3.msra.mxu0 %v5155_v1  ;;  %4296 = vmatpush3.msra.mxu1 %v6806_v17  ;;  %v3724_v13 = vpop.f32.mrf.mxu0  ;;  %v3776_v4 = vadd.f32 %v3775_v60, %v3774_v5  ;;  %v1088_v17 = vld [vmem:[%s9721_s1 + $0x130] sm:$0xff]  ;;  %v5168_v60 = vld [vmem:[%s9719_s4 + $0xa0] sm:$0xff] }
 0x137   :  { %4244 = vmatprep.subr.mxu0 %v5156_v46  ;;  %4297 = vmatprep.subr.mxu1 %v6816_v21  ;;  %v5158_v21 = vld [vmem:[%s9719_s4 + $0xc8] sm:$0xff] }
 0x138   :  { %1741 = vmatprep.mubr.f32.mxu0 %v1100_v2  ;;  %4245 = vmatpush3.msra.mxu0 %v5157_v38  ;;  %v3725_v0 = vpop.f32.mrf.mxu0  ;;  %v7679_v16 = vadd.f32 %v3776_v4, %v635_v52  ;;  %v5169_v4 = vld [vmem:[%s9719_s4 + $0x20] sm:$0xff] }
 0x139   :  { %4298 = vmatpush3.msra.mxu1 %v6826_v29  ;;  %1742 = vmatmul.mubr.f32.gmra.mxu0 %v1099_v61  ;;  %v3726_v37 = vadd.f32 %v3725_v0, %v3724_v13  ;;  %v3777_v8 = vpop.f32.mrf.mxu1  ;;  %v1113_v29 = vld [vmem:[%s9721_s1 + $0x1f8] sm:$0xff]  ;;  %v5167_v61 = vld [vmem:[%s9719_s4 + $0x28] sm:$0xff] }
 0x13a   :  { %4959 = vmatprep.mubr.msk.f32.mxu1 %vm5480_vm1, %v9912_v44  ;;  %4246 = vmatprep.subr.mxu0 %v5158_v21 }
 0x13b   :  { %4299 = vmatprep.subr.mxu1 %v6837_v35  ;;  %4960 = vmatmul.mubr.msk.f32.gmra.mxu1 %vm321_vm0, %v1088_v17  ;;  %v640_v6 = vadd.f32 %v3726_v37, %v7484_v43  ;;  %v3778_v35 = vpop.f32.mrf.mxu1 }
 0x13c   :  { %4247 = vmatpush3.msra.mxu0 %v5159_v50  ;;  %4300 = vmatpush3.msra.mxu1 %v6845_v10  ;;  %v3779_v43 = vadd.f32 %v3778_v35, %v3777_v8  ;;  %v1101_v10 = vld [vmem:[%s9721_s1 + $0x198] sm:$0xff]  ;;  %v5173_v50 = vld [vmem:[%s9719_s4 + $0x10] sm:$0xff] }
 0x13d   :  { %4248 = vmatprep.subr.mxu0 %v5160_v57  ;;  %4301 = vmatprep.subr.mxu1 %v6852_v12  ;;  %v5162_v12 = vld [vmem:[%s9719_s4 + $0xb8] sm:$0xff] }
 0x13e   :  { %1746 = vmatprep.mubr.f32.mxu0 %v1113_v29  ;;  %4249 = vmatpush3.msra.mxu0 %v5161_v56  ;;  %v7710_v53 = vadd.f32 %v3779_v43, %v640_v6  ;;  %v5172_v6 = vld [vmem:[%s9719_s4 + $0x90] sm:$0xff]  ;;  %v5175_v43 = vld [vmem:[%s9719_s4 + $0x8] sm:$0xff]  ;;  %v1876_v56 = vld [vmem:[%s9723_s2] sm:$0xff] }
 0x13f   :  { %4302 = vmatpush3.msra.mxu1 %v6862_v14  ;;  %1747 = vmatmul.mubr.f32.gmra.mxu0 %v1112_v41  ;;  %v1126_v14 = vld [vmem:[%s9721_s1 + $0x260] sm:$0xff] }
 0x140   :  { %4962 = vmatprep.mubr.msk.f32.mxu1 %vm5480_vm1, %v9912_v44  ;;  %4250 = vmatprep.subr.mxu0 %v5162_v12  ;;  %v3812_v55 = vpop.f32.mrf.mxu0 }
 0x141   :  { %4303 = vmatprep.subr.mxu1 %v6877_v51  ;;  %4963 = vmatmul.mubr.msk.f32.gmra.mxu1 %vm321_vm0, %v1101_v10  ;;  %v5164_v51 = vld [vmem:[%s9719_s4 + $0xb0] sm:$0xff] }
 0x142   :  { %4251 = vmatpush3.msra.mxu0 %v5163_v58  ;;  %4304 = vmatpush3.msra.mxu1 %v6885_v59  ;;  %v3813_v42 = vpop.f32.mrf.mxu0  ;;  %v3865_v23 = vpop.f32.mrf.mxu1  ;;  %v1114_v59 = vld [vmem:[%s9721_s1 + $0x200] sm:$0xff]  ;;  %v1878_v58 = vld [vmem:[%s9723_s2 + $0x10] sm:$0xff] }
 0x143   :  { %4252 = vmatprep.subr.mxu0 %v5164_v51  ;;  %4305 = vmatprep.subr.mxu1 %v6892_v18  ;;  %v3814_v39 = vadd.f32 %v3813_v42, %v3812_v55  ;;  %v5166_v18 = vld [vmem:[%s9719_s4 + $0xa8] sm:$0xff]  ;;  %v5176_v55 = vld [vmem:[%s9719_s4 + $0x80] sm:$0xff]  ;;  %v5178_v51 = vld [vmem:[%s9719_s4 + $0x2f8] sm:$0xff] }
 0x144   :  { %1751 = vmatprep.mubr.f32.mxu0 %v1126_v14  ;;  %4253 = vmatpush3.msra.mxu0 %v5165_v11  ;;  %v3866_v62 = vpop.f32.mrf.mxu1  ;;  %v3815_v2 = vpop.f32.mrf.mxu0  ;;  %v1879_v14 = vld [vmem:[%s9723_s2 + $0x18] sm:$0xff] }
 0x145   :  { %4306 = vmatpush3.msra.mxu1 %v6902_v20  ;;  %1752 = vmatmul.mubr.f32.gmra.mxu0 %v1125_v45  ;;  %v810_v5 = vadd.f32 %v3814_v39, %v7519_v30  ;;  %v3867_v52 = vadd.f32 %v3866_v62, %v3865_v23  ;;  %v1139_v20 = vld [vmem:[%s9721_s1 + $0x2c8] sm:$0x3] }
 0x146   :  { %4965 = vmatprep.mubr.msk.f32.mxu1 %vm5480_vm1, %v9912_v44  ;;  %4254 = vmatprep.subr.mxu0 %v5166_v18  ;;  %v3816_v1 = vpop.f32.mrf.mxu0 }
 0x147   :  { %4307 = vmatprep.subr.mxu1 %v6917_v22  ;;  %4966 = vmatmul.mubr.msk.f32.gmra.mxu1 %vm321_vm0, %v1114_v59  ;;  %v7751_v30 = vadd.f32 %v3867_v52, %v810_v5  ;;  %v1138_v22 = vld [vmem:[%s9721_s1 + $0x2c0] sm:$0x3]  ;;  %v3817_v13 = vadd.f32 %v3816_v1, %v3815_v2  ;;  %v5181_v52 = vld [vmem:[%s9719_s4 + $0x270] sm:$0xff] }
 0x148   :  { %4255 = vmatpush3.msra.mxu0 %v5167_v61  ;;  %4308 = vmatpush3.msra.mxu1 %v6925_v31  ;;  %v3868_v46 = vpop.f32.mrf.mxu1  ;;  %v1127_v31 = vld [vmem:[%s9721_s1 + $0x268] sm:$0xff]  ;;  %v9913_v1 = vld [vmem:[#allocation2_spill] sm:$0xff] }
 0x149   :  { %4256 = vmatprep.subr.mxu0 %v5168_v60  ;;  %4309 = vmatprep.subr.mxu1 %v6932_v24  ;;  %v815_v38 = vadd.f32 %v3817_v13, %v7560_v19  ;;  %v5170_v24 = vld [vmem:[%s9719_s4 + $0x98] sm:$0xff]  ;;  %v1892_v60 = vld [vmem:[%s9723_s2 + $0x80] sm:$0xff] }
 0x14a   :  { %1756 = vmatprep.mubr.f32.mxu0 %v1139_v20  ;;  %4257 = vmatpush3.msra.mxu0 %v5169_v4  ;;  %v3818_v17 = vpop.f32.mrf.mxu0  ;;  %v3869_v0 = vpop.f32.mrf.mxu1  ;;  %v1891_v4 = vld [vmem:[%s9723_s2 + $0x78] sm:$0xff] }
 0x14b   :  { %4310 = vmatpush3.msra.mxu1 %v6942_v26  ;;  %1757 = vmatmul.mubr.f32.gmra.mxu0 %v1138_v22  ;;  %v3870_v37 = vadd.f32 %v3869_v0, %v3868_v46  ;;  %v5171_v26 = vld [vmem:[%s9719_s4 + $0x18] sm:$0xff]  ;;  %v9914_v46 = vld [vmem:[#allocation3_spill] sm:$0xff]  ;;  %v5185_v0 = vld [vmem:[%s9719_s4 + $0x260] sm:$0xff] }
 0x14c   :  { %4968 = vmatprep.mubr.msk.f32.mxu1 %vm5480_vm1, %v9912_v44  ;;  %4258 = vmatprep.subr.mxu0 %v5170_v24  ;;  %v3819_v21 = vpop.f32.mrf.mxu0  ;;  %v9915_v24 = vld [vmem:[#allocation4_spill] sm:$0xff] }
 0x14d   :  { %4311 = vmatprep.subr.mxu1 %v6957_v28  ;;  %4969 = vmatmul.mubr.msk.f32.gmra.mxu1 %vm321_vm0, %v1127_v31  ;;  %v3820_v19 = vadd.f32 %v3819_v21, %v3818_v17  ;;  %v3871_v8 = vpop.f32.mrf.mxu1  ;;  %v7783_v29 = vadd.f32 %v3870_v37, %v815_v38  ;;  %v1140_v28 = vld [vmem:[%s9721_s1 + $0x2d0] sm:$0x3]  ;;  %v5186_v21 = vld [vmem:[%s9719_s4 + $0x2d8] sm:$0xff] }
 0x14e   :  { %4259 = vmatpush3.msra.mxu0 %v5171_v26  ;;  %4312 = vmatpush3.msra.mxu1 %v6965_v3 }
 0x14f   :  { %4260 = vmatprep.subr.mxu0 %v5172_v6  ;;  %4313 = vmatprep.subr.mxu1 %v6975_v15  ;;  %v820_v3 = vadd.f32 %v3820_v19, %v7591_v27  ;;  %v3821_v41 = vpop.f32.mrf.mxu0  ;;  %v3872_v35 = vpop.f32.mrf.mxu1  ;;  %v5174_v15 = vld [vmem:[%s9719_s4 + $0x88] sm:$0xff]  ;;  %v9916_v19 = vld [vmem:[#allocation5_spill] sm:$0xff] }
 0x150   :  { %4261 = vmatpush3.msra.mxu0 %v5173_v50  ;;  %4314 = vmatpush3.msra.mxu1 %v6982_v32  ;;  %v3873_v57 = vadd.f32 %v3872_v35, %v3871_v8  ;;  %v1877_v32 = vld [vmem:[%s9723_s2 + $0x8] sm:$0xff]  ;;  %v1902_v8 = vld [vmem:[%s9723_s2 + $0xd0] sm:$0xff] }
 0x151   :  { %4971 = vmatprep.mubr.msk.f32.mxu1 %vm5480_vm1, %v9912_v44  ;;  %4262 = vmatprep.subr.mxu0 %v5174_v15  ;;  %v3822_v27 = vpop.f32.mrf.mxu0  ;;  %v5188_v35 = vld [vmem:[%s9719_s4 + $0x2d0] sm:$0xff]  ;;  %v1905_v15 = vld [vmem:[%s9723_s2 + $0xe8] sm:$0xff] }
 0x152   :  { %4315 = vmatprep.subr.mxu1 %v6992_v34  ;;  %4972 = vmatmul.mubr.msk.f32.gmra.mxu1 %vm321_vm0, %v1140_v28  ;;  %v3823_v10 = vadd.f32 %v3822_v27, %v3821_v41  ;;  %v3874_v34 = vpop.f32.mrf.mxu1  ;;  %v7814_v12 = vadd.f32 %v3873_v57, %v820_v3  ;;  %v5187_v3 = vld [vmem:[%s9719_s4 + $0x258] sm:$0xff]  ;;  %v9917_v41 = vld [vmem:[#allocation6_spill] sm:$0xff]  ;;  %v9918_v27 = vld [vmem:[#allocation7_spill] sm:$0xff] }
 0x153   :  { %4263 = vmatpush3.msra.mxu0 %v5175_v43  ;;  %4316 = vmatpush3.msra.mxu1 %v6999_v36  ;;  %v5177_v36 = vld [vmem:[%s9719_s4] sm:$0xff] }
 0x154   :  { %4264 = vmatprep.subr.mxu0 %v5176_v55  ;;  %4317 = vmatprep.subr.mxu1 %v7009_v40  ;;  %v825_v45 = vadd.f32 %v3823_v10, %v7619_v48  ;;  %v3875_v23 = vpop.f32.mrf.mxu1  ;;  %v5180_v48 = vld [vmem:[%s9719_s4 + $0x2f0] sm:$0xff]  ;;  %v1904_v43 = vld [vmem:[%s9723_s2 + $0xe0] sm:$0xff] }
 0x155   :  { %4265 = vmatpush3.msra.mxu0 %v5177_v36  ;;  %2052 = vmatprep.mubr.f32.mxu0 %v1877_v32  ;;  %v3824_v42 = vpop.f32.mrf.mxu0  ;;  %v3876_v40 = vadd.f32 %v3875_v23, %v3874_v34  ;;  %v5189_v34 = vld [vmem:[%s9719_s4 + $0x250] sm:$0xff]  ;;  %v1916_v36 = vld [vmem:[%s9723_s2 + $0x140] sm:$0xff]  ;;  %v5193_v23 = vld [vmem:[%s9719_s4 + $0x248] sm:$0xff] }
 0x156   :  { %4318 = vmatpush3.msra.mxu1 %v7022_v54  ;;  %2053 = vmatmul.mubr.f32.vlgmr.msra.gmra.mxu0 %v1876_v56  ;;  %v5179_v54 = vld [vmem:[%s9719_s4 + $0x278] sm:$0xff]  ;;  %v5190_v55 = vld [vmem:[%s9719_s4 + $0x350] sm:$0xff] }
 0x157   :  { %2152 = vmatprep.mubr.f32.mxu1 %v1879_v14  ;;  %4340 = vmatprep.subr.mxu0 %v5178_v51  ;;  %v3825_v39 = vpop.f32.mrf.mxu0  ;;  %v3877_v59 = vpop.f32.mrf.mxu1  ;;  %v7835_v62 = vadd.f32 %v3876_v40, %v825_v45  ;;  %v5191_v14 = vld [vmem:[%s9719_s4 + $0x2c8] sm:$0xff]  ;;  %v5195_v51 = vld [vmem:[%s9719_s4 + $0x2c0] sm:$0xff] }
 0x158   :  { %4393 = vmatprep.subr.mxu1 %v7033_v25  ;;  %2153 = vmatmul.mubr.f32.vlgmr.msra.gmra.mxu1 %v1878_v58  ;;  %v3826_v11 = vadd.f32 %v3825_v39, %v3824_v42  ;;  %v5192_v42 = vld [vmem:[%s9719_s4 + $0x3c8] sm:$0xff]  ;;  %v1918_v39 = vld [vmem:[%s9723_s2 + $0x150] sm:$0xff] }
 0x159   :  { %4341 = vmatpush3.msra.mxu0 %v5179_v54  ;;  %4394 = vmatpush3.msra.mxu1 %v7043_v47  ;;  %v3878_v2 = vpop.f32.mrf.mxu1  ;;  %v1890_v47 = vld [vmem:[%s9723_s2 + $0x70] sm:$0xff]  ;;  %v5194_v40 = vld [vmem:[%s9719_s4 + $0x348] sm:$0xff] }
 0x15a   :  { %4342 = vmatprep.subr.mxu0 %v5180_v48  ;;  %4395 = vmatprep.subr.mxu1 %v7053_v9  ;;  %v830_v25 = vadd.f32 %v3826_v11, %v7648_v63  ;;  %v3827_v5 = vpop.f32.mrf.mxu0  ;;  %v3879_v18 = vadd.f32 %v3878_v2, %v3877_v59  ;;  %v5182_v9 = vld [vmem:[%s9719_s4 + $0x2e8] sm:$0xff]  ;;  %v5196_v59 = vld [vmem:[%s9719_s4 + $0x3c0] sm:$0xff] }
 0x15b   :  { %4343 = vmatpush3.msra.mxu0 %v5181_v52  ;;  %4396 = vmatpush3.msra.mxu1 %v7063_v49  ;;  %v1889_v63 = vld [vmem:[%s9723_s2 + $0x68] sm:$0xff]  ;;  %v5198_v52 = vld [vmem:[%s9719_s4 + $0x2b8] sm:$0xff] }
 0x15c   :  { %4344 = vmatprep.subr.mxu0 %v5182_v9  ;;  %4397 = vmatprep.subr.mxu1 %v7073_v33  ;;  %v3828_v20 = vpop.f32.mrf.mxu0  ;;  %v5183_v49 = vld [vmem:[%s9719_s4 + $0x268] sm:$0xff]  ;;  %v7864_v13 = vadd.f32 %v3879_v18, %v830_v25  ;;  %v5184_v33 = vld [vmem:[%s9719_s4 + $0x2e0] sm:$0xff] }
 0x15d   :  { %4345 = vmatpush3.msra.mxu0 %v5183_v49  ;;  %4398 = vmatpush3.msra.mxu1 %v9913_v1  ;;  %v3829_v61 = vadd.f32 %v3828_v20, %v3827_v5  ;;  %v3880_v22 = vpop.f32.mrf.mxu1  ;;  %v1917_v54 = vld [vmem:[%s9723_s2 + $0x148] sm:$0xff]  ;;  %v5197_v25 = vld [vmem:[%s9719_s4 + $0x240] sm:$0xff]  ;;  %v9919_v5 = vld [vmem:[#allocation8_spill] sm:$0xff] }
 0x15e   :  { %2057 = vmatprep.mubr.f32.mxu0 %v1890_v47  ;;  %4346 = vmatprep.subr.mxu0 %v5184_v33  ;;  %v1929_v47 = vld [vmem:[%s9723_s2 + $0x1a8] sm:$0xff]  ;;  %v1928_v18 = vld [vmem:[%s9723_s2 + $0x1a0] sm:$0xff]  ;;  %v5200_v49 = vld [vmem:[%s9719_s4 + $0x2b0] sm:$0xff] }
 0x15f   :  { %4399 = vmatprep.subr.mxu1 %v9914_v46  ;;  %2058 = vmatmul.mubr.f32.gmra.mxu0 %v1889_v63  ;;  %v835_v31 = vadd.f32 %v3829_v61, %v7679_v16  ;;  %v3830_v38 = vpop.f32.mrf.mxu0  ;;  %v3881_v17 = vpop.f32.mrf.mxu1  ;;  %v1903_v16 = vld [vmem:[%s9723_s2 + $0xd8] sm:$0xff]  ;;  %v9921_v20 = vld [vmem:[#allocation10_spill] sm:$0xff]  ;;  %v1930_v33 = vld [vmem:[%s9723_s2 + $0x1b0] sm:$0xff] }
 0x160   :  { %4347 = vmatpush3.msra.mxu0 %v5185_v0  ;;  %4400 = vmatpush3.msra.mxu1 %v9915_v24  ;;  %v3882_v37 = vadd.f32 %v3881_v17, %v3880_v22  ;;  %v5199_v63 = vld [vmem:[%s9719_s4 + $0x238] sm:$0xff]  ;;  %v9922_v22 = vld [vmem:[#allocation11_spill] sm:$0xff]  ;;  %v5201_v46 = vld [vmem:[%s9719_s4 + $0x230] sm:$0xff] }
 0x161   :  { %2157 = vmatprep.mubr.f32.mxu1 %v1892_v60  ;;  %4348 = vmatprep.subr.mxu0 %v5186_v21  ;;  %v3831_v26 = vpop.f32.mrf.mxu0  ;;  %v1931_v1 = vld [vmem:[%s9723_s2 + $0x1b8] sm:$0xff]  ;;  %v5202_v17 = vld [vmem:[%s9719_s4 + $0x2a8] sm:$0xff]  ;;  %v9925_v21 = vld [vmem:[#allocation14_spill] sm:$0xff] }
 0x162   :  { %4401 = vmatprep.subr.mxu1 %v9916_v19  ;;  %2158 = vmatmul.mubr.f32.gmra.mxu1 %v1891_v4  ;;  %v3832_v6 = vadd.f32 %v3831_v26, %v3830_v38  ;;  %v3883_v28 = vpop.f32.mrf.mxu1  ;;  %v7891_v50 = vadd.f32 %v3882_v37, %v835_v31  ;;  %v9923_v4 = vld [vmem:[#allocation12_spill] sm:$0xff]  ;;  %v9924_v0 = vld [vmem:[#allocation13_spill] sm:$0xff]  ;;  %v1941_v24 = vld [vmem:[%s9723_s2 + $0x208] sm:$0xff] }
 0x163   :  { %4349 = vmatpush3.msra.mxu0 %v5187_v3  ;;  %4402 = vmatpush3.msra.mxu1 %v9917_v41  ;;  %v5203_v37 = vld [vmem:[%s9719_s4 + $0x228] sm:$0xff]  ;;  %v5204_v26 = vld [vmem:[%s9719_s4 + $0x2a0] sm:$0xff]  ;;  %v1943_v3 = vld [vmem:[%s9723_s2 + $0x218] sm:$0xff] }
 0x164   :  { %2062 = vmatprep.mubr.f32.mxu0 %v1903_v16  ;;  %4350 = vmatprep.subr.mxu0 %v5188_v35  ;;  %v840_v57 = vadd.f32 %v3832_v6, %v7710_v53  ;;  %v3884_v32 = vpop.f32.mrf.mxu1  ;;  %v1009_v10 = vpop.f32.mrf.mxu0  ;;  %v1944_v19 = vld [vmem:[%s9723_s2 + $0x220] sm:$0xff] }
 0x165   :  { %4403 = vmatprep.subr.mxu1 %v9918_v27  ;;  %2063 = vmatmul.mubr.f32.gmra.mxu0 %v1902_v8  ;;  %v3885_v56 = vadd.f32 %v3884_v32, %v3883_v28  ;;  %v7915_v53 = vadd.f32 %v1009_v10, %v7751_v30  ;;  %v1915_v30 = vld [vmem:[%s9723_s2 + $0x138] sm:$0xff]  ;;  %v5205_v28 = vld [vmem:[%s9719_s4 + $0x3a0] sm:$0xff]  ;;  %v9927_v27 = vld [vmem:[#allocation16_spill] sm:$0xff] }
 0x166   :  { %4351 = vmatpush3.msra.mxu0 %v5189_v34  ;;  %4404 = vmatpush3.msra.mxu1 %v5190_v55  ;;  %v4918_v58 = vpop.f32.mrf.mxu0  ;;  %v5206_v35 = vld [vmem:[%s9719_s4 + $0x220] sm:$0xff]  ;;  %v1955_v32 = vld [vmem:[%s9723_s2 + $0x278] sm:$0x3]  ;;  %v5209_v55 = vld [vmem:[%s9719_s4 + $0x290] sm:$0xff] }
 0x167   :  { %2162 = vmatprep.mubr.f32.mxu1 %v1905_v15  ;;  %4352 = vmatprep.subr.mxu0 %v5191_v14  ;;  %v7923_v45 = vadd.f32 %v3885_v56, %v840_v57  ;;  %v5207_v57 = vld [vmem:[%s9719_s4 + $0x298] sm:$0xff]  ;;  %v1957_v14 = vld [vmem:[%s9723_s2 + $0x288] sm:$0x3] }
 0x168   :  { %4405 = vmatprep.subr.mxu1 %v5192_v42  ;;  %2163 = vmatmul.mubr.f32.gmra.mxu1 %v1904_v43  ;;  %v1954_v43 = vld [vmem:[%s9723_s2 + $0x270] sm:$0x3]  ;;  %v5208_v56 = vld [vmem:[%s9719_s4 + $0x218] sm:$0xff]  ;;  %v9929_v42 = vld [vmem:[#allocation18_spill] sm:$0xff] }
 0x169   :  { %4353 = vmatpush3.msra.mxu0 %v5193_v23  ;;  %4406 = vmatpush3.msra.mxu1 %v5194_v40  ;;  %v1014_v11 = vpop.f32.mrf.mxu0  ;;  %v9928_v10 = vld [vmem:[#allocation17_spill] sm:$0xff]  ;;  %v5210_v40 = vld [vmem:[%s9719_s4 + $0x210] sm:$0xff] }
 0x16a   :  { %2067 = vmatprep.mubr.f32.mxu0 %v1916_v36  ;;  %4354 = vmatprep.subr.mxu0 %v5195_v51  ;;  %v7950_v48 = vadd.f32 %v1014_v11, %v7783_v29  ;;  %v9920_v29 = vld [vmem:[#allocation9_spill] sm:$0xff]  ;;  %v9930_v51 = vld [vmem:[#allocation19_spill] sm:$0xff]  ;;  %v9931_v11 = vld [vmem:[#allocation20_spill] sm:$0xff] }
 0x16b   :  { %4407 = vmatprep.subr.mxu1 %v5196_v59  ;;  %2068 = vmatmul.mubr.f32.gmra.mxu0 %v1915_v30  ;;  %v4921_v2 = vpop.f32.mrf.mxu0  ;;  %v7966_v9 = vpop.f32.mrf.mxu1  ;;  %v1956_v30 = vld [vmem:[%s9723_s2 + $0x280] sm:$0x3]  ;;  %v1881_v59 = vld [vmem:[%s9723_s2 + $0x28] sm:$0xff] }
 0x16c   :  { %4355 = vmatpush3.msra.mxu0 %v5197_v25  ;;  %4408 = vmatpush3.msra.mxu1 %v9919_v5  ;;  %v9932_v25 = vld [vmem:[#allocation21_spill] sm:$0xff]  ;;  %v1880_v5 = vld [vmem:[%s9723_s2 + $0x20] sm:$0xff] }
 0x16d   :  { %2167 = vmatprep.mubr.f32.mxu1 %v1918_v39  ;;  %4356 = vmatprep.subr.mxu0 %v5198_v52  ;;  %v7989_v38 = vpop.f32.mrf.mxu1  ;;  %v5213_v52 = vld [vmem:[%s9719_s4 + $0x280] sm:$0xff] }
 0x16e   :  { %4409 = vmatprep.subr.mxu1 %v9920_v29  ;;  %2168 = vmatmul.mubr.f32.gmra.mxu1 %v1917_v54  ;;  %v5212_v54 = vld [vmem:[%s9719_s4 + $0x208] sm:$0xff]  ;;  %v1883_v29 = vld [vmem:[%s9723_s2 + $0x38] sm:$0xff] }
 0x16f   :  { %4357 = vmatpush3.msra.mxu0 %v5199_v63  ;;  %4410 = vmatpush3.msra.mxu1 %v9921_v20  ;;  %v1019_v61 = vpop.f32.mrf.mxu0  ;;  %v5214_v20 = vld [vmem:[%s9719_s4 + $0x200] sm:$0xff] }
 0x170   :  { %2072 = vmatprep.mubr.f32.mxu0 %v1929_v47  ;;  %4358 = vmatprep.subr.mxu0 %v5200_v49  ;;  %v7983_v60 = vadd.f32 %v1019_v61, %v7814_v12  ;;  %v1942_v12 = vld [vmem:[%s9723_s2 + $0x210] sm:$0xff]  ;;  %v9933_v47 = vld [vmem:[#allocation22_spill] sm:$0xff] }
 0x171   :  { %4411 = vmatprep.subr.mxu1 %v9922_v22  ;;  %2073 = vmatmul.mubr.f32.gmra.mxu0 %v1928_v18  ;;  %v4924_v31 = vpop.f32.mrf.mxu0  ;;  %v1882_v49 = vld [vmem:[%s9723_s2 + $0x30] sm:$0xff]  ;;  %v5215_v61 = vld [vmem:[%s9719_s4 + $0x300] sm:$0xff]  ;;  %v5216_v22 = vld [vmem:[%s9719_s4 + $0x4f8] sm:$0xff] }
 0x172   :  { %4359 = vmatpush3.msra.mxu0 %v5201_v46  ;;  %4412 = vmatpush3.msra.mxu1 %v9923_v4  ;;  %v1894_v46 = vld [vmem:[%s9723_s2 + $0x90] sm:$0xff]  ;;  %v5217_v4 = vld [vmem:[%s9719_s4 + $0x478] sm:$0xff] }
 0x173   :  { %2172 = vmatprep.mubr.f32.mxu1 %v1931_v1  ;;  %4360 = vmatprep.subr.mxu0 %v5202_v17  ;;  %v9935_v31 = vld [vmem:[#allocation24_spill] sm:$0xff]  ;;  %v1893_v17 = vld [vmem:[%s9723_s2 + $0x88] sm:$0xff] }
 0x174   :  { %4413 = vmatprep.subr.mxu1 %v9924_v0  ;;  %2173 = vmatmul.mubr.f32.gmra.mxu1 %v1930_v33  ;;  %v9934_v33 = vld [vmem:[#allocation23_spill] sm:$0xff]  ;;  %v5218_v0 = vld [vmem:[%s9719_s4 + $0x4f0] sm:$0xff] }
 0x175   :  { %4361 = vmatpush3.msra.mxu0 %v5203_v37  ;;  %4414 = vmatpush3.msra.mxu1 %v9925_v21  ;;  %v1024_v16 = vpop.f32.mrf.mxu0  ;;  %v8014_v6 = vpop.f32.mrf.mxu1 }
 0x176   :  { %2077 = vmatprep.mubr.f32.mxu0 %v1942_v12  ;;  %4362 = vmatprep.subr.mxu0 %v5204_v26  ;;  %v8012_v8 = vadd.f32 %v1024_v16, %v7835_v62  ;;  %v9926_v62 = vld [vmem:[#allocation15_spill] sm:$0xff]  ;;  %v5219_v16 = vld [vmem:[%s9719_s4 + $0x470] sm:$0xff]  ;;  %v1896_v26 = vld [vmem:[%s9723_s2 + $0xa0] sm:$0xff] }
 0x177   :  { %4415 = vmatprep.subr.mxu1 %v5205_v28  ;;  %2078 = vmatmul.mubr.f32.gmra.mxu0 %v1941_v24  ;;  %v4927_v41 = vpop.f32.mrf.mxu0  ;;  %v8026_v15 = vpop.f32.mrf.mxu1  ;;  %v9936_v24 = vld [vmem:[#allocation25_spill] sm:$0xff]  ;;  %v9937_v28 = vld [vmem:[#allocation26_spill] sm:$0xff] }
 0x178   :  { %4363 = vmatpush3.msra.mxu0 %v5206_v35  ;;  %4416 = vmatpush3.msra.mxu1 %v9926_v62  ;;  %v9938_v41 = vld [vmem:[#allocation27_spill] sm:$0xff]  ;;  %v1895_v35 = vld [vmem:[%s9723_s2 + $0x98] sm:$0xff] }
 0x179   :  { %2177 = vmatprep.mubr.f32.mxu1 %v1944_v19  ;;  %4364 = vmatprep.subr.mxu0 %v5207_v57  ;;  %v5221_v62 = vld [vmem:[%s9719_s4 + $0x468] sm:$0xff]  ;;  %v1907_v57 = vld [vmem:[%s9723_s2 + $0xf8] sm:$0xff] }
 0x17a   :  { %4417 = vmatprep.subr.mxu1 %v9927_v27  ;;  %2178 = vmatmul.mubr.f32.gmra.mxu1 %v1943_v3  ;;  %v5222_v27 = vld [vmem:[%s9719_s4 + $0x4e0] sm:$0xff] }
 0x17b   :  { %4365 = vmatpush3.msra.mxu0 %v5208_v56  ;;  %4418 = vmatpush3.msra.mxu1 %v9928_v10  ;;  %v1029_v34 = vpop.f32.mrf.mxu0  ;;  %v8051_v58 = vpop.f32.mrf.mxu1  ;;  %v9940_v10 = vld [vmem:[#allocation29_spill] sm:$0xff] }
 0x17c   :  { %2082 = vmatprep.mubr.f32.mxu0 %v1955_v32  ;;  %4366 = vmatprep.subr.mxu0 %v5209_v55  ;;  %v8049_v36 = vadd.f32 %v1029_v34, %v7864_v13  ;;  %v5211_v13 = vld [vmem:[%s9719_s4 + $0x288] sm:$0xff]  ;;  %v9939_v32 = vld [vmem:[#allocation28_spill] sm:$0xff]  ;;  %v5223_v34 = vld [vmem:[%s9719_s4 + $0x460] sm:$0xff] }
 0x17d   :  { %4419 = vmatprep.subr.mxu1 %v9929_v42  ;;  %2083 = vmatmul.mubr.f32.gmra.mxu0 %v1954_v43  ;;  %v4930_v23 = vpop.f32.mrf.mxu0  ;;  %v8061_v39 = vpop.f32.mrf.mxu1  ;;  %v1906_v43 = vld [vmem:[%s9723_s2 + $0xf0] sm:$0xff]  ;;  %v1909_v55 = vld [vmem:[%s9723_s2 + $0x108] sm:$0xff]  ;;  %v9941_v42 = vld [vmem:[#allocation30_spill] sm:$0xff] }
 0x17e   :  { %4367 = vmatpush3.msra.mxu0 %v5210_v40  ;;  %4420 = vmatpush3.msra.mxu1 %v9930_v51  ;;  %v5224_v23 = vld [vmem:[%s9719_s4 + $0x4d8] sm:$0xff]  ;;  %v9942_v40 = vld [vmem:[#allocation31_spill] sm:$0xff]  ;;  %v1908_v51 = vld [vmem:[%s9723_s2 + $0x100] sm:$0xff] }
 0x17f   :  { %2182 = vmatprep.mubr.f32.mxu1 %v1957_v14  ;;  %4368 = vmatprep.subr.mxu0 %v5211_v13 }
 0x180   :  { %4421 = vmatprep.subr.mxu1 %v9931_v11  ;;  %2183 = vmatmul.mubr.f32.gmra.mxu1 %v1956_v30  ;;  %v3935_v30 = vadd.f32 %v7989_v38, %v7966_v9  ;;  %v5225_v11 = vld [vmem:[%s9719_s4 + $0x458] sm:$0xff]  ;;  %v1920_v9 = vld [vmem:[%s9723_s2 + $0x160] sm:$0xff]  ;;  %v9943_v38 = vld [vmem:[#allocation32_spill] sm:$0xff] }
 0x181   :  { %4369 = vmatpush3.msra.mxu0 %v5212_v54  ;;  %4422 = vmatpush3.msra.mxu1 %v9932_v25  ;;  %v1034_v2 = vpop.f32.mrf.mxu0  ;;  %v8087_v63 = vpop.f32.mrf.mxu1  ;;  %v1919_v54 = vld [vmem:[%s9723_s2 + $0x158] sm:$0xff] }
 0x182   :  { %4370 = vmatprep.subr.mxu0 %v5213_v52  ;;  %4423 = vmatprep.subr.mxu1 %v9933_v47  ;;  %v8085_v18 = vadd.f32 %v1034_v2, %v7891_v50  ;;  %v9944_v2 = vld [vmem:[#allocation33_spill] sm:$0xff]  ;;  %v8192_v52 = vld [vmem:[%s9722_s5] ss:$0 sm:$0xff] }
 0x183   :  { %4371 = vmatpush3.msra.mxu0 %v5214_v20  ;;  %2252 = vmatprep.mubr.f32.mxu0 %v1881_v59  ;;  %v4933_v1 = vpop.f32.mrf.mxu0  ;;  %v8098_v50 = vpop.f32.mrf.mxu1  ;;  %v5226_v59 = vld [vmem:[%s9719_s4 + $0x4d0] sm:$0xff]  ;;  %v1229_v47 = vadd.f32 %v8192_v52, %v3935_v30 }
 0x184   :  { %4424 = vmatpush3.msra.mxu1 %v5215_v61  ;;  %2253 = vmatmul.mubr.f32.vlgmr.msra.gmra.mxu0 %v1880_v5  ;;  %v5228_v20 = vld [vmem:[%s9719_s4 + $0x450] sm:$0xff] }
 0x185   :  { %2352 = vmatprep.mubr.f32.mxu1 %v1883_v29  ;;  %4446 = vmatprep.subr.mxu0 %v5216_v22  ;;  %v5229_v61 = vld [vmem:[%s9719_s4 + $0x550] sm:$0xff]  ;;  %v3938_v22 = vadd.f32 %v8026_v15, %v8014_v6  ;;  %v1933_v6 = vld [vmem:[%s9723_s2 + $0x1c8] sm:$0xff] }
 0x186   :  { %4499 = vmatprep.subr.mxu1 %v9934_v33  ;;  %2353 = vmatmul.mubr.f32.vlgmr.msra.gmra.mxu1 %v1882_v49  ;;  %v1922_v49 = vld [vmem:[%s9723_s2 + $0x170] sm:$0xff]  ;;  %v5232_v15 = vld [vmem:[%s9719_s4 + $0x548] sm:$0xff] }
 0x187   :  { %4447 = vmatpush3.msra.mxu0 %v5217_v4  ;;  %4500 = vmatpush3.msra.mxu1 %v9935_v31  ;;  %v1039_v12 = vpop.f32.mrf.mxu0  ;;  %v8121_v21 = vpop.f32.mrf.mxu1  ;;  %v1921_v4 = vld [vmem:[%s9723_s2 + $0x168] sm:$0xff]  ;;  %v5241_v30 = vld [vmem:[%s9719_s4 + $0x4b0] sm:$0xff] }
 0x188   :  { %4448 = vmatprep.subr.mxu0 %v5218_v0  ;;  %4501 = vmatprep.subr.mxu1 %v9936_v24  ;;  %v8119_v37 = vadd.f32 %v1039_v12, %v7923_v45  ;;  %v5220_v45 = vld [vmem:[%s9719_s4 + $0x4e8] sm:$0xff]  ;;  %v1932_v12 = vld [vmem:[%s9723_s2 + $0x1c0] sm:$0xff] }
 0x189   :  { %2257 = vmatprep.mubr.f32.mxu0 %v1894_v46  ;;  %4449 = vmatpush3.msra.mxu0 %v5219_v16  ;;  %v4936_v19 = vpop.f32.mrf.mxu0  ;;  %v8130_v3 = vpop.f32.mrf.mxu1  ;;  %v5230_v46 = vld [vmem:[%s9719_s4 + $0x4c8] sm:$0xff]  ;;  %v5234_v16 = vld [vmem:[%s9719_s4 + $0x5c0] sm:$0xff] }
 0x18a   :  { %4502 = vmatpush3.msra.mxu1 %v9937_v28  ;;  %2258 = vmatmul.mubr.f32.gmra.mxu0 %v1893_v17  ;;  %v5231_v17 = vld [vmem:[%s9719_s4 + $0x448] sm:$0xff]  ;;  %v5235_v28 = vld [vmem:[%s9719_s4 + $0x440] sm:$0xff] }
 0x18b   :  { %4450 = vmatprep.subr.mxu0 %v5220_v45  ;;  %4503 = vmatprep.subr.mxu1 %v9938_v41  ;;  %v1935_v45 = vld [vmem:[%s9723_s2 + $0x1d8] sm:$0xff] }
 0x18c   :  { %2357 = vmatprep.mubr.f32.mxu1 %v1896_v26  ;;  %4451 = vmatpush3.msra.mxu0 %v5221_v62  ;;  %v1234_v26 = vadd.f32 %v8192_v52, %v3938_v22  ;;  %v3941_v62 = vadd.f32 %v8061_v39, %v8051_v58  ;;  %v5239_v58 = vld [vmem:[%s9719_s4 + $0x438] sm:$0xff]  ;;  %v1946_v39 = vld [vmem:[%s9723_s2 + $0x230] sm:$0xff] }
 0x18d   :  { %4504 = vmatpush3.msra.mxu1 %v9939_v32  ;;  %4452 = vmatprep.subr.mxu0 %v5222_v27  ;;  %v8152_v56 = vpop.f32.mrf.mxu1  ;;  %v5237_v27 = vld [vmem:[%s9719_s4 + $0x4b8] sm:$0xff] }
 0x18e   :  { %2358 = vmatmul.mubr.f32.gmra.mxu1 %v1895_v35  ;;  %4505 = vmatprep.subr.mxu1 %v9940_v10  ;;  %v5236_v35 = vld [vmem:[%s9719_s4 + $0x540] sm:$0xff]  ;;  %v1934_v10 = vld [vmem:[%s9723_s2 + $0x1d0] sm:$0xff] }
 0x18f   :  { %2262 = vmatprep.mubr.f32.mxu0 %v1907_v57  ;;  %4453 = vmatpush3.msra.mxu0 %v5223_v34  ;;  %v8161_v14 = vpop.f32.mrf.mxu1 }
 0x190   :  { %4506 = vmatpush3.msra.mxu1 %v9941_v42  ;;  %2263 = vmatmul.mubr.f32.gmra.mxu0 %v1906_v43  ;;  %v5238_v43 = vld [vmem:[%s9719_s4 + $0x5b8] sm:$0xff] }
 0x191   :  { %4454 = vmatprep.subr.mxu0 %v5224_v23  ;;  %4507 = vmatprep.subr.mxu1 %v9942_v40  ;;  %v3986_v13 = vpop.f32.mrf.mxu0  ;;  %v5240_v42 = vld [vmem:[%s9719_s4 + $0x538] sm:$0xff]  ;;  %v1945_v23 = vld [vmem:[%s9723_s2 + $0x228] sm:$0xff] }
 0x192   :  { %2362 = vmatprep.mubr.f32.mxu1 %v1909_v55  ;;  %4455 = vmatpush3.msra.mxu0 %v5225_v11  ;;  %v8186_v25 = vpop.f32.mrf.mxu1  ;;  %v1239_v11 = vadd.f32 %v8192_v52, %v3941_v62  ;;  %v1960_v62 = vld [vmem:[%s9723_s2 + $0x2a0] sm:$0x3] }
 0x193   :  { %4508 = vmatpush3.msra.mxu1 %v9943_v38  ;;  %4456 = vmatprep.subr.mxu0 %v5226_v59  ;;  %v3987_v5 = vpop.f32.mrf.mxu0  ;;  %v5243_v38 = vld [vmem:[%s9719_s4 + $0x430] sm:$0xff]  ;;  %v1948_v59 = vld [vmem:[%s9723_s2 + $0x240] sm:$0xff] }
 0x194   :  { %2363 = vmatmul.mubr.f32.gmra.mxu1 %v1908_v51  ;;  %4509 = vmatprep.subr.mxu1 %v9944_v2  ;;  %v3988_v29 = vadd.f32 %v3987_v5, %v3986_v13  ;;  %v8201_v1 = vpop.f32.mrf.mxu1  ;;  %v5242_v13 = vld [vmem:[%s9719_s4 + $0x5b0] sm:$0xff]  ;;  %v3944_v2 = vadd.f32 %v8098_v50, %v8087_v63  ;;  %v5247_v63 = vld [vmem:[%s9719_s4 + $0x428] sm:$0xff]  ;;  %v1959_v50 = vld [vmem:[%s9723_s2 + $0x298] sm:$0x3] }
 0x195   :  { %2267 = vmatprep.mubr.f32.mxu0 %v1920_v9  ;;  %4457 = vmatpush3.msra.mxu0 %v5228_v20  ;;  %v5244_v5 = vld [vmem:[%s9719_s4 + $0x530] sm:$0xff]  ;;  %v5245_v20 = vld [vmem:[%s9719_s4 + $0x4a8] sm:$0xff] }
 0x196   :  { %4510 = vmatpush3.msra.mxu1 %v5229_v61  ;;  %2268 = vmatmul.mubr.f32.gmra.mxu0 %v1919_v54  ;;  %v1329_v33 = vadd.f32 %v3988_v29, %v1229_v47  ;;  %v1947_v61 = vld [vmem:[%s9723_s2 + $0x238] sm:$0xff] }
 0x197   :  { %4458 = vmatprep.subr.mxu0 %v5230_v46  ;;  %4511 = vmatprep.subr.mxu1 %v7457_v7  ;;  %v3989_v31 = vpop.f32.mrf.mxu0  ;;  %v5233_v7 = vld [vmem:[%s9719_s4 + $0x4c0] sm:$0xff]  ;;  %v5248_v46 = vld [vmem:[%s9719_s4 + $0x528] sm:$0xff] }
 0x198   :  { %2367 = vmatprep.mubr.f32.mxu1 %v1922_v49  ;;  %4459 = vmatpush3.msra.mxu0 %v5231_v17  ;;  %v4039_v0 = vpop.f32.mrf.mxu1  ;;  %v5246_v49 = vld [vmem:[%s9719_s4 + $0x5a8] sm:$0xff] }
 0x199   :  { %4512 = vmatpush3.msra.mxu1 %v5232_v15  ;;  %4460 = vmatprep.subr.mxu0 %v5233_v7  ;;  %v3990_v24 = vpop.f32.mrf.mxu0  ;;  %v5250_v15 = vld [vmem:[%s9719_s4 + $0x5a0] sm:$0xff]  ;;  %v1244_v7 = vadd.f32 %v8192_v52, %v3944_v2 }
 0x19a   :  { %2368 = vmatmul.mubr.f32.gmra.mxu1 %v1921_v4  ;;  %4513 = vmatprep.subr.mxu1 %v5234_v16  ;;  %v3991_v19 = vadd.f32 %v3990_v24, %v3989_v31  ;;  %v4040_v41 = vpop.f32.mrf.mxu1  ;;  %v5249_v4 = vld [vmem:[%s9719_s4 + $0x4a0] sm:$0xff]  ;;  %v1958_v31 = vld [vmem:[%s9723_s2 + $0x290] sm:$0x3]  ;;  %v1961_v24 = vld [vmem:[%s9723_s2 + $0x2a8] sm:$0x3] }
 0x19b   :  { %2272 = vmatprep.mubr.f32.mxu0 %v1933_v6  ;;  %4461 = vmatpush3.msra.mxu0 %v5235_v28  ;;  %v4041_v32 = vadd.f32 %v4040_v41, %v4039_v0  ;;  %v5251_v0 = vld [vmem:[%s9719_s4 + $0x420] sm:$0xff]  ;;  %v5253_v41 = vld [vmem:[%s9719_s4 + $0x498] sm:$0xff] }
 0x19c   :  { %4514 = vmatpush3.msra.mxu1 %v5236_v35  ;;  %2273 = vmatmul.mubr.f32.gmra.mxu0 %v1932_v12  ;;  %v1334_v57 = vadd.f32 %v3991_v19, %v1234_v26  ;;  %v3992_v34 = vpop.f32.mrf.mxu0  ;;  %v5252_v26 = vld [vmem:[%s9719_s4 + $0x520] sm:$0xff]  ;;  %v3947_v19 = vadd.f32 %v8130_v3, %v8121_v21  ;;  %v5254_v35 = vld [vmem:[%s9719_s4 + $0x598] sm:$0xff] }
 0x19d   :  { %4462 = vmatprep.subr.mxu0 %v5237_v27  ;;  %4515 = vmatprep.subr.mxu1 %v5238_v43  ;;  %v8260_v55 = vadd.f32 %v4041_v32, %v1329_v33  ;;  %v5255_v21 = vld [vmem:[%s9719_s4 + $0x418] sm:$0xff]  ;;  %v5257_v27 = vld [vmem:[%s9719_s4 + $0x490] sm:$0xff] }
 0x19e   :  { %2372 = vmatprep.mubr.f32.mxu1 %v1935_v45  ;;  %4463 = vmatpush3.msra.mxu0 %v5239_v58  ;;  %v3993_v51 = vpop.f32.mrf.mxu0  ;;  %v5256_v32 = vld [vmem:[%s9719_s4 + $0x518] sm:$0xff]  ;;  %v1249_v58 = vadd.f32 %v8192_v52, %v3947_v19  ;;  %v5273_v19 = vld [vmem:[%s9719_s4 + $0x70] sm:$0xff] }
 0x19f   :  { %4516 = vmatpush3.msra.mxu1 %v5240_v42  ;;  %4464 = vmatprep.subr.mxu0 %v5241_v30  ;;  %v4042_v40 = vpop.f32.mrf.mxu1  ;;  %v3994_v9 = vadd.f32 %v3993_v51, %v3992_v34  ;;  %v5258_v34 = vld [vmem:[%s9719_s4 + $0x590] sm:$0xff]  ;;  %v5262_v51 = vld [vmem:[%s9719_s4 + $0x588] sm:$0xff] }
 0x1a0   :  { %2373 = vmatmul.mubr.f32.gmra.mxu1 %v1934_v10  ;;  %4517 = vmatprep.subr.mxu1 %v5242_v13  ;;  %v5259_v42 = vld [vmem:[%s9719_s4 + $0x410] sm:$0xff]  ;;  %v1885_v13 = vld [vmem:[%s9723_s2 + $0x48] sm:$0xff] }
 0x1a1   :  { %2277 = vmatprep.mubr.f32.mxu0 %v1946_v39  ;;  %4465 = vmatpush3.msra.mxu0 %v5243_v38  ;;  %v4043_v54 = vpop.f32.mrf.mxu1  ;;  %v1339_v47 = vadd.f32 %v3994_v9, %v1239_v11  ;;  %v5260_v30 = vld [vmem:[%s9719_s4 + $0x510] sm:$0xff]  ;;  %v3950_v11 = vadd.f32 %v8161_v14, %v8152_v56  ;;  %v5265_v56 = vld [vmem:[%s9719_s4 + $0x480] sm:$0xff] }
 0x1a2   :  { %4518 = vmatpush3.msra.mxu1 %v5244_v5  ;;  %2278 = vmatmul.mubr.f32.gmra.mxu0 %v1945_v23  ;;  %v4044_v29 = vadd.f32 %v4043_v54, %v4042_v40  ;;  %v3995_v22 = vpop.f32.mrf.mxu0  ;;  %v5261_v40 = vld [vmem:[%s9719_s4 + $0x488] sm:$0xff]  ;;  %v1884_v5 = vld [vmem:[%s9723_s2 + $0x40] sm:$0xff] }
 0x1a3   :  { %4466 = vmatprep.subr.mxu0 %v5245_v20  ;;  %4519 = vmatprep.subr.mxu1 %v5246_v49  ;;  %v5264_v54 = vld [vmem:[%s9719_s4 + $0x508] sm:$0xff]  ;;  %v5266_v14 = vld [vmem:[%s9719_s4 + $0x580] sm:$0xff]  ;;  %v1886_v49 = vld [vmem:[%s9723_s2 + $0x50] sm:$0xff] }
 0x1a4   :  { %2377 = vmatprep.mubr.f32.mxu1 %v1948_v59  ;;  %4467 = vmatpush3.msra.mxu0 %v5247_v63  ;;  %v8301_v33 = vadd.f32 %v4044_v29, %v1334_v57  ;;  %v3996_v6 = vpop.f32.mrf.mxu0  ;;  %v5263_v59 = vld [vmem:[%s9719_s4 + $0x408] sm:$0xff]  ;;  %v5267_v20 = vld [vmem:[%s9719_s4 + $0x400] sm:$0xff] }
 0x1a5   :  { %4520 = vmatpush3.msra.mxu1 %v5248_v46  ;;  %4468 = vmatprep.subr.mxu0 %v5249_v4  ;;  %v4045_v17 = vpop.f32.mrf.mxu1  ;;  %v3997_v12 = vadd.f32 %v3996_v6, %v3995_v22  ;;  %v5268_v63 = vld [vmem:[%s9719_s4 + $0x500] sm:$0xff]  ;;  %v1898_v4 = vld [vmem:[%s9723_s2 + $0xb0] sm:$0xff]  ;;  %v1897_v6 = vld [vmem:[%s9723_s2 + $0xa8] sm:$0xff] }
 0x1a6   :  { %2378 = vmatmul.mubr.f32.gmra.mxu1 %v1947_v61  ;;  %4521 = vmatprep.subr.mxu1 %v5250_v15  ;;  %v3953_v15 = vadd.f32 %v8201_v1, %v8186_v25  ;;  %v1900_v25 = vld [vmem:[%s9723_s2 + $0xc0] sm:$0xff] }
 0x1a7   :  { %2282 = vmatprep.mubr.f32.mxu0 %v1959_v50  ;;  %4469 = vmatpush3.msra.mxu0 %v5251_v0  ;;  %v4046_v16 = vpop.f32.mrf.mxu1  ;;  %v1344_v28 = vadd.f32 %v3997_v12, %v1244_v7  ;;  %v1254_v50 = vadd.f32 %v8192_v52, %v3950_v11  ;;  %v5270_v0 = vld [vmem:[%s9719_s4 + $0x638] sm:$0xff]  ;;  %v5280_v11 = vld [vmem:[%s9719_s4 + $0x628] sm:$0xff] }
 0x1a8   :  { %4522 = vmatpush3.msra.mxu1 %v5252_v26  ;;  %2283 = vmatmul.mubr.f32.gmra.mxu0 %v1958_v31  ;;  %v4047_v45 = vadd.f32 %v4046_v16, %v4045_v17  ;;  %v3998_v57 = vpop.f32.mrf.mxu0  ;;  %v5269_v17 = vld [vmem:[%s9719_s4 + $0xf8] sm:$0xff]  ;;  %v5272_v26 = vld [vmem:[%s9719_s4 + $0xf0] sm:$0xff] }
 0x1a9   :  { %4470 = vmatprep.subr.mxu0 %v5253_v41  ;;  %4523 = vmatprep.subr.mxu1 %v5254_v35  ;;  %v5274_v35 = vld [vmem:[%s9719_s4 + $0xe8] sm:$0xff] }
 0x1aa   :  { %2382 = vmatprep.mubr.f32.mxu1 %v1961_v24  ;;  %4471 = vmatpush3.msra.mxu0 %v5255_v21  ;;  %v8339_v3 = vadd.f32 %v4047_v45, %v1339_v47  ;;  %v3999_v10 = vpop.f32.mrf.mxu0  ;;  %v1887_v47 = vld [vmem:[%s9723_s2 + $0x58] sm:$0xff] }
 0x1ab   :  { %4524 = vmatpush3.msra.mxu1 %v5256_v32  ;;  %4472 = vmatprep.subr.mxu0 %v5257_v27  ;;  %v4048_v43 = vpop.f32.mrf.mxu1  ;;  %v4000_v39 = vadd.f32 %v3999_v10, %v3998_v57  ;;  %v5271_v24 = vld [vmem:[%s9719_s4 + $0x78] sm:$0xff]  ;;  %v1259_v57 = vadd.f32 %v8192_v52, %v3953_v15  ;;  %v5275_v32 = vld [vmem:[%s9719_s4 + $0x630] sm:$0xff] }
 0x1ac   :  { %2383 = vmatmul.mubr.f32.gmra.mxu1 %v1960_v62  ;;  %4525 = vmatprep.subr.mxu1 %v5258_v34  ;;  %v1899_v62 = vld [vmem:[%s9723_s2 + $0xb8] sm:$0xff]  ;;  %v1910_v10 = vld [vmem:[%s9723_s2 + $0x110] sm:$0xff] }
 0x1ad   :  { %4473 = vmatpush3.msra.mxu0 %v5259_v42  ;;  %4526 = vmatpush3.msra.mxu1 %v5260_v30  ;;  %v4049_v23 = vpop.f32.mrf.mxu1  ;;  %v1349_v9 = vadd.f32 %v4000_v39, %v1249_v58  ;;  %v5277_v58 = vld [vmem:[%s9719_s4 + $0xe0] sm:$0xff]  ;;  %v1913_v39 = vld [vmem:[%s9723_s2 + $0x128] sm:$0xff] }
 0x1ae   :  { %4474 = vmatprep.subr.mxu0 %v5261_v40  ;;  %4527 = vmatprep.subr.mxu1 %v5262_v51  ;;  %v4050_v38 = vadd.f32 %v4049_v23, %v4048_v43  ;;  %v4001_v2 = vpop.f32.mrf.mxu0  ;;  %v5276_v43 = vld [vmem:[%s9719_s4 + $0x68] sm:$0xff]  ;;  %v5278_v42 = vld [vmem:[%s9719_s4 + $0x60] sm:$0xff]  ;;  %v5279_v51 = vld [vmem:[%s9719_s4 + $0xd8] sm:$0xff] }
 0x1af   :  { %4475 = vmatpush3.msra.mxu0 %v5263_v59  ;;  %4528 = vmatpush3.msra.mxu1 %v5264_v54  ;;  %v1924_v30 = vld [vmem:[%s9723_s2 + $0x180] sm:$0xff]  ;;  %v1923_v59 = vld [vmem:[%s9723_s2 + $0x178] sm:$0xff] }
 0x1b0   :  { %4476 = vmatprep.subr.mxu0 %v5265_v56  ;;  %4529 = vmatprep.subr.mxu1 %v5266_v14  ;;  %v8386_v29 = vadd.f32 %v4050_v38, %v1344_v28  ;;  %v4002_v22 = vpop.f32.mrf.mxu0  ;;  %v1911_v28 = vld [vmem:[%s9723_s2 + $0x118] sm:$0xff]  ;;  %v5283_v14 = vld [vmem:[%s9719_s4 + $0x50] sm:$0xff] }
 0x1b1   :  { %4477 = vmatpush3.msra.mxu0 %v5267_v20  ;;  %2452 = vmatprep.mubr.f32.mxu0 %v1885_v13  ;;  %v4051_v61 = vpop.f32.mrf.mxu1  ;;  %v4003_v46 = vadd.f32 %v4002_v22, %v4001_v2  ;;  %v1912_v13 = vld [vmem:[%s9723_s2 + $0x120] sm:$0xff]  ;;  %v5281_v38 = vld [vmem:[%s9719_s4 + $0x58] sm:$0xff]  ;;  %v1926_v2 = vld [vmem:[%s9723_s2 + $0x190] sm:$0xff] }
 0x1b2   :  { %4530 = vmatpush3.msra.mxu1 %v5268_v63  ;;  %2453 = vmatmul.mubr.f32.vlgmr.msra.gmra.mxu0 %v1884_v5  ;;  %v5282_v5 = vld [vmem:[%s9719_s4 + $0xd0] sm:$0xff]  ;;  %v5284_v20 = vld [vmem:[%s9719_s4 + $0xc8] sm:$0xff]  ;;  %v5285_v22 = vld [vmem:[%s9719_s4 + $0x620] sm:$0xff] }
 0x1b3   :  { %2552 = vmatprep.mubr.f32.mxu1 %v1887_v47  ;;  %4974 = vmatprep.subr.mxu0 %v9912_v44  ;;  %v4052_v31 = vpop.f32.mrf.mxu1  ;;  %v1354_v7 = vadd.f32 %v4003_v46, %v1254_v50  ;;  %v1937_v63 = vld [vmem:[%s9723_s2 + $0x1e8] sm:$0xff] }
 0x1b4   :  { %4567 = vmatprep.subr.mxu1 %v5269_v17  ;;  %2553 = vmatmul.mubr.f32.vlgmr.msra.gmra.mxu1 %v1886_v49  ;;  %v4053_v12 = vadd.f32 %v4052_v31, %v4051_v61  ;;  %v4004_v16 = vpop.f32.mrf.mxu0  ;;  %v1925_v49 = vld [vmem:[%s9723_s2 + $0x188] sm:$0xff]  ;;  %v5287_v31 = vld [vmem:[%s9719_s4 + $0xc0] sm:$0xff]  ;;  %v1939_v17 = vld [vmem:[%s9723_s2 + $0x1f8] sm:$0xff] }
 0x1b5   :  { %4975 = vmatpush3.msra.mxu0 %v5270_v0  ;;  %4568 = vmatpush3.msra.mxu1 %v5271_v24  ;;  %v5286_v46 = vld [vmem:[%s9719_s4 + $0x48] sm:$0xff]  ;;  %v1938_v0 = vld [vmem:[%s9723_s2 + $0x1f0] sm:$0xff] }
 0x1b6   :  { %4569 = vmatprep.subr.mxu1 %v5272_v26  ;;  %2457 = vmatprep.mubr.f32.mxu0 %v1898_v4  ;;  %v8422_v1 = vadd.f32 %v4053_v12, %v1349_v9  ;;  %v4005_v41 = vpop.f32.mrf.mxu0  ;;  %v1936_v4 = vld [vmem:[%s9723_s2 + $0x1e0] sm:$0xff]  ;;  %v1950_v26 = vld [vmem:[%s9723_s2 + $0x250] sm:$0xff] }
 0x1b7   :  { %4570 = vmatpush3.msra.mxu1 %v5273_v19  ;;  %2458 = vmatmul.mubr.f32.gmra.mxu0 %v1897_v6  ;;  %v4054_v45 = vpop.f32.mrf.mxu1  ;;  %v4006_v21 = vadd.f32 %v4005_v41, %v4004_v16  ;;  %v5289_v12 = vld [vmem:[%s9719_s4 + $0x40] sm:$0xff]  ;;  %v5291_v19 = vld [vmem:[%s9719_s4 + $0x38] sm:$0xff]  ;;  %v5292_v41 = vld [vmem:[%s9719_s4 + $0xb0] sm:$0xff] }
 0x1b8   :  { %4976 = vmatprep.subr.mxu0 %v9912_v44  ;;  %4571 = vmatprep.subr.mxu1 %v5274_v35  ;;  %v1952_v35 = vld [vmem:[%s9723_s2 + $0x260] sm:$0xff] }
 0x1b9   :  { %2557 = vmatprep.mubr.f32.mxu1 %v1900_v25  ;;  %4977 = vmatpush3.msra.mxu0 %v5275_v32  ;;  %v4055_v27 = vpop.f32.mrf.mxu1  ;;  %v1359_v34 = vadd.f32 %v4006_v21, %v1259_v57  ;;  %v5293_v32 = vld [vmem:[%s9719_s4 + $0x610] sm:$0xff] }
 0x1ba   :  { %4572 = vmatpush3.msra.mxu1 %v5276_v43  ;;  %2462 = vmatprep.mubr.f32.mxu0 %v1911_v28  ;;  %v4056_v52 = vadd.f32 %v4055_v27, %v4054_v45  ;;  %v1949_v28 = vld [vmem:[%s9723_s2 + $0x248] sm:$0xff]  ;;  %v5294_v43 = vld [vmem:[%s9719_s4 + $0x30] sm:$0xff] }
 0x1bb   :  { %2558 = vmatmul.mubr.f32.gmra.mxu1 %v1899_v62  ;;  %4573 = vmatprep.subr.mxu1 %v5277_v58  ;;  %v1963_v58 = vld [vmem:[%s9723_s2 + $0x2b8] sm:$0x3] }
 0x1bc   :  { %4978 = vmatprep.subr.mxu0 %v9912_v44  ;;  %4574 = vmatpush3.msra.mxu1 %v5278_v42  ;;  %v8460_v23 = vadd.f32 %v4056_v52, %v1354_v7  ;;  %v4057_v40 = vpop.f32.mrf.mxu1  ;;  %v5288_v7 = vld [vmem:[%s9719_s4 + $0x618] sm:$0xff]  ;;  %v5295_v52 = vld [vmem:[%s9719_s4 + $0xa8] sm:$0xff] }
 0x1bd   :  { %2463 = vmatmul.mubr.f32.gmra.mxu0 %v1910_v10  ;;  %4575 = vmatprep.subr.mxu1 %v5279_v51  ;;  %v1951_v10 = vld [vmem:[%s9723_s2 + $0x258] sm:$0xff] }
 0x1be   :  { %4979 = vmatpush3.msra.mxu0 %v5280_v11  ;;  %2562 = vmatprep.mubr.f32.mxu1 %v1913_v39  ;;  %v4058_v9 = vpop.f32.mrf.mxu1  ;;  %v5297_v11 = vld [vmem:[%s9719_s4 + $0x608] sm:$0xff] }
 0x1bf   :  { %4576 = vmatpush3.msra.mxu1 %v5281_v38  ;;  %2467 = vmatprep.mubr.f32.mxu0 %v1924_v30  ;;  %v4059_v54 = vadd.f32 %v4058_v9, %v4057_v40  ;;  %v4092_v56 = vpop.f32.mrf.mxu0  ;;  %v5296_v30 = vld [vmem:[%s9719_s4 + $0x28] sm:$0xff]  ;;  %v1962_v40 = vld [vmem:[%s9723_s2 + $0x2b0] sm:$0x3] }
 0x1c0   :  { %2563 = vmatmul.mubr.f32.gmra.mxu1 %v1912_v13  ;;  %4577 = vmatprep.subr.mxu1 %v5282_v5  ;;  %v1965_v9 = vld [vmem:[%s9723_s2 + $0x2c8] sm:$0x3] }
 0x1c1   :  { %4980 = vmatprep.subr.mxu0 %v9912_v44  ;;  %4578 = vmatpush3.msra.mxu1 %v5283_v14  ;;  %v8487_v47 = vadd.f32 %v4059_v54, %v1359_v34  ;;  %v4093_v61 = vpop.f32.mrf.mxu0 }
 0x1c2   :  { %2468 = vmatmul.mubr.f32.gmra.mxu0 %v1923_v59  ;;  %4579 = vmatprep.subr.mxu1 %v5284_v20  ;;  %v4094_v50 = vadd.f32 %v4093_v61, %v4092_v56  ;;  %v5298_v59 = vld [vmem:[%s9719_s4 + $0xa0] sm:$0xff]  ;;  %v5300_v20 = vld [vmem:[%s9719_s4 + $0x98] sm:$0xff] }
 0x1c3   :  { %4981 = vmatpush3.msra.mxu0 %v5285_v22  ;;  %2567 = vmatprep.mubr.f32.mxu1 %v1926_v2  ;;  %v5299_v56 = vld [vmem:[%s9719_s4 + $0x20] sm:$0xff]  ;;  %v5301_v61 = vld [vmem:[%s9719_s4 + $0x18] sm:$0xff] }
 0x1c4   :  { %4580 = vmatpush3.msra.mxu1 %v5286_v46  ;;  %4982 = vmatprep.subr.mxu0 %v9912_v44  ;;  %v1529_v6 = vadd.f32 %v4094_v50, %v8260_v55  ;;  %v5290_v55 = vld [vmem:[%s9719_s4 + $0xb8] sm:$0xff]  ;;  %v5302_v46 = vld [vmem:[%s9719_s4 + $0x600] sm:$0xff] }
 0x1c5   :  { %2568 = vmatmul.mubr.f32.gmra.mxu1 %v1925_v49  ;;  %4581 = vmatprep.subr.mxu1 %v5287_v31  ;;  %v4095_v15 = vpop.f32.mrf.mxu0  ;;  %v5303_v31 = vld [vmem:[%s9719_s4 + $0x90] sm:$0xff] }
 0x1c6   :  { %2472 = vmatprep.mubr.f32.mxu0 %v1937_v63  ;;  %4983 = vmatpush3.msra.mxu0 %v5288_v7  ;;  %v4145_v24 = vpop.f32.mrf.mxu1  ;;  %v5305_v7 = vld [vmem:[%s9719_s4 + $0x1f8] sm:$0xff] }
 0x1c7   :  { %4582 = vmatpush3.msra.mxu1 %v5289_v12  ;;  %2473 = vmatmul.mubr.f32.gmra.mxu0 %v1936_v4  ;;  %v4096_v16 = vpop.f32.mrf.mxu0  ;;  %v1888_v4 = vld [vmem:[%s9723_s2 + $0x60] sm:$0xff] }
 0x1c8   :  { %4583 = vmatprep.subr.mxu1 %v5290_v55  ;;  %2572 = vmatprep.mubr.f32.mxu1 %v1939_v17  ;;  %v4097_v25 = vadd.f32 %v4096_v16, %v4095_v15  ;;  %v4146_v45 = vpop.f32.mrf.mxu1  ;;  %v5304_v15 = vld [vmem:[%s9719_s4 + $0x10] sm:$0xff]  ;;  %v5307_v16 = vld [vmem:[%s9719_s4 + $0x178] sm:$0xff]  ;;  %v5308_v55 = vld [vmem:[%s9719_s4 + $0x8] sm:$0xff] }
 0x1c9   :  { %4584 = vmatpush3.msra.mxu1 %v5291_v19  ;;  %4984 = vmatprep.subr.mxu0 %v9912_v44  ;;  %v4147_v57 = vadd.f32 %v4146_v45, %v4145_v24  ;;  %v5309_v19 = vld [vmem:[%s9719_s4 + $0x1f0] sm:$0xff]  ;;  %v1901_v45 = vld [vmem:[%s9723_s2 + $0xc8] sm:$0xff] }
 0x1ca   :  { %2573 = vmatmul.mubr.f32.gmra.mxu1 %v1938_v0  ;;  %4585 = vmatprep.subr.mxu1 %v5292_v41  ;;  %v1534_v62 = vadd.f32 %v4097_v25, %v8301_v33  ;;  %v4098_v21 = vpop.f32.mrf.mxu0  ;;  %v5306_v0 = vld [vmem:[%s9719_s4 + $0x88] sm:$0xff] }
 0x1cb   :  { %2477 = vmatprep.mubr.f32.mxu0 %v1950_v26  ;;  %4985 = vmatpush3.msra.mxu0 %v5293_v32  ;;  %v4148_v27 = vpop.f32.mrf.mxu1  ;;  %v8553_v33 = vadd.f32 %v4147_v57, %v1529_v6  ;;  %v2696_v41 = vld [vmem:[%s9724_s3 + $0x8] sm:$0xff] }
 0x1cc   :  { %4586 = vmatpush3.msra.mxu1 %v5294_v43  ;;  %2478 = vmatmul.mubr.f32.gmra.mxu0 %v1949_v28  ;;  %v4099_v34 = vpop.f32.mrf.mxu0  ;;  %v5310_v28 = vld [vmem:[%s9719_s4 + $0x80] sm:$0xff]  ;;  %v5313_v32 = vld [vmem:[%s9719_s4 + $0x1e8] sm:$0xff] }
 0x1cd   :  { %4587 = vmatprep.subr.mxu1 %v5295_v52  ;;  %2577 = vmatprep.mubr.f32.mxu1 %v1952_v35  ;;  %v4100_v39 = vadd.f32 %v4099_v34, %v4098_v21  ;;  %v4149_v42 = vpop.f32.mrf.mxu1  ;;  %v5311_v35 = vld [vmem:[%s9719_s4 + $0x170] sm:$0xff]  ;;  %v5312_v21 = vld [vmem:[%s9719_s4] sm:$0xff]  ;;  %v5314_v52 = vld [vmem:[%s9719_s4 + $0x168] sm:$0xff] }
 0x1ce   :  { %4986 = vmatprep.subr.mxu0 %v9912_v44  ;;  %4588 = vmatpush3.msra.mxu1 %v5296_v30  ;;  %v4150_v51 = vadd.f32 %v4149_v42, %v4148_v27  ;;  %v4101_v13 = vpop.f32.mrf.mxu0  ;;  %v2695_v27 = vld [vmem:[%s9724_s3] sm:$0xff] }
 0x1cf   :  { %2578 = vmatmul.mubr.f32.gmra.mxu1 %v1951_v10  ;;  %4987 = vmatpush3.msra.mxu0 %v5297_v11  ;;  %v1539_v38 = vadd.f32 %v4100_v39, %v8339_v3  ;;  %v1964_v3 = vld [vmem:[%s9723_s2 + $0x2c0] sm:$0x3]  ;;  %v1914_v11 = vld [vmem:[%s9723_s2 + $0x130] sm:$0xff] }
 0x1d0   :  { %4589 = vmatprep.subr.mxu1 %v5298_v59  ;;  %2482 = vmatprep.mubr.f32.mxu0 %v1963_v58  ;;  %v8578_v54 = vadd.f32 %v4150_v51, %v1534_v62  ;;  %v4151_v5 = vpop.f32.mrf.mxu1  ;;  %v4102_v2 = vpop.f32.mrf.mxu0  ;;  %v5315_v58 = vld [vmem:[%s9719_s4 + $0x2f8] sm:$0xff]  ;;  %v5316_v42 = vld [vmem:[%s9719_s4 + $0x1e0] sm:$0xff] }
 0x1d1   :  { %4590 = vmatpush3.msra.mxu1 %v5299_v56  ;;  %2483 = vmatmul.mubr.f32.gmra.mxu0 %v1962_v40  ;;  %v4103_v14 = vadd.f32 %v4102_v2, %v4101_v13  ;;  %v5317_v51 = vld [vmem:[%s9719_s4 + $0x278] sm:$0xff]  ;;  %v5318_v13 = vld [vmem:[%s9719_s4 + $0x160] sm:$0xff]  ;;  %v5321_v2 = vld [vmem:[%s9719_s4 + $0x270] sm:$0xff] }
 0x1d2   :  { %4591 = vmatprep.subr.mxu1 %v5300_v20  ;;  %2582 = vmatprep.mubr.f32.mxu1 %v1965_v9  ;;  %v4152_v49 = vpop.f32.mrf.mxu1 }
 0x1d3   :  { %4988 = vmatprep.subr.mxu0 %v9912_v44  ;;  %4592 = vmatpush3.msra.mxu1 %v5301_v61  ;;  %v1544_v22 = vadd.f32 %v4103_v14, %v8386_v29  ;;  %v4153_v63 = vadd.f32 %v4152_v49, %v4151_v5  ;;  %v4104_v50 = vpop.f32.mrf.mxu0  ;;  %v5320_v5 = vld [vmem:[%s9719_s4 + $0x1d8] sm:$0xff]  ;;  %v5322_v14 = vld [vmem:[%s9719_s4 + $0x2e8] sm:$0xff] }
 0x1d4   :  { %2583 = vmatmul.mubr.f32.gmra.mxu1 %v1964_v3  ;;  %4989 = vmatpush3.msra.mxu0 %v5302_v46  ;;  %v5323_v49 = vld [vmem:[%s9719_s4 + $0x158] sm:$0xff]  ;;  %v5324_v61 = vld [vmem:[%s9719_s4 + $0x268] sm:$0xff]  ;;  %v5326_v46 = vld [vmem:[%s9719_s4 + $0x2e0] sm:$0xff] }
 0x1d5   :  { %4593 = vmatprep.subr.mxu1 %v5303_v31  ;;  %4990 = vmatprep.mubr.msk.f32.mxu0 %vm5480_vm1, %v9912_v44  ;;  %v8605_v29 = vadd.f32 %v4153_v63, %v1539_v38  ;;  %v4154_v17 = vpop.f32.mrf.mxu1  ;;  %v4105_v6 = vpop.f32.mrf.mxu0 }
 0x1d6   :  { %4594 = vmatpush3.msra.mxu1 %v5304_v15  ;;  %4620 = vmatprep.subr.mxu0 %v5305_v7  ;;  %v4106_v12 = vadd.f32 %v4105_v6, %v4104_v50  ;;  %v5325_v50 = vld [vmem:[%s9719_s4 + $0x1d0] sm:$0xff]  ;;  %v2708_v6 = vld [vmem:[%s9724_s3 + $0x68] sm:$0xff] }
 0x1d7   :  { %4991 = vmatmul.mubr.msk.f32.vlgmr.msra.gmra.mxu0 %vm321_vm0, %v1888_v4  ;;  %4595 = vmatprep.subr.mxu1 %v5306_v0  ;;  %v4155_v24 = vpop.f32.mrf.mxu1  ;;  %v1927_v4 = vld [vmem:[%s9723_s2 + $0x198] sm:$0xff]  ;;  %v5328_v15 = vld [vmem:[%s9719_s4 + $0x1c8] sm:$0xff] }
 0x1d8   :  { %4621 = vmatpush3.msra.mxu0 %v5307_v16  ;;  %4596 = vmatpush3.msra.mxu1 %v5308_v55  ;;  %v1549_v26 = vadd.f32 %v4106_v12, %v8422_v1  ;;  %v4156_v25 = vadd.f32 %v4155_v24, %v4154_v17  ;;  %v5329_v12 = vld [vmem:[%s9719_s4 + $0x260] sm:$0xff]  ;;  %v5330_v24 = vld [vmem:[%s9719_s4 + $0x148] sm:$0xff]  ;;  %v5331_v55 = vld [vmem:[%s9719_s4 + $0x2d8] sm:$0xff] }
 0x1d9   :  { %4622 = vmatprep.subr.mxu0 %v5309_v19  ;;  %4597 = vmatprep.subr.mxu1 %v5310_v28  ;;  %v4107_v1 = vpop.f32.mrf.mxu0  ;;  %v5333_v28 = vld [vmem:[%s9719_s4 + $0x258] sm:$0xff] }
 0x1da   :  { %4623 = vmatpush3.msra.mxu0 %v5311_v35  ;;  %4993 = vmatprep.mubr.msk.f32.mxu0 %vm5480_vm1, %v9912_v44  ;;  %v8641_v62 = vadd.f32 %v4156_v25, %v1544_v22  ;;  %v4157_v57 = vpop.f32.mrf.mxu1  ;;  %v2709_v22 = vld [vmem:[%s9724_s3 + $0x70] sm:$0xff]  ;;  %v2722_v25 = vld [vmem:[%s9724_s3 + $0xd8] sm:$0xff] }
 0x1db   :  { %4598 = vmatpush3.msra.mxu1 %v5312_v21  ;;  %4624 = vmatprep.subr.mxu0 %v5313_v32  ;;  %v4108_v43 = vpop.f32.mrf.mxu0  ;;  %v2721_v21 = vld [vmem:[%s9724_s3 + $0xd0] sm:$0xff] }
 0x1dc   :  { %4994 = vmatmul.mubr.msk.f32.gmra.mxu0 %vm321_vm0, %v1901_v45  ;;  %2871 = vmatprep.mubr.f32.mxu1 %v2696_v41  ;;  %v4109_v10 = vadd.f32 %v4108_v43, %v4107_v1  ;;  %v4158_v34 = vpop.f32.mrf.mxu1  ;;  %v5334_v45 = vld [vmem:[%s9719_s4 + $0x140] sm:$0xff] }
 0x1dd   :  { %4625 = vmatpush3.msra.mxu0 %v5314_v52  ;;  %4673 = vmatprep.subr.mxu1 %v5315_v58  ;;  %v4159_v39 = vadd.f32 %v4158_v34, %v4157_v57  ;;  %v1940_v41 = vld [vmem:[%s9723_s2 + $0x200] sm:$0xff]  ;;  %v5335_v57 = vld [vmem:[%s9719_s4 + $0x2d0] sm:$0xff]  ;;  %v5338_v52 = vld [vmem:[%s9719_s4 + $0x138] sm:$0xff] }
 0x1de   :  { %2872 = vmatmul.mubr.f32.vlgmr.msra.gmra.mxu1 %v2695_v27  ;;  %4626 = vmatprep.subr.mxu0 %v5316_v42  ;;  %v1554_v30 = vadd.f32 %v4109_v10, %v8460_v23  ;;  %v4110_v40 = vpop.f32.mrf.mxu0  ;;  %v5319_v23 = vld [vmem:[%s9719_s4 + $0x2f0] sm:$0xff]  ;;  %v5336_v27 = vld [vmem:[%s9719_s4 + $0x1b8] sm:$0xff] }
 0x1df   :  { %4674 = vmatpush3.msra.mxu1 %v5317_v51  ;;  %4627 = vmatpush3.msra.mxu0 %v5318_v13  ;;  %v8672_v9 = vadd.f32 %v4159_v39, %v1549_v26  ;;  %v4160_v38 = vpop.f32.mrf.mxu1  ;;  %v5332_v26 = vld [vmem:[%s9719_s4 + $0x1c0] sm:$0xff]  ;;  %v5337_v10 = vld [vmem:[%s9719_s4 + $0x250] sm:$0xff]  ;;  %v5339_v39 = vld [vmem:[%s9719_s4 + $0x2c8] sm:$0xff] }
 0x1e0   :  { %4675 = vmatprep.subr.mxu1 %v5319_v23  ;;  %4996 = vmatprep.mubr.msk.f32.mxu0 %vm5480_vm1, %v9912_v44  ;;  %v4111_v59 = vpop.f32.mrf.mxu0  ;;  %v5340_v42 = vld [vmem:[%s9719_s4 + $0x1b0] sm:$0xff]  ;;  %v1953_v13 = vld [vmem:[%s9723_s2 + $0x268] sm:$0xff]  ;;  %v5343_v23 = vld [vmem:[%s9719_s4 + $0x2c0] sm:$0xff] }
 0x1e1   :  { %4628 = vmatprep.subr.mxu0 %v5320_v5  ;;  %4676 = vmatpush3.msra.mxu1 %v5321_v2  ;;  %v4112_v56 = vadd.f32 %v4111_v59, %v4110_v40  ;;  %v4161_v3 = vpop.f32.mrf.mxu1  ;;  %v5341_v40 = vld [vmem:[%s9719_s4 + $0x248] sm:$0xff]  ;;  %v5342_v51 = vld [vmem:[%s9719_s4 + $0x130] sm:$0xff]  ;;  %v2734_v59 = vld [vmem:[%s9724_s3 + $0x138] sm:$0xff] }
 0x1e2   :  { %4997 = vmatmul.mubr.msk.f32.gmra.mxu0 %vm321_vm0, %v1914_v11  ;;  %4677 = vmatprep.subr.mxu1 %v5322_v14  ;;  %v4162_v20 = vadd.f32 %v4161_v3, %v4160_v38  ;;  %v1043_v38 = vmax.f32 %v7915_v53, 0.0  ;;  %v5345_v53 = vld [vmem:[%s9719_s4 + $0x240] sm:$0xff] }
 0x1e3   :  { %4629 = vmatpush3.msra.mxu0 %v5323_v49  ;;  %4678 = vmatpush3.msra.mxu1 %v5324_v61  ;;  %v1559_v63 = vadd.f32 %v4112_v56, %v8487_v47  ;;  %v5327_v47 = vld [vmem:[%s9719_s4 + $0x150] sm:$0xff]  ;;  %v5344_v56 = vld [vmem:[%s9719_s4 + $0x1a8] sm:$0xff]  ;;  %v5347_v61 = vld [vmem:[%s9719_s4 + $0x2b8] sm:$0xff] }
 0x1e4   :  { %4630 = vmatprep.subr.mxu0 %v5325_v50  ;;  %4679 = vmatprep.subr.mxu1 %v5326_v46  ;;  %v8708_v31 = vadd.f32 %v4162_v20, %v1554_v30  ;;  %v4163_v17 = vpop.f32.mrf.mxu1  ;;  %v5346_v49 = vld [vmem:[%s9719_s4 + $0x128] sm:$0xff]  ;;  %v5349_v46 = vld [vmem:[%s9719_s4 + $0x238] sm:$0xff] }
 0x1e5   :  { %4631 = vmatpush3.msra.mxu0 %v5327_v47  ;;  %4999 = vmatprep.mubr.msk.f32.mxu0 %vm5480_vm1, %v9912_v44 }
 0x1e6   :  { %2876 = vmatprep.mubr.f32.mxu1 %v2709_v22  ;;  %4632 = vmatprep.subr.mxu0 %v5328_v15  ;;  %v4164_v7 = vpop.f32.mrf.mxu1  ;;  %v5348_v22 = vld [vmem:[%s9719_s4 + $0x1a0] sm:$0xff]  ;;  %v5351_v15 = vld [vmem:[%s9719_s4 + $0x2b0] sm:$0xff] }
 0x1e7   :  { %4680 = vmatpush3.msra.mxu1 %v5329_v12  ;;  %5000 = vmatmul.mubr.msk.f32.gmra.mxu0 %vm321_vm0, %v1927_v4  ;;  %v4165_v0 = vadd.f32 %v4164_v7, %v4163_v17  ;;  %v5350_v4 = vld [vmem:[%s9719_s4 + $0x120] sm:$0xff]  ;;  %v1966_v17 = vld [vmem:[%s9723_s2 + $0x2d0] sm:$0x3] }
 0x1e8   :  { %2877 = vmatmul.mubr.f32.gmra.mxu1 %v2708_v6  ;;  %4633 = vmatpush3.msra.mxu0 %v5330_v24  ;;  %v4198_v16 = vpop.f32.mrf.mxu0  ;;  %v2747_v7 = vld [vmem:[%s9724_s3 + $0x1a0] sm:$0xff]  ;;  %v5352_v24 = vld [vmem:[%s9719_s4 + $0x198] sm:$0xff] }
 0x1e9   :  { %4681 = vmatprep.subr.mxu1 %v5331_v55  ;;  %4634 = vmatprep.subr.mxu0 %v5332_v26  ;;  %v8737_v19 = vadd.f32 %v4165_v0, %v1559_v63  ;;  %v1044_v0 = vmax.f32 %v7950_v48, 0.0  ;;  %v5353_v26 = vld [vmem:[%s9719_s4 + $0x230] sm:$0xff]  ;;  %v5354_v48 = vld [vmem:[%s9719_s4 + $0x118] sm:$0xff] }
 0x1ea   :  { %4682 = vmatpush3.msra.mxu1 %v5333_v28  ;;  %4635 = vmatpush3.msra.mxu0 %v5334_v45  ;;  %v4199_v1 = vpop.f32.mrf.mxu0  ;;  %v1828_v35 = vpop.f32.mrf.mxu1  ;;  %v2761_v28 = vld [vmem:[%s9724_s3 + $0x210] sm:$0xff] }
 0x1eb   :  { %4683 = vmatprep.subr.mxu1 %v5335_v57  ;;  %5002 = vmatprep.mubr.msk.f32.mxu0 %vm5480_vm1, %v9912_v44  ;;  %v4200_v32 = vadd.f32 %v4199_v1, %v4198_v16  ;;  %v5357_v57 = vld [vmem:[%s9719_s4 + $0x228] sm:$0xff] }
 0x1ec   :  { %2881 = vmatprep.mubr.f32.mxu1 %v2722_v25  ;;  %4636 = vmatprep.subr.mxu0 %v5336_v27  ;;  %v4955_v43 = vpop.f32.mrf.mxu1 }
 0x1ed   :  { %4684 = vmatpush3.msra.mxu1 %v5337_v10  ;;  %5003 = vmatmul.mubr.msk.f32.gmra.mxu0 %vm321_vm0, %v1940_v41  ;;  %v1729_v34 = vadd.f32 %v4200_v32, %v8553_v33  ;;  %v2735_v33 = vld [vmem:[%s9724_s3 + $0x140] sm:$0xff]  ;;  %v5356_v41 = vld [vmem:[%s9719_s4 + $0x190] sm:$0xff]  ;;  %v2760_v32 = vld [vmem:[%s9724_s3 + $0x208] sm:$0xff] }
 0x1ee   :  { %2882 = vmatmul.mubr.f32.gmra.mxu1 %v2721_v21  ;;  %4637 = vmatpush3.msra.mxu0 %v5338_v52  ;;  %v4201_v58 = vpop.f32.mrf.mxu0  ;;  %v5358_v21 = vld [vmem:[%s9719_s4 + $0x110] sm:$0xff]  ;;  %v5359_v10 = vld [vmem:[%s9719_s4 + $0x2a0] sm:$0xff]  ;;  %v1045_v52 = vmax.f32 %v7983_v60, 0.0  ;;  %v2698_v60 = vld [vmem:[%s9724_s3 + $0x18] sm:$0xff] }
 0x1ef   :  { %4685 = vmatprep.subr.mxu1 %v5339_v39  ;;  %4638 = vmatprep.subr.mxu0 %v5340_v42  ;;  %v1829_v30 = vadd.f32 %v1828_v35, %v1729_v34  ;;  %v5361_v39 = vld [vmem:[%s9719_s4 + $0x220] sm:$0xff] }
 0x1f0   :  { %4686 = vmatpush3.msra.mxu1 %v5341_v40  ;;  %4639 = vmatpush3.msra.mxu0 %v5342_v51  ;;  %v4202_v11 = vpop.f32.mrf.mxu0  ;;  %v5363_v51 = vld [vmem:[%s9719_s4 + $0x298] sm:$0xff] }
 0x1f1   :  { %4687 = vmatprep.subr.mxu1 %v5343_v23  ;;  %5005 = vmatprep.mubr.msk.f32.mxu0 %vm5480_vm1, %v9912_v44  ;;  %v1862_v5 = vmax.f32 %v1829_v30, 0.0  ;;  %v4203_v2 = vadd.f32 %v4202_v11, %v4201_v58  ;;  %v5360_v58 = vld [vmem:[%s9719_s4 + $0x188] sm:$0xff]  ;;  %v2697_v11 = vld [vmem:[%s9724_s3 + $0x10] sm:$0xff]  ;;  %v5365_v23 = vld [vmem:[%s9719_s4 + $0x218] sm:$0xff] }
 0x1f2   :  { %2886 = vmatprep.mubr.f32.mxu1 %v2735_v33  ;;  %4640 = vmatprep.subr.mxu0 %v5344_v56  ;;  %v5362_v30 = vld [vmem:[%s9719_s4 + $0x108] sm:$0xff]  ;;  %v5367_v56 = vld [vmem:[%s9719_s4 + $0x290] sm:$0xff] }
 0x1f3   :  { %4688 = vmatpush3.msra.mxu1 %v5345_v53  ;;  %5006 = vmatmul.mubr.msk.f32.gmra.mxu0 %vm321_vm0, %v1953_v13  ;;  %v8801_v3 = vmax.f32 %v1043_v38, %v1862_v5  ;;  %v4204_v14 = vpop.f32.mrf.mxu0  ;;  %v1734_v20 = vadd.f32 %v4203_v2, %v8578_v54  ;;  %v2748_v54 = vld [vmem:[%s9724_s3 + $0x1a8] sm:$0xff]  ;;  %v2774_v13 = vld [vmem:[%s9724_s3 + $0x278] sm:$0x3]  ;;  %v2773_v53 = vld [vmem:[%s9724_s3 + $0x270] sm:$0x3] }
 0x1f4   :  { %2887 = vmatmul.mubr.f32.gmra.mxu1 %v2734_v59  ;;  %4641 = vmatpush3.msra.mxu0 %v5346_v49  ;;  %v5366_v59 = vld [vmem:[%s9719_s4 + $0x100] sm:$0xff] }
 0x1f5   :  { %4689 = vmatprep.subr.mxu1 %v5347_v61  ;;  %4642 = vmatprep.subr.mxu0 %v5348_v22  ;;  %v4205_v63 = vpop.f32.mrf.mxu0  ;;  %v1833_v50 = vpop.f32.mrf.mxu1  ;;  %v1046_v61 = vmax.f32 %v8012_v8, 0.0  ;;  %v5368_v22 = vld [vmem:[%s9719_s4 + $0x210] sm:$0xff]  ;;  %v5370_v8 = vld [vmem:[%s9719_s4 + $0x288] sm:$0xff] }
 0x1f6   :  { %4690 = vmatpush3.msra.mxu1 %v5349_v46  ;;  %4643 = vmatpush3.msra.mxu0 %v5350_v4  ;;  %v4206_v47 = vadd.f32 %v4205_v63, %v4204_v14  ;;  %v1834_v6 = vadd.f32 %v1833_v50, %v1734_v20  ;;  %v2711_v63 = vld [vmem:[%s9724_s3 + $0x80] sm:$0xff] }
 0x1f7   :  { %4691 = vmatprep.subr.mxu1 %v5351_v15  ;;  %5008 = vmatprep.mubr.msk.f32.mxu0 %vm5480_vm1, %v9912_v44  ;;  %v4958_v12 = vpop.f32.mrf.mxu1  ;;  %v5373_v15 = vld [vmem:[%s9719_s4 + $0x3f0] sm:$0xff] }
 0x1f8   :  { %2891 = vmatprep.mubr.f32.mxu1 %v2748_v54  ;;  %4644 = vmatprep.subr.mxu0 %v5352_v24  ;;  %v1863_v16 = vmax.f32 %v1834_v6, 0.0  ;;  %v1739_v55 = vadd.f32 %v4206_v47, %v8605_v29  ;;  %v5355_v29 = vld [vmem:[%s9719_s4 + $0x2a8] sm:$0xff]  ;;  %v5369_v54 = vld [vmem:[%s9719_s4 + $0x3f8] sm:$0xff]  ;;  %v5374_v24 = vld [vmem:[%s9719_s4 + $0x280] sm:$0xff] }
 0x1f9   :  { %4692 = vmatpush3.msra.mxu1 %v5353_v26  ;;  %5009 = vmatmul.mubr.msk.f32.gmra.mxu0 %vm321_vm0, %v1966_v17  ;;  %v4207_v25 = vpop.f32.mrf.mxu0  ;;  %v5371_v17 = vld [vmem:[%s9719_s4 + $0x378] sm:$0xff]  ;;  %v5372_v47 = vld [vmem:[%s9719_s4 + $0x208] sm:$0xff] }
 0x1fa   :  { %2892 = vmatmul.mubr.f32.gmra.mxu1 %v2747_v7  ;;  %4645 = vmatpush3.msra.mxu0 %v5354_v48  ;;  %v8848_v45 = vmax.f32 %v1044_v0, %v1863_v16  ;;  %v2700_v7 = vld [vmem:[%s9724_s3 + $0x28] sm:$0xff]  ;;  %v5375_v16 = vld [vmem:[%s9719_s4 + $0x370] sm:$0xff]  ;;  %v5376_v48 = vld [vmem:[%s9719_s4 + $0x200] sm:$0xff] }
 0x1fb   :  { %4693 = vmatprep.subr.mxu1 %v5355_v29  ;;  %4646 = vmatprep.subr.mxu0 %v5356_v41  ;;  %v4208_v1 = vpop.f32.mrf.mxu0  ;;  %v1838_v35 = vpop.f32.mrf.mxu1  ;;  %v1047_v29 = vmax.f32 %v8049_v36, 0.0  ;;  %v5377_v41 = vld [vmem:[%s9719_s4 + $0x3e8] sm:$0xff] }
 0x1fc   :  { %9945 = vst [vmem:[#allocation34_spill] sm:$0xff] %v8848_v45  ;;  %4694 = vmatpush3.msra.mxu1 %v5357_v57  ;;  %4647 = vmatpush3.msra.mxu0 %v5358_v21  ;;  %v4209_v27 = vadd.f32 %v4208_v1, %v4207_v25  ;;  %v1839_v43 = vadd.f32 %v1838_v35, %v1739_v55  ;;  %v2699_v55 = vld [vmem:[%s9724_s3 + $0x20] sm:$0xff]  ;;  %v2724_v1 = vld [vmem:[%s9724_s3 + $0xe8] sm:$0xff] }
 0x1fd   :  { %4695 = vmatprep.subr.mxu1 %v5359_v10  ;;  %2896 = vmatprep.mubr.f32.mxu1 %v2761_v28  ;;  %v4961_v34 = vpop.f32.mrf.mxu1  ;;  %v5378_v21 = vld [vmem:[%s9719_s4 + $0x368] sm:$0xff] }
 0x1fe   :  { %4648 = vmatprep.subr.mxu0 %v5360_v58  ;;  %4696 = vmatpush3.msra.mxu1 %v5361_v39  ;;  %v1864_v42 = vmax.f32 %v1839_v43, 0.0  ;;  %v1744_v33 = vadd.f32 %v4209_v27, %v8641_v62  ;;  %v5364_v62 = vld [vmem:[%s9719_s4 + $0x180] sm:$0xff]  ;;  %v2713_v43 = vld [vmem:[%s9724_s3 + $0x90] sm:$0xff]  ;;  %v5381_v34 = vld [vmem:[%s9719_s4 + $0x478] sm:$0xff] }
 0x1ff   :  { %2897 = vmatmul.mubr.f32.gmra.mxu1 %v2760_v32  ;;  %4649 = vmatpush3.msra.mxu0 %v5362_v30  ;;  %v4210_v40 = vpop.f32.mrf.mxu0  ;;  %v5379_v32 = vld [vmem:[%s9719_s4 + $0x4f8] sm:$0xff]  ;;  %v5380_v27 = vld [vmem:[%s9719_s4 + $0x3e0] sm:$0xff] }
 0x200   :  { %4697 = vmatprep.subr.mxu1 %v5363_v51  ;;  %4650 = vmatprep.subr.mxu0 %v5364_v62  ;;  %v8894_v38 = vmax.f32 %v1045_v52, %v1864_v42  ;;  %v5382_v39 = vld [vmem:[%s9719_s4 + $0x360] sm:$0xff]  ;;  %v5383_v42 = vld [vmem:[%s9719_s4 + $0x4f0] sm:$0xff]  ;;  %v1048_v51 = vmax.f32 %v8085_v18, 0.0  ;;  %v5384_v62 = vld [vmem:[%s9719_s4 + $0x3d8] sm:$0xff] }
 0x201   :  { %4698 = vmatpush3.msra.mxu1 %v5365_v23  ;;  %4651 = vmatpush3.msra.mxu0 %v5366_v59  ;;  %v4211_v5 = vpop.f32.mrf.mxu0  ;;  %v1843_v2 = vpop.f32.mrf.mxu1  ;;  %v5386_v18 = vld [vmem:[%s9719_s4 + $0x358] sm:$0xff] }
 0x202   :  { %9946 = vst [vmem:[#allocation35_spill] sm:$0xff] %v8894_v38  ;;  %2971 = vmatprep.mubr.f32.mxu0 %v2698_v60  ;;  %4699 = vmatprep.subr.mxu1 %v5367_v56  ;;  %v4212_v14 = vadd.f32 %v4211_v5, %v4210_v40  ;;  %v1844_v20 = vadd.f32 %v1843_v2, %v1744_v33  ;;  %v2712_v33 = vld [vmem:[%s9724_s3 + $0x88] sm:$0xff]  ;;  %v5388_v2 = vld [vmem:[%s9719_s4 + $0x3d0] sm:$0xff]  ;;  %v2726_v56 = vld [vmem:[%s9724_s3 + $0xf8] sm:$0xff] }
 0x203   :  { %2901 = vmatprep.mubr.f32.mxu1 %v2774_v13  ;;  %2972 = vmatmul.mubr.f32.vlgmr.msra.gmra.mxu0 %v2697_v11  ;;  %v4964_v49 = vpop.f32.mrf.mxu1  ;;  %v5385_v13 = vld [vmem:[%s9719_s4 + $0x470] sm:$0xff]  ;;  %v5387_v5 = vld [vmem:[%s9719_s4 + $0x4e8] sm:$0xff] }
 0x204   :  { %4700 = vmatpush3.msra.mxu1 %v5368_v22  ;;  %4726 = vmatprep.subr.mxu0 %v5369_v54  ;;  %v1865_v50 = vmax.f32 %v1844_v20, 0.0  ;;  %v1749_v46 = vadd.f32 %v4212_v14, %v8672_v9  ;;  %v2710_v9 = vld [vmem:[%s9724_s3 + $0x78] sm:$0xff]  ;;  %v2737_v11 = vld [vmem:[%s9724_s3 + $0x150] sm:$0xff]  ;;  %v5389_v20 = vld [vmem:[%s9719_s4 + $0x468] sm:$0xff] }
 0x205   :  { %2902 = vmatmul.mubr.f32.gmra.mxu1 %v2773_v53  ;;  %4701 = vmatprep.subr.mxu1 %v5370_v8  ;;  %v4213_v4 = vpop.f32.mrf.mxu0  ;;  %v5391_v22 = vld [vmem:[%s9719_s4 + $0x4e0] sm:$0xff]  ;;  %v2725_v54 = vld [vmem:[%s9724_s3 + $0xf0] sm:$0xff]  ;;  %v5392_v8 = vld [vmem:[%s9719_s4 + $0x3c8] sm:$0xff] }
 0x206   :  { %4727 = vmatpush3.msra.mxu0 %v5371_v17  ;;  %4702 = vmatpush3.msra.mxu1 %v5372_v47  ;;  %v8931_v6 = vmax.f32 %v1046_v61, %v1865_v50  ;;  %v5390_v61 = vld [vmem:[%s9719_s4 + $0x350] sm:$0xff]  ;;  %v1049_v50 = vmax.f32 %v8119_v37, 0.0  ;;  %v2750_v17 = vld [vmem:[%s9724_s3 + $0x1b8] sm:$0xff]  ;;  %v5394_v37 = vld [vmem:[%s9719_s4 + $0x348] sm:$0xff] }
 0x207   :  { %4728 = vmatprep.subr.mxu0 %v5373_v15  ;;  %2976 = vmatprep.mubr.f32.mxu0 %v2711_v63  ;;  %v4214_v12 = vpop.f32.mrf.mxu0  ;;  %v1848_v0 = vpop.f32.mrf.mxu1  ;;  %v5395_v15 = vld [vmem:[%s9719_s4 + $0x4d8] sm:$0xff] }
 0x208   :  { %9947 = vst [vmem:[#allocation36_spill] sm:$0xff] %v8931_v6  ;;  %4703 = vmatprep.subr.mxu1 %v5374_v24  ;;  %4729 = vmatpush3.msra.mxu0 %v5375_v16  ;;  %v4215_v26 = vadd.f32 %v4214_v12, %v4213_v4  ;;  %v1849_v25 = vadd.f32 %v1848_v0, %v1749_v46  ;;  %v5393_v4 = vld [vmem:[%s9719_s4 + $0x460] sm:$0xff]  ;;  %v2749_v12 = vld [vmem:[%s9724_s3 + $0x1b0] sm:$0xff] }
 0x209   :  { %2977 = vmatmul.mubr.f32.gmra.mxu0 %v2710_v9  ;;  %4704 = vmatpush3.msra.mxu1 %v5376_v48  ;;  %v4967_v28 = vpop.f32.mrf.mxu1  ;;  %v2739_v0 = vld [vmem:[%s9724_s3 + $0x160] sm:$0xff]  ;;  %v5399_v48 = vld [vmem:[%s9719_s4 + $0x4d0] sm:$0xff] }
 0x20a   :  { %3071 = vmatprep.mubr.f32.mxu1 %v2700_v7  ;;  %4730 = vmatprep.subr.mxu0 %v5377_v41  ;;  %v1866_v35 = vmax.f32 %v1849_v25, 0.0  ;;  %v1754_v57 = vadd.f32 %v4215_v26, %v8708_v31  ;;  %v2723_v31 = vld [vmem:[%s9724_s3 + $0xe0] sm:$0xff]  ;;  %v2738_v28 = vld [vmem:[%s9724_s3 + $0x158] sm:$0xff] }
 0x20b   :  { %3072 = vmatmul.mubr.f32.vlgmr.msra.gmra.mxu1 %v2699_v55  ;;  %4731 = vmatpush3.msra.mxu0 %v5378_v21  ;;  %v4216_v36 = vpop.f32.mrf.mxu0  ;;  %v5396_v7 = vld [vmem:[%s9719_s4 + $0x3c0] sm:$0xff]  ;;  %v5397_v55 = vld [vmem:[%s9719_s4 + $0x458] sm:$0xff]  ;;  %v5402_v21 = vld [vmem:[%s9719_s4 + $0x450] sm:$0xff] }
 0x20c   :  { %4779 = vmatprep.subr.mxu1 %v5379_v32  ;;  %4732 = vmatprep.subr.mxu0 %v5380_v27  ;;  %v8974_v10 = vmax.f32 %v1047_v29, %v1866_v35  ;;  %v5398_v25 = vld [vmem:[%s9719_s4 + $0x340] sm:$0xff]  ;;  %v5403_v32 = vld [vmem:[%s9719_s4 + $0x338] sm:$0xff] }
 0x20d   :  { %4780 = vmatpush3.msra.mxu1 %v5381_v34  ;;  %2981 = vmatprep.mubr.f32.mxu0 %v2724_v1  ;;  %v4217_v52 = vpop.f32.mrf.mxu0  ;;  %v1853_v58 = vpop.f32.mrf.mxu1  ;;  %v9070_v41 = vld [vmem:[%s9722_s5] ss:$0 sm:$0xff]  ;;  %v2762_v34 = vld [vmem:[%s9724_s3 + $0x218] sm:$0xff] }
 0x20e   :  { %9948 = vst [vmem:[#allocation37_spill] sm:$0xff] %v8974_v10  ;;  %4733 = vmatpush3.msra.mxu0 %v5382_v39  ;;  %4781 = vmatprep.subr.mxu1 %v5383_v42  ;;  %v4218_v30 = vadd.f32 %v4217_v52, %v4216_v36  ;;  %v1854_v60 = vadd.f32 %v1853_v58, %v1754_v57  ;;  %v5401_v57 = vld [vmem:[%s9719_s4 + $0x3b8] sm:$0xff]  ;;  %v2763_v36 = vld [vmem:[%s9724_s3 + $0x220] sm:$0xff]  ;;  %v2752_v52 = vld [vmem:[%s9724_s3 + $0x1c8] sm:$0xff] }
 0x20f   :  { %2982 = vmatmul.mubr.f32.gmra.mxu0 %v2723_v31  ;;  %3076 = vmatprep.mubr.f32.mxu1 %v2713_v43  ;;  %v4970_v40 = vpop.f32.mrf.mxu1  ;;  %v5404_v31 = vld [vmem:[%s9719_s4 + $0x4c8] sm:$0xff]  ;;  %v5405_v43 = vld [vmem:[%s9719_s4 + $0x3b0] sm:$0xff] }
 0x210   :  { %4734 = vmatprep.subr.mxu0 %v5384_v62  ;;  %4782 = vmatpush3.msra.mxu1 %v5385_v13  ;;  %v1867_v23 = vmax.f32 %v1854_v60, 0.0  ;;  %v1759_v59 = vadd.f32 %v4218_v30, %v8737_v19  ;;  %v2736_v19 = vld [vmem:[%s9724_s3 + $0x148] sm:$0xff]  ;;  %v5407_v42 = vld [vmem:[%s9719_s4 + $0x330] sm:$0xff]  ;;  %v2751_v30 = vld [vmem:[%s9724_s3 + $0x1c0] sm:$0xff] }
 0x211   :  { %3077 = vmatmul.mubr.f32.gmra.mxu1 %v2712_v33  ;;  %4735 = vmatpush3.msra.mxu0 %v5386_v18  ;;  %v5406_v58 = vld [vmem:[%s9719_s4 + $0x448] sm:$0xff]  ;;  %v5408_v33 = vld [vmem:[%s9719_s4 + $0x4c0] sm:$0xff] }
 0x212   :  { %4783 = vmatprep.subr.mxu1 %v5387_v5  ;;  %4736 = vmatprep.subr.mxu0 %v5388_v2  ;;  %v9014_v53 = vmax.f32 %v1048_v51, %v1867_v23  ;;  %v1858_v14 = vpop.f32.mrf.mxu1  ;;  %v5409_v40 = vld [vmem:[%s9719_s4 + $0x3a8] sm:$0xff]  ;;  %v5410_v51 = vld [vmem:[%s9719_s4 + $0x440] sm:$0xff]  ;;  %v2765_v2 = vld [vmem:[%s9724_s3 + $0x230] sm:$0xff] }
 0x213   :  { %4784 = vmatpush3.msra.mxu1 %v5389_v20  ;;  %2986 = vmatprep.mubr.f32.mxu0 %v2737_v11  ;;  %v1859_v49 = vadd.f32 %v1858_v14, %v1759_v59  ;;  %v2776_v62 = vld [vmem:[%s9724_s3 + $0x288] sm:$0x3]  ;;  %v5412_v59 = vld [vmem:[%s9719_s4 + $0x4b8] sm:$0xff]  ;;  %v5413_v18 = vld [vmem:[%s9719_s4 + $0x3a0] sm:$0xff] }
 0x214   :  { %9949 = vst [vmem:[#allocation38_spill] sm:$0xff] %v9014_v53  ;;  %4737 = vmatpush3.msra.mxu0 %v5390_v61  ;;  %4785 = vmatprep.subr.mxu1 %v5391_v22  ;;  %v4973_v63 = vpop.f32.mrf.mxu1  ;;  %v5411_v23 = vld [vmem:[%s9719_s4 + $0x328] sm:$0xff]  ;;  %v2775_v5 = vld [vmem:[%s9724_s3 + $0x280] sm:$0x3]  ;;  %v5414_v14 = vld [vmem:[%s9719_s4 + $0x438] sm:$0xff] }
 0x215   :  { %2987 = vmatmul.mubr.f32.gmra.mxu0 %v2736_v19  ;;  %3081 = vmatprep.mubr.f32.mxu1 %v2726_v56  ;;  %v1868_v46 = vmax.f32 %v1859_v49, 0.0  ;;  %v5415_v61 = vld [vmem:[%s9719_s4 + $0x320] sm:$0xff]  ;;  %v5416_v22 = vld [vmem:[%s9719_s4 + $0x4b0] sm:$0xff] }
 0x216   :  { %4738 = vmatprep.subr.mxu0 %v5392_v8  ;;  %4786 = vmatpush3.msra.mxu1 %v5393_v4  ;;  %v4266_v47 = vpop.f32.mrf.mxu0  ;;  %v5418_v8 = vld [vmem:[%s9719_s4 + $0x430] sm:$0xff] }
 0x217   :  { %3082 = vmatmul.mubr.f32.gmra.mxu1 %v2725_v54  ;;  %4739 = vmatpush3.msra.mxu0 %v5394_v37  ;;  %v9041_v9 = vmax.f32 %v1049_v50, %v1868_v46  ;;  %v2764_v54 = vld [vmem:[%s9724_s3 + $0x228] sm:$0xff]  ;;  %v5417_v46 = vld [vmem:[%s9719_s4 + $0x398] sm:$0xff] }
 0x218   :  { %4787 = vmatprep.subr.mxu1 %v5395_v15  ;;  %4740 = vmatprep.subr.mxu0 %v5396_v7  ;;  %v4267_v24 = vpop.f32.mrf.mxu0  ;;  %v4319_v16 = vpop.f32.mrf.mxu1  ;;  %v2778_v37 = vld [vmem:[%s9724_s3 + $0x298] sm:$0x3]  ;;  %v5420_v15 = vld [vmem:[%s9719_s4 + $0x4a8] sm:$0xff]  ;;  %v5421_v7 = vld [vmem:[%s9719_s4 + $0x390] sm:$0xff] }
 0x219   :  { %9950 = vst [vmem:[#allocation39_spill] sm:$0xff] %v9041_v9  ;;  %4788 = vmatpush3.msra.mxu1 %v5397_v55  ;;  %2991 = vmatprep.mubr.f32.mxu0 %v2750_v17  ;;  %v4268_v26 = vadd.f32 %v4267_v24, %v4266_v47  ;;  %v5419_v47 = vld [vmem:[%s9719_s4 + $0x318] sm:$0xff]  ;;  %v5422_v24 = vld [vmem:[%s9719_s4 + $0x428] sm:$0xff]  ;;  %v2777_v55 = vld [vmem:[%s9724_s3 + $0x290] sm:$0x3] }
 0x21a   :  { %4741 = vmatpush3.msra.mxu0 %v5398_v25  ;;  %4789 = vmatprep.subr.mxu1 %v5399_v48  ;;  %v4320_v29 = vpop.f32.mrf.mxu1  ;;  %v5424_v48 = vld [vmem:[%s9719_s4 + $0x4a0] sm:$0xff] }
 0x21b   :  { %2992 = vmatmul.mubr.f32.gmra.mxu0 %v2749_v12  ;;  %3086 = vmatprep.mubr.f32.mxu1 %v2739_v0  ;;  %v2055_v1 = vadd.f32 %v9070_v41, %v4268_v26  ;;  %v4321_v35 = vadd.f32 %v4320_v29, %v4319_v16  ;;  %v5423_v16 = vld [vmem:[%s9719_s4 + $0x310] sm:$0xff]  ;;  %v5426_v29 = vld [vmem:[%s9719_s4 + $0x420] sm:$0xff] }
 0x21c   :  { %4742 = vmatprep.subr.mxu0 %v5401_v57  ;;  %4790 = vmatpush3.msra.mxu1 %v5402_v21  ;;  %v5427_v57 = vld [vmem:[%s9719_s4 + $0x308] sm:$0xff]  ;;  %v2702_v21 = vld [vmem:[%s9724_s3 + $0x38] sm:$0xff] }
 0x21d   :  { %3087 = vmatmul.mubr.f32.gmra.mxu1 %v2738_v28  ;;  %4743 = vmatpush3.msra.mxu0 %v5403_v32  ;;  %v9085_v27 = vadd.f32 %v4321_v35, %v2055_v1  ;;  %v5425_v28 = vld [vmem:[%s9719_s4 + $0x388] sm:$0xff] }
 0x21e   :  { %4791 = vmatprep.subr.mxu1 %v5404_v31  ;;  %4744 = vmatprep.subr.mxu0 %v5405_v43  ;;  %v5428_v31 = vld [vmem:[%s9719_s4 + $0x498] sm:$0xff]  ;;  %v5429_v43 = vld [vmem:[%s9719_s4 + $0x380] sm:$0xff] }
 0x21f   :  { %4792 = vmatpush3.msra.mxu1 %v5406_v58  ;;  %2996 = vmatprep.mubr.f32.mxu0 %v2763_v36  ;;  %v4269_v39 = vpop.f32.mrf.mxu0  ;;  %v5431_v58 = vld [vmem:[%s9719_s4 + $0x300] sm:$0xff] }
 0x220   :  { %4745 = vmatpush3.msra.mxu0 %v5407_v42  ;;  %4793 = vmatprep.subr.mxu1 %v5408_v33  ;;  %v5432_v33 = vld [vmem:[%s9719_s4 + $0x490] sm:$0xff] }
 0x221   :  { %2997 = vmatmul.mubr.f32.gmra.mxu0 %v2762_v34  ;;  %3091 = vmatprep.mubr.f32.mxu1 %v2752_v52  ;;  %v4270_v60 = vpop.f32.mrf.mxu0  ;;  %v2701_v34 = vld [vmem:[%s9724_s3 + $0x30] sm:$0xff]  ;;  %v5430_v52 = vld [vmem:[%s9719_s4 + $0x418] sm:$0xff] }
 0x222   :  { %4746 = vmatprep.subr.mxu0 %v5409_v40  ;;  %4794 = vmatpush3.msra.mxu1 %v5410_v51  ;;  %v4271_v13 = vadd.f32 %v4270_v60, %v4269_v39  ;;  %v4322_v11 = vpop.f32.mrf.mxu1  ;;  %v5433_v40 = vld [vmem:[%s9719_s4 + $0x410] sm:$0xff]  ;;  %v2715_v51 = vld [vmem:[%s9724_s3 + $0xa0] sm:$0xff] }
 0x223   :  { %3092 = vmatmul.mubr.f32.gmra.mxu1 %v2751_v30  ;;  %4747 = vmatpush3.msra.mxu0 %v5411_v23 }
 0x224   :  { %4795 = vmatprep.subr.mxu1 %v5412_v59  ;;  %4748 = vmatprep.subr.mxu0 %v5413_v18  ;;  %v2060_v19 = vadd.f32 %v9070_v41, %v4271_v13  ;;  %v4323_v56 = vpop.f32.mrf.mxu1  ;;  %v5435_v13 = vld [vmem:[%s9719_s4 + $0x488] sm:$0xff]  ;;  %v5436_v59 = vld [vmem:[%s9719_s4 + $0x578] sm:$0xff] }
 0x225   :  { %4796 = vmatpush3.msra.mxu1 %v5414_v14  ;;  %3001 = vmatprep.mubr.f32.mxu0 %v2776_v62  ;;  %v4272_v20 = vpop.f32.mrf.mxu0  ;;  %v4324_v49 = vadd.f32 %v4323_v56, %v4322_v11  ;;  %v5434_v62 = vld [vmem:[%s9719_s4 + $0x5f8] sm:$0xff]  ;;  %v5437_v18 = vld [vmem:[%s9719_s4 + $0x408] sm:$0xff]  ;;  %v5438_v56 = vld [vmem:[%s9719_s4 + $0x5f0] sm:$0xff] }
 0x226   :  { %4749 = vmatpush3.msra.mxu0 %v5415_v61  ;;  %4797 = vmatprep.subr.mxu1 %v5416_v22  ;;  %v2704_v14 = vld [vmem:[%s9724_s3 + $0x48] sm:$0xff]  ;;  %v2703_v61 = vld [vmem:[%s9724_s3 + $0x40] sm:$0xff] }
 0x227   :  { %3002 = vmatmul.mubr.f32.gmra.mxu0 %v2775_v5  ;;  %3096 = vmatprep.mubr.f32.mxu1 %v2765_v2  ;;  %v9148_v63 = vadd.f32 %v4324_v49, %v2060_v19  ;;  %v4273_v50 = vpop.f32.mrf.mxu0  ;;  %v2714_v5 = vld [vmem:[%s9724_s3 + $0x98] sm:$0xff]  ;;  %v5440_v49 = vld [vmem:[%s9719_s4 + $0x570] sm:$0xff] }
 0x228   :  { %4750 = vmatprep.subr.mxu0 %v5417_v46  ;;  %4798 = vmatpush3.msra.mxu1 %v5418_v8  ;;  %v4274_v4 = vadd.f32 %v4273_v50, %v4272_v20  ;;  %v4325_v17 = vpop.f32.mrf.mxu1  ;;  %v5439_v20 = vld [vmem:[%s9719_s4 + $0x480] sm:$0xff]  ;;  %v2728_v46 = vld [vmem:[%s9724_s3 + $0x108] sm:$0xff] }
 0x229   :  { %3097 = vmatmul.mubr.f32.gmra.mxu1 %v2764_v54  ;;  %4751 = vmatpush3.msra.mxu0 %v5419_v47  ;;  %v5441_v50 = vld [vmem:[%s9719_s4 + $0x400] sm:$0xff]  ;;  %v2717_v47 = vld [vmem:[%s9724_s3 + $0xb0] sm:$0xff] }
 0x22a   :  { %4799 = vmatprep.subr.mxu1 %v5420_v15  ;;  %4752 = vmatprep.subr.mxu0 %v5421_v7  ;;  %v2065_v12 = vadd.f32 %v9070_v41, %v4274_v4  ;;  %v4326_v0 = vpop.f32.mrf.mxu1  ;;  %v2727_v15 = vld [vmem:[%s9724_s3 + $0x100] sm:$0xff] }
 0x22b   :  { %4800 = vmatpush3.msra.mxu1 %v5422_v24  ;;  %4753 = vmatpush3.msra.mxu0 %v5423_v16  ;;  %v4275_v26 = vpop.f32.mrf.mxu0  ;;  %v4327_v25 = vadd.f32 %v4326_v0, %v4325_v17  ;;  %v5442_v17 = vld [vmem:[%s9719_s4 + $0x5e8] sm:$0xff]  ;;  %v5444_v0 = vld [vmem:[%s9719_s4 + $0x5e0] sm:$0xff] }
 0x22c   :  { %4801 = vmatprep.subr.mxu1 %v5424_v48  ;;  %3101 = vmatprep.mubr.f32.mxu1 %v2778_v37  ;;  %v5443_v37 = vld [vmem:[%s9719_s4 + $0x568] sm:$0xff]  ;;  %v2741_v48 = vld [vmem:[%s9724_s3 + $0x170] sm:$0xff] }
 0x22d   :  { %4754 = vmatprep.subr.mxu0 %v5425_v28  ;;  %4802 = vmatpush3.msra.mxu1 %v5426_v29  ;;  %v9187_v1 = vadd.f32 %v4327_v25, %v2065_v12  ;;  %v4276_v35 = vpop.f32.mrf.mxu0  ;;  %v2716_v24 = vld [vmem:[%s9724_s3 + $0xa8] sm:$0xff]  ;;  %v5446_v25 = vld [vmem:[%s9719_s4 + $0x5d8] sm:$0xff] }
 0x22e   :  { %3102 = vmatmul.mubr.f32.gmra.mxu1 %v2777_v55  ;;  %4755 = vmatpush3.msra.mxu0 %v5427_v57  ;;  %v4277_v36 = vadd.f32 %v4276_v35, %v4275_v26  ;;  %v4328_v32 = vpop.f32.mrf.mxu1  ;;  %v5445_v26 = vld [vmem:[%s9719_s4 + $0x560] sm:$0xff]  ;;  %v5447_v35 = vld [vmem:[%s9719_s4 + $0x558] sm:$0xff]  ;;  %v2740_v57 = vld [vmem:[%s9724_s3 + $0x168] sm:$0xff] }
 0x22f   :  { %4803 = vmatprep.subr.mxu1 %v5428_v31  ;;  %4756 = vmatprep.subr.mxu0 %v5429_v43  ;;  %v2730_v31 = vld [vmem:[%s9724_s3 + $0x118] sm:$0xff]  ;;  %v5449_v43 = vld [vmem:[%s9719_s4 + $0x550] sm:$0xff] }
 0x230   :  { %4804 = vmatpush3.msra.mxu1 %v5430_v52  ;;  %4757 = vmatpush3.msra.mxu0 %v5431_v58  ;;  %v2070_v39 = vadd.f32 %v9070_v41, %v4277_v36  ;;  %v4329_v42 = vpop.f32.mrf.mxu1 }
 0x231   :  { %3171 = vmatprep.mubr.f32.mxu0 %v2702_v21  ;;  %4805 = vmatprep.subr.mxu1 %v5432_v33  ;;  %v4278_v30 = vpop.f32.mrf.mxu0  ;;  %v4330_v60 = vadd.f32 %v4329_v42, %v4328_v32  ;;  %v5448_v32 = vld [vmem:[%s9719_s4 + $0x5d0] sm:$0xff] }
 0x232   :  { %3172 = vmatmul.mubr.f32.vlgmr.msra.gmra.mxu0 %v2701_v34  ;;  %4806 = vmatpush3.msra.mxu1 %v5433_v40  ;;  %v2729_v34 = vld [vmem:[%s9724_s3 + $0x110] sm:$0xff]  ;;  %v5452_v40 = vld [vmem:[%s9719_s4 + $0x548] sm:$0xff] }
 0x233   :  { %4832 = vmatprep.subr.mxu0 %v5434_v62  ;;  %4807 = vmatprep.subr.mxu1 %v5435_v13  ;;  %v9226_v11 = vadd.f32 %v4330_v60, %v2070_v39  ;;  %v4279_v23 = vpop.f32.mrf.mxu0  ;;  %v5450_v39 = vld [vmem:[%s9719_s4 + $0x638] sm:$0xff] }
 0x234   :  { %4833 = vmatpush3.msra.mxu0 %v5436_v59  ;;  %4808 = vmatpush3.msra.mxu1 %v5437_v18  ;;  %v4280_v2 = vadd.f32 %v4279_v23, %v4278_v30  ;;  %v4331_v19 = vpop.f32.mrf.mxu1  ;;  %v5451_v30 = vld [vmem:[%s9719_s4 + $0x5c8] sm:$0xff]  ;;  %v2754_v60 = vld [vmem:[%s9724_s3 + $0x1d8] sm:$0xff]  ;;  %v5453_v23 = vld [vmem:[%s9719_s4 + $0x5c0] sm:$0xff] }
 0x235   :  { %4834 = vmatprep.subr.mxu0 %v5438_v56  ;;  %3176 = vmatprep.mubr.f32.mxu0 %v2715_v51  ;;  %v2753_v51 = vld [vmem:[%s9724_s3 + $0x1d0] sm:$0xff]  ;;  %v2743_v59 = vld [vmem:[%s9724_s3 + $0x180] sm:$0xff] }
 0x236   :  { %4809 = vmatprep.subr.mxu1 %v5439_v20  ;;  %4835 = vmatpush3.msra.mxu0 %v5440_v49  ;;  %v2075_v22 = vadd.f32 %v9070_v41, %v4280_v2  ;;  %v4332_v54 = vpop.f32.mrf.mxu1  ;;  %v2742_v2 = vld [vmem:[%s9724_s3 + $0x178] sm:$0xff]  ;;  %v5455_v56 = vld [vmem:[%s9719_s4 + $0x630] sm:$0xff]  ;;  %v2767_v49 = vld [vmem:[%s9724_s3 + $0x240] sm:$0xff] }
 0x237   :  { %3177 = vmatmul.mubr.f32.gmra.mxu0 %v2714_v5  ;;  %4810 = vmatpush3.msra.mxu1 %v5441_v50  ;;  %v4281_v8 = vpop.f32.mrf.mxu0  ;;  %v4333_v4 = vadd.f32 %v4332_v54, %v4331_v19  ;;  %v5454_v5 = vld [vmem:[%s9719_s4 + $0x540] sm:$0xff]  ;;  %v5456_v20 = vld [vmem:[%s9719_s4 + $0x5b8] sm:$0xff]  ;;  %v2756_v50 = vld [vmem:[%s9724_s3 + $0x1e8] sm:$0xff] }
 0x238   :  { %3271 = vmatprep.mubr.f32.mxu1 %v2704_v14  ;;  %4836 = vmatprep.subr.mxu0 %v5442_v17  ;;  %v5457_v54 = vld [vmem:[%s9719_s4 + $0x538] sm:$0xff] }
 0x239   :  { %3272 = vmatmul.mubr.f32.vlgmr.msra.gmra.mxu1 %v2703_v61  ;;  %4837 = vmatpush3.msra.mxu0 %v5443_v37  ;;  %v9271_v7 = vadd.f32 %v4333_v4, %v2075_v22  ;;  %v4282_v12 = vpop.f32.mrf.mxu0  ;;  %v2766_v4 = vld [vmem:[%s9724_s3 + $0x238] sm:$0xff]  ;;  %v2755_v37 = vld [vmem:[%s9724_s3 + $0x1e0] sm:$0xff] }
 0x23a   :  { %4838 = vmatprep.subr.mxu0 %v5444_v0  ;;  %3181 = vmatprep.mubr.f32.mxu0 %v2728_v46  ;;  %v4283_v16 = vadd.f32 %v4282_v12, %v4281_v8  ;;  %v4334_v55 = vpop.f32.mrf.mxu1  ;;  %v5458_v8 = vld [vmem:[%s9719_s4 + $0x5b0] sm:$0xff] }
 0x23b   :  { %4839 = vmatpush3.msra.mxu0 %v5445_v26  ;;  %3276 = vmatprep.mubr.f32.mxu1 %v2717_v47  ;;  %v5459_v47 = vld [vmem:[%s9719_s4 + $0x628] sm:$0xff]  ;;  %v5460_v0 = vld [vmem:[%s9719_s4 + $0x530] sm:$0xff] }
 0x23c   :  { %3182 = vmatmul.mubr.f32.gmra.mxu0 %v2727_v15  ;;  %4840 = vmatprep.subr.mxu0 %v5446_v25  ;;  %v2080_v28 = vadd.f32 %v9070_v41, %v4283_v16  ;;  %v4335_v29 = vpop.f32.mrf.mxu1  ;;  %v5461_v16 = vld [vmem:[%s9719_s4 + $0x5a8] sm:$0xff]  ;;  %v2769_v25 = vld [vmem:[%s9724_s3 + $0x250] sm:$0xff] }
 0x23d   :  { %3277 = vmatmul.mubr.f32.gmra.mxu1 %v2716_v24  ;;  %4841 = vmatpush3.msra.mxu0 %v5447_v35  ;;  %v4284_v21 = vpop.f32.mrf.mxu0  ;;  %v4336_v36 = vadd.f32 %v4335_v29, %v4334_v55  ;;  %v2780_v55 = vld [vmem:[%s9724_s3 + $0x2a8] sm:$0x3]  ;;  %v2779_v29 = vld [vmem:[%s9724_s3 + $0x2a0] sm:$0x3] }
 0x23e   :  { %4842 = vmatprep.subr.mxu0 %v5448_v32  ;;  %5011 = vmatprep.subr.mxu1 %v9912_v44  ;;  %v5465_v32 = vld [vmem:[%s9719_s4 + $0x520] sm:$0xff] }
 0x23f   :  { %3186 = vmatprep.mubr.f32.mxu0 %v2741_v48  ;;  %4843 = vmatpush3.msra.mxu0 %v5449_v43  ;;  %v9308_v52 = vadd.f32 %v4336_v36, %v2080_v28  ;;  %v4285_v58 = vpop.f32.mrf.mxu0  ;;  %v5463_v28 = vld [vmem:[%s9719_s4 + $0x5a0] sm:$0xff]  ;;  %v5466_v43 = vld [vmem:[%s9719_s4 + $0x598] sm:$0xff] }
 0x240   :  { %5012 = vmatpush3.msra.mxu1 %v5450_v39  ;;  %3187 = vmatmul.mubr.f32.gmra.mxu0 %v2740_v57  ;;  %v4286_v42 = vadd.f32 %v4285_v58, %v4284_v21  ;;  %v4337_v33 = vpop.f32.mrf.mxu1  ;;  %v5464_v57 = vld [vmem:[%s9719_s4 + $0x620] sm:$0xff]  ;;  %v2768_v21 = vld [vmem:[%s9724_s3 + $0x248] sm:$0xff] }
 0x241   :  { %3281 = vmatprep.mubr.f32.mxu1 %v2730_v31  ;;  %4844 = vmatprep.subr.mxu0 %v5451_v30  ;;  %v2781_v30 = vld [vmem:[%s9724_s3 + $0x2b0] sm:$0x3] }
 0x242   :  { %3282 = vmatmul.mubr.f32.gmra.mxu1 %v2729_v34  ;;  %4845 = vmatpush3.msra.mxu0 %v5452_v40  ;;  %v2085_v62 = vadd.f32 %v9070_v41, %v4286_v42  ;;  %v4338_v13 = vpop.f32.mrf.mxu1  ;;  %v2782_v34 = vld [vmem:[%s9724_s3 + $0x2b8] sm:$0x3]  ;;  %v5469_v40 = vld [vmem:[%s9719_s4 + $0x590] sm:$0xff] }
 0x243   :  { %4846 = vmatprep.subr.mxu0 %v5453_v23  ;;  %5013 = vmatprep.subr.mxu1 %v9912_v44  ;;  %v4339_v18 = vadd.f32 %v4338_v13, %v4337_v33  ;;  %v5468_v33 = vld [vmem:[%s9719_s4 + $0x618] sm:$0xff]  ;;  %v5470_v13 = vld [vmem:[%s9719_s4 + $0x510] sm:$0xff] }
 0x244   :  { %3191 = vmatprep.mubr.f32.mxu0 %v2754_v60  ;;  %4847 = vmatpush3.msra.mxu0 %v5454_v5  ;;  %v4372_v19 = vpop.f32.mrf.mxu0  ;;  %v2706_v23 = vld [vmem:[%s9724_s3 + $0x58] sm:$0xff] }
 0x245   :  { %5014 = vmatpush3.msra.mxu1 %v5455_v56  ;;  %3192 = vmatmul.mubr.f32.gmra.mxu0 %v2753_v51  ;;  %v9342_v14 = vadd.f32 %v4339_v18, %v2085_v62  ;;  %v5471_v18 = vld [vmem:[%s9719_s4 + $0x588] sm:$0xff]  ;;  %v2705_v56 = vld [vmem:[%s9724_s3 + $0x50] sm:$0xff] }
 0x246   :  { %3286 = vmatprep.mubr.f32.mxu1 %v2743_v59  ;;  %4848 = vmatprep.subr.mxu0 %v5456_v20  ;;  %v4373_v61 = vpop.f32.mrf.mxu0  ;;  %v4425_v22 = vpop.f32.mrf.mxu1 }
 0x247   :  { %3287 = vmatmul.mubr.f32.gmra.mxu1 %v2742_v2  ;;  %4849 = vmatpush3.msra.mxu0 %v5457_v54  ;;  %v4374_v46 = vadd.f32 %v4373_v61, %v4372_v19  ;;  %v5472_v2 = vld [vmem:[%s9719_s4 + $0x508] sm:$0xff]  ;;  %v5473_v19 = vld [vmem:[%s9719_s4 + $0x610] sm:$0xff]  ;;  %v2719_v61 = vld [vmem:[%s9724_s3 + $0xc0] sm:$0xff] }
 0x248   :  { %5015 = vmatprep.subr.mxu1 %v9912_v44  ;;  %4850 = vmatprep.subr.mxu0 %v5458_v8  ;;  %v4426_v17 = vpop.f32.mrf.mxu1  ;;  %v5475_v54 = vld [vmem:[%s9719_s4 + $0x500] sm:$0xff] }
 0x249   :  { %5016 = vmatpush3.msra.mxu1 %v5459_v47  ;;  %3196 = vmatprep.mubr.f32.mxu0 %v2767_v49  ;;  %v2255_v15 = vadd.f32 %v4374_v46, %v9085_v27  ;;  %v4427_v12 = vadd.f32 %v4426_v17, %v4425_v22  ;;  %v5462_v27 = vld [vmem:[%s9719_s4 + $0x528] sm:$0xff]  ;;  %v2707_v8 = vld [vmem:[%s9724_s3 + $0x60] sm:$0xff]  ;;  %v2718_v47 = vld [vmem:[%s9724_s3 + $0xb8] sm:$0xff] }
 0x24a   :  { %4851 = vmatpush3.msra.mxu0 %v5460_v0  ;;  %3291 = vmatprep.mubr.f32.mxu1 %v2756_v50  ;;  %v4375_v24 = vpop.f32.mrf.mxu0  ;;  %v5476_v46 = vld [vmem:[%s9719_s4 + $0x608] sm:$0xff] }
 0x24b   :  { %3197 = vmatmul.mubr.f32.gmra.mxu0 %v2766_v4  ;;  %4852 = vmatprep.subr.mxu0 %v5461_v16  ;;  %v9379_v26 = vadd.f32 %v4427_v12, %v2255_v15  ;;  %v5477_v15 = vld [vmem:[%s9719_s4 + $0x600] sm:$0xff]  ;;  %v2732_v12 = vld [vmem:[%s9724_s3 + $0x128] sm:$0xff] }
 0x24c   :  { %3292 = vmatmul.mubr.f32.gmra.mxu1 %v2755_v37  ;;  %4853 = vmatpush3.msra.mxu0 %v5462_v27  ;;  %v4376_v48 = vpop.f32.mrf.mxu0 }
 0x24d   :  { %5017 = vmatprep.subr.mxu1 %v9912_v44  ;;  %4854 = vmatprep.subr.mxu0 %v5463_v28  ;;  %v4377_v35 = vadd.f32 %v4376_v48, %v4375_v24 }
 0x24e   :  { %5018 = vmatpush3.msra.mxu1 %v5464_v57  ;;  %3201 = vmatprep.mubr.f32.mxu0 %v2780_v55  ;;  %v4428_v36 = vpop.f32.mrf.mxu1  ;;  %v2720_v55 = vld [vmem:[%s9724_s3 + $0xc8] sm:$0xff]  ;;  %v2733_v57 = vld [vmem:[%s9724_s3 + $0x130] sm:$0xff] }
 0x24f   :  { %4855 = vmatpush3.msra.mxu0 %v5465_v32  ;;  %3296 = vmatprep.mubr.f32.mxu1 %v2769_v25  ;;  %v2260_v31 = vadd.f32 %v4377_v35, %v9148_v63  ;;  %v5467_v63 = vld [vmem:[%s9719_s4 + $0x518] sm:$0xff]  ;;  %v2731_v25 = vld [vmem:[%s9724_s3 + $0x120] sm:$0xff] }
 0x250   :  { %3202 = vmatmul.mubr.f32.gmra.mxu0 %v2779_v29  ;;  %4856 = vmatprep.subr.mxu0 %v5466_v43  ;;  %v4378_v58 = vpop.f32.mrf.mxu0  ;;  %v4429_v39 = vpop.f32.mrf.mxu1  ;;  %v2758_v43 = vld [vmem:[%s9724_s3 + $0x1f8] sm:$0xff] }
 0x251   :  { %5019 = vmatprep.subr.mxu1 %v9912_v44  ;;  %3297 = vmatmul.mubr.f32.gmra.mxu1 %v2768_v21  ;;  %v4430_v42 = vadd.f32 %v4429_v39, %v4428_v36  ;;  %v2744_v36 = vld [vmem:[%s9724_s3 + $0x188] sm:$0xff] }
 0x252   :  { %4857 = vmatpush3.msra.mxu0 %v5467_v63  ;;  %5020 = vmatpush3.msra.mxu1 %v5468_v33  ;;  %v4379_v60 = vpop.f32.mrf.mxu0  ;;  %v2757_v63 = vld [vmem:[%s9724_s3 + $0x1f0] sm:$0xff] }
 0x253   :  { %4858 = vmatprep.subr.mxu0 %v5469_v40  ;;  %3301 = vmatprep.mubr.f32.mxu1 %v2782_v34  ;;  %v9423_v51 = vadd.f32 %v4430_v42, %v2260_v31  ;;  %v4380_v62 = vadd.f32 %v4379_v60, %v4378_v58 }
 0x254   :  { %4859 = vmatpush3.msra.mxu0 %v5470_v13  ;;  %5021 = vmatprep.subr.mxu1 %v9912_v44  ;;  %v4431_v59 = vpop.f32.mrf.mxu1  ;;  %v2759_v13 = vld [vmem:[%s9724_s3 + $0x200] sm:$0xff] }
 0x255   :  { %4860 = vmatprep.subr.mxu0 %v5471_v18  ;;  %3302 = vmatmul.mubr.f32.gmra.mxu1 %v2781_v30  ;;  %v2265_v5 = vadd.f32 %v4380_v62, %v9187_v1  ;;  %v5474_v1 = vld [vmem:[%s9719_s4 + $0x580] sm:$0xff] }
 0x256   :  { %4861 = vmatpush3.msra.mxu0 %v5472_v2  ;;  %5022 = vmatpush3.msra.mxu1 %v5473_v19  ;;  %v4381_v20 = vpop.f32.mrf.mxu0  ;;  %v4432_v49 = vpop.f32.mrf.mxu1  ;;  %v2771_v30 = vld [vmem:[%s9724_s3 + $0x260] sm:$0xff] }
 0x257   :  { %4862 = vmatprep.subr.mxu0 %v5474_v1  ;;  %3371 = vmatprep.mubr.f32.mxu0 %v2706_v23  ;;  %v4433_v22 = vadd.f32 %v4432_v49, %v4431_v59  ;;  %v2770_v59 = vld [vmem:[%s9724_s3 + $0x258] sm:$0xff]  ;;  %v2783_v49 = vld [vmem:[%s9724_s3 + $0x2c0] sm:$0x3] }
 0x258   :  { %4863 = vmatpush3.msra.mxu0 %v5475_v54  ;;  %5023 = vmatprep.subr.mxu1 %v9912_v44  ;;  %v4382_v50 = vpop.f32.mrf.mxu0 }
 0x259   :  { %3372 = vmatmul.mubr.f32.vlgmr.msra.gmra.mxu0 %v2705_v56  ;;  %5024 = vmatpush3.msra.mxu1 %v5476_v46  ;;  %v9461_v4 = vadd.f32 %v4433_v22, %v2265_v5  ;;  %v4383_v17 = vadd.f32 %v4382_v50, %v4381_v20  ;;  %v2772_v56 = vld [vmem:[%s9724_s3 + $0x268] sm:$0xff]  ;;  %v2785_v22 = vld [vmem:[%s9724_s3 + $0x2d0] sm:$0x3] }
 0x25a   :  { %3376 = vmatprep.mubr.f32.mxu0 %v2719_v61  ;;  %5025 = vmatprep.subr.mxu1 %v9912_v44  ;;  %v4434_v37 = vpop.f32.mrf.mxu1 }
 0x25b   :  { %5026 = vmatpush3.msra.mxu1 %v5477_v15  ;;  %5027 = vmatprep.mubr.msk.f32.mxu1 %vm5480_vm1, %v9912_v44  ;;  %v2270_v0 = vadd.f32 %v4383_v17, %v9226_v11  ;;  %v2745_v11 = vld [vmem:[%s9724_s3 + $0x190] sm:$0xff] }
 0x25c   :  { %5028 = vmatmul.mubr.msk.f32.vlgmr.msra.gmra.mxu1 %vm321_vm0, %v2707_v8  ;;  %v4384_v24 = vpop.f32.mrf.mxu0  ;;  %v4435_v16 = vpop.f32.mrf.mxu1 }
 0x25d   :  { %3377 = vmatmul.mubr.f32.gmra.mxu0 %v2718_v47  ;;  %5030 = vmatprep.mubr.msk.f32.mxu1 %vm5480_vm1, %v9912_v44  ;;  %v4436_v27 = vadd.f32 %v4435_v16, %v4434_v37 }
 0x25e   :  { %3381 = vmatprep.mubr.f32.mxu0 %v2732_v12  ;;  %v4385_v48 = vpop.f32.mrf.mxu0 }
 0x25f   :  { %v9488_v28 = vadd.f32 %v4436_v27, %v2270_v0  ;;  %v4386_v29 = vadd.f32 %v4385_v48, %v4384_v24 }
 0x260   :  { %5031 = vmatmul.mubr.msk.f32.gmra.mxu1 %vm321_vm0, %v2720_v55  ;;  %v4437_v35 = vpop.f32.mrf.mxu1 }
 0x261   :  { %3382 = vmatmul.mubr.f32.gmra.mxu0 %v2731_v25  ;;  %5033 = vmatprep.mubr.msk.f32.mxu1 %vm5480_vm1, %v9912_v44  ;;  %v2275_v21 = vadd.f32 %v4386_v29, %v9271_v7  ;;  %v2746_v7 = vld [vmem:[%s9724_s3 + $0x198] sm:$0xff] }
 0x262   :  { %3386 = vmatprep.mubr.f32.mxu0 %v2745_v11  ;;  %v4387_v32 = vpop.f32.mrf.mxu0  ;;  %v4438_v31 = vpop.f32.mrf.mxu1 }
 0x263   :  { %v4439_v34 = vadd.f32 %v4438_v31, %v4437_v35 }
 0x264   :  { %5034 = vmatmul.mubr.msk.f32.gmra.mxu1 %vm321_vm0, %v2733_v57  ;;  %v4388_v58 = vpop.f32.mrf.mxu0 }
 0x265   :  { %3387 = vmatmul.mubr.f32.gmra.mxu0 %v2744_v36  ;;  %5036 = vmatprep.mubr.msk.f32.mxu1 %vm5480_vm1, %v9912_v44  ;;  %v9509_v39 = vadd.f32 %v4439_v34, %v2275_v21  ;;  %v4389_v42 = vadd.f32 %v4388_v58, %v4387_v32 }
 0x266   :  { %3391 = vmatprep.mubr.f32.mxu0 %v2758_v43  ;;  %v4440_v33 = vpop.f32.mrf.mxu1 }
 0x267   :  { %v2280_v60 = vadd.f32 %v4389_v42, %v9308_v52  ;;  %v2784_v52 = vld [vmem:[%s9724_s3 + $0x2c8] sm:$0x3] }
 0x268   :  { %5037 = vmatmul.mubr.msk.f32.gmra.mxu1 %vm321_vm0, %v2746_v7  ;;  %v4390_v40 = vpop.f32.mrf.mxu0  ;;  %v4441_v62 = vpop.f32.mrf.mxu1 }
 0x269   :  { %3392 = vmatmul.mubr.f32.gmra.mxu0 %v2757_v63  ;;  %5039 = vmatprep.mubr.msk.f32.mxu1 %vm5480_vm1, %v9912_v44  ;;  %v4442_v23 = vadd.f32 %v4441_v62, %v4440_v33 }
 0x26a   :  { %3396 = vmatprep.mubr.f32.mxu0 %v2771_v30  ;;  %v4391_v18 = vpop.f32.mrf.mxu0 }
 0x26b   :  { %v2380_v5 = vadd.f32 %v4442_v23, %v2280_v60  ;;  %v4392_v2 = vadd.f32 %v4391_v18, %v4390_v40 }
 0x26c   :  { %5040 = vmatmul.mubr.msk.f32.gmra.mxu1 %vm321_vm0, %v2759_v13  ;;  %v4443_v19 = vpop.f32.mrf.mxu1 }
 0x26d   :  { %3397 = vmatmul.mubr.f32.gmra.mxu0 %v2770_v59  ;;  %5042 = vmatprep.mubr.msk.f32.mxu1 %vm5480_vm1, %v9912_v44  ;;  %v2285_v20 = vadd.f32 %v4392_v2, %v9342_v14 }
 0x26e   :  { %3401 = vmatprep.mubr.f32.mxu0 %v2784_v52  ;;  %v4444_v1 = vpop.f32.mrf.mxu1 }
 0x26f   :  { %v4445_v61 = vadd.f32 %v4444_v1, %v4443_v19 }
 0x270   :  { %5043 = vmatmul.mubr.msk.f32.gmra.mxu1 %vm321_vm0, %v2772_v56 }
 0x271   :  { %3402 = vmatmul.mubr.f32.gmra.mxu0 %v2783_v49  ;;  %5045 = vmatprep.mubr.msk.f32.mxu1 %vm5480_vm1, %v9912_v44  ;;  %v2385_v54 = vadd.f32 %v4445_v61, %v2285_v20 }
 0x272   :  { %v4478_v50 = vpop.f32.mrf.mxu0 }
 0x274   :  { %5046 = vmatmul.mubr.msk.f32.gmra.mxu1 %vm321_vm0, %v2785_v22  ;;  %v4479_v14 = vpop.f32.mrf.mxu0  ;;  %v4531_v46 = vpop.f32.mrf.mxu1 }
 0x275   :  { %v4480_v8 = vadd.f32 %v4479_v14, %v4478_v50 }
 0x276   :  { %v4532_v17 = vpop.f32.mrf.mxu1 }
 0x277   :  { %v2455_v47 = vadd.f32 %v4480_v8, %v9379_v26  ;;  %v4481_v37 = vpop.f32.mrf.mxu0  ;;  %v4533_v15 = vadd.f32 %v4532_v17, %v4531_v46 }
 0x279   :  { %v4482_v12 = vpop.f32.mrf.mxu0  ;;  %v2555_v0 = vadd.f32 %v4533_v15, %v2455_v47 }
 0x27a   :  { %v4483_v24 = vadd.f32 %v4482_v12, %v4481_v37 }
 0x27b   :  { %v4534_v44 = vpop.f32.mrf.mxu1 }
 0x27c   :  { %v2460_v16 = vadd.f32 %v4483_v24, %v9423_v51 }
 0x27d   :  { %v4484_v55 = vpop.f32.mrf.mxu0  ;;  %v4535_v27 = vpop.f32.mrf.mxu1 }
 0x27e   :  { %v4536_v25 = vadd.f32 %v4535_v27, %v4534_v44 }
 0x27f   :  { %v4485_v48 = vpop.f32.mrf.mxu0 }
 0x280   :  { %v4486_v11 = vadd.f32 %v4485_v48, %v4484_v55  ;;  %v4537_v29 = vpop.f32.mrf.mxu1  ;;  %v2560_v35 = vadd.f32 %v4536_v25, %v2460_v16 }
 0x282   :  { %v2465_v57 = vadd.f32 %v4486_v11, %v9461_v4  ;;  %v4487_v21 = vpop.f32.mrf.mxu0  ;;  %v4538_v36 = vpop.f32.mrf.mxu1 }
 0x283   :  { %v4539_v26 = vadd.f32 %v4538_v36, %v4537_v29 }
 0x284   :  { %v4488_v32 = vpop.f32.mrf.mxu0 }
 0x285   :  { %v4489_v31 = vadd.f32 %v4488_v32, %v4487_v21  ;;  %v4540_v43 = vpop.f32.mrf.mxu1  ;;  %v2565_v34 = vadd.f32 %v4539_v26, %v2465_v57 }
 0x287   :  { %v2470_v58 = vadd.f32 %v4489_v31, %v9488_v28  ;;  %v4490_v7 = vpop.f32.mrf.mxu0  ;;  %v4541_v51 = vpop.f32.mrf.mxu1 }
 0x288   :  { %v4542_v42 = vadd.f32 %v4541_v51, %v4540_v43 }
 0x289   :  { %v4491_v63 = vpop.f32.mrf.mxu0 }
 0x28a   :  { %v4492_v33 = vadd.f32 %v4491_v63, %v4490_v7  ;;  %v4543_v30 = vpop.f32.mrf.mxu1  ;;  %v2570_v60 = vadd.f32 %v4542_v42, %v2470_v58 }
 0x28c   :  { %v2475_v40 = vadd.f32 %v4492_v33, %v9509_v39  ;;  %v4493_v62 = vpop.f32.mrf.mxu0  ;;  %v4544_v4 = vpop.f32.mrf.mxu1 }
 0x28d   :  { %v4545_v13 = vadd.f32 %v4544_v4, %v4543_v30 }
 0x28e   :  { %v4494_v23 = vpop.f32.mrf.mxu0 }
 0x28f   :  { %v4495_v59 = vadd.f32 %v4494_v23, %v4493_v62  ;;  %v4546_v18 = vpop.f32.mrf.mxu1  ;;  %v2575_v52 = vadd.f32 %v4545_v13, %v2475_v40 }
 0x291   :  { %v2480_v2 = vadd.f32 %v4495_v59, %v2380_v5  ;;  %v4496_v19 = vpop.f32.mrf.mxu0  ;;  %v4547_v56 = vpop.f32.mrf.mxu1 }
 0x292   :  { %v4548_v28 = vadd.f32 %v4547_v56, %v4546_v18 }
 0x293   :  { %v4497_v20 = vpop.f32.mrf.mxu0 }
 0x294   :  { %v4498_v49 = vadd.f32 %v4497_v20, %v4496_v19  ;;  %v4549_v1 = vpop.f32.mrf.mxu1  ;;  %v2580_v61 = vadd.f32 %v4548_v28, %v2480_v2 }
 0x296   :  { %v2485_v22 = vadd.f32 %v4498_v49, %v2385_v54  ;;  %v4550_v50 = vpop.f32.mrf.mxu1 }
 0x297   :  { %v4551_v14 = vadd.f32 %v4550_v50, %v4549_v1  ;;  %v2654_v46 = vpop.f32.mrf.mxu0 }
 0x298   :  { %v9552_v39 = vadd.f32 %v2654_v46, %v2555_v0 }
 0x299   :  { %v4992_v8 = vpop.f32.mrf.mxu0  ;;  %v2585_v17 = vadd.f32 %v4551_v14, %v2485_v22 }
 0x29c   :  { %v2659_v47 = vpop.f32.mrf.mxu0 }
 0x29d   :  { %v9554_v37 = vadd.f32 %v2659_v47, %v2560_v35 }
 0x29e   :  { %v4995_v15 = vpop.f32.mrf.mxu0  ;;  %v4599_v5 = vpop.f32.mrf.mxu1 }
 0x2a0   :  { %v4600_v12 = vpop.f32.mrf.mxu1 }
 0x2a1   :  { %v9556_v24 = vadd.f32 %v4600_v12, %v4599_v5 }
 0x2a2   :  { %v2664_v44 = vpop.f32.mrf.mxu0 }
 0x2a3   :  { %v9558_v16 = vadd.f32 %v2664_v44, %v2565_v34  ;;  %v2874_v45 = vadd.f32 %v9070_v41, %v9556_v24 }
 0x2a4   :  { %v4998_v55 = vpop.f32.mrf.mxu0 }
 0x2a5   :  { %9951 = vst [vmem:[#allocation40_spill] sm:$0xff] %v9558_v16 }
 0x2a7   :  { %v2669_v54 = vpop.f32.mrf.mxu0 }
 0x2a8   :  { %v9560_v27 = vadd.f32 %v2669_v54, %v2570_v60  ;;  %v4602_v25 = vpop.f32.mrf.mxu1 }
 0x2a9   :  { %v5001_v0 = vpop.f32.mrf.mxu0 }
 0x2aa   :  { %9952 = vst [vmem:[#allocation41_spill] sm:$0xff] %v9560_v27  ;;  %v4603_v48 = vpop.f32.mrf.mxu1 }
 0x2ab   :  { %v9562_v11 = vadd.f32 %v4603_v48, %v4602_v25 }
 0x2ad   :  { %v2674_v29 = vpop.f32.mrf.mxu0 }
 0x2ae   :  { %v9564_v35 = vadd.f32 %v2674_v29, %v2575_v52  ;;  %v4605_v57 = vpop.f32.mrf.mxu1 }
 0x2af   :  { %v5004_v21 = vpop.f32.mrf.mxu0 }
 0x2b0   :  { %9953 = vst [vmem:[#allocation2_spill] sm:$0xff] %v9564_v35  ;;  %v4606_v36 = vpop.f32.mrf.mxu1 }
 0x2b1   :  { %v9566_v26 = vadd.f32 %v4606_v36, %v4605_v57 }
 0x2b3   :  { %v2679_v32 = vpop.f32.mrf.mxu0 }
 0x2b4   :  { %v9568_v31 = vadd.f32 %v2679_v32, %v2580_v61  ;;  %v4608_v43 = vpop.f32.mrf.mxu1 }
 0x2b5   :  { %v5007_v34 = vpop.f32.mrf.mxu0 }
 0x2b6   :  { %9954 = vst [vmem:[#allocation3_spill] sm:$0xff] %v9568_v31  ;;  %v4609_v58 = vpop.f32.mrf.mxu1 }
 0x2b7   :  { %v9570_v7 = vadd.f32 %v4609_v58, %v4608_v43 }
 0x2b9   :  { %v2684_v51 = vpop.f32.mrf.mxu0 }
 0x2ba   :  { %v9572_v42 = vadd.f32 %v2684_v51, %v2585_v17  ;;  %v4611_v63 = vpop.f32.mrf.mxu1 }
 0x2bb   :  { %v5010_v33 = vpop.f32.mrf.mxu0 }
 0x2bc   :  { %9955 = vst [vmem:[#allocation4_spill] sm:$0xff] %v9572_v42  ;;  %v4612_v30 = vpop.f32.mrf.mxu1 }
 0x2bd   :  { %v9574_v60 = vadd.f32 %v4612_v30, %v4611_v63 }
 0x2bf   :  { %v4614_v40 = vpop.f32.mrf.mxu1 }
 0x2c1   :  { %v4615_v62 = vpop.f32.mrf.mxu1 }
 0x2c2   :  { %v9576_v4 = vadd.f32 %v4615_v62, %v4614_v40 }
 0x2c3   :  { %v4652_v13 = vpop.f32.mrf.mxu0 }
 0x2c4   :  { %9956 = vst [vmem:[#allocation5_spill] sm:$0xff] %v9576_v4 }
 0x2c5   :  { %v4617_v23 = vpop.f32.mrf.mxu1  ;;  %v4653_v59 = vpop.f32.mrf.mxu0 }
 0x2c7   :  { %v4618_v18 = vpop.f32.mrf.mxu1 }
 0x2c8   :  { %v9578_v52 = vadd.f32 %v4618_v18, %v4617_v23 }
 0x2c9   :  { %v4655_v2 = vpop.f32.mrf.mxu0 }
 0x2ca   :  { %9957 = vst [vmem:[#allocation6_spill] sm:$0xff] %v9578_v52 }
 0x2cb   :  { %v4705_v19 = vpop.f32.mrf.mxu1  ;;  %v4656_v56 = vpop.f32.mrf.mxu0 }
 0x2cc   :  { %v4657_v16 = vadd.f32 %v4656_v56, %v4655_v2 }
 0x2cd   :  { %v4706_v28 = vpop.f32.mrf.mxu1 }
 0x2cf   :  { %v4658_v20 = vpop.f32.mrf.mxu0 }
 0x2d1   :  { %v4708_v49 = vpop.f32.mrf.mxu1  ;;  %v4659_v1 = vpop.f32.mrf.mxu0 }
 0x2d3   :  { %v4709_v61 = vpop.f32.mrf.mxu1 }
 0x2d5   :  { %v9580_v22 = vpop.f32.mrf.mxu0 }
 0x2d7   :  { %v4711_v50 = vpop.f32.mrf.mxu1  ;;  %v9582_v14 = vpop.f32.mrf.mxu0 }
 0x2d9   :  { %v4712_v46 = vpop.f32.mrf.mxu1 }
 0x2da   :  { %v4713_v2 = vadd.f32 %v4712_v46, %v4711_v50 }
 0x2db   :  { %v9584_v8 = vpop.f32.mrf.mxu0 }
 0x2dd   :  { %v9586_v17 = vpop.f32.mrf.mxu1  ;;  %v9590_v15 = vpop.f32.mrf.mxu0 }
 0x2df   :  { %v9588_v47 = vpop.f32.mrf.mxu1 }
 0x2e1   :  { %v9594_v12 = vpop.f32.mrf.mxu0 }
 0x2e3   :  { %v9592_v5 = vpop.f32.mrf.mxu1  ;;  %v9598_v55 = vpop.f32.mrf.mxu0 }
 0x2e5   :  { %v9596_v44 = vpop.f32.mrf.mxu1 }
 0x2e7   :  { %v9602_v25 = vpop.f32.mrf.mxu0 }
 0x2e8   :  { %9959 = vst [vmem:[#allocation8_spill] sm:$0xff] %v9602_v25 }
 0x2e9   :  { %v9600_v54 = vpop.f32.mrf.mxu1  ;;  %v9606_v48 = vpop.f32.mrf.mxu0 }
 0x2ea   :  { %9958 = vst [vmem:[#allocation7_spill] sm:$0xff] %v9600_v54  ;;  %9961 = vst [vmem:[#allocation10_spill] sm:$0xff] %v9606_v48  ;;  %v4707_v48 = vadd.f32 %v4706_v28, %v4705_v19 }
 0x2eb   :  { %v9604_v0 = vpop.f32.mrf.mxu1 }
 0x2ec   :  { %9960 = vst [vmem:[#allocation9_spill] sm:$0xff] %v9604_v0 }
 0x2ee   :  { %v9608_v57 = vpop.f32.mrf.mxu1 }
 0x2ef   :  { %9962 = vst [vmem:[#allocation11_spill] sm:$0xff] %v9608_v57 }
 0x2f0   :  { %v9610_v36 = vpop.f32.mrf.mxu1 }
 0x2f1   :  { %9963 = vst [vmem:[#allocation12_spill] sm:$0xff] %v9610_v36  ;;  %v4654_v36 = vadd.f32 %v4653_v59, %v4652_v13  ;;  %v4710_v13 = vadd.f32 %v4709_v61, %v4708_v49 }
 0x2f2   :  { %v4758_v29 = vpop.f32.mrf.mxu0 }
 0x2f3   :  { %v2974_v25 = vadd.f32 %v4654_v36, %v2874_v45  ;;  %v2884_v45 = vadd.f32 %v9070_v41, %v9566_v26  ;;  %v2688_v36 = vmax.f32 %v9552_v39, 0.0 }
 0x2f4   :  { %v4759_v21 = vpop.f32.mrf.mxu0 }
 0x2f7   :  { %v4761_v32 = vpop.f32.mrf.mxu0 }
 0x2f9   :  { %v4811_v43 = vpop.f32.mrf.mxu1  ;;  %v4762_v34 = vpop.f32.mrf.mxu0 }
 0x2fa   :  { %v4763_v4 = vadd.f32 %v4762_v34, %v4761_v32 }
 0x2fb   :  { %v4812_v58 = vpop.f32.mrf.mxu1 }
 0x2fc   :  { %v4764_v51 = vpop.f32.mrf.mxu0  ;;  %v4813_v59 = vadd.f32 %v4812_v58, %v4811_v43  ;;  %v4719_v58 = vadd.f32 %v9596_v44, %v9592_v5 }
 0x2fd   :  { %v4814_v63 = vpop.f32.mrf.mxu1 }
 0x2fe   :  { %v4765_v33 = vpop.f32.mrf.mxu0 }
 0x2ff   :  { %v4815_v30 = vpop.f32.mrf.mxu1 }
 0x300   :  { %v4767_v40 = vpop.f32.mrf.mxu0 }
 0x302   :  { %v4817_v62 = vpop.f32.mrf.mxu1  ;;  %v4768_v23 = vpop.f32.mrf.mxu0 }
 0x304   :  { %v4818_v18 = vpop.f32.mrf.mxu1 }
 0x305   :  { %v9612_v9 = vpop.f32.mrf.mxu0 }
 0x307   :  { %v9614_v53 = vpop.f32.mrf.mxu1  ;;  %v9616_v42 = vpop.f32.mrf.mxu0 }
 0x308   :  { %v4772_v5 = vadd.f32 %v9616_v42, %v9612_v9 }
 0x309   :  { %v9618_v10 = vpop.f32.mrf.mxu1 }
 0x30b   :  { %v9620_v31 = vpop.f32.mrf.mxu0 }
 0x30c   :  { %9964 = vst [vmem:[#allocation13_spill] sm:$0xff] %v9620_v31  ;;  %v9622_v6 = vpop.f32.mrf.mxu1  ;;  %v4760_v31 = vadd.f32 %v4759_v21, %v4758_v29  ;;  %v4816_v29 = vadd.f32 %v4815_v30, %v4814_v63 }
 0x30d   :  { %9965 = vst [vmem:[#allocation14_spill] sm:$0xff] %v9622_v6  ;;  %v9626_v38 = vpop.f32.mrf.mxu0 }
 0x30e   :  { %v9624_v35 = vpop.f32.mrf.mxu1  ;;  %9967 = vst [vmem:[#allocation16_spill] sm:$0xff] %v9626_v38  ;;  %v2879_v38 = vadd.f32 %v9070_v41, %v9562_v11 }
 0x30f   :  { %9966 = vst [vmem:[#allocation15_spill] sm:$0xff] %v9624_v35 }
 0x310   :  { %v9630_v57 = vpop.f32.mrf.mxu0 }
 0x311   :  { %v9628_v27 = vpop.f32.mrf.mxu1  ;;  %9969 = vst [vmem:[#allocation18_spill] sm:$0xff] %v9630_v57  ;;  %v4660_v57 = vadd.f32 %v4659_v1, %v4658_v20  ;;  %v4663_v20 = vadd.f32 %v9582_v14, %v9580_v22  ;;  %v2889_v1 = vadd.f32 %v9070_v41, %v9570_v7  ;;  %v4769_v22 = vadd.f32 %v4768_v23, %v4767_v40 }
 0x312   :  { %9968 = vst [vmem:[#allocation17_spill] sm:$0xff] %v9628_v27  ;;  %v9638_v6 = vpop.f32.mrf.mxu0  ;;  %v3074_v27 = vadd.f32 %v4707_v48, %v2974_v25  ;;  %v2689_v40 = vmax.f32 %v9554_v37, 0.0  ;;  %v4669_v23 = vadd.f32 %v9598_v55, %v9594_v12 }
 0x313   :  { %v9632_v52 = vpop.f32.mrf.mxu1  ;;  %v2984_v25 = vadd.f32 %v4660_v57, %v2884_v45  ;;  %v2989_v57 = vadd.f32 %v4663_v20, %v2889_v1 }
 0x314   :  { %9970 = vst [vmem:[#allocation19_spill] sm:$0xff] %v9632_v52  ;;  %v2979_v52 = vadd.f32 %v4657_v16, %v2879_v38  ;;  %v3174_v54 = vadd.f32 %v4760_v31, %v3074_v27  ;;  %v4766_v16 = vadd.f32 %v4765_v33, %v4764_v51 }
 0x315   :  { %v9636_v0 = vpop.f32.mrf.mxu1  ;;  %v3084_v26 = vadd.f32 %v4713_v2, %v2984_v25  ;;  %v9976_v25 = vld [vmem:[#allocation40_spill] sm:$0xff] }
 0x316   :  { %v3079_v56 = vadd.f32 %v4710_v13, %v2979_v52  ;;  %v3274_v28 = vadd.f32 %v4813_v59, %v3174_v54  ;;  %v4716_v52 = vadd.f32 %v9588_v47, %v9586_v17  ;;  %v5478_v17 = vld [vmem:[%s9722_s5] ss:$0 sm:$0xff]  ;;  %v9971_v59 = vld [vmem:[#allocation5_spill] sm:$0xff]  ;;  %v9975_v12 = vld [vmem:[#allocation15_spill] sm:$0xff]  ;;  %v2690_v20 = vmax.f32 %v9976_v25, 0.0 }
 0x317   :  { %v9642_v24 = vpop.f32.mrf.mxu1  ;;  %v3184_v32 = vadd.f32 %v4766_v16, %v3084_v26  ;;  %v2894_v47 = vadd.f32 %v5478_v17, %v9574_v60  ;;  %v2899_v45 = vadd.f32 %v5478_v17, %v9971_v59  ;;  %v9978_v16 = vld [vmem:[#allocation10_spill] sm:$0xff]  ;;  %v9980_v1 = vld [vmem:[#allocation16_spill] sm:$0xff] }
 0x318   :  { %v3179_v38 = vadd.f32 %v4763_v4, %v3079_v56  ;;  %v4666_v4 = vadd.f32 %v9590_v15, %v9584_v8  ;;  %v3089_v34 = vadd.f32 %v4716_v52, %v2989_v57  ;;  %v4822_v8 = vadd.f32 %v9618_v10, %v9614_v53  ;;  %v9973_v56 = vld [vmem:[#allocation9_spill] sm:$0xff]  ;;  %v9982_v57 = vld [vmem:[#allocation6_spill] sm:$0xff] }
 0x319   :  { %v4864_v35 = vpop.f32.mrf.mxu0  ;;  %v4831_v59 = vadd.f32 %v9642_v24, %v9636_v0 }
 0x31a   :  { %v3279_v50 = vadd.f32 %v4816_v29, %v3179_v38  ;;  %v3189_v60 = vadd.f32 %v4769_v22, %v3089_v34  ;;  %v9977_v38 = vld [vmem:[#allocation8_spill] sm:$0xff] }
 0x31b   :  { %v4865_v19 = vpop.f32.mrf.mxu0 }
 0x31c   :  { %v4866_v21 = vadd.f32 %v4865_v19, %v4864_v35  ;;  %v3473_v11 = vpop.f32.mrf.mxu1  ;;  %v4819_v35 = vadd.f32 %v4818_v18, %v4817_v62  ;;  %v2994_v62 = vadd.f32 %v4666_v4, %v2894_v47  ;;  %v9972_v19 = vld [vmem:[#allocation7_spill] sm:$0xff]  ;;  %v2904_v4 = vadd.f32 %v5478_v17, %v9982_v57 }
 0x31d   :  { %v4867_v49 = vpop.f32.mrf.mxu0  ;;  %v4722_v37 = vadd.f32 %v9973_v56, %v9972_v19 }
 0x31e   :  { %v3374_v27 = vadd.f32 %v4866_v21, %v3274_v28  ;;  %v5029_v31 = vpop.f32.mrf.mxu1  ;;  %v3284_v51 = vadd.f32 %v4819_v35, %v3184_v32  ;;  %v3094_v2 = vadd.f32 %v4719_v58, %v2994_v62  ;;  %v3289_v28 = vadd.f32 %v4822_v8, %v3189_v60  ;;  %v9974_v21 = vld [vmem:[#allocation14_spill] sm:$0xff] }
 0x31f   :  { %v4868_v61 = vpop.f32.mrf.mxu0  ;;  %v4825_v55 = vadd.f32 %v9975_v12, %v9974_v21  ;;  %v9979_v31 = vld [vmem:[#allocation13_spill] sm:$0xff]  ;;  %v9991_v21 = vld [vmem:[#allocation36_spill] sm:$0xff] }
 0x320   :  { %v3474_v46 = vadd.f32 %v3473_v11, %v3374_v27  ;;  %v4869_v54 = vadd.f32 %v4868_v61, %v4867_v49  ;;  %v3478_v48 = vpop.f32.mrf.mxu1  ;;  %v2999_v49 = vadd.f32 %v4669_v23, %v2899_v45  ;;  %v4672_v27 = vadd.f32 %v9978_v16, %v9977_v38  ;;  %v9989_v23 = vld [vmem:[#allocation35_spill] sm:$0xff]  ;;  %v9993_v16 = vld [vmem:[#allocation37_spill] sm:$0xff] }
 0x321   :  { %v4870_v14 = vpop.f32.mrf.mxu0  ;;  %v4775_v26 = vadd.f32 %v9980_v1, %v9979_v31  ;;  %v3194_v61 = vadd.f32 %v4772_v5, %v3094_v2 }
 0x322   :  { %v3507_v41 = vmax.f32 %v3474_v46, 0.0  ;;  %v3379_v7 = vadd.f32 %v4869_v54, %v3279_v50  ;;  %v5032_v43 = vpop.f32.mrf.mxu1  ;;  %v9981_v50 = vld [vmem:[#allocation34_spill] sm:$0xff]  ;;  %v3099_v22 = vadd.f32 %v4722_v37, %v2999_v49  ;;  %v3004_v17 = vadd.f32 %v4672_v27, %v2904_v4  ;;  %v9992_v49 = vld [vmem:[#allocation3_spill] sm:$0xff] }
 0x323   :  { %v4871_v15 = vpop.f32.mrf.mxu0  ;;  %v3294_v34 = vadd.f32 %v4825_v55, %v3194_v61  ;;  %v2693_v38 = vmax.f32 %v9992_v49, 0.0  ;;  %v9996_v4 = vld [vmem:[#allocation39_spill] sm:$0xff] }
 0x324   :  { %v3514_v39 = vmax.f32 %v2688_v36, %v3507_v41  ;;  %v3479_v63 = vadd.f32 %v3478_v48, %v3379_v7  ;;  %v4872_v33 = vadd.f32 %v4871_v15, %v4870_v14  ;;  %v3483_v30 = vpop.f32.mrf.mxu1  ;;  %v9983_v14 = vld [vmem:[#allocation11_spill] sm:$0xff]  ;;  %v9984_v36 = vld [vmem:[#allocation12_spill] sm:$0xff]  ;;  %v9985_v41 = vld [vmem:[#allocation17_spill] sm:$0xff] }
 0x325   :  { %v4873_v18 = vpop.f32.mrf.mxu0  ;;  %v4725_v32 = vadd.f32 %v9984_v36, %v9983_v14  ;;  %v9986_v7 = vld [vmem:[#allocation19_spill] sm:$0xff] }
 0x326   :  { %v3521_v44 = vmax.f32 %v8801_v3, %v3514_v39  ;;  %v3508_v10 = vmax.f32 %v3479_v63, 0.0  ;;  %v3384_v53 = vadd.f32 %v4872_v33, %v3284_v51  ;;  %v5035_v13 = vpop.f32.mrf.mxu1  ;;  %v4828_v43 = vadd.f32 %v9986_v7, %v9985_v41  ;;  %v9987_v39 = vld [vmem:[#allocation41_spill] sm:$0xff] }
 0x327   :  { %v4874_v29 = vpop.f32.mrf.mxu0  ;;  %v2691_v63 = vmax.f32 %v9987_v39, 0.0  ;;  %v3199_v33 = vadd.f32 %v4775_v26, %v3099_v22 }
 0x328   :  { %3528 = vst [vmem:[%s9725_s6] sm:$0xff] %v3521_v44  ;;  %v3515_v9 = vmax.f32 %v2689_v40, %v3508_v10  ;;  %v3484_v3 = vadd.f32 %v3483_v30, %v3384_v53  ;;  %v4875_v42 = vadd.f32 %v4874_v29, %v4873_v18  ;;  %v3488_v11 = vpop.f32.mrf.mxu1  ;;  %v9988_v40 = vld [vmem:[#allocation18_spill] sm:$0xff]  ;;  %v3104_v10 = vadd.f32 %v4725_v32, %v3004_v17 }
 0x329   :  { %v4876_v52 = vpop.f32.mrf.mxu0  ;;  %v4778_v62 = vadd.f32 %v9638_v6, %v9988_v40  ;;  %v3299_v53 = vadd.f32 %v4828_v43, %v3199_v33  ;;  %v9990_v6 = vld [vmem:[#allocation2_spill] sm:$0xff] }
 0x32a   :  { %v3522_v35 = vmax.f32 %v9981_v50, %v3515_v9  ;;  %v3509_v46 = vmax.f32 %v3484_v3, 0.0  ;;  %v3389_v54 = vadd.f32 %v4875_v42, %v3289_v28  ;;  %v5038_v48 = vpop.f32.mrf.mxu1  ;;  %v2692_v37 = vmax.f32 %v9990_v6, 0.0  ;;  %v9994_v50 = vld [vmem:[#allocation4_spill] sm:$0xff] }
 0x32b   :  { %v4877_v47 = vpop.f32.mrf.mxu0  ;;  %v3204_v29 = vadd.f32 %v4778_v62, %v3104_v10 }
 0x32c   :  { %3529 = vst [vmem:[%s9725_s6 + $0x8] sm:$0xff] %v3522_v35  ;;  %v3516_v58 = vmax.f32 %v2690_v20, %v3509_v46  ;;  %v3489_v8 = vadd.f32 %v3488_v11, %v3389_v54  ;;  %v4878_v15 = vadd.f32 %v4877_v47, %v4876_v52  ;;  %v3493_v51 = vpop.f32.mrf.mxu1  ;;  %v2694_v35 = vmax.f32 %v9994_v50, 0.0  ;;  %v9995_v46 = vld [vmem:[#allocation38_spill] sm:$0xff] }
 0x32d   :  { %v4879_v30 = vpop.f32.mrf.mxu0  ;;  %v3304_v11 = vadd.f32 %v4831_v59, %v3204_v29 }
 0x32e   :  { %v3523_v60 = vmax.f32 %v9989_v23, %v3516_v58  ;;  %v3510_v18 = vmax.f32 %v3489_v8, 0.0  ;;  %v3394_v5 = vadd.f32 %v4878_v15, %v3294_v34  ;;  %v5041_v44 = vpop.f32.mrf.mxu1 }
 0x32f   :  { %v4880_v13 = vpop.f32.mrf.mxu0 }
 0x330   :  { %3530 = vst [vmem:[%s9725_s6 + $0x10] sm:$0xff] %v3523_v60  ;;  %v3517_v45 = vmax.f32 %v2691_v63, %v3510_v18  ;;  %v3494_v2 = vadd.f32 %v3493_v51, %v3394_v5  ;;  %v4881_v19 = vadd.f32 %v4880_v13, %v4879_v30  ;;  %v3498_v56 = vpop.f32.mrf.mxu1 }
 0x331   :  { %v4882_v28 = vpop.f32.mrf.mxu0 }
 0x332   :  { %v3524_v12 = vmax.f32 %v9991_v21, %v3517_v45  ;;  %v3511_v55 = vmax.f32 %v3494_v2, 0.0  ;;  %v3399_v9 = vadd.f32 %v4881_v19, %v3299_v53  ;;  %v5044_v3 = vpop.f32.mrf.mxu1 }
 0x333   :  { %v4883_v42 = vpop.f32.mrf.mxu0 }
 0x334   :  { %3531 = vst [vmem:[%s9725_s6 + $0x18] sm:$0xff] %v3524_v12  ;;  %v3518_v0 = vmax.f32 %v2692_v37, %v3511_v55  ;;  %v3499_v24 = vadd.f32 %v3498_v56, %v3399_v9  ;;  %v4884_v25 = vadd.f32 %v4883_v42, %v4882_v28  ;;  %v3503_v20 = vpop.f32.mrf.mxu1 }
 0x336   :  { %v3525_v27 = vmax.f32 %v9993_v16, %v3518_v0  ;;  %v3512_v31 = vmax.f32 %v3499_v24, 0.0  ;;  %v3404_v1 = vadd.f32 %v4884_v25, %v3304_v11  ;;  %v5047_v26 = vpop.f32.mrf.mxu1 }
 0x338   :  { %3532 = vst [vmem:[%s9725_s6 + $0x20] sm:$0xff] %v3525_v27  ;;  %v3519_v52 = vmax.f32 %v2693_v38, %v3512_v31  ;;  %v3504_v61 = vadd.f32 %v3503_v20, %v3404_v1 }
 0x33a   :  { %v3526_v54 = vmax.f32 %v9995_v46, %v3519_v52  ;;  %v3513_v48 = vmax.f32 %v3504_v61, 0.0 }
 0x33c   :  { %3533 = vst [vmem:[%s9725_s6 + $0x28] sm:$0xff] %v3526_v54  ;;  %v3520_v57 = vmax.f32 %v2694_v35, %v3513_v48 }
 0x33e   :  { %v3527_v22 = vmax.f32 %v9996_v4, %v3520_v57 }
 0x340   :  { %3534 = vst [vmem:[%s9725_s6 + $0x30] sm:$0x3] %v3527_v22 }

// kernel: net_forward.5
= control target key start
LH: loop header
LB: loop body
LE: loop exit
PB: predicated region body
PF: predicated region fallthrough
CT: control target
= control target key end

     0   :  { %v2308_v27 = vmov 1983009808   ;;  %v452_v29 = vlaneseq  ;;  %s3745_s0 = inlined_call_operand.vmem [shape: f32[2,3200], index: 0, kind: input, shape index: {}]   ;;  %s3746_s1 = inlined_call_operand.vmem [shape: f32[3200,120], index: 1, kind: input, shape index: {}]   ;;  %s3747_s2 = inlined_call_operand.vmem [shape: f32[1,120], index: 2, kind: input, shape index: {}]   ;;  %s3748_s3 = inlined_call_operand.vmem [shape: f32[120,128], index: 3, kind: input, shape index: {}]   ;;  %s3749_s4 = inlined_call_operand.vmem [shape: f32[1,128], index: 4, kind: input, shape index: {}]   ;;  %s3750_s5 = inlined_call_operand.vmem [shape: f32[128,128], index: 5, kind: input, shape index: {}]   ;;  %s3751_s6 = inlined_call_operand.vmem [shape: f32[1,128], index: 6, kind: input, shape index: {}]   ;;  %s3752_s7 = inlined_call_operand.hbm [shape: f32[2,128], index: 7, kind: output, shape index: {}]  }
   0x1   :  { %v65_v0 = vld [vmem:[%s3746_s1 + $0xf8] sm:$0xff]  ;;  %v64_v2 = vld [vmem:[%s3746_s1 + $0xf0] sm:$0xff]  ;;  %v63_v6 = vld [vmem:[%s3746_s1 + $0xe8] sm:$0xff]  ;;  %v450_v28 = vunpack.c.l.s4 %v2308_v27 }
   0x2   :  { %v49_v1 = vld [vmem:[%s3746_s1 + $0x78] sm:$0xff]  ;;  %1703 = vmatprep.subr.mxu0 %v65_v0  ;;  %v48_v4 = vld [vmem:[%s3746_s1 + $0x70] sm:$0xff]  ;;  %v47_v8 = vld [vmem:[%s3746_s1 + $0x68] sm:$0xff]  ;;  %v453_v39 = vshrl.u32 %v452_v29, 7 }
   0x3   :  { %v97_v3 = vld [vmem:[%s3746_s1 + $0x1f8] sm:$0xff]  ;;  %1704 = vmatpush3.msra.mxu0 %v49_v1  ;;  %v96_v7 = vld [vmem:[%s3746_s1 + $0x1f0] sm:$0xff]  ;;  %v95_v10 = vld [vmem:[%s3746_s1 + $0x1e8] sm:$0xff]  ;;  %v451_v38 = vunpack.c.0.s8 %v450_v28 }
   0x4   :  { %v81_v5 = vld [vmem:[%s3746_s1 + $0x178] sm:$0xff]  ;;  %1738 = vmatprep.subr.mxu1 %v97_v3  ;;  %1705 = vmatprep.subr.mxu0 %v64_v2  ;;  %v80_v9 = vld [vmem:[%s3746_s1 + $0x170] sm:$0xff]  ;;  %v62_v11 = vld [vmem:[%s3746_s1 + $0xe0] sm:$0xff] }
   0x5   :  { %1739 = vmatpush3.msra.mxu1 %v81_v5  ;;  %1706 = vmatpush3.msra.mxu0 %v48_v4  ;;  %v79_v12 = vld [vmem:[%s3746_s1 + $0x168] sm:$0xff]  ;;  %v46_v13 = vld [vmem:[%s3746_s1 + $0x60] sm:$0xff]  ;;  %v61_v15 = vld [vmem:[%s3746_s1 + $0xd8] sm:$0xff]  ;;  %v2481_v48 = vsub.s32 %v451_v38, %v453_v39 }
   0x6   :  { %1740 = vmatprep.subr.mxu1 %v96_v7  ;;  %1707 = vmatprep.subr.mxu0 %v63_v6  ;;  %v94_v14 = vld [vmem:[%s3746_s1 + $0x1e0] sm:$0xff]  ;;  %v45_v17 = vld [vmem:[%s3746_s1 + $0x58] sm:$0xff]  ;;  %v60_v19 = vld [vmem:[%s3746_s1 + $0xd0] sm:$0xff] }
   0x7   :  { %1741 = vmatpush3.msra.mxu1 %v80_v9  ;;  %1708 = vmatpush3.msra.mxu0 %v47_v8  ;;  %v78_v16 = vld [vmem:[%s3746_s1 + $0x160] sm:$0xff]  ;;  %v93_v18 = vld [vmem:[%s3746_s1 + $0x1d8] sm:$0xff]  ;;  %v44_v21 = vld [vmem:[%s3746_s1 + $0x50] sm:$0xff] }
   0x8   :  { %1742 = vmatprep.subr.mxu1 %v95_v10  ;;  %1709 = vmatprep.subr.mxu0 %v62_v11  ;;  %v77_v20 = vld [vmem:[%s3746_s1 + $0x158] sm:$0xff]  ;;  %v92_v22 = vld [vmem:[%s3746_s1 + $0x1d0] sm:$0xff]  ;;  %v59_v23 = vld [vmem:[%s3746_s1 + $0xc8] sm:$0xff] }
   0x9   :  { %1743 = vmatpush3.msra.mxu1 %v79_v12  ;;  %1710 = vmatpush3.msra.mxu0 %v46_v13  ;;  %v76_v24 = vld [vmem:[%s3746_s1 + $0x150] sm:$0xff]  ;;  %v43_v25 = vld [vmem:[%s3746_s1 + $0x48] sm:$0xff]  ;;  %v58_v30 = vld [vmem:[%s3746_s1 + $0xc0] sm:$0xff] }
   0xa   :  { %1744 = vmatprep.subr.mxu1 %v94_v14  ;;  %1711 = vmatprep.subr.mxu0 %v61_v15  ;;  %v91_v26 = vld [vmem:[%s3746_s1 + $0x1c8] sm:$0xff]  ;;  %v42_v32 = vld [vmem:[%s3746_s1 + $0x40] sm:$0xff]  ;;  %v57_v34 = vld [vmem:[%s3746_s1 + $0xb8] sm:$0xff] }
   0xb   :  { %1745 = vmatpush3.msra.mxu1 %v78_v16  ;;  %1712 = vmatpush3.msra.mxu0 %v45_v17  ;;  %v75_v31 = vld [vmem:[%s3746_s1 + $0x148] sm:$0xff]  ;;  %v90_v33 = vld [vmem:[%s3746_s1 + $0x1c0] sm:$0xff]  ;;  %v41_v36 = vld [vmem:[%s3746_s1 + $0x38] sm:$0xff] }
   0xc   :  { %1746 = vmatprep.subr.mxu1 %v93_v18  ;;  %1713 = vmatprep.subr.mxu0 %v60_v19  ;;  %v74_v35 = vld [vmem:[%s3746_s1 + $0x140] sm:$0xff]  ;;  %v89_v37 = vld [vmem:[%s3746_s1 + $0x1b8] sm:$0xff]  ;;  %v56_v40 = vld [vmem:[%s3746_s1 + $0xb0] sm:$0xff] }
   0xd   :  { %1747 = vmatpush3.msra.mxu1 %v77_v20  ;;  %1714 = vmatpush3.msra.mxu0 %v44_v21  ;;  %v73_v41 = vld [vmem:[%s3746_s1 + $0x138] sm:$0xff]  ;;  %v40_v42 = vld [vmem:[%s3746_s1 + $0x30] sm:$0xff]  ;;  %v55_v44 = vld [vmem:[%s3746_s1 + $0xa8] sm:$0xff] }
   0xe   :  { %1748 = vmatprep.subr.mxu1 %v92_v22  ;;  %1715 = vmatprep.subr.mxu0 %v59_v23  ;;  %v88_v43 = vld [vmem:[%s3746_s1 + $0x1b0] sm:$0xff]  ;;  %v39_v46 = vld [vmem:[%s3746_s1 + $0x28] sm:$0xff]  ;;  %v54_v49 = vld [vmem:[%s3746_s1 + $0xa0] sm:$0xff] }
   0xf   :  { %1749 = vmatpush3.msra.mxu1 %v76_v24  ;;  %1716 = vmatpush3.msra.mxu0 %v43_v25  ;;  %v72_v45 = vld [vmem:[%s3746_s1 + $0x130] sm:$0xff]  ;;  %v87_v47 = vld [vmem:[%s3746_s1 + $0x1a8] sm:$0xff]  ;;  %v27_v51 = vld [vmem:[%s3745_s0] sm:$0xff] }
  0x10   :  { %1750 = vmatprep.subr.mxu1 %v91_v26  ;;  %1717 = vmatprep.subr.mxu0 %v58_v30  ;;  %v71_v50 = vld [vmem:[%s3746_s1 + $0x128] sm:$0xff]  ;;  %v38_v52 = vld [vmem:[%s3746_s1 + $0x20] sm:$0xff]  ;;  %v53_v54 = vld [vmem:[%s3746_s1 + $0x98] sm:$0xff]  ;;  %v455_v58 = vrot.slane %v27_v51, %v2481_v48  ;;  %v448_v59 = vcombine.high %v27_v51, %v27_v51 }
  0x11   :  { %1751 = vmatpush3.msra.mxu1 %v75_v31  ;;  %1718 = vmatpush3.msra.mxu0 %v42_v32  ;;  %v86_v53 = vld [vmem:[%s3746_s1 + $0x1a0] sm:$0xff]  ;;  %v37_v56 = vld [vmem:[%s3746_s1 + $0x18] sm:$0xff]  ;;  %v52_v60 = vld [vmem:[%s3746_s1 + $0x90] sm:$0xff] }
  0x12   :  { %1752 = vmatprep.subr.mxu1 %v90_v33  ;;  %1719 = vmatprep.subr.mxu0 %v57_v34  ;;  %v70_v55 = vld [vmem:[%s3746_s1 + $0x120] sm:$0xff]  ;;  %v85_v57 = vld [vmem:[%s3746_s1 + $0x198] sm:$0xff]  ;;  %v36_v62 = vld [vmem:[%s3746_s1 + $0x10] sm:$0xff]  ;;  %v463_v4 = vcombine.high %v455_v58, %v455_v58  ;;  %v462_v5 = vrot.slane %v448_v59, %v2481_v48 }
  0x13   :  { %1753 = vmatpush3.msra.mxu1 %v74_v35  ;;  %1720 = vmatpush3.msra.mxu0 %v41_v36  ;;  %v69_v61 = vld [vmem:[%s3746_s1 + $0x118] sm:$0xff]  ;;  %v84_v63 = vld [vmem:[%s3746_s1 + $0x190] sm:$0xff]  ;;  %v51_v0 = vld [vmem:[%s3746_s1 + $0x88] sm:$0xff] }
  0x14   :  { %1754 = vmatprep.subr.mxu1 %v89_v37  ;;  %1721 = vmatprep.subr.mxu0 %v56_v40  ;;  %v68_v1 = vld [vmem:[%s3746_s1 + $0x110] sm:$0xff]  ;;  %v35_v2 = vld [vmem:[%s3746_s1 + $0x8] sm:$0xff]  ;;  %v50_v6 = vld [vmem:[%s3746_s1 + $0x80] sm:$0xff]  ;;  %v464_v12 = vcombine.high %v462_v5, %v462_v5 }
  0x15   :  { %1755 = vmatpush3.msra.mxu1 %v73_v41  ;;  %1722 = vmatpush3.msra.mxu0 %v40_v42  ;;  %v83_v3 = vld [vmem:[%s3746_s1 + $0x188] sm:$0xff]  ;;  %v34_v7 = vld [vmem:[%s3746_s1] sm:$0xff]  ;;  %v129_v10 = vld [vmem:[%s3746_s1 + $0x2f8] sm:$0xff] }
  0x16   :  { %1756 = vmatprep.subr.mxu1 %v88_v43  ;;  %1723 = vmatprep.subr.mxu0 %v55_v44  ;;  %v67_v8 = vld [vmem:[%s3746_s1 + $0x108] sm:$0xff]  ;;  %v82_v9 = vld [vmem:[%s3746_s1 + $0x180] sm:$0xff]  ;;  %v113_v13 = vld [vmem:[%s3746_s1 + $0x278] sm:$0xff] }
  0x17   :  { %1757 = vmatpush3.msra.mxu1 %v72_v45  ;;  %1724 = vmatpush3.msra.mxu0 %v39_v46  ;;  %v66_v11 = vld [vmem:[%s3746_s1 + $0x100] sm:$0xff]  ;;  %v128_v14 = vld [vmem:[%s3746_s1 + $0x2f0] sm:$0xff]  ;;  %v161_v15 = vld [vmem:[%s3746_s1 + $0x3f8] sm:$0xff] }
  0x18   :  { %1758 = vmatprep.subr.mxu1 %v87_v47  ;;  %1725 = vmatprep.subr.mxu0 %v54_v49  ;;  %v112_v16 = vld [vmem:[%s3746_s1 + $0x270] sm:$0xff]  ;;  %v145_v17 = vld [vmem:[%s3746_s1 + $0x378] sm:$0xff]  ;;  %v127_v18 = vld [vmem:[%s3746_s1 + $0x2e8] sm:$0xff] }
  0x19   :  { %1759 = vmatpush3.msra.mxu1 %v71_v50  ;;  %1726 = vmatpush3.msra.mxu0 %v38_v52  ;;  %v160_v19 = vld [vmem:[%s3746_s1 + $0x3f0] sm:$0xff]  ;;  %v111_v20 = vld [vmem:[%s3746_s1 + $0x268] sm:$0xff]  ;;  %v126_v22 = vld [vmem:[%s3746_s1 + $0x2e0] sm:$0xff] }
  0x1a   :  { %1760 = vmatprep.subr.mxu1 %v86_v53  ;;  %1727 = vmatprep.subr.mxu0 %v53_v54  ;;  %v144_v21 = vld [vmem:[%s3746_s1 + $0x370] sm:$0xff]  ;;  %v159_v23 = vld [vmem:[%s3746_s1 + $0x3e8] sm:$0xff]  ;;  %v110_v24 = vld [vmem:[%s3746_s1 + $0x260] sm:$0xff] }
  0x1b   :  { %1761 = vmatpush3.msra.mxu1 %v70_v55  ;;  %1728 = vmatpush3.msra.mxu0 %v37_v56  ;;  %v143_v25 = vld [vmem:[%s3746_s1 + $0x368] sm:$0xff]  ;;  %v125_v26 = vld [vmem:[%s3746_s1 + $0x2d8] sm:$0xff]  ;;  %v158_v27 = vld [vmem:[%s3746_s1 + $0x3e0] sm:$0xff] }
  0x1c   :  { %1762 = vmatprep.subr.mxu1 %v85_v57  ;;  %1729 = vmatprep.subr.mxu0 %v52_v60  ;;  %v109_v28 = vld [vmem:[%s3746_s1 + $0x258] sm:$0xff]  ;;  %v142_v29 = vld [vmem:[%s3746_s1 + $0x360] sm:$0xff]  ;;  %v124_v30 = vld [vmem:[%s3746_s1 + $0x2d0] sm:$0xff] }
  0x1d   :  { %1763 = vmatpush3.msra.mxu1 %v69_v61  ;;  %1730 = vmatpush3.msra.mxu0 %v36_v62  ;;  %v157_v31 = vld [vmem:[%s3746_s1 + $0x3d8] sm:$0xff]  ;;  %v108_v32 = vld [vmem:[%s3746_s1 + $0x250] sm:$0xff]  ;;  %v123_v34 = vld [vmem:[%s3746_s1 + $0x2c8] sm:$0xff] }
  0x1e   :  { %1764 = vmatprep.subr.mxu1 %v84_v63  ;;  %1731 = vmatprep.subr.mxu0 %v51_v0  ;;  %v141_v33 = vld [vmem:[%s3746_s1 + $0x358] sm:$0xff]  ;;  %v156_v35 = vld [vmem:[%s3746_s1 + $0x3d0] sm:$0xff]  ;;  %v107_v36 = vld [vmem:[%s3746_s1 + $0x248] sm:$0xff] }
  0x1f   :  { %1765 = vmatpush3.msra.mxu1 %v68_v1  ;;  %1732 = vmatpush3.msra.mxu0 %v35_v2  ;;  %v140_v37 = vld [vmem:[%s3746_s1 + $0x350] sm:$0xff]  ;;  %v122_v38 = vld [vmem:[%s3746_s1 + $0x2c0] sm:$0xff]  ;;  %v155_v39 = vld [vmem:[%s3746_s1 + $0x3c8] sm:$0xff] }
  0x20   :  { %1766 = vmatprep.subr.mxu1 %v83_v3  ;;  %1733 = vmatprep.subr.mxu0 %v50_v6  ;;  %v106_v40 = vld [vmem:[%s3746_s1 + $0x240] sm:$0xff]  ;;  %v139_v41 = vld [vmem:[%s3746_s1 + $0x348] sm:$0xff]  ;;  %v121_v42 = vld [vmem:[%s3746_s1 + $0x2b8] sm:$0xff] }
  0x21   :  { %646 = vmatprep.mubr.f32.mxu0 %v463_v4  ;;  %1734 = vmatpush3.msra.mxu0 %v34_v7  ;;  %v154_v43 = vld [vmem:[%s3746_s1 + $0x3c0] sm:$0xff]  ;;  %v105_v44 = vld [vmem:[%s3746_s1 + $0x238] sm:$0xff]  ;;  %v120_v46 = vld [vmem:[%s3746_s1 + $0x2b0] sm:$0xff] }
  0x22   :  { %1767 = vmatpush3.msra.mxu1 %v67_v8  ;;  %647 = vmatmul.mubr.f32.vlgmr.msra.gmra.mxu0 %v455_v58  ;;  %v138_v45 = vld [vmem:[%s3746_s1 + $0x340] sm:$0xff]  ;;  %v153_v47 = vld [vmem:[%s3746_s1 + $0x3b8] sm:$0xff]  ;;  %v104_v49 = vld [vmem:[%s3746_s1 + $0x230] sm:$0xff] }
  0x23   :  { %1768 = vmatprep.subr.mxu1 %v82_v9  ;;  %1773 = vmatprep.subr.mxu0 %v129_v10  ;;  %v137_v50 = vld [vmem:[%s3746_s1 + $0x338] sm:$0xff]  ;;  %v119_v51 = vld [vmem:[%s3746_s1 + $0x2a8] sm:$0xff]  ;;  %v152_v52 = vld [vmem:[%s3746_s1 + $0x3b0] sm:$0xff] }
  0x24   :  { %1769 = vmatpush3.msra.mxu1 %v66_v11  ;;  %716 = vmatprep.mubr.f32.mxu1 %v464_v12  ;;  %v103_v53 = vld [vmem:[%s3746_s1 + $0x228] sm:$0xff]  ;;  %v136_v54 = vld [vmem:[%s3746_s1 + $0x330] sm:$0xff]  ;;  %v118_v55 = vld [vmem:[%s3746_s1 + $0x2a0] sm:$0xff] }
  0x25   :  { %1774 = vmatpush3.msra.mxu0 %v113_v13  ;;  %717 = vmatmul.mubr.f32.vlgmr.msra.gmra.mxu1 %v462_v5  ;;  %v151_v56 = vld [vmem:[%s3746_s1 + $0x3a8] sm:$0xff]  ;;  %v102_v57 = vld [vmem:[%s3746_s1 + $0x220] sm:$0xff]  ;;  %v117_v60 = vld [vmem:[%s3746_s1 + $0x298] sm:$0xff] }
  0x26   :  { %1775 = vmatprep.subr.mxu0 %v128_v14  ;;  %1808 = vmatprep.subr.mxu1 %v161_v15  ;;  %v28_v58 = vld [vmem:[%s3745_s0 + $0x8] sm:$0xff]  ;;  %v150_v61 = vld [vmem:[%s3746_s1 + $0x3a0] sm:$0xff]  ;;  %v101_v62 = vld [vmem:[%s3746_s1 + $0x218] sm:$0xff] }
  0x27   :  { %1776 = vmatpush3.msra.mxu0 %v112_v16  ;;  %1809 = vmatpush3.msra.mxu1 %v145_v17  ;;  %v135_v59 = vld [vmem:[%s3746_s1 + $0x328] sm:$0xff]  ;;  %v134_v63 = vld [vmem:[%s3746_s1 + $0x320] sm:$0xff]  ;;  %v116_v0 = vld [vmem:[%s3746_s1 + $0x290] sm:$0xff]  ;;  %v465_v1 = vcombine.high %v28_v58, %v28_v58  ;;  %v472_v4 = vrot.slane %v28_v58, %v2481_v48 }
  0x28   :  { %1777 = vmatprep.subr.mxu0 %v127_v18  ;;  %1810 = vmatprep.subr.mxu1 %v160_v19  ;;  %v149_v2 = vld [vmem:[%s3746_s1 + $0x398] sm:$0xff]  ;;  %v100_v3 = vld [vmem:[%s3746_s1 + $0x210] sm:$0xff]  ;;  %v115_v6 = vld [vmem:[%s3746_s1 + $0x288] sm:$0xff] }
  0x29   :  { %1778 = vmatpush3.msra.mxu0 %v111_v20  ;;  %1811 = vmatpush3.msra.mxu1 %v144_v21  ;;  %v133_v5 = vld [vmem:[%s3746_s1 + $0x318] sm:$0xff]  ;;  %v148_v7 = vld [vmem:[%s3746_s1 + $0x390] sm:$0xff]  ;;  %v99_v8 = vld [vmem:[%s3746_s1 + $0x208] sm:$0xff]  ;;  %v479_v11 = vrot.slane %v465_v1, %v2481_v48  ;;  %v480_v14 = vcombine.high %v472_v4, %v472_v4 }
  0x2a   :  { %1779 = vmatprep.subr.mxu0 %v126_v22  ;;  %1812 = vmatprep.subr.mxu1 %v159_v23  ;;  %v132_v9 = vld [vmem:[%s3746_s1 + $0x310] sm:$0xff]  ;;  %v114_v10 = vld [vmem:[%s3746_s1 + $0x280] sm:$0xff]  ;;  %v147_v12 = vld [vmem:[%s3746_s1 + $0x388] sm:$0xff] }
  0x2b   :  { %1780 = vmatpush3.msra.mxu0 %v110_v24  ;;  %1813 = vmatpush3.msra.mxu1 %v143_v25  ;;  %v98_v13 = vld [vmem:[%s3746_s1 + $0x200] sm:$0xff]  ;;  %v131_v15 = vld [vmem:[%s3746_s1 + $0x308] sm:$0xff]  ;;  %v193_v17 = vld [vmem:[%s3746_s1 + $0x4f8] sm:$0xff]  ;;  %v481_v19 = vcombine.high %v479_v11, %v479_v11 }
  0x2c   :  { %1781 = vmatprep.subr.mxu0 %v125_v26  ;;  %1814 = vmatprep.subr.mxu1 %v158_v27  ;;  %v146_v16 = vld [vmem:[%s3746_s1 + $0x380] sm:$0xff]  ;;  %v177_v20 = vld [vmem:[%s3746_s1 + $0x478] sm:$0xff]  ;;  %v192_v21 = vld [vmem:[%s3746_s1 + $0x4f0] sm:$0xff] }
  0x2d   :  { %1782 = vmatpush3.msra.mxu0 %v109_v28  ;;  %1815 = vmatpush3.msra.mxu1 %v142_v29  ;;  %v130_v18 = vld [vmem:[%s3746_s1 + $0x300] sm:$0xff]  ;;  %v225_v22 = vld [vmem:[%s3746_s1 + $0x5f8] sm:$0xff]  ;;  %v176_v23 = vld [vmem:[%s3746_s1 + $0x470] sm:$0xff] }
  0x2e   :  { %1783 = vmatprep.subr.mxu0 %v124_v30  ;;  %1816 = vmatprep.subr.mxu1 %v157_v31  ;;  %v209_v24 = vld [vmem:[%s3746_s1 + $0x578] sm:$0xff]  ;;  %v191_v25 = vld [vmem:[%s3746_s1 + $0x4e8] sm:$0xff]  ;;  %v224_v26 = vld [vmem:[%s3746_s1 + $0x5f0] sm:$0xff] }
  0x2f   :  { %1784 = vmatpush3.msra.mxu0 %v108_v32  ;;  %1817 = vmatpush3.msra.mxu1 %v141_v33  ;;  %v175_v27 = vld [vmem:[%s3746_s1 + $0x468] sm:$0xff]  ;;  %v208_v28 = vld [vmem:[%s3746_s1 + $0x570] sm:$0xff]  ;;  %v190_v29 = vld [vmem:[%s3746_s1 + $0x4e0] sm:$0xff] }
  0x30   :  { %1785 = vmatprep.subr.mxu0 %v123_v34  ;;  %1818 = vmatprep.subr.mxu1 %v156_v35  ;;  %v223_v30 = vld [vmem:[%s3746_s1 + $0x5e8] sm:$0xff]  ;;  %v174_v31 = vld [vmem:[%s3746_s1 + $0x460] sm:$0xff]  ;;  %v189_v33 = vld [vmem:[%s3746_s1 + $0x4d8] sm:$0xff] }
  0x31   :  { %1786 = vmatpush3.msra.mxu0 %v107_v36  ;;  %1819 = vmatpush3.msra.mxu1 %v140_v37  ;;  %v207_v32 = vld [vmem:[%s3746_s1 + $0x568] sm:$0xff]  ;;  %v222_v34 = vld [vmem:[%s3746_s1 + $0x5e0] sm:$0xff]  ;;  %v173_v35 = vld [vmem:[%s3746_s1 + $0x458] sm:$0xff] }
  0x32   :  { %1787 = vmatprep.subr.mxu0 %v122_v38  ;;  %1820 = vmatprep.subr.mxu1 %v155_v39  ;;  %v206_v36 = vld [vmem:[%s3746_s1 + $0x560] sm:$0xff]  ;;  %v188_v37 = vld [vmem:[%s3746_s1 + $0x4d0] sm:$0xff]  ;;  %v221_v38 = vld [vmem:[%s3746_s1 + $0x5d8] sm:$0xff] }
  0x33   :  { %1788 = vmatpush3.msra.mxu0 %v106_v40  ;;  %1821 = vmatpush3.msra.mxu1 %v139_v41  ;;  %v172_v39 = vld [vmem:[%s3746_s1 + $0x450] sm:$0xff]  ;;  %v205_v40 = vld [vmem:[%s3746_s1 + $0x558] sm:$0xff]  ;;  %v187_v41 = vld [vmem:[%s3746_s1 + $0x4c8] sm:$0xff] }
  0x34   :  { %1789 = vmatprep.subr.mxu0 %v121_v42  ;;  %1822 = vmatprep.subr.mxu1 %v154_v43  ;;  %v220_v42 = vld [vmem:[%s3746_s1 + $0x5d0] sm:$0xff]  ;;  %v171_v43 = vld [vmem:[%s3746_s1 + $0x448] sm:$0xff] }
  0x35   :  { %1790 = vmatpush3.msra.mxu0 %v105_v44  ;;  %1823 = vmatpush3.msra.mxu1 %v138_v45  ;;  %v204_v44 = vld [vmem:[%s3746_s1 + $0x550] sm:$0xff]  ;;  %v186_v45 = vld [vmem:[%s3746_s1 + $0x4c0] sm:$0xff]  ;;  %v183_v58 = vld [vmem:[%s3746_s1 + $0x4a8] sm:$0xff] }
  0x36   :  { %1791 = vmatprep.subr.mxu0 %v120_v46  ;;  %1824 = vmatprep.subr.mxu1 %v153_v47  ;;  %v219_v46 = vld [vmem:[%s3746_s1 + $0x5c8] sm:$0xff]  ;;  %v170_v47 = vld [vmem:[%s3746_s1 + $0x440] sm:$0xff]  ;;  %v29_v1 = vld [vmem:[%s3745_s0 + $0x10] sm:$0xff] }
  0x37   :  { %1792 = vmatpush3.msra.mxu0 %v104_v49  ;;  %1825 = vmatpush3.msra.mxu1 %v137_v50  ;;  %v203_v49 = vld [vmem:[%s3746_s1 + $0x548] sm:$0xff]  ;;  %v185_v50 = vld [vmem:[%s3746_s1 + $0x4b8] sm:$0xff] }
  0x38   :  { %1793 = vmatprep.subr.mxu0 %v119_v51  ;;  %1826 = vmatprep.subr.mxu1 %v152_v52  ;;  %v218_v51 = vld [vmem:[%s3746_s1 + $0x5c0] sm:$0xff]  ;;  %v169_v52 = vld [vmem:[%s3746_s1 + $0x438] sm:$0xff] }
  0x39   :  { %1794 = vmatpush3.msra.mxu0 %v103_v53  ;;  %1827 = vmatpush3.msra.mxu1 %v136_v54  ;;  %v202_v53 = vld [vmem:[%s3746_s1 + $0x540] sm:$0xff]  ;;  %v184_v54 = vld [vmem:[%s3746_s1 + $0x4b0] sm:$0xff] }
  0x3a   :  { %1795 = vmatprep.subr.mxu0 %v118_v55  ;;  %1828 = vmatprep.subr.mxu1 %v151_v56  ;;  %v217_v55 = vld [vmem:[%s3746_s1 + $0x5b8] sm:$0xff]  ;;  %v168_v56 = vld [vmem:[%s3746_s1 + $0x430] sm:$0xff] }
  0x3b   :  { %1796 = vmatpush3.msra.mxu0 %v102_v57  ;;  %1829 = vmatpush3.msra.mxu1 %v135_v59  ;;  %v201_v57 = vld [vmem:[%s3746_s1 + $0x538] sm:$0xff]  ;;  %v216_v59 = vld [vmem:[%s3746_s1 + $0x5b0] sm:$0xff] }
  0x3c   :  { %1797 = vmatprep.subr.mxu0 %v117_v60  ;;  %1830 = vmatprep.subr.mxu1 %v150_v61  ;;  %v167_v60 = vld [vmem:[%s3746_s1 + $0x428] sm:$0xff]  ;;  %v200_v61 = vld [vmem:[%s3746_s1 + $0x530] sm:$0xff] }
  0x3d   :  { %1798 = vmatpush3.msra.mxu0 %v101_v62  ;;  %1831 = vmatpush3.msra.mxu1 %v134_v63  ;;  %v182_v62 = vld [vmem:[%s3746_s1 + $0x4a0] sm:$0xff]  ;;  %v215_v63 = vld [vmem:[%s3746_s1 + $0x5a8] sm:$0xff] }
  0x3e   :  { %1799 = vmatprep.subr.mxu0 %v116_v0  ;;  %1832 = vmatprep.subr.mxu1 %v149_v2  ;;  %v166_v0 = vld [vmem:[%s3746_s1 + $0x420] sm:$0xff]  ;;  %v199_v2 = vld [vmem:[%s3746_s1 + $0x528] sm:$0xff] }
  0x3f   :  { %1800 = vmatpush3.msra.mxu0 %v100_v3  ;;  %1833 = vmatpush3.msra.mxu1 %v133_v5  ;;  %v181_v3 = vld [vmem:[%s3746_s1 + $0x498] sm:$0xff] }
  0x40   :  { %1801 = vmatprep.subr.mxu0 %v115_v6  ;;  %1834 = vmatprep.subr.mxu1 %v148_v7  ;;  %v165_v5 = vld [vmem:[%s3746_s1 + $0x418] sm:$0xff]  ;;  %v198_v6 = vld [vmem:[%s3746_s1 + $0x520] sm:$0xff]  ;;  %v180_v7 = vld [vmem:[%s3746_s1 + $0x490] sm:$0xff] }
  0x41   :  { %1802 = vmatpush3.msra.mxu0 %v99_v8  ;;  %1835 = vmatpush3.msra.mxu1 %v132_v9  ;;  %v482_v8 = vcombine.high %v29_v1, %v29_v1  ;;  %v213_v9 = vld [vmem:[%s3746_s1 + $0x598] sm:$0xff] }
  0x42   :  { %1803 = vmatprep.subr.mxu0 %v114_v10  ;;  %1836 = vmatprep.subr.mxu1 %v147_v12  ;;  %v164_v10 = vld [vmem:[%s3746_s1 + $0x410] sm:$0xff]  ;;  %v197_v12 = vld [vmem:[%s3746_s1 + $0x518] sm:$0xff] }
  0x43   :  { %1804 = vmatpush3.msra.mxu0 %v98_v13  ;;  %786 = vmatprep.mubr.f32.mxu0 %v480_v14  ;;  %v179_v13 = vld [vmem:[%s3746_s1 + $0x488] sm:$0xff]  ;;  %v212_v14 = vld [vmem:[%s3746_s1 + $0x590] sm:$0xff] }
  0x44   :  { %1837 = vmatpush3.msra.mxu1 %v131_v15  ;;  %787 = vmatmul.mubr.f32.vlgmr.msra.gmra.mxu0 %v472_v4  ;;  %v214_v4 = vld [vmem:[%s3746_s1 + $0x5a0] sm:$0xff]  ;;  %v163_v15 = vld [vmem:[%s3746_s1 + $0x408] sm:$0xff] }
  0x45   :  { %1838 = vmatprep.subr.mxu1 %v146_v16  ;;  %1843 = vmatprep.subr.mxu0 %v193_v17  ;;  %v196_v16 = vld [vmem:[%s3746_s1 + $0x510] sm:$0xff]  ;;  %v178_v17 = vld [vmem:[%s3746_s1 + $0x480] sm:$0xff] }
  0x46   :  { %1839 = vmatpush3.msra.mxu1 %v130_v18  ;;  %856 = vmatprep.mubr.f32.mxu1 %v481_v19  ;;  %v496_v18 = vrot.slane %v482_v8, %v2481_v48  ;;  %v211_v19 = vld [vmem:[%s3746_s1 + $0x588] sm:$0xff]  ;;  %v30_v8 = vld [vmem:[%s3745_s0 + $0x18] sm:$0xff] }
  0x47   :  { %1844 = vmatpush3.msra.mxu0 %v177_v20  ;;  %857 = vmatmul.mubr.f32.vlgmr.msra.gmra.mxu1 %v479_v11  ;;  %v489_v11 = vrot.slane %v29_v1, %v2481_v48  ;;  %v162_v20 = vld [vmem:[%s3746_s1 + $0x400] sm:$0xff]  ;;  %v247_v1 = vld [vmem:[%s3746_s1 + $0x6a8] sm:$0xff] }
  0x48   :  { %1845 = vmatprep.subr.mxu0 %v192_v21  ;;  %1878 = vmatprep.subr.mxu1 %v225_v22  ;;  %v195_v22 = vld [vmem:[%s3746_s1 + $0x508] sm:$0xff] }
  0x49   :  { %1846 = vmatpush3.msra.mxu0 %v176_v23  ;;  %1879 = vmatpush3.msra.mxu1 %v209_v24  ;;  %v497_v21 = vcombine.high %v489_v11, %v489_v11  ;;  %v210_v23 = vld [vmem:[%s3746_s1 + $0x580] sm:$0xff]  ;;  %v257_v24 = vld [vmem:[%s3746_s1 + $0x6f8] sm:$0xff] }
  0x4a   :  { %1847 = vmatprep.subr.mxu0 %v191_v25  ;;  %1880 = vmatprep.subr.mxu1 %v224_v26  ;;  %v194_v25 = vld [vmem:[%s3746_s1 + $0x500] sm:$0xff]  ;;  %v498_v26 = vcombine.high %v496_v18, %v496_v18 }
  0x4b   :  { %1848 = vmatpush3.msra.mxu0 %v175_v27  ;;  %1881 = vmatpush3.msra.mxu1 %v208_v28  ;;  %v241_v27 = vld [vmem:[%s3746_s1 + $0x678] sm:$0xff]  ;;  %v256_v28 = vld [vmem:[%s3746_s1 + $0x6f0] sm:$0xff] }
  0x4c   :  { %1849 = vmatprep.subr.mxu0 %v190_v29  ;;  %1882 = vmatprep.subr.mxu1 %v223_v30  ;;  %v289_v29 = vld [vmem:[%s3746_s1 + $0x7f8] sm:$0xff]  ;;  %v240_v30 = vld [vmem:[%s3746_s1 + $0x670] sm:$0xff] }
  0x4d   :  { %1850 = vmatpush3.msra.mxu0 %v174_v31  ;;  %1883 = vmatpush3.msra.mxu1 %v207_v32  ;;  %v273_v31 = vld [vmem:[%s3746_s1 + $0x778] sm:$0xff]  ;;  %v255_v32 = vld [vmem:[%s3746_s1 + $0x6e8] sm:$0xff] }
  0x4e   :  { %1851 = vmatprep.subr.mxu0 %v189_v33  ;;  %1884 = vmatprep.subr.mxu1 %v222_v34  ;;  %v288_v33 = vld [vmem:[%s3746_s1 + $0x7f0] sm:$0xff]  ;;  %v239_v34 = vld [vmem:[%s3746_s1 + $0x668] sm:$0xff] }
  0x4f   :  { %1852 = vmatpush3.msra.mxu0 %v173_v35  ;;  %1885 = vmatpush3.msra.mxu1 %v206_v36  ;;  %v272_v35 = vld [vmem:[%s3746_s1 + $0x770] sm:$0xff]  ;;  %v254_v36 = vld [vmem:[%s3746_s1 + $0x6e0] sm:$0xff] }
  0x50   :  { %1853 = vmatprep.subr.mxu0 %v188_v37  ;;  %1886 = vmatprep.subr.mxu1 %v221_v38  ;;  %v287_v37 = vld [vmem:[%s3746_s1 + $0x7e8] sm:$0xff]  ;;  %v238_v38 = vld [vmem:[%s3746_s1 + $0x660] sm:$0xff] }
  0x51   :  { %1854 = vmatpush3.msra.mxu0 %v172_v39  ;;  %1887 = vmatpush3.msra.mxu1 %v205_v40  ;;  %v271_v39 = vld [vmem:[%s3746_s1 + $0x768] sm:$0xff]  ;;  %v253_v40 = vld [vmem:[%s3746_s1 + $0x6d8] sm:$0xff] }
  0x52   :  { %1855 = vmatprep.subr.mxu0 %v187_v41  ;;  %1888 = vmatprep.subr.mxu1 %v220_v42  ;;  %v286_v41 = vld [vmem:[%s3746_s1 + $0x7e0] sm:$0xff]  ;;  %v237_v42 = vld [vmem:[%s3746_s1 + $0x658] sm:$0xff] }
  0x53   :  { %1856 = vmatpush3.msra.mxu0 %v171_v43  ;;  %1889 = vmatpush3.msra.mxu1 %v204_v44  ;;  %v270_v43 = vld [vmem:[%s3746_s1 + $0x760] sm:$0xff]  ;;  %v252_v44 = vld [vmem:[%s3746_s1 + $0x6d0] sm:$0xff] }
  0x54   :  { %1857 = vmatprep.subr.mxu0 %v186_v45  ;;  %1890 = vmatprep.subr.mxu1 %v219_v46  ;;  %v285_v45 = vld [vmem:[%s3746_s1 + $0x7d8] sm:$0xff]  ;;  %v236_v46 = vld [vmem:[%s3746_s1 + $0x650] sm:$0xff] }
  0x55   :  { %1858 = vmatpush3.msra.mxu0 %v170_v47  ;;  %1891 = vmatpush3.msra.mxu1 %v203_v49  ;;  %v269_v47 = vld [vmem:[%s3746_s1 + $0x758] sm:$0xff]  ;;  %v251_v49 = vld [vmem:[%s3746_s1 + $0x6c8] sm:$0xff] }
  0x56   :  { %1859 = vmatprep.subr.mxu0 %v185_v50  ;;  %1892 = vmatprep.subr.mxu1 %v218_v51  ;;  %v284_v50 = vld [vmem:[%s3746_s1 + $0x7d0] sm:$0xff]  ;;  %v235_v51 = vld [vmem:[%s3746_s1 + $0x648] sm:$0xff] }
  0x57   :  { %1860 = vmatpush3.msra.mxu0 %v169_v52  ;;  %1893 = vmatpush3.msra.mxu1 %v202_v53  ;;  %v268_v52 = vld [vmem:[%s3746_s1 + $0x750] sm:$0xff]  ;;  %v250_v53 = vld [vmem:[%s3746_s1 + $0x6c0] sm:$0xff] }
  0x58   :  { %1861 = vmatprep.subr.mxu0 %v184_v54  ;;  %1894 = vmatprep.subr.mxu1 %v217_v55  ;;  %v283_v54 = vld [vmem:[%s3746_s1 + $0x7c8] sm:$0xff]  ;;  %v234_v55 = vld [vmem:[%s3746_s1 + $0x640] sm:$0xff] }
  0x59   :  { %1862 = vmatpush3.msra.mxu0 %v168_v56  ;;  %1895 = vmatpush3.msra.mxu1 %v201_v57  ;;  %v267_v56 = vld [vmem:[%s3746_s1 + $0x748] sm:$0xff]  ;;  %v249_v57 = vld [vmem:[%s3746_s1 + $0x6b8] sm:$0xff] }
  0x5a   :  { %1863 = vmatprep.subr.mxu0 %v183_v58  ;;  %1896 = vmatprep.subr.mxu1 %v216_v59  ;;  %v282_v58 = vld [vmem:[%s3746_s1 + $0x7c0] sm:$0xff]  ;;  %v233_v59 = vld [vmem:[%s3746_s1 + $0x638] sm:$0xff] }
  0x5b   :  { %1864 = vmatpush3.msra.mxu0 %v167_v60  ;;  %1897 = vmatpush3.msra.mxu1 %v200_v61  ;;  %v266_v60 = vld [vmem:[%s3746_s1 + $0x740] sm:$0xff]  ;;  %v248_v61 = vld [vmem:[%s3746_s1 + $0x6b0] sm:$0xff] }
  0x5c   :  { %1865 = vmatprep.subr.mxu0 %v182_v62  ;;  %1898 = vmatprep.subr.mxu1 %v215_v63  ;;  %v281_v62 = vld [vmem:[%s3746_s1 + $0x7b8] sm:$0xff]  ;;  %v232_v63 = vld [vmem:[%s3746_s1 + $0x630] sm:$0xff] }
  0x5d   :  { %1866 = vmatpush3.msra.mxu0 %v166_v0  ;;  %1899 = vmatpush3.msra.mxu1 %v199_v2  ;;  %v265_v0 = vld [vmem:[%s3746_s1 + $0x738] sm:$0xff]  ;;  %v280_v2 = vld [vmem:[%s3746_s1 + $0x7b0] sm:$0xff] }
  0x5e   :  { %1867 = vmatprep.subr.mxu0 %v181_v3  ;;  %1900 = vmatprep.subr.mxu1 %v214_v4  ;;  %v231_v3 = vld [vmem:[%s3746_s1 + $0x628] sm:$0xff]  ;;  %v264_v4 = vld [vmem:[%s3746_s1 + $0x730] sm:$0xff] }
  0x5f   :  { %1868 = vmatpush3.msra.mxu0 %v165_v5  ;;  %1901 = vmatpush3.msra.mxu1 %v198_v6  ;;  %v246_v5 = vld [vmem:[%s3746_s1 + $0x6a0] sm:$0xff]  ;;  %v279_v6 = vld [vmem:[%s3746_s1 + $0x7a8] sm:$0xff] }
  0x60   :  { %1869 = vmatprep.subr.mxu0 %v180_v7  ;;  %1902 = vmatprep.subr.mxu1 %v213_v9  ;;  %v230_v7 = vld [vmem:[%s3746_s1 + $0x620] sm:$0xff]  ;;  %v263_v9 = vld [vmem:[%s3746_s1 + $0x728] sm:$0xff] }
  0x61   :  { %1870 = vmatpush3.msra.mxu0 %v164_v10  ;;  %1903 = vmatpush3.msra.mxu1 %v197_v12  ;;  %v245_v10 = vld [vmem:[%s3746_s1 + $0x698] sm:$0xff] }
  0x62   :  { %1871 = vmatprep.subr.mxu0 %v179_v13  ;;  %1904 = vmatprep.subr.mxu1 %v212_v14  ;;  %v229_v12 = vld [vmem:[%s3746_s1 + $0x618] sm:$0xff]  ;;  %v262_v13 = vld [vmem:[%s3746_s1 + $0x720] sm:$0xff]  ;;  %v244_v14 = vld [vmem:[%s3746_s1 + $0x690] sm:$0xff] }
  0x63   :  { %1872 = vmatpush3.msra.mxu0 %v163_v15  ;;  %1905 = vmatpush3.msra.mxu1 %v196_v16  ;;  %v499_v15 = vcombine.high %v30_v8, %v30_v8  ;;  %v277_v16 = vld [vmem:[%s3746_s1 + $0x798] sm:$0xff] }
  0x64   :  { %1873 = vmatprep.subr.mxu0 %v178_v17  ;;  %1906 = vmatprep.subr.mxu1 %v211_v19  ;;  %v228_v17 = vld [vmem:[%s3746_s1 + $0x610] sm:$0xff]  ;;  %v261_v19 = vld [vmem:[%s3746_s1 + $0x718] sm:$0xff] }
  0x65   :  { %1874 = vmatpush3.msra.mxu0 %v162_v20  ;;  %926 = vmatprep.mubr.f32.mxu0 %v497_v21  ;;  %v243_v20 = vld [vmem:[%s3746_s1 + $0x688] sm:$0xff]  ;;  %v276_v21 = vld [vmem:[%s3746_s1 + $0x790] sm:$0xff] }
  0x66   :  { %1907 = vmatpush3.msra.mxu1 %v195_v22  ;;  %927 = vmatmul.mubr.f32.vlgmr.msra.gmra.mxu0 %v489_v11  ;;  %v278_v11 = vld [vmem:[%s3746_s1 + $0x7a0] sm:$0xff]  ;;  %v227_v22 = vld [vmem:[%s3746_s1 + $0x608] sm:$0xff] }
  0x67   :  { %1908 = vmatprep.subr.mxu1 %v210_v23  ;;  %1913 = vmatprep.subr.mxu0 %v257_v24  ;;  %v260_v23 = vld [vmem:[%s3746_s1 + $0x710] sm:$0xff]  ;;  %v242_v24 = vld [vmem:[%s3746_s1 + $0x680] sm:$0xff] }
  0x68   :  { %1909 = vmatpush3.msra.mxu1 %v194_v25  ;;  %996 = vmatprep.mubr.f32.mxu1 %v498_v26  ;;  %v513_v25 = vrot.slane %v499_v15, %v2481_v48  ;;  %v275_v26 = vld [vmem:[%s3746_s1 + $0x788] sm:$0xff] }
  0x69   :  { %1914 = vmatpush3.msra.mxu0 %v241_v27  ;;  %997 = vmatmul.mubr.f32.vlgmr.msra.gmra.mxu1 %v496_v18  ;;  %v506_v18 = vrot.slane %v30_v8, %v2481_v48  ;;  %v226_v27 = vld [vmem:[%s3746_s1 + $0x600] sm:$0xff] }
  0x6a   :  { %1915 = vmatprep.subr.mxu0 %v256_v28  ;;  %1948 = vmatprep.subr.mxu1 %v289_v29  ;;  %v259_v29 = vld [vmem:[%s3746_s1 + $0x708] sm:$0xff] }
  0x6b   :  { %1916 = vmatpush3.msra.mxu0 %v240_v30  ;;  %1949 = vmatpush3.msra.mxu1 %v273_v31  ;;  %v514_v28 = vcombine.high %v506_v18, %v506_v18  ;;  %v274_v30 = vld [vmem:[%s3746_s1 + $0x780] sm:$0xff]  ;;  %v321_v31 = vld [vmem:[%s3746_s1 + $0x8f8] sm:$0xff] }
  0x6c   :  { %1917 = vmatprep.subr.mxu0 %v255_v32  ;;  %1950 = vmatprep.subr.mxu1 %v288_v33  ;;  %v258_v32 = vld [vmem:[%s3746_s1 + $0x700] sm:$0xff]  ;;  %v515_v33 = vcombine.high %v513_v25, %v513_v25 }
  0x6d   :  { %1918 = vmatpush3.msra.mxu0 %v239_v34  ;;  %1951 = vmatpush3.msra.mxu1 %v272_v35  ;;  %v305_v34 = vld [vmem:[%s3746_s1 + $0x878] sm:$0xff]  ;;  %v320_v35 = vld [vmem:[%s3746_s1 + $0x8f0] sm:$0xff] }
  0x6e   :  { %1919 = vmatprep.subr.mxu0 %v254_v36  ;;  %1952 = vmatprep.subr.mxu1 %v287_v37  ;;  %v353_v36 = vld [vmem:[%s3746_s1 + $0x9f8] sm:$0xff]  ;;  %v304_v37 = vld [vmem:[%s3746_s1 + $0x870] sm:$0xff] }
  0x6f   :  { %1920 = vmatpush3.msra.mxu0 %v238_v38  ;;  %1953 = vmatpush3.msra.mxu1 %v271_v39 }
  0x70   :  { %1921 = vmatprep.subr.mxu0 %v253_v40  ;;  %1954 = vmatprep.subr.mxu1 %v286_v41 }
  0x71   :  { %1922 = vmatpush3.msra.mxu0 %v237_v42  ;;  %1955 = vmatpush3.msra.mxu1 %v270_v43 }
  0x72   :  { %1923 = vmatprep.subr.mxu0 %v252_v44  ;;  %1956 = vmatprep.subr.mxu1 %v285_v45 }
  0x73   :  { %1924 = vmatpush3.msra.mxu0 %v236_v46  ;;  %1957 = vmatpush3.msra.mxu1 %v269_v47 }
  0x74   :  { %1925 = vmatprep.subr.mxu0 %v251_v49  ;;  %1958 = vmatprep.subr.mxu1 %v284_v50 }
  0x75   :  { %1926 = vmatpush3.msra.mxu0 %v235_v51  ;;  %1959 = vmatpush3.msra.mxu1 %v268_v52 }
  0x76   :  { %1927 = vmatprep.subr.mxu0 %v250_v53  ;;  %1960 = vmatprep.subr.mxu1 %v283_v54 }
  0x77   :  { %1928 = vmatpush3.msra.mxu0 %v234_v55  ;;  %1961 = vmatpush3.msra.mxu1 %v267_v56 }
  0x78   :  { %1929 = vmatprep.subr.mxu0 %v249_v57  ;;  %1962 = vmatprep.subr.mxu1 %v282_v58 }
  0x79   :  { %1930 = vmatpush3.msra.mxu0 %v233_v59  ;;  %1963 = vmatpush3.msra.mxu1 %v266_v60 }
  0x7a   :  { %1931 = vmatprep.subr.mxu0 %v248_v61  ;;  %1964 = vmatprep.subr.mxu1 %v281_v62 }
  0x7b   :  { %1932 = vmatpush3.msra.mxu0 %v232_v63  ;;  %1965 = vmatpush3.msra.mxu1 %v265_v0 }
  0x7c   :  { %1933 = vmatprep.subr.mxu0 %v247_v1  ;;  %1966 = vmatprep.subr.mxu1 %v280_v2 }
  0x7d   :  { %1934 = vmatpush3.msra.mxu0 %v231_v3  ;;  %1967 = vmatpush3.msra.mxu1 %v264_v4 }
  0x7e   :  { %1935 = vmatprep.subr.mxu0 %v246_v5  ;;  %1968 = vmatprep.subr.mxu1 %v279_v6 }
  0x7f   :  { %1936 = vmatpush3.msra.mxu0 %v230_v7  ;;  %1969 = vmatpush3.msra.mxu1 %v263_v9 }
  0x80   :  { %1937 = vmatprep.subr.mxu0 %v245_v10  ;;  %1970 = vmatprep.subr.mxu1 %v278_v11 }
  0x81   :  { %1938 = vmatpush3.msra.mxu0 %v229_v12  ;;  %1971 = vmatpush3.msra.mxu1 %v262_v13 }
  0x82   :  { %1939 = vmatprep.subr.mxu0 %v244_v14  ;;  %1972 = vmatprep.subr.mxu1 %v277_v16 }
  0x83   :  { %1940 = vmatpush3.msra.mxu0 %v228_v17  ;;  %1973 = vmatpush3.msra.mxu1 %v261_v19 }
  0x84   :  { %1941 = vmatprep.subr.mxu0 %v243_v20  ;;  %1974 = vmatprep.subr.mxu1 %v276_v21 }
  0x85   :  { %1942 = vmatpush3.msra.mxu0 %v227_v22  ;;  %1975 = vmatpush3.msra.mxu1 %v260_v23 }
  0x86   :  { %1943 = vmatprep.subr.mxu0 %v242_v24  ;;  %1976 = vmatprep.subr.mxu1 %v275_v26 }
  0x87   :  { %1944 = vmatpush3.msra.mxu0 %v226_v27  ;;  %1066 = vmatprep.mubr.f32.mxu0 %v514_v28 }
  0x88   :  { %1977 = vmatpush3.msra.mxu1 %v259_v29  ;;  %1067 = vmatmul.mubr.f32.vlgmr.msra.gmra.mxu0 %v506_v18 }
  0x89   :  { %1978 = vmatprep.subr.mxu1 %v274_v30  ;;  %1983 = vmatprep.subr.mxu0 %v321_v31 }
  0x8a   :  { %1979 = vmatpush3.msra.mxu1 %v258_v32 }
  0x8b   :  { %12 = vsyncpa [#allocation3], 0  ;;  %1136 = vmatprep.mubr.f32.mxu1 %v515_v33  ;;  %1984 = vmatpush3.msra.mxu0 %v305_v34  ;;  %v337_v38 = vld [vmem:[%s3746_s1 + $0x978] sm:$0xff]  ;;  %v319_v39 = vld [vmem:[%s3746_s1 + $0x8e8] sm:$0xff]  ;;  %vm2310_vm0 = vmmov 0   ;;  %vm1515_vm1 = vcmask 982016  }
  0x8c   :  { %1137 = vmatmul.mubr.f32.vlgmr.msra.gmra.mxu1 %v513_v25  ;;  %1985 = vmatprep.subr.mxu0 %v320_v35  ;;  %v352_v40 = vld [vmem:[%s3746_s1 + $0x9f0] sm:$0xff]  ;;  %v303_v41 = vld [vmem:[%s3746_s1 + $0x868] sm:$0xff]  ;;  %v318_v43 = vld [vmem:[%s3746_s1 + $0x8e0] sm:$0xff]  ;;  %s2311_s22 = smov [#allocation2]  }
  0x8d   :  { %2018 = vmatprep.subr.mxu1 %v353_v36  ;;  %1986 = vmatpush3.msra.mxu0 %v304_v37  ;;  %v336_v42 = vld [vmem:[%s3746_s1 + $0x970] sm:$0xff]  ;;  %v351_v44 = vld [vmem:[%s3746_s1 + $0x9e8] sm:$0xff]  ;;  %v302_v45 = vld [vmem:[%s3746_s1 + $0x860] sm:$0xff]  ;;  %s1690_s23 = sshll.u32 %s2311_s22, 4  ;;  %s1691_s23 = int_to_ptr.vmem [resolvable:$true] %s1690_s23 }
  0x8e   :  { %2019 = vmatpush3.msra.mxu1 %v337_v38  ;;  %1987 = vmatprep.subr.mxu0 %v319_v39  ;;  %v335_v46 = vld [vmem:[%s3746_s1 + $0x968] sm:$0xff]  ;;  %v317_v47 = vld [vmem:[%s3746_s1 + $0x8d8] sm:$0xff]  ;;  %v350_v49 = vld [vmem:[%s3746_s1 + $0x9e0] sm:$0xff]  ;;  %p2291_p1 = scmp.lt.s32.totalorder %s1691_s23, %s1691_s23 }
  0x8f   :  { %2020 = vmatprep.subr.mxu1 %v352_v40  ;;  %1988 = vmatpush3.msra.mxu0 %v303_v41  ;;  %v301_v50 = vld [vmem:[%s3746_s1 + $0x858] sm:$0xff]  ;;  %v334_v51 = vld [vmem:[%s3746_s1 + $0x960] sm:$0xff]  ;;  %v316_v52 = vld [vmem:[%s3746_s1 + $0x8d0] sm:$0xff] }
  0x90   :  { %2021 = vmatpush3.msra.mxu1 %v336_v42  ;;  %1989 = vmatprep.subr.mxu0 %v318_v43  ;;  %v349_v53 = vld [vmem:[%s3746_s1 + $0x9d8] sm:$0xff]  ;;  %v300_v54 = vld [vmem:[%s3746_s1 + $0x850] sm:$0xff]  ;;  %v315_v56 = vld [vmem:[%s3746_s1 + $0x8c8] sm:$0xff] }
  0x91   :  { %2022 = vmatprep.subr.mxu1 %v351_v44  ;;  %1990 = vmatpush3.msra.mxu0 %v302_v45  ;;  %v333_v55 = vld [vmem:[%s3746_s1 + $0x958] sm:$0xff]  ;;  %v348_v57 = vld [vmem:[%s3746_s1 + $0x9d0] sm:$0xff]  ;;  %v299_v58 = vld [vmem:[%s3746_s1 + $0x848] sm:$0xff] }
  0x92   :  { %2023 = vmatpush3.msra.mxu1 %v335_v46  ;;  %1991 = vmatprep.subr.mxu0 %v317_v47  ;;  %v332_v59 = vld [vmem:[%s3746_s1 + $0x950] sm:$0xff]  ;;  %v314_v60 = vld [vmem:[%s3746_s1 + $0x8c0] sm:$0xff]  ;;  %v347_v61 = vld [vmem:[%s3746_s1 + $0x9c8] sm:$0xff] }
  0x93   :  { %2024 = vmatprep.subr.mxu1 %v350_v49  ;;  %1992 = vmatpush3.msra.mxu0 %v301_v50  ;;  %v298_v62 = vld [vmem:[%s3746_s1 + $0x840] sm:$0xff]  ;;  %v331_v63 = vld [vmem:[%s3746_s1 + $0x948] sm:$0xff]  ;;  %v313_v0 = vld [vmem:[%s3746_s1 + $0x8b8] sm:$0xff] }
  0x94   :  { %2025 = vmatpush3.msra.mxu1 %v334_v51  ;;  %1993 = vmatprep.subr.mxu0 %v316_v52  ;;  %v346_v1 = vld [vmem:[%s3746_s1 + $0x9c0] sm:$0xff]  ;;  %v297_v2 = vld [vmem:[%s3746_s1 + $0x838] sm:$0xff]  ;;  %v312_v4 = vld [vmem:[%s3746_s1 + $0x8b0] sm:$0xff] }
  0x95   :  { %2026 = vmatprep.subr.mxu1 %v349_v53  ;;  %1994 = vmatpush3.msra.mxu0 %v300_v54  ;;  %v330_v3 = vld [vmem:[%s3746_s1 + $0x940] sm:$0xff]  ;;  %v345_v5 = vld [vmem:[%s3746_s1 + $0x9b8] sm:$0xff]  ;;  %v296_v6 = vld [vmem:[%s3746_s1 + $0x830] sm:$0xff] }
  0x96   :  { %2027 = vmatpush3.msra.mxu1 %v333_v55  ;;  %1995 = vmatprep.subr.mxu0 %v315_v56  ;;  %v329_v7 = vld [vmem:[%s3746_s1 + $0x938] sm:$0xff]  ;;  %v311_v8 = vld [vmem:[%s3746_s1 + $0x8a8] sm:$0xff]  ;;  %v344_v9 = vld [vmem:[%s3746_s1 + $0x9b0] sm:$0xff] }
  0x97   :  { %2028 = vmatprep.subr.mxu1 %v348_v57  ;;  %1996 = vmatpush3.msra.mxu0 %v299_v58  ;;  %v295_v10 = vld [vmem:[%s3746_s1 + $0x828] sm:$0xff]  ;;  %v328_v11 = vld [vmem:[%s3746_s1 + $0x930] sm:$0xff]  ;;  %v310_v12 = vld [vmem:[%s3746_s1 + $0x8a0] sm:$0xff] }
  0x98   :  { %2029 = vmatpush3.msra.mxu1 %v332_v59  ;;  %1997 = vmatprep.subr.mxu0 %v314_v60  ;;  %v343_v13 = vld [vmem:[%s3746_s1 + $0x9a8] sm:$0xff]  ;;  %v294_v14 = vld [vmem:[%s3746_s1 + $0x820] sm:$0xff]  ;;  %v309_v17 = vld [vmem:[%s3746_s1 + $0x898] sm:$0xff] }
  0x99   :  { %2030 = vmatprep.subr.mxu1 %v347_v61  ;;  %1998 = vmatpush3.msra.mxu0 %v298_v62  ;;  %v31_v15 = vld [vmem:[%s3745_s0 + $0x20] sm:$0xff]  ;;  %v327_v16 = vld [vmem:[%s3746_s1 + $0x928] sm:$0xff]  ;;  %v293_v19 = vld [vmem:[%s3746_s1 + $0x818] sm:$0xff] }
  0x9a   :  { %2031 = vmatpush3.msra.mxu1 %v331_v63  ;;  %1999 = vmatprep.subr.mxu0 %v313_v0  ;;  %v342_v18 = vld [vmem:[%s3746_s1 + $0x9a0] sm:$0xff]  ;;  %v308_v21 = vld [vmem:[%s3746_s1 + $0x890] sm:$0xff]  ;;  %v516_v22 = vcombine.high %v31_v15, %v31_v15  ;;  %v341_v23 = vld [vmem:[%s3746_s1 + $0x998] sm:$0xff]  ;;  %v523_v25 = vrot.slane %v31_v15, %v2481_v48 }
  0x9b   :  { %2032 = vmatprep.subr.mxu1 %v346_v1  ;;  %2000 = vmatpush3.msra.mxu0 %v297_v2  ;;  %v326_v20 = vld [vmem:[%s3746_s1 + $0x920] sm:$0xff]  ;;  %v292_v24 = vld [vmem:[%s3746_s1 + $0x810] sm:$0xff]  ;;  %v325_v26 = vld [vmem:[%s3746_s1 + $0x918] sm:$0xff] }
  0x9c   :  { %2033 = vmatpush3.msra.mxu1 %v330_v3  ;;  %2001 = vmatprep.subr.mxu0 %v312_v4  ;;  %v307_v27 = vld [vmem:[%s3746_s1 + $0x888] sm:$0xff]  ;;  %v340_v28 = vld [vmem:[%s3746_s1 + $0x990] sm:$0xff]  ;;  %v306_v31 = vld [vmem:[%s3746_s1 + $0x880] sm:$0xff]  ;;  %v530_v32 = vrot.slane %v516_v22, %v2481_v48  ;;  %v531_v35 = vcombine.high %v523_v25, %v523_v25 }
  0x9d   :  { %2034 = vmatprep.subr.mxu1 %v345_v5  ;;  %2002 = vmatpush3.msra.mxu0 %v296_v6  ;;  %v291_v29 = vld [vmem:[%s3746_s1 + $0x808] sm:$0xff]  ;;  %v324_v30 = vld [vmem:[%s3746_s1 + $0x910] sm:$0xff]  ;;  %v290_v34 = vld [vmem:[%s3746_s1 + $0x800] sm:$0xff] }
  0x9e   :  { %2035 = vmatpush3.msra.mxu1 %v329_v7  ;;  %2003 = vmatprep.subr.mxu0 %v311_v8  ;;  %v339_v33 = vld [vmem:[%s3746_s1 + $0x988] sm:$0xff]  ;;  %v338_v37 = vld [vmem:[%s3746_s1 + $0x980] sm:$0xff]  ;;  %v385_v38 = vld [vmem:[%s3746_s1 + $0xaf8] sm:$0xff]  ;;  %v532_v40 = vcombine.high %v530_v32, %v530_v32 }
  0x9f   :  { %2036 = vmatprep.subr.mxu1 %v344_v9  ;;  %2004 = vmatpush3.msra.mxu0 %v295_v10  ;;  %v323_v36 = vld [vmem:[%s3746_s1 + $0x908] sm:$0xff]  ;;  %v322_v39 = vld [vmem:[%s3746_s1 + $0x900] sm:$0xff]  ;;  %v369_v41 = vld [vmem:[%s3746_s1 + $0xa78] sm:$0xff] }
  0xa0   :  { %2037 = vmatpush3.msra.mxu1 %v328_v11  ;;  %2005 = vmatprep.subr.mxu0 %v310_v12  ;;  %v384_v42 = vld [vmem:[%s3746_s1 + $0xaf0] sm:$0xff]  ;;  %v417_v43 = vld [vmem:[%s3746_s1 + $0xbf8] sm:$0xff]  ;;  %v383_v46 = vld [vmem:[%s3746_s1 + $0xae8] sm:$0xff] }
  0xa1   :  { %2038 = vmatprep.subr.mxu1 %v343_v13  ;;  %2006 = vmatpush3.msra.mxu0 %v294_v14  ;;  %v368_v44 = vld [vmem:[%s3746_s1 + $0xa70] sm:$0xff]  ;;  %v401_v45 = vld [vmem:[%s3746_s1 + $0xb78] sm:$0xff]  ;;  %v367_v49 = vld [vmem:[%s3746_s1 + $0xa68] sm:$0xff] }
  0xa2   :  { %2039 = vmatpush3.msra.mxu1 %v327_v16  ;;  %2007 = vmatprep.subr.mxu0 %v309_v17  ;;  %v416_v47 = vld [vmem:[%s3746_s1 + $0xbf0] sm:$0xff]  ;;  %v382_v51 = vld [vmem:[%s3746_s1 + $0xae0] sm:$0xff]  ;;  %v415_v52 = vld [vmem:[%s3746_s1 + $0xbe8] sm:$0xff] }
  0xa3   :  { %2040 = vmatprep.subr.mxu1 %v342_v18  ;;  %2008 = vmatpush3.msra.mxu0 %v293_v19  ;;  %v400_v50 = vld [vmem:[%s3746_s1 + $0xb70] sm:$0xff]  ;;  %v366_v53 = vld [vmem:[%s3746_s1 + $0xa60] sm:$0xff]  ;;  %v399_v54 = vld [vmem:[%s3746_s1 + $0xb68] sm:$0xff] }
  0xa4   :  { %2041 = vmatpush3.msra.mxu1 %v326_v20  ;;  %2009 = vmatprep.subr.mxu0 %v308_v21  ;;  %v381_v55 = vld [vmem:[%s3746_s1 + $0xad8] sm:$0xff]  ;;  %v414_v56 = vld [vmem:[%s3746_s1 + $0xbe0] sm:$0xff]  ;;  %v380_v59 = vld [vmem:[%s3746_s1 + $0xad0] sm:$0xff] }
  0xa5   :  { %2042 = vmatprep.subr.mxu1 %v341_v23  ;;  %2010 = vmatpush3.msra.mxu0 %v292_v24  ;;  %v365_v57 = vld [vmem:[%s3746_s1 + $0xa58] sm:$0xff]  ;;  %v398_v58 = vld [vmem:[%s3746_s1 + $0xb60] sm:$0xff]  ;;  %v364_v61 = vld [vmem:[%s3746_s1 + $0xa50] sm:$0xff] }
  0xa6   :  { %2043 = vmatpush3.msra.mxu1 %v325_v26  ;;  %2011 = vmatprep.subr.mxu0 %v307_v27  ;;  %v413_v60 = vld [vmem:[%s3746_s1 + $0xbd8] sm:$0xff]  ;;  %v379_v63 = vld [vmem:[%s3746_s1 + $0xac8] sm:$0xff]  ;;  %v412_v0 = vld [vmem:[%s3746_s1 + $0xbd0] sm:$0xff] }
  0xa7   :  { %2044 = vmatprep.subr.mxu1 %v340_v28  ;;  %2012 = vmatpush3.msra.mxu0 %v291_v29  ;;  %v397_v62 = vld [vmem:[%s3746_s1 + $0xb58] sm:$0xff]  ;;  %v363_v1 = vld [vmem:[%s3746_s1 + $0xa48] sm:$0xff]  ;;  %v396_v2 = vld [vmem:[%s3746_s1 + $0xb50] sm:$0xff] }
  0xa8   :  { %2045 = vmatpush3.msra.mxu1 %v324_v30  ;;  %2013 = vmatprep.subr.mxu0 %v306_v31  ;;  %v378_v3 = vld [vmem:[%s3746_s1 + $0xac0] sm:$0xff]  ;;  %v411_v4 = vld [vmem:[%s3746_s1 + $0xbc8] sm:$0xff]  ;;  %v377_v7 = vld [vmem:[%s3746_s1 + $0xab8] sm:$0xff] }
  0xa9   :  { %2046 = vmatprep.subr.mxu1 %v339_v33  ;;  %2014 = vmatpush3.msra.mxu0 %v290_v34  ;;  %v362_v5 = vld [vmem:[%s3746_s1 + $0xa40] sm:$0xff]  ;;  %v395_v6 = vld [vmem:[%s3746_s1 + $0xb48] sm:$0xff]  ;;  %v361_v9 = vld [vmem:[%s3746_s1 + $0xa38] sm:$0xff] }
  0xaa   :  { %1206 = vmatprep.mubr.f32.mxu0 %v531_v35  ;;  %2047 = vmatpush3.msra.mxu1 %v323_v36  ;;  %v410_v8 = vld [vmem:[%s3746_s1 + $0xbc0] sm:$0xff]  ;;  %v376_v11 = vld [vmem:[%s3746_s1 + $0xab0] sm:$0xff]  ;;  %v409_v12 = vld [vmem:[%s3746_s1 + $0xbb8] sm:$0xff] }
  0xab   :  { %1207 = vmatmul.mubr.f32.vlgmr.msra.gmra.mxu0 %v523_v25  ;;  %2048 = vmatprep.subr.mxu1 %v338_v37  ;;  %v394_v10 = vld [vmem:[%s3746_s1 + $0xb40] sm:$0xff]  ;;  %v360_v13 = vld [vmem:[%s3746_s1 + $0xa30] sm:$0xff]  ;;  %v393_v14 = vld [vmem:[%s3746_s1 + $0xb38] sm:$0xff] }
  0xac   :  { %2053 = vmatprep.subr.mxu0 %v385_v38  ;;  %2049 = vmatpush3.msra.mxu1 %v322_v39  ;;  %v375_v15 = vld [vmem:[%s3746_s1 + $0xaa8] sm:$0xff]  ;;  %v408_v16 = vld [vmem:[%s3746_s1 + $0xbb0] sm:$0xff]  ;;  %v374_v19 = vld [vmem:[%s3746_s1 + $0xaa0] sm:$0xff] }
  0xad   :  { %1276 = vmatprep.mubr.f32.mxu1 %v532_v40  ;;  %2054 = vmatpush3.msra.mxu0 %v369_v41  ;;  %v359_v17 = vld [vmem:[%s3746_s1 + $0xa28] sm:$0xff]  ;;  %v392_v18 = vld [vmem:[%s3746_s1 + $0xb30] sm:$0xff]  ;;  %v358_v21 = vld [vmem:[%s3746_s1 + $0xa20] sm:$0xff] }
  0xae   :  { %1277 = vmatmul.mubr.f32.vlgmr.msra.gmra.mxu1 %v530_v32  ;;  %2055 = vmatprep.subr.mxu0 %v384_v42  ;;  %v407_v20 = vld [vmem:[%s3746_s1 + $0xba8] sm:$0xff]  ;;  %v373_v24 = vld [vmem:[%s3746_s1 + $0xa98] sm:$0xff]  ;;  %v406_v25 = vld [vmem:[%s3746_s1 + $0xba0] sm:$0xff] }
  0xaf   :  { %2088 = vmatprep.subr.mxu1 %v417_v43  ;;  %2056 = vmatpush3.msra.mxu0 %v368_v44  ;;  %v32_v22 = vld [vmem:[%s3745_s0 + $0x28] sm:$0xff]  ;;  %v357_v26 = vld [vmem:[%s3746_s1 + $0xa18] sm:$0xff]  ;;  %v390_v27 = vld [vmem:[%s3746_s1 + $0xb20] sm:$0xff] }
  0xb0   :  { %2089 = vmatpush3.msra.mxu1 %v401_v45  ;;  %2057 = vmatprep.subr.mxu0 %v383_v46  ;;  %v391_v23 = vld [vmem:[%s3746_s1 + $0xb28] sm:$0xff]  ;;  %v372_v28 = vld [vmem:[%s3746_s1 + $0xa90] sm:$0xff]  ;;  %v533_v29 = vcombine.high %v32_v22, %v32_v22  ;;  %v405_v30 = vld [vmem:[%s3746_s1 + $0xb98] sm:$0xff]  ;;  %v540_v32 = vrot.slane %v32_v22, %v2481_v48 }
  0xb1   :  { %2090 = vmatprep.subr.mxu1 %v416_v47  ;;  %2058 = vmatpush3.msra.mxu0 %v367_v49  ;;  %v356_v31 = vld [vmem:[%s3746_s1 + $0xa10] sm:$0xff]  ;;  %v389_v33 = vld [vmem:[%s3746_s1 + $0xb18] sm:$0xff]  ;;  %v371_v34 = vld [vmem:[%s3746_s1 + $0xa88] sm:$0xff]  ;;  %v2309_v47 = vmov 0.0  }
  0xb2   :  { %2091 = vmatpush3.msra.mxu1 %v400_v50  ;;  %2059 = vmatprep.subr.mxu0 %v382_v51  ;;  %v404_v35 = vld [vmem:[%s3746_s1 + $0xb90] sm:$0xff]  ;;  %v355_v36 = vld [vmem:[%s3746_s1 + $0xa08] sm:$0xff]  ;;  %v370_v38 = vld [vmem:[%s3746_s1 + $0xa80] sm:$0xff]  ;;  %v547_v39 = vrot.slane %v533_v29, %v2481_v48  ;;  %v548_v42 = vcombine.high %v540_v32, %v540_v32 }
  0xb3   :  { %2092 = vmatprep.subr.mxu1 %v415_v52  ;;  %2060 = vmatpush3.msra.mxu0 %v366_v53  ;;  %v388_v37 = vld [vmem:[%s3746_s1 + $0xb10] sm:$0xff]  ;;  %v403_v40 = vld [vmem:[%s3746_s1 + $0xb88] sm:$0xff]  ;;  %v354_v41 = vld [vmem:[%s3746_s1 + $0xa00] sm:$0xff] }
  0xb4   :  { %2093 = vmatpush3.msra.mxu1 %v399_v54  ;;  %2061 = vmatprep.subr.mxu0 %v381_v55  ;;  %v387_v43 = vld [vmem:[%s3746_s1 + $0xb08] sm:$0xff]  ;;  %v402_v48 = vld [vmem:[%s3746_s1 + $0xb80] sm:$0xff]  ;;  %v549_v45 = vcombine.high %v547_v39, %v547_v39  ;;  %v433_v46 = vld [vmem:[%s3746_s1 + $0xc78] sm:$0xff] }
  0xb5   :  { %2094 = vmatprep.subr.mxu1 %v414_v56  ;;  %2062 = vmatpush3.msra.mxu0 %v365_v57  ;;  %v386_v44 = vld [vmem:[%s3746_s1 + $0xb00] sm:$0xff]  ;;  %v432_v49 = vld [vmem:[%s3746_s1 + $0xc70] sm:$0xff]  ;;  %v431_v50 = vld [vmem:[%s3746_s1 + $0xc68] sm:$0xff] }
  0xb6   :  { %2095 = vmatpush3.msra.mxu1 %v398_v58  ;;  %2063 = vmatprep.subr.mxu0 %v380_v59  ;;  %v430_v51 = vld [vmem:[%s3746_s1 + $0xc60] sm:$0xff]  ;;  %v429_v52 = vld [vmem:[%s3746_s1 + $0xc58] sm:$0xff]  ;;  %v428_v53 = vld [vmem:[%s3746_s1 + $0xc50] sm:$0xff] }
  0xb7   :  { %2096 = vmatprep.subr.mxu1 %v413_v60  ;;  %2064 = vmatpush3.msra.mxu0 %v364_v61  ;;  %v427_v54 = vld [vmem:[%s3746_s1 + $0xc48] sm:$0xff]  ;;  %v426_v55 = vld [vmem:[%s3746_s1 + $0xc40] sm:$0xff]  ;;  %v425_v56 = vld [vmem:[%s3746_s1 + $0xc38] sm:$0xff] }
  0xb8   :  { %2097 = vmatpush3.msra.mxu1 %v397_v62  ;;  %2065 = vmatprep.subr.mxu0 %v379_v63  ;;  %v424_v57 = vld [vmem:[%s3746_s1 + $0xc30] sm:$0xff]  ;;  %v423_v58 = vld [vmem:[%s3746_s1 + $0xc28] sm:$0xff]  ;;  %v422_v59 = vld [vmem:[%s3746_s1 + $0xc20] sm:$0xff] }
  0xb9   :  { %2098 = vmatprep.subr.mxu1 %v412_v0  ;;  %2066 = vmatpush3.msra.mxu0 %v363_v1  ;;  %v421_v60 = vld [vmem:[%s3746_s1 + $0xc18] sm:$0xff]  ;;  %v420_v61 = vld [vmem:[%s3746_s1 + $0xc10] sm:$0xff]  ;;  %v419_v62 = vld [vmem:[%s3746_s1 + $0xc08] sm:$0xff] }
  0xba   :  { %2099 = vmatpush3.msra.mxu1 %v396_v2  ;;  %2067 = vmatprep.subr.mxu0 %v378_v3  ;;  %v418_v63 = vld [vmem:[%s3746_s1 + $0xc00] sm:$0xff]  ;;  %v1699_v0 = vld.sshfl [vmem:[%s3745_s0 + $0x30] sm:$0x3 pattern:$0x76325410]  ;;  %v1506_v2 = vld [vmem:[%s3748_s3 + $0x68] sm:$0xff] }
  0xbb   :  { %2100 = vmatprep.subr.mxu1 %v411_v4  ;;  %2068 = vmatpush3.msra.mxu0 %v362_v5  ;;  %v1507_v1 = vld [vmem:[%s3748_s3 + $0x70] sm:$0xff]  ;;  %v1505_v3 = vld [vmem:[%s3748_s3 + $0x60] sm:$0xff]  ;;  %v1504_v4 = vld [vmem:[%s3748_s3 + $0x58] sm:$0xff] }
  0xbc   :  { %2101 = vmatpush3.msra.mxu1 %v395_v6  ;;  %2069 = vmatprep.subr.mxu0 %v377_v7  ;;  %v1503_v5 = vld [vmem:[%s3748_s3 + $0x50] sm:$0xff]  ;;  %v1502_v6 = vld [vmem:[%s3748_s3 + $0x48] sm:$0xff]  ;;  %v1501_v7 = vld [vmem:[%s3748_s3 + $0x40] sm:$0xff] }
  0xbd   :  { %2102 = vmatprep.subr.mxu1 %v410_v8  ;;  %2070 = vmatpush3.msra.mxu0 %v361_v9  ;;  %v1500_v8 = vld [vmem:[%s3748_s3 + $0x38] sm:$0xff]  ;;  %v1499_v9 = vld [vmem:[%s3748_s3 + $0x30] sm:$0xff] }
  0xbe   :  { %2103 = vmatpush3.msra.mxu1 %v394_v10  ;;  %2071 = vmatprep.subr.mxu0 %v376_v11  ;;  %v1498_v10 = vld [vmem:[%s3748_s3 + $0x28] sm:$0xff]  ;;  %v1497_v11 = vld [vmem:[%s3748_s3 + $0x20] sm:$0xff] }
  0xbf   :  { %2104 = vmatprep.subr.mxu1 %v409_v12  ;;  %2072 = vmatpush3.msra.mxu0 %v360_v13  ;;  %v1496_v12 = vld [vmem:[%s3748_s3 + $0x18] sm:$0xff]  ;;  %v1495_v13 = vld [vmem:[%s3748_s3 + $0x10] sm:$0xff] }
  0xc0   :  { %2105 = vmatpush3.msra.mxu1 %v393_v14  ;;  %2073 = vmatprep.subr.mxu0 %v375_v15  ;;  %v1494_v14 = vld [vmem:[%s3748_s3 + $0x8] sm:$0xff]  ;;  %v1493_v15 = vld [vmem:[%s3748_s3] sm:$0xff] }
  0xc1   :  { %2106 = vmatprep.subr.mxu1 %v408_v16  ;;  %2074 = vmatpush3.msra.mxu0 %v359_v17 }
  0xc2   :  { %2107 = vmatpush3.msra.mxu1 %v392_v18  ;;  %2075 = vmatprep.subr.mxu0 %v374_v19 }
  0xc3   :  { %2108 = vmatprep.subr.mxu1 %v407_v20  ;;  %2076 = vmatpush3.msra.mxu0 %v358_v21  ;;  %v1698_v21 = vld [vmem:[%s3747_s2] ss:$0 sm:$0xff] }
  0xc4   :  { %2109 = vmatpush3.msra.mxu1 %v391_v23  ;;  %2077 = vmatprep.subr.mxu0 %v373_v24 }
  0xc5   :  { %2110 = vmatprep.subr.mxu1 %v406_v25  ;;  %2078 = vmatpush3.msra.mxu0 %v357_v26 }
  0xc6   :  { %2111 = vmatpush3.msra.mxu1 %v390_v27  ;;  %2079 = vmatprep.subr.mxu0 %v372_v28 }
  0xc7   :  { %2112 = vmatprep.subr.mxu1 %v405_v30  ;;  %2080 = vmatpush3.msra.mxu0 %v356_v31 }
  0xc8   :  { %2113 = vmatpush3.msra.mxu1 %v389_v33  ;;  %2081 = vmatprep.subr.mxu0 %v371_v34 }
  0xc9   :  { %2114 = vmatprep.subr.mxu1 %v404_v35  ;;  %2082 = vmatpush3.msra.mxu0 %v355_v36 }
  0xca   :  { %2115 = vmatpush3.msra.mxu1 %v388_v37  ;;  %2083 = vmatprep.subr.mxu0 %v370_v38 }
  0xcb   :  { %2116 = vmatprep.subr.mxu1 %v403_v40  ;;  %2084 = vmatpush3.msra.mxu0 %v354_v41 }
  0xcc   :  { %1346 = vmatprep.mubr.f32.mxu0 %v548_v42  ;;  %2117 = vmatpush3.msra.mxu1 %v387_v43 }
  0xcd   :  { %1347 = vmatmul.mubr.f32.vlgmr.msra.gmra.mxu0 %v540_v32  ;;  %2118 = vmatprep.subr.mxu1 %v402_v48 }
  0xce   :  { %2173 = vmatprep.subr.mxu0 %v2309_v47  ;;  %2119 = vmatpush3.msra.mxu1 %v386_v44 }
  0xcf   :  { %1416 = vmatprep.mubr.f32.mxu1 %v549_v45  ;;  %2174 = vmatpush3.msra.mxu0 %v433_v46 }
  0xd0   :  { %1417 = vmatmul.mubr.f32.vlgmr.msra.gmra.mxu1 %v547_v39  ;;  %2175 = vmatprep.subr.mxu0 %v2309_v47 }
  0xd1   :  { %2176 = vmatpush3.msra.mxu0 %v432_v49  ;;  %2205 = vmatprep.mubr.msk.f32.mxu0 %vm2310_vm0, %v2309_v47 }
  0xd2   :  { %2177 = vmatprep.subr.mxu0 %v2309_v47  ;;  %2208 = vmatprep.subr.mxu1 %v2309_v47 }
  0xd3   :  { %2178 = vmatpush3.msra.mxu0 %v431_v50  ;;  %2238 = vmatprep.mubr.msk.f32.mxu1 %vm2310_vm0, %v2309_v47 }
  0xd4   :  { %2179 = vmatprep.subr.mxu0 %v2309_v47  ;;  %2209 = vmatpush3.msra.mxu1 %v1507_v1 }
  0xd5   :  { %2180 = vmatpush3.msra.mxu0 %v430_v51  ;;  %2210 = vmatprep.subr.mxu1 %v2309_v47 }
  0xd6   :  { %2181 = vmatprep.subr.mxu0 %v2309_v47  ;;  %2211 = vmatpush3.msra.mxu1 %v1506_v2 }
  0xd7   :  { %2182 = vmatpush3.msra.mxu0 %v429_v52  ;;  %2212 = vmatprep.subr.mxu1 %v2309_v47 }
  0xd8   :  { %2183 = vmatprep.subr.mxu0 %v2309_v47  ;;  %2213 = vmatpush3.msra.mxu1 %v1505_v3 }
  0xd9   :  { %2184 = vmatpush3.msra.mxu0 %v428_v53  ;;  %2214 = vmatprep.subr.mxu1 %v2309_v47 }
  0xda   :  { %2185 = vmatprep.subr.mxu0 %v2309_v47  ;;  %2215 = vmatpush3.msra.mxu1 %v1504_v4 }
  0xdb   :  { %2186 = vmatpush3.msra.mxu0 %v427_v54  ;;  %2216 = vmatprep.subr.mxu1 %v2309_v47 }
  0xdc   :  { %2187 = vmatprep.subr.mxu0 %v2309_v47  ;;  %2217 = vmatpush3.msra.mxu1 %v1503_v5 }
  0xdd   :  { %2188 = vmatpush3.msra.mxu0 %v426_v55  ;;  %2218 = vmatprep.subr.mxu1 %v2309_v47 }
  0xde   :  { %2189 = vmatprep.subr.mxu0 %v2309_v47  ;;  %2219 = vmatpush3.msra.mxu1 %v1502_v6  ;;  %v1605_v6 = vld [vmem:[%s3750_s5 + $0x78] sm:$0xff] }
  0xdf   :  { %2190 = vmatpush3.msra.mxu0 %v425_v56  ;;  %2220 = vmatprep.subr.mxu1 %v2309_v47 }
  0xe0   :  { %2191 = vmatprep.subr.mxu0 %v2309_v47  ;;  %2221 = vmatpush3.msra.mxu1 %v1501_v7  ;;  %v1604_v7 = vld [vmem:[%s3750_s5 + $0x70] sm:$0xff] }
  0xe1   :  { %2192 = vmatpush3.msra.mxu0 %v424_v57  ;;  %2222 = vmatprep.subr.mxu1 %v2309_v47 }
  0xe2   :  { %2193 = vmatprep.subr.mxu0 %v2309_v47  ;;  %2223 = vmatpush3.msra.mxu1 %v1500_v8  ;;  %v1735_v16 = vpop.f32.mrf.mxu0  ;;  %v1603_v8 = vld [vmem:[%s3750_s5 + $0x68] sm:$0xff] }
  0xe3   :  { %2194 = vmatpush3.msra.mxu0 %v423_v58  ;;  %2224 = vmatprep.subr.mxu1 %v2309_v47 }
  0xe4   :  { %2195 = vmatprep.subr.mxu0 %v2309_v47  ;;  %2225 = vmatpush3.msra.mxu1 %v1499_v9  ;;  %v1736_v17 = vpop.f32.mrf.mxu0  ;;  %v1602_v9 = vld [vmem:[%s3750_s5 + $0x60] sm:$0xff] }
  0xe5   :  { %2196 = vmatpush3.msra.mxu0 %v422_v59  ;;  %2226 = vmatprep.subr.mxu1 %v2309_v47  ;;  %v1770_v18 = vpop.f32.mrf.mxu1  ;;  %v1737_v20 = vadd.f32 %v1736_v17, %v1735_v16  ;;  %v1595_v16 = vld [vmem:[%s3750_s5 + $0x28] sm:$0xff]  ;;  %v1594_v17 = vld [vmem:[%s3750_s5 + $0x20] sm:$0xff] }
  0xe6   :  { %2197 = vmatprep.subr.mxu0 %v2309_v47  ;;  %2227 = vmatpush3.msra.mxu1 %v1498_v10  ;;  %v1601_v10 = vld [vmem:[%s3750_s5 + $0x58] sm:$0xff] }
  0xe7   :  { %2198 = vmatpush3.msra.mxu0 %v421_v60  ;;  %2228 = vmatprep.subr.mxu1 %v2309_v47  ;;  %v1771_v22 = vpop.f32.mrf.mxu1  ;;  %v649_v25 = vadd.f32 %v1737_v20, %v1698_v21  ;;  %v1591_v20 = vld [vmem:[%s3750_s5 + $0x8] sm:$0xff]  ;;  %v1590_v21 = vld [vmem:[%s3750_s5] sm:$0xff] }
  0xe8   :  { %2199 = vmatprep.subr.mxu0 %v2309_v47  ;;  %2229 = vmatpush3.msra.mxu1 %v1497_v11  ;;  %v1772_v26 = vadd.f32 %v1771_v22, %v1770_v18  ;;  %v1600_v11 = vld [vmem:[%s3750_s5 + $0x50] sm:$0xff]  ;;  %v1593_v18 = vld [vmem:[%s3750_s5 + $0x18] sm:$0xff]  ;;  %v1700_v22 = vld [vmem:[%s3749_s4] ss:$0 sm:$0xff] }
  0xe9   :  { %2200 = vmatpush3.msra.mxu0 %v420_v61  ;;  %2230 = vmatprep.subr.mxu1 %v2309_v47 }
  0xea   :  { %2201 = vmatprep.subr.mxu0 %v2309_v47  ;;  %2231 = vmatpush3.msra.mxu1 %v1496_v12  ;;  %v719_v30 = vadd.f32 %v1772_v26, %v649_v25  ;;  %v1599_v12 = vld [vmem:[%s3750_s5 + $0x48] sm:$0xff] }
  0xeb   :  { %2202 = vmatpush3.msra.mxu0 %v419_v62  ;;  %2232 = vmatprep.subr.mxu1 %v2309_v47 }
  0xec   :  { %2203 = vmatprep.subr.mxu0 %v2309_v47  ;;  %2233 = vmatpush3.msra.mxu1 %v1495_v13  ;;  %v1598_v13 = vld [vmem:[%s3750_s5 + $0x40] sm:$0xff] }
  0xed   :  { %2204 = vmatpush3.msra.mxu0 %v418_v63  ;;  %2234 = vmatprep.subr.mxu1 %v2309_v47 }
  0xee   :  { %2206 = vmatmul.mubr.f32.vlgmr.msra.gmra.mxu0 %v1699_v0  ;;  %2235 = vmatpush3.msra.mxu1 %v1494_v14  ;;  %v1597_v14 = vld [vmem:[%s3750_s5 + $0x38] sm:$0xff] }
  0xef   :  { %2236 = vmatprep.subr.mxu1 %v2309_v47 }
  0xf0   :  { %2237 = vmatpush3.msra.mxu1 %v1493_v15  ;;  %v1596_v15 = vld [vmem:[%s3750_s5 + $0x30] sm:$0xff] }
  0xf1   :  { %2241 = vmatprep.subr.mxu1 %v2309_v47 }
 0x104   :  { %v1805_v19 = vpop.f32.mrf.mxu0 }
 0x106   :  { %v1806_v23 = vpop.f32.mrf.mxu0 }
 0x107   :  { %v1840_v24 = vpop.f32.mrf.mxu1  ;;  %v1807_v28 = vadd.f32 %v1806_v23, %v1805_v19  ;;  %v1592_v19 = vld [vmem:[%s3750_s5 + $0x10] sm:$0xff]  ;;  %s2286_s5 = scalar_lea.vmem %s1691_s23, 32 }
 0x108   :  { %p2287_p0 = scmp.ne.s32.totalorder %s1691_s23, %s2286_s5  ;;  %p2292_p2 = scmp.lt.s32.totalorder %s2286_s5, %s2286_s5 }
 0x109   :  { %v1841_v29 = vpop.f32.mrf.mxu1  ;;  %v789_v33 = vadd.f32 %v1807_v28, %v719_v30 }
 0x10a   :  { %v1842_v34 = vadd.f32 %v1841_v29, %v1840_v24  ;;  %p2293_p3 = por %p2292_p2, %p2291_p1 }
 0x10c   :  { %v859_v38 = vadd.f32 %v1842_v34, %v789_v33  ;;  %p2294_p4 = pnand %p2293_p3, %p2287_p0 }
 0x126   :  { %v1875_v27 = vpop.f32.mrf.mxu0 }
 0x128   :  { %v1876_v31 = vpop.f32.mrf.mxu0 }
 0x129   :  { %v1910_v32 = vpop.f32.mrf.mxu1  ;;  %v1877_v36 = vadd.f32 %v1876_v31, %v1875_v27  ;;  %v1702_v27 = vld [vmem:[%s3751_s6] ss:$0 sm:$0xff] }
 0x12b   :  { %v1911_v37 = vpop.f32.mrf.mxu1  ;;  %v929_v41 = vadd.f32 %v1877_v36, %v859_v38 }
 0x12c   :  { %v1912_v42 = vadd.f32 %v1911_v37, %v1910_v32 }
 0x12e   :  { %v999_v45 = vadd.f32 %v1912_v42, %v929_v41 }
 0x148   :  { %v1945_v35 = vpop.f32.mrf.mxu0 }
 0x14a   :  { %v1946_v39 = vpop.f32.mrf.mxu0 }
 0x14b   :  { %v1947_v48 = vadd.f32 %v1946_v39, %v1945_v35 }
 0x14c   :  { %v1980_v40 = vpop.f32.mrf.mxu1 }
 0x14d   :  { %v1069_v50 = vadd.f32 %v1947_v48, %v999_v45 }
 0x14e   :  { %v1981_v44 = vpop.f32.mrf.mxu1 }
 0x14f   :  { %v1982_v51 = vadd.f32 %v1981_v44, %v1980_v40 }
 0x151   :  { %v1139_v55 = vadd.f32 %v1982_v51, %v1069_v50 }
 0x16b   :  { %v2015_v43 = vpop.f32.mrf.mxu0 }
 0x16d   :  { %v2016_v46 = vpop.f32.mrf.mxu0 }
 0x16e   :  { %v2050_v49 = vpop.f32.mrf.mxu1  ;;  %v2017_v53 = vadd.f32 %v2016_v46, %v2015_v43 }
 0x170   :  { %v2051_v54 = vpop.f32.mrf.mxu1  ;;  %v1209_v58 = vadd.f32 %v2017_v53, %v1139_v55 }
 0x171   :  { %v2052_v59 = vadd.f32 %v2051_v54, %v2050_v49 }
 0x173   :  { %v1279_v62 = vadd.f32 %v2052_v59, %v1209_v58 }
 0x18d   :  { %v2085_v52 = vpop.f32.mrf.mxu0 }
 0x18f   :  { %v2086_v56 = vpop.f32.mrf.mxu0 }
 0x190   :  { %v2120_v57 = vpop.f32.mrf.mxu1  ;;  %v2087_v60 = vadd.f32 %v2086_v56, %v2085_v52 }
 0x192   :  { %v2121_v61 = vpop.f32.mrf.mxu1  ;;  %v1349_v63 = vadd.f32 %v2087_v60, %v1279_v62 }
 0x193   :  { %v2122_v0 = vadd.f32 %v2121_v61, %v2120_v57 }
 0x195   :  { %v1419_v1 = vadd.f32 %v2122_v0, %v1349_v63 }
 0x1ae   :  { %v1488_v2 = vpop.f32.mrf.mxu0 }
 0x1af   :  { %v1489_v3 = vadd.f32 %v1488_v2, %v1419_v1 }
 0x1b0   :  { %v2207_v4 = vpop.f32.mrf.mxu0 }
 0x1b1   :  { %v1492_v5 = vmax.f32 %v1489_v3, 0.0 }
 0x1b3   :  { %2239 = vmatmul.mubr.msk.f32.vlgmr.msra.gmra.mxu1 %vm1515_vm1, %v1492_v5 }
 0x1b4   :  { %2242 = vmatpush3.msra.mxu1 %v1605_v6  ;;  %2273 = vmatprep.mubr.msk.f32.mxu1 %vm2310_vm0, %v2309_v47 }
 0x1b5   :  { %2243 = vmatprep.subr.mxu1 %v2309_v47 }
 0x1b6   :  { %2244 = vmatpush3.msra.mxu1 %v1604_v7 }
 0x1b7   :  { %2245 = vmatprep.subr.mxu1 %v2309_v47 }
 0x1b8   :  { %2246 = vmatpush3.msra.mxu1 %v1603_v8 }
 0x1b9   :  { %2247 = vmatprep.subr.mxu1 %v2309_v47 }
 0x1ba   :  { %2248 = vmatpush3.msra.mxu1 %v1602_v9 }
 0x1bb   :  { %2249 = vmatprep.subr.mxu1 %v2309_v47 }
 0x1bc   :  { %2250 = vmatpush3.msra.mxu1 %v1601_v10 }
 0x1bd   :  { %2251 = vmatprep.subr.mxu1 %v2309_v47 }
 0x1be   :  { %2252 = vmatpush3.msra.mxu1 %v1600_v11 }
 0x1bf   :  { %2253 = vmatprep.subr.mxu1 %v2309_v47 }
 0x1c0   :  { %2254 = vmatpush3.msra.mxu1 %v1599_v12 }
 0x1c1   :  { %2255 = vmatprep.subr.mxu1 %v2309_v47 }
 0x1c2   :  { %2256 = vmatpush3.msra.mxu1 %v1598_v13 }
 0x1c3   :  { %2257 = vmatprep.subr.mxu1 %v2309_v47 }
 0x1c4   :  { %2258 = vmatpush3.msra.mxu1 %v1597_v14 }
 0x1c5   :  { %2259 = vmatprep.subr.mxu1 %v2309_v47 }
 0x1c6   :  { %2260 = vmatpush3.msra.mxu1 %v1596_v15 }
 0x1c7   :  { %2261 = vmatprep.subr.mxu1 %v2309_v47 }
 0x1c8   :  { %2262 = vmatpush3.msra.mxu1 %v1595_v16 }
 0x1c9   :  { %2263 = vmatprep.subr.mxu1 %v2309_v47 }
 0x1ca   :  { %2264 = vmatpush3.msra.mxu1 %v1594_v17 }
 0x1cb   :  { %2265 = vmatprep.subr.mxu1 %v2309_v47 }
 0x1cc   :  { %2266 = vmatpush3.msra.mxu1 %v1593_v18 }
 0x1cd   :  { %2267 = vmatprep.subr.mxu1 %v2309_v47 }
 0x1ce   :  { %2268 = vmatpush3.msra.mxu1 %v1592_v19 }
 0x1cf   :  { %2269 = vmatprep.subr.mxu1 %v2309_v47 }
 0x1d0   :  { %2270 = vmatpush3.msra.mxu1 %v1591_v20 }
 0x1d1   :  { %2271 = vmatprep.subr.mxu1 %v2309_v47 }
 0x1d2   :  { %2272 = vmatpush3.msra.mxu1 %v1590_v21 }
 0x273   :  { %v1585_v23 = vpop.f32.mrf.mxu1 }
 0x274   :  { %v1586_v24 = vadd.f32 %v1700_v22, %v1585_v23 }
 0x275   :  { %v2240_v25 = vpop.f32.mrf.mxu1 }
 0x276   :  { %v1589_v26 = vmax.f32 %v1586_v24, 0.0 }
 0x278   :  { %2274 = vmatmul.mubr.f32.vlgmr.msra.gmra.mxu1 %v1589_v26 }
 0x338   :  { %v1679_v47 = vpop.f32.mrf.mxu1 }
 0x339   :  { %v1680_v28 = vadd.f32 %v1702_v27, %v1679_v47 }
 0x33a   :  { %v2275_v29 = vpop.f32.mrf.mxu1 }
 0x33b   :  { %1683 = vst [vmem:[#allocation2] sm:$0x3] %v1680_v28 }
 0x33c   :  { %2297 = shalt.err (!%p2294_p4)
}
 0x33d   :  { %1693 = dma.vmem_to_hbm [thread:$0]  %s1691_s23, 32, %s3752_s7, [#allocation3]  }
 0x33e   :  { %2306 = dma.done.wait [#allocation3], 32  }
 0x33f   :  { %2307 = vsyncadd [#allocation3], 4294967264 }
 0x340   :  { %1697 = vsyncpa [#allocation3], 1 }

</bundles_post_ra>
